<compile_context>
chip_gen: v6e
topology: v6e:2x2x1
jax: 0.10.0
libtpu: 0.0.40
codegen_flags: <defaults>
</compile_context>

<pallas_src>
import functools

import jax
import jax.numpy as jnp
from jax import lax
from jax.experimental import pallas as pl
from jax.experimental.pallas import tpu as pltpu


_LANE = 128
_BN_EPS = 1e-5


def _round_up(x, m):
    return ((x + m - 1) // m) * m


def _pad_to(a, shape):
    pads = [(0, s - d) for d, s in zip(a.shape, shape)]
    if all(p == (0, 0) for p in pads):
        return a
    return jnp.pad(a, pads)


def _bf16(a):
    return a.astype(jnp.bfloat16)


def _mxu(a, b):
    """a @ b on the MXU: bf16 operands, f32 accumulation."""
    return jnp.dot(_bf16(a), _bf16(b), preferred_element_type=jnp.float32)


def _mxu_nt(a, b):
    """a @ b.T on the MXU (both contract on their last dim): bf16 in, f32 acc."""
    return lax.dot_general(
        _bf16(a), _bf16(b), (((1,), (1,)), ((), ())),
        preferred_element_type=jnp.float32)


def cross_nonlocal_kernel(
    x_ref, ob_ref, od_ref,      # (1, N, Cp) f32 token blocks
    wt_ref, wp_ref,             # (Cp, Cip) bf16 : shared t / p convs (no bias)
    wg_ref, bg_ref,             # (3, Cp, Cip) bf16, (3, Cip) f32 : g_x / g_b / g_d
    wW_ref, bW_ref,             # (5, Cip, Cp) bf16, (5, Cp) f32 : W_x/W_b/W_d/W_xb/W_xd
    xs_ref, s1_ref, s2_ref,     # (1, N, Cp) f32 outputs
    st_ref,                     # (1, 4, Cp) f32 : [sum s1, sum s1^2, sum s2, sum s2^2]
):
    X, OB, OD = x_ref[0], ob_ref[0], od_ref[0]
    wt = wt_ref[...]
    wp = wp_ref[...]
    bg = bg_ref[...]
    bW = bW_ref[...]
    ci = wt.shape[1]            # padded inter_channels (static)

    def attend(Y, g_cat):
        """y = D^-1/2 sym(relu(t) relu(p)^T) D^-1/2 @ g_cat.

        Only one N x N buffer is materialized and it is never touched
        elementwise: symmetrization is a single wider matmul and the degree
        scaling lives on the thin (N, k*Ci) operands.
        """
        t = jnp.maximum(_mxu(Y, wt), 0.0)             # (N, Cip) f32
        p = jnp.maximum(_mxu(Y, wp), 0.0)
        # Closed-form row sums of S = t p^T + p t^T (all entries >= 0).
        # The 0.5 of the reference symmetrization cancels in D^-1/2 S D^-1/2.
        col_t = jnp.sum(t, axis=0, keepdims=True)     # (1, Cip)
        col_p = jnp.sum(p, axis=0, keepdims=True)
        r = (jnp.sum(t * col_p, axis=1, keepdims=True)
             + jnp.sum(p * col_t, axis=1, keepdims=True))       # (N, 1)
        # reference: d[d != 0] = sqrt(1/d); entries are non-negative here.
        d = jnp.where(r > 0.0, lax.rsqrt(jnp.where(r > 0.0, r, 1.0)), 0.0)
        # transpose-free symmetrization: [t|p] @ [p|t]^T == t p^T + p t^T
        lhs = jnp.concatenate([_bf16(t), _bf16(p)], axis=1)     # (N, 2Cip)
        rhs = jnp.concatenate([_bf16(p), _bf16(t)], axis=1)
        att = _mxu_nt(lhs, rhs).astype(jnp.bfloat16)            # (N, N)
        y = jnp.dot(att, _bf16(d * g_cat),
                    preferred_element_type=jnp.float32)         # (N, k*Cip)
        return d * y

    def g_conv(Y, i):
        return _mxu(Y, wg_ref[i]) + bg[i:i + 1, :]              # (N, Cip)

    def w_proj(Z, i):
        return _mxu(Z, wW_ref[i]) + bW[i:i + 1, :]              # (N, Cp)

    g_x = g_conv(X, 0)
    g_b = g_conv(OB, 1)
    g_d = g_conv(OD, 2)

    # --- branch X: x_self = W_x(f_x @ g_x) ---------------------------------
    y_x = attend(X, g_x)
    xs_ref[0] = w_proj(y_x, 0)

    # --- branch OB: f_b @ [g_b | g_x] -> W_b(.), W_xb(.) -------------------
    y_b = attend(OB, jnp.concatenate([g_b, g_x], axis=1))
    ob_self = w_proj(y_b[:, :ci], 1)
    x_ob_cross = w_proj(y_b[:, ci:], 3)

    # --- branch OD: f_d @ [g_d | g_x] -> W_d(.), W_xd(.) -------------------
    y_d = attend(OD, jnp.concatenate([g_d, g_x], axis=1))
    od_self = w_proj(y_d[:, :ci], 2)
    x_od_cross = w_proj(y_d[:, ci:], 4)

    s1 = od_self + x_ob_cross       # -> bn1
    s2 = ob_self + x_od_cross       # -> bn2
    s1_ref[0] = s1
    s2_ref[0] = s2
    # per-batch BN statistics (summed across the batch grid in the wrapper)
    st_ref[0] = jnp.concatenate(
        [jnp.sum(s1, axis=0, keepdims=True),
         jnp.sum(s1 * s1, axis=0, keepdims=True),
         jnp.sum(s2, axis=0, keepdims=True),
         jnp.sum(s2 * s2, axis=0, keepdims=True)], axis=0)      # (4, Cp)


def bn_apply_kernel(
    xs_ref, s1_ref, s2_ref, x_ref,        # (tm, Cp) f32 row tiles
    sc1_ref, sh1_ref, sc2_ref, sh2_ref,   # (1, Cp) f32 folded BN scale / shift
    wout_ref, bout_ref,                   # (Cp, Cp) bf16, (1, Cp) f32
    out_ref,                              # (tm, Cp) f32
):
    pre = (s1_ref[...] * sc1_ref[...] + sh1_ref[...]
           + s2_ref[...] * sc2_ref[...] + sh2_ref[...]
           + xs_ref[...])
    out = jnp.dot(_bf16(pre), wout_ref[...], preferred_element_type=jnp.float32)
    out_ref[...] = out + bout_ref[...] + x_ref[...]             # + residual


def _vmem_limit_bytes():
    try:
        cap = int(pltpu.get_tpu_info().vmem_capacity_bytes)
    except Exception:
        cap = 64 * 1024 * 1024
    # leave headroom; cap at ~100 MiB on big-VMEM chips
    return int(min(cap * 3 // 4, 100 * 1024 * 1024))


def cross_nonlocal_forward(params, x, ob, od):
    """x, ob, od: (B, C, H, W) float32 (NCHW, like the PyTorch module)."""
    B, C, H, W = x.shape
    N = H * W
    Ci = params["wt"].shape[1]
    Cp = _round_up(C, _LANE)
    Cip = _round_up(Ci, _LANE)
    vmem = _vmem_limit_bytes()

    def to_tokens(a):   # NCHW -> lane-dense (B, N, Cp) tokens
        t = a.reshape(B, C, N).transpose(0, 2, 1).astype(jnp.float32)
        return _pad_to(t, (B, N, Cp))

    xt, obt, odt = to_tokens(x), to_tokens(ob), to_tokens(od)

    # pre-transposed, channel-padded, bf16 weight tiles (biases stay f32)
    wt = _bf16(_pad_to(params["wt"], (Cp, Cip)))
    wp = _bf16(_pad_to(params["wp"], (Cp, Cip)))
    wg = _bf16(_pad_to(params["wg"], (3, Cp, Cip)))
    bg = _pad_to(params["bg"], (3, Cip)).astype(jnp.float32)
    wW = _bf16(_pad_to(params["wW"], (5, Cip, Cp)))
    bW = _pad_to(params["bW"], (5, Cp)).astype(jnp.float32)

    tok_spec = pl.BlockSpec((1, N, Cp), lambda b: (b, 0, 0))
    xs, s1, s2, stats = pl.pallas_call(
        cross_nonlocal_kernel,
        out_shape=(
            jax.ShapeDtypeStruct((B, N, Cp), jnp.float32),
            jax.ShapeDtypeStruct((B, N, Cp), jnp.float32),
            jax.ShapeDtypeStruct((B, N, Cp), jnp.float32),
            jax.ShapeDtypeStruct((B, 4, Cp), jnp.float32),
        ),
        grid_spec=pltpu.PrefetchScalarGridSpec(
            num_scalar_prefetch=0,
            grid=(B,),
            in_specs=[
                tok_spec, tok_spec, tok_spec,
                pl.BlockSpec((Cp, Cip), lambda b: (0, 0)),
                pl.BlockSpec((Cp, Cip), lambda b: (0, 0)),
                pl.BlockSpec((3, Cp, Cip), lambda b: (0, 0, 0)),
                pl.BlockSpec((3, Cip), lambda b: (0, 0)),
                pl.BlockSpec((5, Cip, Cp), lambda b: (0, 0, 0)),
                pl.BlockSpec((5, Cp), lambda b: (0, 0)),
            ],
            out_specs=[tok_spec, tok_spec, tok_spec,
                       pl.BlockSpec((1, 4, Cp), lambda b: (b, 0, 0))],
        ),
        compiler_params=pltpu.CompilerParams(
            dimension_semantics=("parallel",), vmem_limit_bytes=vmem),
    )(xt, obt, odt, wt, wp, wg, bg, wW, bW)

    # --- fold training-mode BatchNorm (biased variance) into scale/shift ---
    cnt = jnp.float32(B * N)
    st = jnp.sum(stats, axis=0)                       # (4, Cp)
    mean1, mean2 = st[0] / cnt, st[2] / cnt
    var1 = jnp.maximum(st[1] / cnt - mean1 * mean1, 0.0)
    var2 = jnp.maximum(st[3] / cnt - mean2 * mean2, 0.0)
    g1 = _pad_to(params["bn1_gamma"].astype(jnp.float32), (1, Cp))
    b1 = _pad_to(params["bn1_beta"].astype(jnp.float32), (1, Cp))
    g2 = _pad_to(params["bn2_gamma"].astype(jnp.float32), (1, Cp))
    b2 = _pad_to(params["bn2_beta"].astype(jnp.float32), (1, Cp))
    sc1 = g1 * lax.rsqrt(var1 + _BN_EPS)
    sh1 = b1 - mean1 * sc1
    sc2 = g2 * lax.rsqrt(var2 + _BN_EPS)
    sh2 = b2 - mean2 * sc2

    wout = _bf16(_pad_to(params["wout"], (Cp, Cp)))
    bout = _pad_to(params["bout"], (1, Cp)).astype(jnp.float32)

    # --- tiled, pipelined BN-apply + out_conv + residual -------------------
    bn_tokens = B * N
    tm = bn_tokens
    for cand in (2048, 1024, 512, 256, 128, 64, 32, 16, 8):
        if bn_tokens % cand == 0:
            tm = cand
            break

    flat = lambda a: a.reshape(bn_tokens, Cp)
    row_spec = pl.BlockSpec((tm, Cp), lambda i: (i, 0))
    vec_spec = pl.BlockSpec((1, Cp), lambda i: (0, 0))
    out_flat = pl.pallas_call(
        bn_apply_kernel,
        out_shape=jax.ShapeDtypeStruct((bn_tokens, Cp), jnp.float32),
        grid_spec=pltpu.PrefetchScalarGridSpec(
            num_scalar_prefetch=0,
            grid=(bn_tokens // tm,),
            in_specs=[row_spec, row_spec, row_spec, row_spec,
                      vec_spec, vec_spec, vec_spec, vec_spec,
                      pl.BlockSpec((Cp, Cp), lambda i: (0, 0)),
                      vec_spec],
            out_specs=row_spec,
        ),
        compiler_params=pltpu.CompilerParams(
            dimension_semantics=("parallel",), vmem_limit_bytes=vmem),
    )(flat(xs), flat(s1), flat(s2), flat(xt),
      sc1.astype(jnp.float32), sh1.astype(jnp.float32),
      sc2.astype(jnp.float32), sh2.astype(jnp.float32),
      wout, bout)

    # back to NCHW, dropping the channel padding
    out = out_flat.reshape(B, N, Cp)[:, :, :C]
    return out.transpose(0, 2, 1).reshape(B, C, H, W)


def init_params(key, in_channels, inter_channels):
    """Parameters in the pre-transposed "matmul" layout.

    A PyTorch Conv2d 1x1 weight of shape (out, in, 1, 1) corresponds here to
    its squeezed transpose of shape (in, out).
    """
    C, Ci = in_channels, inter_channels
    ks = jax.random.split(key, 8)
    rnd = lambda k, shape: (0.1 * jax.random.normal(k, shape)).astype(jnp.float32)
    return {
        "wt": rnd(ks[0], (C, Ci)),       # t : Conv2d(C -> Ci, 1, bias=False)
        "wp": rnd(ks[1], (C, Ci)),       # p : Conv2d(C -> Ci, 1, bias=False)
        "wg": rnd(ks[2], (3, C, Ci)),    # g_x, g_b, g_d : Conv2d(C -> Ci, 1)
        "bg": rnd(ks[3], (3, Ci)),
        "wW": rnd(ks[4], (5, Ci, C)),    # W_x, W_b, W_d, W_xb, W_xd : Conv2d(Ci -> C, 1)
        "bW": rnd(ks[5], (5, C)),
        # BatchNorm2d affine params (PyTorch default init: gamma=1, beta=0)
        "bn1_gamma": jnp.ones((1, C), jnp.float32),
        "bn1_beta": jnp.zeros((1, C), jnp.float32),
        "bn2_gamma": jnp.ones((1, C), jnp.float32),
        "bn2_beta": jnp.zeros((1, C), jnp.float32),
        # out_conv : Conv2d(C -> C, 1), stored as (C_in, C_out)
        "wout": rnd(ks[6], (C, C)),
        "bout": rnd(ks[7], (1, C)),
    }


if __name__ == "__main__":
    B, C, Ci, H, W = 2, 4, 8, 16, 16
    key = jax.random.PRNGKey(0)
    k_par, k_x, k_b, k_d = jax.random.split(key, 4)

    params = init_params(k_par, C, Ci)
    x = jax.random.normal(k_x, (B, C, H, W), jnp.float32)
    ob = jax.random.normal(k_b, (B, C, H, W), jnp.float32)
    od = jax.random.normal(k_d, (B, C, H, W), jnp.float32)

    fwd = jax.jit(functools.partial(cross_nonlocal_forward, params))
    out = jax.block_until_ready(fwd(x, ob, od))

    assert out.shape == (B, C, H, W), out.shape
    assert bool(jnp.all(jnp.isfinite(out)))
    print("KERNEL_OK")
</pallas_src>

<mosaic_0001>
module attributes {stable_mosaic.version = 11 : i64} {
  func.func @cross_nonlocal_kernel(%arg0: i32, %arg1: memref<1x256x128xf32, #tpu.memory_space<vmem>>, %arg2: memref<1x256x128xf32, #tpu.memory_space<vmem>>, %arg3: memref<1x256x128xf32, #tpu.memory_space<vmem>>, %arg4: memref<128x128xbf16, #tpu.memory_space<vmem>>, %arg5: memref<128x128xbf16, #tpu.memory_space<vmem>>, %arg6: memref<3x128x128xbf16, #tpu.memory_space<vmem>>, %arg7: memref<3x128xf32, #tpu.memory_space<vmem>>, %arg8: memref<5x128x128xbf16, #tpu.memory_space<vmem>>, %arg9: memref<5x128xf32, #tpu.memory_space<vmem>>, %arg10: memref<1x256x128xf32, #tpu.memory_space<vmem>>, %arg11: memref<1x256x128xf32, #tpu.memory_space<vmem>>, %arg12: memref<1x256x128xf32, #tpu.memory_space<vmem>>, %arg13: memref<1x4x128xf32, #tpu.memory_space<vmem>>) attributes {dimension_semantics = [#tpu.dimension_semantics<parallel>], iteration_bounds = array<i64: 2>, scalar_prefetch = 0 : i64, scratch_operands = 0 : i64, tpu.core_type = #tpu.core_type<tc>, window_params = [{transform_indices = @transform_0, window_bounds = array<i64: 1, 256, 128>}, {transform_indices = @transform_1, window_bounds = array<i64: 1, 256, 128>}, {transform_indices = @transform_2, window_bounds = array<i64: 1, 256, 128>}, {pipeline_mode = #tpu.pipeline_mode<synchronous>, transform_indices = @transform_3, window_bounds = array<i64: 128, 128>}, {pipeline_mode = #tpu.pipeline_mode<synchronous>, transform_indices = @transform_4, window_bounds = array<i64: 128, 128>}, {pipeline_mode = #tpu.pipeline_mode<synchronous>, transform_indices = @transform_5, window_bounds = array<i64: 3, 128, 128>}, {pipeline_mode = #tpu.pipeline_mode<synchronous>, transform_indices = @transform_6, window_bounds = array<i64: 3, 128>}, {pipeline_mode = #tpu.pipeline_mode<synchronous>, transform_indices = @transform_7, window_bounds = array<i64: 5, 128, 128>}, {pipeline_mode = #tpu.pipeline_mode<synchronous>, transform_indices = @transform_8, window_bounds = array<i64: 5, 128>}, {transform_indices = @transform_9, window_bounds = array<i64: 1, 256, 128>}, {transform_indices = @transform_10, window_bounds = array<i64: 1, 256, 128>}, {transform_indices = @transform_11, window_bounds = array<i64: 1, 256, 128>}, {transform_indices = @transform_12, window_bounds = array<i64: 1, 4, 128>}]} {
    %c0 = arith.constant 0 : index
    %c0_0 = arith.constant 0 : index
    %c0_1 = arith.constant 0 : index
    %0 = vector.load %arg1[%c0, %c0_0, %c0_1] : memref<1x256x128xf32, #tpu.memory_space<vmem>>, vector<1x256x128xf32>
    %1 = vector.shape_cast %0 : vector<1x256x128xf32> to vector<256x128xf32>
    %c0_2 = arith.constant 0 : index
    %c0_3 = arith.constant 0 : index
    %c0_4 = arith.constant 0 : index
    %2 = vector.load %arg2[%c0_2, %c0_3, %c0_4] : memref<1x256x128xf32, #tpu.memory_space<vmem>>, vector<1x256x128xf32>
    %3 = vector.shape_cast %2 : vector<1x256x128xf32> to vector<256x128xf32>
    %c0_5 = arith.constant 0 : index
    %c0_6 = arith.constant 0 : index
    %c0_7 = arith.constant 0 : index
    %4 = vector.load %arg3[%c0_5, %c0_6, %c0_7] : memref<1x256x128xf32, #tpu.memory_space<vmem>>, vector<1x256x128xf32>
    %5 = vector.shape_cast %4 : vector<1x256x128xf32> to vector<256x128xf32>
    %c0_8 = arith.constant 0 : index
    %c0_9 = arith.constant 0 : index
    %6 = vector.load %arg4[%c0_8, %c0_9] : memref<128x128xbf16, #tpu.memory_space<vmem>>, vector<128x128xbf16>
    %c0_10 = arith.constant 0 : index
    %c0_11 = arith.constant 0 : index
    %7 = vector.load %arg5[%c0_10, %c0_11] : memref<128x128xbf16, #tpu.memory_space<vmem>>, vector<128x128xbf16>
    %c0_12 = arith.constant 0 : index
    %c0_13 = arith.constant 0 : index
    %8 = vector.load %arg7[%c0_12, %c0_13] : memref<3x128xf32, #tpu.memory_space<vmem>>, vector<3x128xf32>
    %c0_14 = arith.constant 0 : index
    %c0_15 = arith.constant 0 : index
    %9 = vector.load %arg9[%c0_14, %c0_15] : memref<5x128xf32, #tpu.memory_space<vmem>>, vector<5x128xf32>
    %c0_16 = arith.constant 0 : index
    %c0_17 = arith.constant 0 : index
    %c0_18 = arith.constant 0 : index
    %10 = vector.load %arg6[%c0_16, %c0_17, %c0_18] : memref<3x128x128xbf16, #tpu.memory_space<vmem>>, vector<1x128x128xbf16>
    %11 = vector.shape_cast %10 : vector<1x128x128xbf16> to vector<128x128xbf16>
    %12 = arith.truncf %1 : vector<256x128xf32> to vector<256x128xbf16>
    %cst = arith.constant dense<0.000000e+00> : vector<256x128xf32>
    %13 = tpu.matmul %12, %11, %cst {dimension_numbers = #tpu.dot_dimension_numbers<[1], [0], [0], [1], [0, 0, 1, 1], [], []>} : vector<256x128xbf16>, vector<128x128xbf16>, vector<256x128xf32> -> vector<256x128xf32>
    %14 = vector.extract_strided_slice %8 {offsets = [0, 0], sizes = [1, 128], strides = [1, 1]} : vector<3x128xf32> to vector<1x128xf32>
    %15 = vector.broadcast %14 : vector<1x128xf32> to vector<256x128xf32>
    %16 = arith.addf %13, %15 : vector<256x128xf32>
    %c1 = arith.constant 1 : index
    %c0_19 = arith.constant 0 : index
    %c0_20 = arith.constant 0 : index
    %17 = vector.load %arg6[%c1, %c0_19, %c0_20] : memref<3x128x128xbf16, #tpu.memory_space<vmem>>, vector<1x128x128xbf16>
    %18 = vector.shape_cast %17 : vector<1x128x128xbf16> to vector<128x128xbf16>
    %19 = arith.truncf %3 : vector<256x128xf32> to vector<256x128xbf16>
    %cst_21 = arith.constant dense<0.000000e+00> : vector<256x128xf32>
    %20 = tpu.matmul %19, %18, %cst_21 {dimension_numbers = #tpu.dot_dimension_numbers<[1], [0], [0], [1], [0, 0, 1, 1], [], []>} : vector<256x128xbf16>, vector<128x128xbf16>, vector<256x128xf32> -> vector<256x128xf32>
    %21 = vector.extract_strided_slice %8 {offsets = [1, 0], sizes = [1, 128], strides = [1, 1]} : vector<3x128xf32> to vector<1x128xf32>
    %22 = vector.broadcast %21 : vector<1x128xf32> to vector<256x128xf32>
    %23 = arith.addf %20, %22 : vector<256x128xf32>
    %c2 = arith.constant 2 : index
    %c0_22 = arith.constant 0 : index
    %c0_23 = arith.constant 0 : index
    %24 = vector.load %arg6[%c2, %c0_22, %c0_23] : memref<3x128x128xbf16, #tpu.memory_space<vmem>>, vector<1x128x128xbf16>
    %25 = vector.shape_cast %24 : vector<1x128x128xbf16> to vector<128x128xbf16>
    %26 = arith.truncf %5 : vector<256x128xf32> to vector<256x128xbf16>
    %cst_24 = arith.constant dense<0.000000e+00> : vector<256x128xf32>
    %27 = tpu.matmul %26, %25, %cst_24 {dimension_numbers = #tpu.dot_dimension_numbers<[1], [0], [0], [1], [0, 0, 1, 1], [], []>} : vector<256x128xbf16>, vector<128x128xbf16>, vector<256x128xf32> -> vector<256x128xf32>
    %28 = vector.extract_strided_slice %8 {offsets = [2, 0], sizes = [1, 128], strides = [1, 1]} : vector<3x128xf32> to vector<1x128xf32>
    %29 = vector.broadcast %28 : vector<1x128xf32> to vector<256x128xf32>
    %30 = arith.addf %27, %29 : vector<256x128xf32>
    %31 = arith.truncf %1 : vector<256x128xf32> to vector<256x128xbf16>
    %cst_25 = arith.constant dense<0.000000e+00> : vector<256x128xf32>
    %32 = tpu.matmul %31, %6, %cst_25 {dimension_numbers = #tpu.dot_dimension_numbers<[1], [0], [0], [1], [0, 0, 1, 1], [], []>} : vector<256x128xbf16>, vector<128x128xbf16>, vector<256x128xf32> -> vector<256x128xf32>
    %cst_26 = arith.constant 0.000000e+00 : f32
    %33 = vector.broadcast %cst_26 : f32 to vector<256x128xf32>
    %34 = arith.maximumf %32, %33 : vector<256x128xf32>
    %35 = arith.truncf %1 : vector<256x128xf32> to vector<256x128xbf16>
    %cst_27 = arith.constant dense<0.000000e+00> : vector<256x128xf32>
    %36 = tpu.matmul %35, %7, %cst_27 {dimension_numbers = #tpu.dot_dimension_numbers<[1], [0], [0], [1], [0, 0, 1, 1], [], []>} : vector<256x128xbf16>, vector<128x128xbf16>, vector<256x128xf32> -> vector<256x128xf32>
    %cst_28 = arith.constant 0.000000e+00 : f32
    %37 = vector.broadcast %cst_28 : f32 to vector<256x128xf32>
    %38 = arith.maximumf %36, %37 : vector<256x128xf32>
    %cst_29 = arith.constant dense<0.000000e+00> : vector<128xf32>
    %39 = vector.multi_reduction <add>, %34, %cst_29 [0] : vector<256x128xf32> to vector<128xf32>
    %40 = vector.shape_cast %39 : vector<128xf32> to vector<1x128xf32>
    %cst_30 = arith.constant dense<0.000000e+00> : vector<128xf32>
    %41 = vector.multi_reduction <add>, %38, %cst_30 [0] : vector<256x128xf32> to vector<128xf32>
    %42 = vector.shape_cast %41 : vector<128xf32> to vector<1x128xf32>
    %43 = vector.broadcast %42 : vector<1x128xf32> to vector<256x128xf32>
    %44 = arith.mulf %34, %43 : vector<256x128xf32>
    %cst_31 = arith.constant dense<0.000000e+00> : vector<256xf32>
    %45 = vector.multi_reduction <add>, %44, %cst_31 [1] : vector<256x128xf32> to vector<256xf32>
    %46 = vector.shape_cast %45 : vector<256xf32> to vector<256x1xf32>
    %47 = vector.broadcast %40 : vector<1x128xf32> to vector<256x128xf32>
    %48 = arith.mulf %38, %47 : vector<256x128xf32>
    %cst_32 = arith.constant dense<0.000000e+00> : vector<256xf32>
    %49 = vector.multi_reduction <add>, %48, %cst_32 [1] : vector<256x128xf32> to vector<256xf32>
    %50 = vector.shape_cast %49 : vector<256xf32> to vector<256x1xf32>
    %51 = arith.addf %46, %50 : vector<256x1xf32>
    %cst_33 = arith.constant 0.000000e+00 : f32
    %52 = vector.broadcast %cst_33 : f32 to vector<256x1xf32>
    %53 = arith.cmpf ogt, %51, %52 : vector<256x1xf32>
    %cst_34 = arith.constant 0.000000e+00 : f32
    %54 = vector.broadcast %cst_34 : f32 to vector<256x1xf32>
    %55 = arith.cmpf ogt, %51, %54 : vector<256x1xf32>
    %cst_35 = arith.constant 1.000000e+00 : f32
    %56 = vector.broadcast %cst_35 : f32 to vector<256x1xf32>
    %57 = arith.select %55, %51, %56 : vector<256x1xi1>, vector<256x1xf32>
    %58 = math.rsqrt %57 : vector<256x1xf32>
    %cst_36 = arith.constant 0.000000e+00 : f32
    %59 = vector.broadcast %cst_36 : f32 to vector<256x1xf32>
    %60 = arith.select %53, %58, %59 : vector<256x1xi1>, vector<256x1xf32>
    %61 = arith.truncf %34 : vector<256x128xf32> to vector<256x128xbf16>
    %62 = arith.truncf %38 : vector<256x128xf32> to vector<256x128xbf16>
    %63 = tpu.concatenate %61, %62 in 1 : vector<256x128xbf16>, vector<256x128xbf16> -> vector<256x256xbf16>
    %64 = arith.truncf %38 : vector<256x128xf32> to vector<256x128xbf16>
    %65 = arith.truncf %34 : vector<256x128xf32> to vector<256x128xbf16>
    %66 = tpu.concatenate %64, %65 in 1 : vector<256x128xbf16>, vector<256x128xbf16> -> vector<256x256xbf16>
    %cst_37 = arith.constant dense<0.000000e+00> : vector<256x256xf32>
    %67 = tpu.matmul %63, %66, %cst_37 {dimension_numbers = #tpu.dot_dimension_numbers<[1], [1], [0], [0], [0, 0, 1, 0], [], []>} : vector<256x256xbf16>, vector<256x256xbf16>, vector<256x256xf32> -> vector<256x256xf32>
    %68 = arith.truncf %67 : vector<256x256xf32> to vector<256x256xbf16>
    %69 = vector.broadcast %60 : vector<256x1xf32> to vector<256x128xf32>
    %70 = arith.mulf %69, %16 : vector<256x128xf32>
    %71 = arith.truncf %70 : vector<256x128xf32> to vector<256x128xbf16>
    %cst_38 = arith.constant dense<0.000000e+00> : vector<256x128xf32>
    %72 = tpu.matmul %68, %71, %cst_38 {dimension_numbers = #tpu.dot_dimension_numbers<[1], [0], [0], [1], [0, 0, 1, 1], [], []>} : vector<256x256xbf16>, vector<256x128xbf16>, vector<256x128xf32> -> vector<256x128xf32>
    %73 = vector.broadcast %60 : vector<256x1xf32> to vector<256x128xf32>
    %74 = arith.mulf %73, %72 : vector<256x128xf32>
    %c0_39 = arith.constant 0 : index
    %c0_40 = arith.constant 0 : index
    %c0_41 = arith.constant 0 : index
    %75 = vector.load %arg8[%c0_39, %c0_40, %c0_41] : memref<5x128x128xbf16, #tpu.memory_space<vmem>>, vector<1x128x128xbf16>
    %76 = vector.shape_cast %75 : vector<1x128x128xbf16> to vector<128x128xbf16>
    %77 = arith.truncf %74 : vector<256x128xf32> to vector<256x128xbf16>
    %cst_42 = arith.constant dense<0.000000e+00> : vector<256x128xf32>
    %78 = tpu.matmul %77, %76, %cst_42 {dimension_numbers = #tpu.dot_dimension_numbers<[1], [0], [0], [1], [0, 0, 1, 1], [], []>} : vector<256x128xbf16>, vector<128x128xbf16>, vector<256x128xf32> -> vector<256x128xf32>
    %79 = vector.extract_strided_slice %9 {offsets = [0, 0], sizes = [1, 128], strides = [1, 1]} : vector<5x128xf32> to vector<1x128xf32>
    %80 = vector.broadcast %79 : vector<1x128xf32> to vector<256x128xf32>
    %81 = arith.addf %78, %80 : vector<256x128xf32>
    %c0_43 = arith.constant 0 : index
    %c0_44 = arith.constant 0 : index
    %c0_45 = arith.constant 0 : index
    %82 = vector.load %arg10[%c0_43, %c0_44, %c0_45] : memref<1x256x128xf32, #tpu.memory_space<vmem>>, vector<1x256x128xf32>
    %83 = vector.shape_cast %82 : vector<1x256x128xf32> to vector<256x128xf32>
    %84 = vector.shape_cast %81 : vector<256x128xf32> to vector<1x256x128xf32>
    tpu.vector_store %arg10[%c0_43, %c0_44, %c0_45], %84 {strides = array<i32>} : memref<1x256x128xf32, #tpu.memory_space<vmem>>, vector<1x256x128xf32>,
    %85 = tpu.concatenate %23, %16 in 1 : vector<256x128xf32>, vector<256x128xf32> -> vector<256x256xf32>
    %86 = arith.truncf %3 : vector<256x128xf32> to vector<256x128xbf16>
    %cst_46 = arith.constant dense<0.000000e+00> : vector<256x128xf32>
    %87 = tpu.matmul %86, %6, %cst_46 {dimension_numbers = #tpu.dot_dimension_numbers<[1], [0], [0], [1], [0, 0, 1, 1], [], []>} : vector<256x128xbf16>, vector<128x128xbf16>, vector<256x128xf32> -> vector<256x128xf32>
    %cst_47 = arith.constant 0.000000e+00 : f32
    %88 = vector.broadcast %cst_47 : f32 to vector<256x128xf32>
    %89 = arith.maximumf %87, %88 : vector<256x128xf32>
    %90 = arith.truncf %3 : vector<256x128xf32> to vector<256x128xbf16>
    %cst_48 = arith.constant dense<0.000000e+00> : vector<256x128xf32>
    %91 = tpu.matmul %90, %7, %cst_48 {dimension_numbers = #tpu.dot_dimension_numbers<[1], [0], [0], [1], [0, 0, 1, 1], [], []>} : vector<256x128xbf16>, vector<128x128xbf16>, vector<256x128xf32> -> vector<256x128xf32>
    %cst_49 = arith.constant 0.000000e+00 : f32
    %92 = vector.broadcast %cst_49 : f32 to vector<256x128xf32>
    %93 = arith.maximumf %91, %92 : vector<256x128xf32>
    %cst_50 = arith.constant dense<0.000000e+00> : vector<128xf32>
    %94 = vector.multi_reduction <add>, %89, %cst_50 [0] : vector<256x128xf32> to vector<128xf32>
    %95 = vector.shape_cast %94 : vector<128xf32> to vector<1x128xf32>
    %cst_51 = arith.constant dense<0.000000e+00> : vector<128xf32>
    %96 = vector.multi_reduction <add>, %93, %cst_51 [0] : vector<256x128xf32> to vector<128xf32>
    %97 = vector.shape_cast %96 : vector<128xf32> to vector<1x128xf32>
    %98 = vector.broadcast %97 : vector<1x128xf32> to vector<256x128xf32>
    %99 = arith.mulf %89, %98 : vector<256x128xf32>
    %cst_52 = arith.constant dense<0.000000e+00> : vector<256xf32>
    %100 = vector.multi_reduction <add>, %99, %cst_52 [1] : vector<256x128xf32> to vector<256xf32>
    %101 = vector.shape_cast %100 : vector<256xf32> to vector<256x1xf32>
    %102 = vector.broadcast %95 : vector<1x128xf32> to vector<256x128xf32>
    %103 = arith.mulf %93, %102 : vector<256x128xf32>
    %cst_53 = arith.constant dense<0.000000e+00> : vector<256xf32>
    %104 = vector.multi_reduction <add>, %103, %cst_53 [1] : vector<256x128xf32> to vector<256xf32>
    %105 = vector.shape_cast %104 : vector<256xf32> to vector<256x1xf32>
    %106 = arith.addf %101, %105 : vector<256x1xf32>
    %cst_54 = arith.constant 0.000000e+00 : f32
    %107 = vector.broadcast %cst_54 : f32 to vector<256x1xf32>
    %108 = arith.cmpf ogt, %106, %107 : vector<256x1xf32>
    %cst_55 = arith.constant 0.000000e+00 : f32
    %109 = vector.broadcast %cst_55 : f32 to vector<256x1xf32>
    %110 = arith.cmpf ogt, %106, %109 : vector<256x1xf32>
    %cst_56 = arith.constant 1.000000e+00 : f32
    %111 = vector.broadcast %cst_56 : f32 to vector<256x1xf32>
    %112 = arith.select %110, %106, %111 : vector<256x1xi1>, vector<256x1xf32>
    %113 = math.rsqrt %112 : vector<256x1xf32>
    %cst_57 = arith.constant 0.000000e+00 : f32
    %114 = vector.broadcast %cst_57 : f32 to vector<256x1xf32>
    %115 = arith.select %108, %113, %114 : vector<256x1xi1>, vector<256x1xf32>
    %116 = arith.truncf %89 : vector<256x128xf32> to vector<256x128xbf16>
    %117 = arith.truncf %93 : vector<256x128xf32> to vector<256x128xbf16>
    %118 = tpu.concatenate %116, %117 in 1 : vector<256x128xbf16>, vector<256x128xbf16> -> vector<256x256xbf16>
    %119 = arith.truncf %93 : vector<256x128xf32> to vector<256x128xbf16>
    %120 = arith.truncf %89 : vector<256x128xf32> to vector<256x128xbf16>
    %121 = tpu.concatenate %119, %120 in 1 : vector<256x128xbf16>, vector<256x128xbf16> -> vector<256x256xbf16>
    %cst_58 = arith.constant dense<0.000000e+00> : vector<256x256xf32>
    %122 = tpu.matmul %118, %121, %cst_58 {dimension_numbers = #tpu.dot_dimension_numbers<[1], [1], [0], [0], [0, 0, 1, 0], [], []>} : vector<256x256xbf16>, vector<256x256xbf16>, vector<256x256xf32> -> vector<256x256xf32>
    %123 = arith.truncf %122 : vector<256x256xf32> to vector<256x256xbf16>
    %124 = vector.broadcast %115 : vector<256x1xf32> to vector<256x256xf32>
    %125 = arith.mulf %124, %85 : vector<256x256xf32>
    %126 = arith.truncf %125 : vector<256x256xf32> to vector<256x256xbf16>
    %cst_59 = arith.constant dense<0.000000e+00> : vector<256x256xf32>
    %127 = tpu.matmul %123, %126, %cst_59 {dimension_numbers = #tpu.dot_dimension_numbers<[1], [0], [0], [1], [0, 0, 1, 1], [], []>} : vector<256x256xbf16>, vector<256x256xbf16>, vector<256x256xf32> -> vector<256x256xf32>
    %128 = vector.broadcast %115 : vector<256x1xf32> to vector<256x256xf32>
    %129 = arith.mulf %128, %127 : vector<256x256xf32>
    %130 = vector.extract_strided_slice %129 {offsets = [0, 0], sizes = [256, 128], strides = [1, 1]} : vector<256x256xf32> to vector<256x128xf32>
    %c1_60 = arith.constant 1 : index
    %c0_61 = arith.constant 0 : index
    %c0_62 = arith.constant 0 : index
    %131 = vector.load %arg8[%c1_60, %c0_61, %c0_62] : memref<5x128x128xbf16, #tpu.memory_space<vmem>>, vector<1x128x128xbf16>
    %132 = vector.shape_cast %131 : vector<1x128x128xbf16> to vector<128x128xbf16>
    %133 = arith.truncf %130 : vector<256x128xf32> to vector<256x128xbf16>
    %cst_63 = arith.constant dense<0.000000e+00> : vector<256x128xf32>
    %134 = tpu.matmul %133, %132, %cst_63 {dimension_numbers = #tpu.dot_dimension_numbers<[1], [0], [0], [1], [0, 0, 1, 1], [], []>} : vector<256x128xbf16>, vector<128x128xbf16>, vector<256x128xf32> -> vector<256x128xf32>
    %135 = vector.extract_strided_slice %9 {offsets = [1, 0], sizes = [1, 128], strides = [1, 1]} : vector<5x128xf32> to vector<1x128xf32>
    %136 = vector.broadcast %135 : vector<1x128xf32> to vector<256x128xf32>
    %137 = arith.addf %134, %136 : vector<256x128xf32>
    %138 = vector.extract_strided_slice %129 {offsets = [0, 128], sizes = [256, 128], strides = [1, 1]} : vector<256x256xf32> to vector<256x128xf32>
    %c3 = arith.constant 3 : index
    %c0_64 = arith.constant 0 : index
    %c0_65 = arith.constant 0 : index
    %139 = vector.load %arg8[%c3, %c0_64, %c0_65] : memref<5x128x128xbf16, #tpu.memory_space<vmem>>, vector<1x128x128xbf16>
    %140 = vector.shape_cast %139 : vector<1x128x128xbf16> to vector<128x128xbf16>
    %141 = arith.truncf %138 : vector<256x128xf32> to vector<256x128xbf16>
    %cst_66 = arith.constant dense<0.000000e+00> : vector<256x128xf32>
    %142 = tpu.matmul %141, %140, %cst_66 {dimension_numbers = #tpu.dot_dimension_numbers<[1], [0], [0], [1], [0, 0, 1, 1], [], []>} : vector<256x128xbf16>, vector<128x128xbf16>, vector<256x128xf32> -> vector<256x128xf32>
    %143 = vector.extract_strided_slice %9 {offsets = [3, 0], sizes = [1, 128], strides = [1, 1]} : vector<5x128xf32> to vector<1x128xf32>
    %144 = vector.broadcast %143 : vector<1x128xf32> to vector<256x128xf32>
    %145 = arith.addf %142, %144 : vector<256x128xf32>
    %146 = tpu.concatenate %30, %16 in 1 : vector<256x128xf32>, vector<256x128xf32> -> vector<256x256xf32>
    %147 = arith.truncf %5 : vector<256x128xf32> to vector<256x128xbf16>
    %cst_67 = arith.constant dense<0.000000e+00> : vector<256x128xf32>
    %148 = tpu.matmul %147, %6, %cst_67 {dimension_numbers = #tpu.dot_dimension_numbers<[1], [0], [0], [1], [0, 0, 1, 1], [], []>} : vector<256x128xbf16>, vector<128x128xbf16>, vector<256x128xf32> -> vector<256x128xf32>
    %cst_68 = arith.constant 0.000000e+00 : f32
    %149 = vector.broadcast %cst_68 : f32 to vector<256x128xf32>
    %150 = arith.maximumf %148, %149 : vector<256x128xf32>
    %151 = arith.truncf %5 : vector<256x128xf32> to vector<256x128xbf16>
    %cst_69 = arith.constant dense<0.000000e+00> : vector<256x128xf32>
    %152 = tpu.matmul %151, %7, %cst_69 {dimension_numbers = #tpu.dot_dimension_numbers<[1], [0], [0], [1], [0, 0, 1, 1], [], []>} : vector<256x128xbf16>, vector<128x128xbf16>, vector<256x128xf32> -> vector<256x128xf32>
    %cst_70 = arith.constant 0.000000e+00 : f32
    %153 = vector.broadcast %cst_70 : f32 to vector<256x128xf32>
    %154 = arith.maximumf %152, %153 : vector<256x128xf32>
    %cst_71 = arith.constant dense<0.000000e+00> : vector<128xf32>
    %155 = vector.multi_reduction <add>, %150, %cst_71 [0] : vector<256x128xf32> to vector<128xf32>
    %156 = vector.shape_cast %155 : vector<128xf32> to vector<1x128xf32>
    %cst_72 = arith.constant dense<0.000000e+00> : vector<128xf32>
    %157 = vector.multi_reduction <add>, %154, %cst_72 [0] : vector<256x128xf32> to vector<128xf32>
    %158 = vector.shape_cast %157 : vector<128xf32> to vector<1x128xf32>
    %159 = vector.broadcast %158 : vector<1x128xf32> to vector<256x128xf32>
    %160 = arith.mulf %150, %159 : vector<256x128xf32>
    %cst_73 = arith.constant dense<0.000000e+00> : vector<256xf32>
    %161 = vector.multi_reduction <add>, %160, %cst_73 [1] : vector<256x128xf32> to vector<256xf32>
    %162 = vector.shape_cast %161 : vector<256xf32> to vector<256x1xf32>
    %163 = vector.broadcast %156 : vector<1x128xf32> to vector<256x128xf32>
    %164 = arith.mulf %154, %163 : vector<256x128xf32>
    %cst_74 = arith.constant dense<0.000000e+00> : vector<256xf32>
    %165 = vector.multi_reduction <add>, %164, %cst_74 [1] : vector<256x128xf32> to vector<256xf32>
    %166 = vector.shape_cast %165 : vector<256xf32> to vector<256x1xf32>
    %167 = arith.addf %162, %166 : vector<256x1xf32>
    %cst_75 = arith.constant 0.000000e+00 : f32
    %168 = vector.broadcast %cst_75 : f32 to vector<256x1xf32>
    %169 = arith.cmpf ogt, %167, %168 : vector<256x1xf32>
    %cst_76 = arith.constant 0.000000e+00 : f32
    %170 = vector.broadcast %cst_76 : f32 to vector<256x1xf32>
    %171 = arith.cmpf ogt, %167, %170 : vector<256x1xf32>
    %cst_77 = arith.constant 1.000000e+00 : f32
    %172 = vector.broadcast %cst_77 : f32 to vector<256x1xf32>
    %173 = arith.select %171, %167, %172 : vector<256x1xi1>, vector<256x1xf32>
    %174 = math.rsqrt %173 : vector<256x1xf32>
    %cst_78 = arith.constant 0.000000e+00 : f32
    %175 = vector.broadcast %cst_78 : f32 to vector<256x1xf32>
    %176 = arith.select %169, %174, %175 : vector<256x1xi1>, vector<256x1xf32>
    %177 = arith.truncf %150 : vector<256x128xf32> to vector<256x128xbf16>
    %178 = arith.truncf %154 : vector<256x128xf32> to vector<256x128xbf16>
    %179 = tpu.concatenate %177, %178 in 1 : vector<256x128xbf16>, vector<256x128xbf16> -> vector<256x256xbf16>
    %180 = arith.truncf %154 : vector<256x128xf32> to vector<256x128xbf16>
    %181 = arith.truncf %150 : vector<256x128xf32> to vector<256x128xbf16>
    %182 = tpu.concatenate %180, %181 in 1 : vector<256x128xbf16>, vector<256x128xbf16> -> vector<256x256xbf16>
    %cst_79 = arith.constant dense<0.000000e+00> : vector<256x256xf32>
    %183 = tpu.matmul %179, %182, %cst_79 {dimension_numbers = #tpu.dot_dimension_numbers<[1], [1], [0], [0], [0, 0, 1, 0], [], []>} : vector<256x256xbf16>, vector<256x256xbf16>, vector<256x256xf32> -> vector<256x256xf32>
    %184 = arith.truncf %183 : vector<256x256xf32> to vector<256x256xbf16>
    %185 = vector.broadcast %176 : vector<256x1xf32> to vector<256x256xf32>
    %186 = arith.mulf %185, %146 : vector<256x256xf32>
    %187 = arith.truncf %186 : vector<256x256xf32> to vector<256x256xbf16>
    %cst_80 = arith.constant dense<0.000000e+00> : vector<256x256xf32>
    %188 = tpu.matmul %184, %187, %cst_80 {dimension_numbers = #tpu.dot_dimension_numbers<[1], [0], [0], [1], [0, 0, 1, 1], [], []>} : vector<256x256xbf16>, vector<256x256xbf16>, vector<256x256xf32> -> vector<256x256xf32>
    %189 = vector.broadcast %176 : vector<256x1xf32> to vector<256x256xf32>
    %190 = arith.mulf %189, %188 : vector<256x256xf32>
    %191 = vector.extract_strided_slice %190 {offsets = [0, 0], sizes = [256, 128], strides = [1, 1]} : vector<256x256xf32> to vector<256x128xf32>
    %c2_81 = arith.constant 2 : index
    %c0_82 = arith.constant 0 : index
    %c0_83 = arith.constant 0 : index
    %192 = vector.load %arg8[%c2_81, %c0_82, %c0_83] : memref<5x128x128xbf16, #tpu.memory_space<vmem>>, vector<1x128x128xbf16>
    %193 = vector.shape_cast %192 : vector<1x128x128xbf16> to vector<128x128xbf16>
    %194 = arith.truncf %191 : vector<256x128xf32> to vector<256x128xbf16>
    %cst_84 = arith.constant dense<0.000000e+00> : vector<256x128xf32>
    %195 = tpu.matmul %194, %193, %cst_84 {dimension_numbers = #tpu.dot_dimension_numbers<[1], [0], [0], [1], [0, 0, 1, 1], [], []>} : vector<256x128xbf16>, vector<128x128xbf16>, vector<256x128xf32> -> vector<256x128xf32>
    %196 = vector.extract_strided_slice %9 {offsets = [2, 0], sizes = [1, 128], strides = [1, 1]} : vector<5x128xf32> to vector<1x128xf32>
    %197 = vector.broadcast %196 : vector<1x128xf32> to vector<256x128xf32>
    %198 = arith.addf %195, %197 : vector<256x128xf32>
    %199 = vector.extract_strided_slice %190 {offsets = [0, 128], sizes = [256, 128], strides = [1, 1]} : vector<256x256xf32> to vector<256x128xf32>
    %c4 = arith.constant 4 : index
    %c0_85 = arith.constant 0 : index
    %c0_86 = arith.constant 0 : index
    %200 = vector.load %arg8[%c4, %c0_85, %c0_86] : memref<5x128x128xbf16, #tpu.memory_space<vmem>>, vector<1x128x128xbf16>
    %201 = vector.shape_cast %200 : vector<1x128x128xbf16> to vector<128x128xbf16>
    %202 = arith.truncf %199 : vector<256x128xf32> to vector<256x128xbf16>
    %cst_87 = arith.constant dense<0.000000e+00> : vector<256x128xf32>
    %203 = tpu.matmul %202, %201, %cst_87 {dimension_numbers = #tpu.dot_dimension_numbers<[1], [0], [0], [1], [0, 0, 1, 1], [], []>} : vector<256x128xbf16>, vector<128x128xbf16>, vector<256x128xf32> -> vector<256x128xf32>
    %204 = vector.extract_strided_slice %9 {offsets = [4, 0], sizes = [1, 128], strides = [1, 1]} : vector<5x128xf32> to vector<1x128xf32>
    %205 = vector.broadcast %204 : vector<1x128xf32> to vector<256x128xf32>
    %206 = arith.addf %203, %205 : vector<256x128xf32>
    %207 = arith.addf %198, %145 : vector<256x128xf32>
    %208 = arith.addf %137, %206 : vector<256x128xf32>
    %c0_88 = arith.constant 0 : index
    %c0_89 = arith.constant 0 : index
    %c0_90 = arith.constant 0 : index
    %209 = vector.load %arg11[%c0_88, %c0_89, %c0_90] : memref<1x256x128xf32, #tpu.memory_space<vmem>>, vector<1x256x128xf32>
    %210 = vector.shape_cast %209 : vector<1x256x128xf32> to vector<256x128xf32>
    %211 = vector.shape_cast %207 : vector<256x128xf32> to vector<1x256x128xf32>
    tpu.vector_store %arg11[%c0_88, %c0_89, %c0_90], %211 {strides = array<i32>} : memref<1x256x128xf32, #tpu.memory_space<vmem>>, vector<1x256x128xf32>,
    %c0_91 = arith.constant 0 : index
    %c0_92 = arith.constant 0 : index
    %c0_93 = arith.constant 0 : index
    %212 = vector.load %arg12[%c0_91, %c0_92, %c0_93] : memref<1x256x128xf32, #tpu.memory_space<vmem>>, vector<1x256x128xf32>
    %213 = vector.shape_cast %212 : vector<1x256x128xf32> to vector<256x128xf32>
    %214 = vector.shape_cast %208 : vector<256x128xf32> to vector<1x256x128xf32>
    tpu.vector_store %arg12[%c0_91, %c0_92, %c0_93], %214 {strides = array<i32>} : memref<1x256x128xf32, #tpu.memory_space<vmem>>, vector<1x256x128xf32>,
    %cst_94 = arith.constant dense<0.000000e+00> : vector<128xf32>
    %215 = vector.multi_reduction <add>, %207, %cst_94 [0] : vector<256x128xf32> to vector<128xf32>
    %216 = vector.shape_cast %215 : vector<128xf32> to vector<1x128xf32>
    %217 = arith.mulf %207, %207 : vector<256x128xf32>
    %cst_95 = arith.constant dense<0.000000e+00> : vector<128xf32>
    %218 = vector.multi_reduction <add>, %217, %cst_95 [0] : vector<256x128xf32> to vector<128xf32>
    %219 = vector.shape_cast %218 : vector<128xf32> to vector<1x128xf32>
    %cst_96 = arith.constant dense<0.000000e+00> : vector<128xf32>
    %220 = vector.multi_reduction <add>, %208, %cst_96 [0] : vector<256x128xf32> to vector<128xf32>
    %221 = vector.shape_cast %220 : vector<128xf32> to vector<1x128xf32>
    %222 = arith.mulf %208, %208 : vector<256x128xf32>
    %cst_97 = arith.constant dense<0.000000e+00> : vector<128xf32>
    %223 = vector.multi_reduction <add>, %222, %cst_97 [0] : vector<256x128xf32> to vector<128xf32>
    %224 = vector.shape_cast %223 : vector<128xf32> to vector<1x128xf32>
    %225 = tpu.concatenate %216, %219, %221, %224 in 0 : vector<1x128xf32>, vector<1x128xf32>, vector<1x128xf32>, vector<1x128xf32> -> vector<4x128xf32>
    %c0_98 = arith.constant 0 : index
    %c0_99 = arith.constant 0 : index
    %c0_100 = arith.constant 0 : index
    %226 = vector.load %arg13[%c0_98, %c0_99, %c0_100] : memref<1x4x128xf32, #tpu.memory_space<vmem>>, vector<1x4x128xf32>
    %227 = vector.shape_cast %226 : vector<1x4x128xf32> to vector<4x128xf32>
    %228 = vector.shape_cast %225 : vector<4x128xf32> to vector<1x4x128xf32>
    tpu.vector_store %arg13[%c0_98, %c0_99, %c0_100], %228 {strides = array<i32>} : memref<1x4x128xf32, #tpu.memory_space<vmem>>, vector<1x4x128xf32>,
    return
  }
  func.func @transform_0(%arg0: i32) -> (i32, i32, i32) {
    %c0_i32 = arith.constant 0 : i32
    %c0_i32_0 = arith.constant 0 : i32
    %c0_i32_1 = arith.constant 0 : i32
    return %arg0, %c0_i32, %c0_i32_0 : i32, i32, i32
  }
  func.func @transform_1(%arg0: i32) -> (i32, i32, i32) {
    %c0_i32 = arith.constant 0 : i32
    %c0_i32_0 = arith.constant 0 : i32
    %c0_i32_1 = arith.constant 0 : i32
    return %arg0, %c0_i32, %c0_i32_0 : i32, i32, i32
  }
  func.func @transform_2(%arg0: i32) -> (i32, i32, i32) {
    %c0_i32 = arith.constant 0 : i32
    %c0_i32_0 = arith.constant 0 : i32
    %c0_i32_1 = arith.constant 0 : i32
    return %arg0, %c0_i32, %c0_i32_0 : i32, i32, i32
  }
  func.func @transform_3(%arg0: i32) -> (i32, i32) {
    %c0_i32 = arith.constant 0 : i32
    %c0_i32_0 = arith.constant 0 : i32
    %c0_i32_1 = arith.constant 0 : i32
    return %c0_i32, %c0_i32_0 : i32, i32
  }
  func.func @transform_4(%arg0: i32) -> (i32, i32) {
    %c0_i32 = arith.constant 0 : i32
    %c0_i32_0 = arith.constant 0 : i32
    %c0_i32_1 = arith.constant 0 : i32
    return %c0_i32, %c0_i32_0 : i32, i32
  }
  func.func @transform_5(%arg0: i32) -> (i32, i32, i32) {
    %c0_i32 = arith.constant 0 : i32
    %c0_i32_0 = arith.constant 0 : i32
    %c0_i32_1 = arith.constant 0 : i32
    %c0_i32_2 = arith.constant 0 : i32
    return %c0_i32, %c0_i32_0, %c0_i32_1 : i32, i32, i32
  }
  func.func @transform_6(%arg0: i32) -> (i32, i32) {
    %c0_i32 = arith.constant 0 : i32
    %c0_i32_0 = arith.constant 0 : i32
    %c0_i32_1 = arith.constant 0 : i32
    return %c0_i32, %c0_i32_0 : i32, i32
  }
  func.func @transform_7(%arg0: i32) -> (i32, i32, i32) {
    %c0_i32 = arith.constant 0 : i32
    %c0_i32_0 = arith.constant 0 : i32
    %c0_i32_1 = arith.constant 0 : i32
    %c0_i32_2 = arith.constant 0 : i32
    return %c0_i32, %c0_i32_0, %c0_i32_1 : i32, i32, i32
  }
  func.func @transform_8(%arg0: i32) -> (i32, i32) {
    %c0_i32 = arith.constant 0 : i32
    %c0_i32_0 = arith.constant 0 : i32
    %c0_i32_1 = arith.constant 0 : i32
    return %c0_i32, %c0_i32_0 : i32, i32
  }
  func.func @transform_9(%arg0: i32) -> (i32, i32, i32) {
    %c0_i32 = arith.constant 0 : i32
    %c0_i32_0 = arith.constant 0 : i32
    %c0_i32_1 = arith.constant 0 : i32
    return %arg0, %c0_i32, %c0_i32_0 : i32, i32, i32
  }
  func.func @transform_10(%arg0: i32) -> (i32, i32, i32) {
    %c0_i32 = arith.constant 0 : i32
    %c0_i32_0 = arith.constant 0 : i32
    %c0_i32_1 = arith.constant 0 : i32
    return %arg0, %c0_i32, %c0_i32_0 : i32, i32, i32
  }
  func.func @transform_11(%arg0: i32) -> (i32, i32, i32) {
    %c0_i32 = arith.constant 0 : i32
    %c0_i32_0 = arith.constant 0 : i32
    %c0_i32_1 = arith.constant 0 : i32
    return %arg0, %c0_i32, %c0_i32_0 : i32, i32, i32
  }
  func.func @transform_12(%arg0: i32) -> (i32, i32, i32) {
    %c0_i32 = arith.constant 0 : i32
    %c0_i32_0 = arith.constant 0 : i32
    %c0_i32_1 = arith.constant 0 : i32
    return %arg0, %c0_i32, %c0_i32_0 : i32, i32, i32
  }
}

module attributes {stable_mosaic.version = 11 : i64} {
  func.func @bn_apply_kernel(%arg0: i32, %arg1: memref<512x128xf32, #tpu.memory_space<vmem>>, %arg2: memref<512x128xf32, #tpu.memory_space<vmem>>, %arg3: memref<512x128xf32, #tpu.memory_space<vmem>>, %arg4: memref<512x128xf32, #tpu.memory_space<vmem>>, %arg5: memref<1x128xf32, #tpu.memory_space<vmem>>, %arg6: memref<1x128xf32, #tpu.memory_space<vmem>>, %arg7: memref<1x128xf32, #tpu.memory_space<vmem>>, %arg8: memref<1x128xf32, #tpu.memory_space<vmem>>, %arg9: memref<128x128xbf16, #tpu.memory_space<vmem>>, %arg10: memref<1x128xf32, #tpu.memory_space<vmem>>, %arg11: memref<512x128xf32, #tpu.memory_space<vmem>>) attributes {dimension_semantics = [#tpu.dimension_semantics<parallel>], iteration_bounds = array<i64: 1>, scalar_prefetch = 0 : i64, scratch_operands = 0 : i64, tpu.core_type = #tpu.core_type<tc>, window_params = [{transform_indices = @transform_0, window_bounds = array<i64: 512, 128>}, {transform_indices = @transform_1, window_bounds = array<i64: 512, 128>}, {transform_indices = @transform_2, window_bounds = array<i64: 512, 128>}, {transform_indices = @transform_3, window_bounds = array<i64: 512, 128>}, {pipeline_mode = #tpu.pipeline_mode<synchronous>, transform_indices = @transform_4, window_bounds = array<i64: 1, 128>}, {pipeline_mode = #tpu.pipeline_mode<synchronous>, transform_indices = @transform_5, window_bounds = array<i64: 1, 128>}, {pipeline_mode = #tpu.pipeline_mode<synchronous>, transform_indices = @transform_6, window_bounds = array<i64: 1, 128>}, {pipeline_mode = #tpu.pipeline_mode<synchronous>, transform_indices = @transform_7, window_bounds = array<i64: 1, 128>}, {pipeline_mode = #tpu.pipeline_mode<synchronous>, transform_indices = @transform_8, window_bounds = array<i64: 128, 128>}, {pipeline_mode = #tpu.pipeline_mode<synchronous>, transform_indices = @transform_9, window_bounds = array<i64: 1, 128>}, {transform_indices = @transform_10, window_bounds = array<i64: 512, 128>}]} {
    %c0 = arith.constant 0 : index
    %c0_0 = arith.constant 0 : index
    %0 = vector.load %arg2[%c0, %c0_0] : memref<512x128xf32, #tpu.memory_space<vmem>>, vector<512x128xf32>
    %c0_1 = arith.constant 0 : index
    %c0_2 = arith.constant 0 : index
    %1 = vector.load %arg5[%c0_1, %c0_2] : memref<1x128xf32, #tpu.memory_space<vmem>>, vector<1x128xf32>
    %2 = vector.broadcast %1 : vector<1x128xf32> to vector<512x128xf32>
    %3 = arith.mulf %0, %2 : vector<512x128xf32>
    %c0_3 = arith.constant 0 : index
    %c0_4 = arith.constant 0 : index
    %4 = vector.load %arg6[%c0_3, %c0_4] : memref<1x128xf32, #tpu.memory_space<vmem>>, vector<1x128xf32>
    %5 = vector.broadcast %4 : vector<1x128xf32> to vector<512x128xf32>
    %6 = arith.addf %3, %5 : vector<512x128xf32>
    %c0_5 = arith.constant 0 : index
    %c0_6 = arith.constant 0 : index
    %7 = vector.load %arg3[%c0_5, %c0_6] : memref<512x128xf32, #tpu.memory_space<vmem>>, vector<512x128xf32>
    %c0_7 = arith.constant 0 : index
    %c0_8 = arith.constant 0 : index
    %8 = vector.load %arg7[%c0_7, %c0_8] : memref<1x128xf32, #tpu.memory_space<vmem>>, vector<1x128xf32>
    %9 = vector.broadcast %8 : vector<1x128xf32> to vector<512x128xf32>
    %10 = arith.mulf %7, %9 : vector<512x128xf32>
    %11 = arith.addf %6, %10 : vector<512x128xf32>
    %c0_9 = arith.constant 0 : index
    %c0_10 = arith.constant 0 : index
    %12 = vector.load %arg8[%c0_9, %c0_10] : memref<1x128xf32, #tpu.memory_space<vmem>>, vector<1x128xf32>
    %13 = vector.broadcast %12 : vector<1x128xf32> to vector<512x128xf32>
    %14 = arith.addf %11, %13 : vector<512x128xf32>
    %c0_11 = arith.constant 0 : index
    %c0_12 = arith.constant 0 : index
    %15 = vector.load %arg1[%c0_11, %c0_12] : memref<512x128xf32, #tpu.memory_space<vmem>>, vector<512x128xf32>
    %16 = arith.addf %14, %15 : vector<512x128xf32>
    %17 = arith.truncf %16 : vector<512x128xf32> to vector<512x128xbf16>
    %c0_13 = arith.constant 0 : index
    %c0_14 = arith.constant 0 : index
    %18 = vector.load %arg9[%c0_13, %c0_14] : memref<128x128xbf16, #tpu.memory_space<vmem>>, vector<128x128xbf16>
    %cst = arith.constant dense<0.000000e+00> : vector<512x128xf32>
    %19 = tpu.matmul %17, %18, %cst {dimension_numbers = #tpu.dot_dimension_numbers<[1], [0], [0], [1], [0, 0, 1, 1], [], []>} : vector<512x128xbf16>, vector<128x128xbf16>, vector<512x128xf32> -> vector<512x128xf32>
    %c0_15 = arith.constant 0 : index
    %c0_16 = arith.constant 0 : index
    %20 = vector.load %arg10[%c0_15, %c0_16] : memref<1x128xf32, #tpu.memory_space<vmem>>, vector<1x128xf32>
    %21 = vector.broadcast %20 : vector<1x128xf32> to vector<512x128xf32>
    %22 = arith.addf %19, %21 : vector<512x128xf32>
    %c0_17 = arith.constant 0 : index
    %c0_18 = arith.constant 0 : index
    %23 = vector.load %arg4[%c0_17, %c0_18] : memref<512x128xf32, #tpu.memory_space<vmem>>, vector<512x128xf32>
    %24 = arith.addf %22, %23 : vector<512x128xf32>
    %c0_19 = arith.constant 0 : index
    %c0_20 = arith.constant 0 : index
    %25 = vector.load %arg11[%c0_19, %c0_20] : memref<512x128xf32, #tpu.memory_space<vmem>>, vector<512x128xf32>
    tpu.vector_store %arg11[%c0_19, %c0_20], %24 {strides = array<i32>} : memref<512x128xf32, #tpu.memory_space<vmem>>, vector<512x128xf32>,
    return
  }
  func.func @transform_0(%arg0: i32) -> (i32, i32) {
    %c0_i32 = arith.constant 0 : i32
    %c0_i32_0 = arith.constant 0 : i32
    return %arg0, %c0_i32 : i32, i32
  }
  func.func @transform_1(%arg0: i32) -> (i32, i32) {
    %c0_i32 = arith.constant 0 : i32
    %c0_i32_0 = arith.constant 0 : i32
    return %arg0, %c0_i32 : i32, i32
  }
  func.func @transform_2(%arg0: i32) -> (i32, i32) {
    %c0_i32 = arith.constant 0 : i32
    %c0_i32_0 = arith.constant 0 : i32
    return %arg0, %c0_i32 : i32, i32
  }
  func.func @transform_3(%arg0: i32) -> (i32, i32) {
    %c0_i32 = arith.constant 0 : i32
    %c0_i32_0 = arith.constant 0 : i32
    return %arg0, %c0_i32 : i32, i32
  }
  func.func @transform_4(%arg0: i32) -> (i32, i32) {
    %c0_i32 = arith.constant 0 : i32
    %c0_i32_0 = arith.constant 0 : i32
    %c0_i32_1 = arith.constant 0 : i32
    return %c0_i32, %c0_i32_0 : i32, i32
  }
  func.func @transform_5(%arg0: i32) -> (i32, i32) {
    %c0_i32 = arith.constant 0 : i32
    %c0_i32_0 = arith.constant 0 : i32
    %c0_i32_1 = arith.constant 0 : i32
    return %c0_i32, %c0_i32_0 : i32, i32
  }
  func.func @transform_6(%arg0: i32) -> (i32, i32) {
    %c0_i32 = arith.constant 0 : i32
    %c0_i32_0 = arith.constant 0 : i32
    %c0_i32_1 = arith.constant 0 : i32
    return %c0_i32, %c0_i32_0 : i32, i32
  }
  func.func @transform_7(%arg0: i32) -> (i32, i32) {
    %c0_i32 = arith.constant 0 : i32
    %c0_i32_0 = arith.constant 0 : i32
    %c0_i32_1 = arith.constant 0 : i32
    return %c0_i32, %c0_i32_0 : i32, i32
  }
  func.func @transform_8(%arg0: i32) -> (i32, i32) {
    %c0_i32 = arith.constant 0 : i32
    %c0_i32_0 = arith.constant 0 : i32
    %c0_i32_1 = arith.constant 0 : i32
    return %c0_i32, %c0_i32_0 : i32, i32
  }
  func.func @transform_9(%arg0: i32) -> (i32, i32) {
    %c0_i32 = arith.constant 0 : i32
    %c0_i32_0 = arith.constant 0 : i32
    %c0_i32_1 = arith.constant 0 : i32
    return %c0_i32, %c0_i32_0 : i32, i32
  }
  func.func @transform_10(%arg0: i32) -> (i32, i32) {
    %c0_i32 = arith.constant 0 : i32
    %c0_i32_0 = arith.constant 0 : i32
    return %arg0, %c0_i32 : i32, i32
  }
}

</mosaic_0001>

<bundles_post_ra>
// kernel: cross_nonlocal_forward.3
= control target key start
LH: loop header
LB: loop body
LE: loop exit
PB: predicated region body
PF: predicated region fallthrough
CT: control target
= control target key end

     0   :  { %s2799_s8 = inlined_call_operand.vmem [shape: bf16[128,128], index: 8, kind: input, shape index: {}]   ;;  %s2800_s1 = inlined_call_operand.vmem [shape: f32[512,128], index: 1, kind: input, shape index: {}]   ;;  %s2801_s4 = inlined_call_operand.vmem [shape: f32[1,128], index: 4, kind: input, shape index: {}]   ;;  %s2802_s2 = inlined_call_operand.vmem [shape: f32[512,128], index: 2, kind: input, shape index: {}]   ;;  %s2803_s5 = inlined_call_operand.vmem [shape: f32[1,128], index: 5, kind: input, shape index: {}]   ;;  %s2804_s6 = inlined_call_operand.vmem [shape: f32[1,128], index: 6, kind: input, shape index: {}]   ;;  %s2805_s7 = inlined_call_operand.vmem [shape: f32[1,128], index: 7, kind: input, shape index: {}]   ;;  %s2806_s0 = inlined_call_operand.vmem [shape: f32[512,128], index: 0, kind: input, shape index: {}]   ;;  %s2807_s9 = inlined_call_operand.vmem [shape: f32[1,128], index: 9, kind: input, shape index: {}]   ;;  %s2808_s3 = inlined_call_operand.vmem [shape: f32[512,128], index: 3, kind: input, shape index: {}]   ;;  %s2809_s10 = inlined_call_operand.vmem [shape: f32[512,128], index: 10, kind: output, shape index: {}]  }
   0x1   :  { %v1377_v0 = vld [vmem:[%s2799_s8 + $0x38] sm:$0xff]   ;;  %v1378_v1 = vld [vmem:[%s2799_s8 + $0x30] sm:$0xff]   ;;  %v1379_v2 = vld [vmem:[%s2799_s8 + $0x28] sm:$0xff]  }
   0x2   :  { %1281 = vmatprep.subr.bf16.mxu0 %v1377_v0  ;;  %1361 = vmatprep.subr.bf16.mxu1 %v1377_v0  ;;  %v1380_v3 = vld [vmem:[%s2799_s8 + $0x20] sm:$0xff]   ;;  %v37_v5 = vld [vmem:[%s2800_s1 + $0x8] sm:$0xff]  ;;  %v1381_v13 = vld [vmem:[%s2799_s8 + $0x18] sm:$0xff]  }
   0x3   :  { %1282 = vmatpush3.bf16.msra.mxu0 %v1377_v0  ;;  %1369 = vmatpush3.bf16.msra.mxu1 %v1377_v0  ;;  %v36_v4 = vld [vmem:[%s2800_s1] sm:$0xff]  ;;  %v243_v11 = vld [vmem:[%s2802_s2 + $0x8] sm:$0xff]  ;;  %v38_v28 = vld [vmem:[%s2800_s1 + $0x10] sm:$0xff] }
   0x4   :  { %1283 = vmatprep.subr.bf16.mxu0 %v1378_v1  ;;  %1362 = vmatprep.subr.bf16.mxu1 %v1378_v1  ;;  %v1465_v6 = vld [vmem:[%s2801_s4] ss:$0 sm:$0xff]  ;;  %v69_v18 = vld [vmem:[%s2800_s1 + $0x108] sm:$0xff]  ;;  %v39_v29 = vld [vmem:[%s2800_s1 + $0x18] sm:$0xff] }
   0x5   :  { %v107_v7 = vmul.f32 %v1465_v6, %v36_v4  ;;  %v108_v8 = vmul.f32 %v1465_v6, %v37_v5  ;;  %v1472_v9 = vld [vmem:[%s2803_s5] ss:$0 sm:$0xff]  ;;  %v140_v22 = vmul.f32 %v1465_v6, %v69_v18  ;;  %v275_v24 = vld [vmem:[%s2802_s2 + $0x108] sm:$0xff]  ;;  %v109_v34 = vmul.f32 %v1465_v6, %v38_v28  ;;  %v244_v35 = vld [vmem:[%s2802_s2 + $0x10] sm:$0xff] }
   0x6   :  { %v242_v10 = vld [vmem:[%s2802_s2] sm:$0xff]  ;;  %v245_v36 = vld [vmem:[%s2802_s2 + $0x18] sm:$0xff]  ;;  %v513_v38 = vld [vmem:[%s2806_s0 + $0x8] sm:$0xff]  ;;  %v110_v39 = vmul.f32 %v1465_v6, %v39_v29 }
   0x7   :  { %1284 = vmatpush3.bf16.msra.mxu0 %v1378_v1  ;;  %1370 = vmatpush3.bf16.msra.mxu1 %v1378_v1  ;;  %v1483_v12 = vld [vmem:[%s2804_s6] ss:$0 sm:$0xff]  ;;  %v178_v14 = vadd.f32 %v1472_v9, %v107_v7  ;;  %v179_v15 = vadd.f32 %v1472_v9, %v108_v8  ;;  %v211_v33 = vadd.f32 %v1472_v9, %v140_v22  ;;  %v70_v41 = vld [vmem:[%s2800_s1 + $0x110] sm:$0xff]  ;;  %v71_v46 = vld [vmem:[%s2800_s1 + $0x118] sm:$0xff] }
   0x8   :  { %1285 = vmatprep.subr.bf16.mxu0 %v1379_v2  ;;  %1363 = vmatprep.subr.bf16.mxu1 %v1379_v2  ;;  %v313_v16 = vmul.f32 %v1483_v12, %v242_v10  ;;  %v68_v17 = vld [vmem:[%s2800_s1 + $0x100] sm:$0xff]  ;;  %v314_v19 = vmul.f32 %v1483_v12, %v243_v11  ;;  %v346_v27 = vmul.f32 %v1483_v12, %v275_v24  ;;  %v1382_v42 = vld [vmem:[%s2799_s8 + $0x10] sm:$0xff]   ;;  %v545_v49 = vld [vmem:[%s2806_s0 + $0x108] sm:$0xff] }
   0x9   :  { %v1501_v20 = vld [vmem:[%s2805_s7] ss:$0 sm:$0xff]  ;;  %v139_v21 = vmul.f32 %v1465_v6, %v68_v17  ;;  %v315_v40 = vmul.f32 %v1483_v12, %v244_v35  ;;  %v180_v50 = vadd.f32 %v1472_v9, %v109_v34  ;;  %v181_v51 = vadd.f32 %v1472_v9, %v110_v39  ;;  %v1383_v53 = vld [vmem:[%s2799_s8 + $0x8] sm:$0xff]   ;;  %v276_v61 = vld [vmem:[%s2802_s2 + $0x110] sm:$0xff] }
   0xa   :  { %v274_v23 = vld [vmem:[%s2802_s2 + $0x100] sm:$0xff]  ;;  %v377_v25 = vadd.f32 %v313_v16, %v178_v14  ;;  %v378_v30 = vadd.f32 %v314_v19, %v179_v15  ;;  %v410_v45 = vadd.f32 %v346_v27, %v211_v33  ;;  %v316_v52 = vmul.f32 %v1483_v12, %v245_v36  ;;  %v277_v62 = vld [vmem:[%s2802_s2 + $0x118] sm:$0xff]  ;;  %v41_v5 = vld [vmem:[%s2800_s1 + $0x28] sm:$0xff] }
   0xb   :  { %1286 = vmatpush3.bf16.msra.mxu0 %v1379_v2  ;;  %1371 = vmatpush3.bf16.msra.mxu1 %v1379_v2  ;;  %v345_v26 = vmul.f32 %v1483_v12, %v274_v23  ;;  %v512_v31 = vld [vmem:[%s2806_s0] sm:$0xff]  ;;  %v210_v32 = vadd.f32 %v1472_v9, %v139_v21  ;;  %v141_v57 = vmul.f32 %v1465_v6, %v70_v41  ;;  %v515_v4 = vld [vmem:[%s2806_s0 + $0x18] sm:$0xff]  ;;  %v247_v18 = vld [vmem:[%s2802_s2 + $0x28] sm:$0xff] }
   0xc   :  { %1287 = vmatprep.subr.bf16.mxu0 %v1380_v3  ;;  %1364 = vmatprep.subr.bf16.mxu1 %v1380_v3  ;;  %v448_v37 = vadd.f32 %v1501_v20, %v377_v25  ;;  %v449_v43 = vadd.f32 %v1501_v20, %v378_v30  ;;  %v544_v48 = vld [vmem:[%s2806_s0 + $0x100] sm:$0xff]  ;;  %v481_v56 = vadd.f32 %v1501_v20, %v410_v45  ;;  %v73_v24 = vld [vmem:[%s2800_s1 + $0x128] sm:$0xff]  ;;  %v43_v45 = vld [vmem:[%s2800_s1 + $0x38] sm:$0xff] }
   0xd   :  { %v409_v44 = vadd.f32 %v345_v26, %v210_v32  ;;  %v379_v58 = vadd.f32 %v315_v40, %v180_v50  ;;  %v380_v59 = vadd.f32 %v316_v52, %v181_v51  ;;  %v142_v60 = vmul.f32 %v1465_v6, %v71_v46  ;;  %v40_v63 = vld [vmem:[%s2800_s1 + $0x20] sm:$0xff]  ;;  %v547_v32 = vld [vmem:[%s2806_s0 + $0x118] sm:$0xff]  ;;  %v279_v40 = vld [vmem:[%s2802_s2 + $0x128] sm:$0xff] }
   0xe   :  { %v576_v47 = vadd.f32 %v512_v31, %v448_v37  ;;  %v577_v54 = vadd.f32 %v513_v38, %v449_v43  ;;  %v609_v2 = vadd.f32 %v545_v49, %v481_v56  ;;  %v212_v10 = vadd.f32 %v1472_v9, %v141_v57  ;;  %v246_v17 = vld [vmem:[%s2802_s2 + $0x20] sm:$0xff]  ;;  %v546_v31 = vld [vmem:[%s2806_s0 + $0x110] sm:$0xff]  ;;  %v517_v49 = vld [vmem:[%s2806_s0 + $0x28] sm:$0xff] }
   0xf   :  { %1288 = vmatpush3.bf16.msra.mxu0 %v1380_v3  ;;  %1372 = vmatpush3.bf16.msra.mxu1 %v1380_v3  ;;  %v480_v55 = vadd.f32 %v1501_v20, %v409_v44  ;;  %v514_v3 = vld [vmem:[%s2806_s0 + $0x10] sm:$0xff]  ;;  %v450_v7 = vadd.f32 %v1501_v20, %v379_v58  ;;  %v451_v8 = vadd.f32 %v1501_v20, %v380_v59  ;;  %v72_v23 = vld [vmem:[%s2800_s1 + $0x120] sm:$0xff] }
  0x10   :  { %1289 = vmatprep.subr.bf16.mxu0 %v1381_v13  ;;  %1365 = vmatprep.subr.bf16.mxu1 %v1381_v13  ;;  %v640_v0 = vpack.c.bf16 %v577_v54, %v576_v47  ;;  %v213_v11 = vadd.f32 %v1472_v9, %v142_v60  ;;  %v347_v14 = vmul.f32 %v1483_v12, %v276_v61  ;;  %v1384_v25 = vld [vmem:[%s2799_s8] sm:$0xff]   ;;  %v42_v44 = vld [vmem:[%s2800_s1 + $0x30] sm:$0xff]  ;;  %v249_v60 = vld [vmem:[%s2802_s2 + $0x38] sm:$0xff] }
  0x11   :  { %v608_v1 = vadd.f32 %v544_v48, %v480_v55  ;;  %v348_v15 = vmul.f32 %v1483_v12, %v277_v62  ;;  %v111_v16 = vmul.f32 %v1465_v6, %v40_v63  ;;  %v1594_v19 = vadd.f32 %v514_v3, %v450_v7  ;;  %v278_v29 = vld [vmem:[%s2802_s2 + $0x120] sm:$0xff]  ;;  %v248_v55 = vld [vmem:[%s2802_s2 + $0x30] sm:$0xff] }
  0x12   :  { %1297 = vmatprep.mubr.bf16.mxu0 %v640_v0  ;;  %v1596_v21 = vadd.f32 %v515_v4, %v451_v8  ;;  %v112_v22 = vmul.f32 %v1465_v6, %v41_v5  ;;  %v411_v26 = vadd.f32 %v347_v14, %v212_v10  ;;  %v317_v34 = vmul.f32 %v1483_v12, %v246_v17  ;;  %v516_v48 = vld [vmem:[%s2806_s0 + $0x20] sm:$0xff]  ;;  %v74_v61 = vld [vmem:[%s2800_s1 + $0x130] sm:$0xff]  ;;  %v549_v4 = vld [vmem:[%s2806_s0 + $0x128] sm:$0xff] }
  0x13   :  { %1290 = vmatpush3.bf16.msra.mxu0 %v1381_v13  ;;  %1373 = vmatpush3.bf16.msra.mxu1 %v1381_v13  ;;  %v656_v13 = vpack.c.bf16 %v609_v2, %v608_v1  ;;  %v412_v27 = vadd.f32 %v348_v15, %v213_v11  ;;  %v182_v28 = vadd.f32 %v1472_v9, %v111_v16  ;;  %v548_v1 = vld [vmem:[%s2806_s0 + $0x120] sm:$0xff]  ;;  %v75_v2 = vld [vmem:[%s2800_s1 + $0x138] sm:$0xff]  ;;  %v280_v10 = vld [vmem:[%s2802_s2 + $0x130] sm:$0xff] }
  0x14   :  { %1291 = vmatprep.subr.bf16.mxu0 %v1382_v42  ;;  %1366 = vmatprep.subr.bf16.mxu1 %v1382_v42  ;;  %v641_v30 = vpack.c.bf16 %v1596_v21, %v1594_v19  ;;  %v183_v33 = vadd.f32 %v1472_v9, %v112_v22  ;;  %v318_v35 = vmul.f32 %v1483_v12, %v247_v18  ;;  %v281_v16 = vld [vmem:[%s2802_s2 + $0x138] sm:$0xff]  ;;  %v44_v17 = vld [vmem:[%s2800_s1 + $0x40] sm:$0xff]  ;;  %v45_v22 = vld [vmem:[%s2800_s1 + $0x48] sm:$0xff] }
  0x15   :  { %1329 = vmatprep.mubr.bf16.mxu1 %v656_v13  ;;  %v482_v36 = vadd.f32 %v1501_v20, %v411_v26  ;;  %v483_v37 = vadd.f32 %v1501_v20, %v412_v27  ;;  %v143_v38 = vmul.f32 %v1465_v6, %v72_v23  ;;  %v144_v39 = vmul.f32 %v1465_v6, %v73_v24 }
  0x16   :  { %v381_v41 = vadd.f32 %v317_v34, %v182_v28  ;;  %v349_v43 = vmul.f32 %v1483_v12, %v278_v29  ;;  %v350_v54 = vmul.f32 %v1483_v12, %v279_v40  ;;  %v113_v58 = vmul.f32 %v1465_v6, %v42_v44  ;;  %v250_v28 = vld [vmem:[%s2802_s2 + $0x40] sm:$0xff]  ;;  %v251_v34 = vld [vmem:[%s2802_s2 + $0x48] sm:$0xff] }
  0x17   :  { %1292 = vmatpush3.bf16.msra.mxu0 %v1382_v42  ;;  %1374 = vmatpush3.bf16.msra.mxu1 %v1382_v42  ;;  %v382_v42 = vadd.f32 %v318_v35, %v183_v33  ;;  %v610_v46 = vadd.f32 %v546_v31, %v482_v36  ;;  %v611_v47 = vadd.f32 %v547_v32, %v483_v37  ;;  %v77_v40 = vld [vmem:[%s2800_s1 + $0x148] sm:$0xff] }
  0x18   :  { %1293 = vmatprep.subr.bf16.mxu0 %v1383_v53  ;;  %1367 = vmatprep.subr.bf16.mxu1 %v1383_v53  ;;  %v214_v50 = vadd.f32 %v1472_v9, %v143_v38  ;;  %v452_v51 = vadd.f32 %v1501_v20, %v381_v41  ;;  %v114_v59 = vmul.f32 %v1465_v6, %v43_v45 }
  0x19   :  { %v453_v52 = vadd.f32 %v1501_v20, %v382_v42  ;;  %v657_v56 = vpack.c.bf16 %v611_v47, %v610_v46  ;;  %v184_v5 = vadd.f32 %v1472_v9, %v113_v58  ;;  %v319_v8 = vmul.f32 %v1483_v12, %v248_v55  ;;  %v282_v46 = vld [vmem:[%s2802_s2 + $0x140] sm:$0xff]  ;;  %v47_v58 = vld [vmem:[%s2800_s1 + $0x58] sm:$0xff] }
  0x1a   :  { %v413_v57 = vadd.f32 %v349_v43, %v214_v50  ;;  %v580_v62 = vadd.f32 %v516_v48, %v452_v51  ;;  %v185_v7 = vadd.f32 %v1472_v9, %v114_v59  ;;  %v320_v14 = vmul.f32 %v1483_v12, %v249_v60  ;;  %v550_v43 = vld [vmem:[%s2806_s0 + $0x130] sm:$0xff] }
  0x1b   :  { %1294 = vmatpush3.bf16.msra.mxu0 %v1383_v53  ;;  %1375 = vmatpush3.bf16.msra.mxu1 %v1383_v53  ;;  %v215_v53 = vadd.f32 %v1472_v9, %v144_v39  ;;  %v581_v63 = vadd.f32 %v517_v49, %v453_v52  ;;  %v145_v15 = vmul.f32 %v1465_v6, %v74_v61  ;;  %v76_v39 = vld [vmem:[%s2800_s1 + $0x140] sm:$0xff]  ;;  %v551_v49 = vld [vmem:[%s2806_s0 + $0x138] sm:$0xff] }
  0x1c   :  { %1295 = vmatprep.subr.bf16.mxu0 %v1384_v25  ;;  %1368 = vmatprep.subr.bf16.mxu1 %v1384_v25  ;;  %v484_v3 = vadd.f32 %v1501_v20, %v413_v57  ;;  %v383_v19 = vadd.f32 %v319_v8, %v184_v5  ;;  %v146_v21 = vmul.f32 %v1465_v6, %v75_v2  ;;  %v46_v57 = vld [vmem:[%s2800_s1 + $0x50] sm:$0xff] }
  0x1d   :  { %v414_v0 = vadd.f32 %v350_v54, %v215_v53  ;;  %v642_v11 = vpack.c.bf16 %v581_v63, %v580_v62  ;;  %v384_v24 = vadd.f32 %v320_v14, %v185_v7  ;;  %v216_v26 = vadd.f32 %v1472_v9, %v145_v15  ;;  %v520_v62 = vld [vmem:[%s2806_s0 + $0x40] sm:$0xff]  ;;  %v78_v14 = vld [vmem:[%s2800_s1 + $0x150] sm:$0xff]  ;;  %v79_v15 = vld [vmem:[%s2800_s1 + $0x158] sm:$0xff] }
  0x1e   :  { %v612_v18 = vadd.f32 %v548_v1, %v484_v3  ;;  %v351_v27 = vmul.f32 %v1483_v12, %v280_v10  ;;  %v454_v29 = vadd.f32 %v1501_v20, %v383_v19  ;;  %v217_v31 = vadd.f32 %v1472_v9, %v146_v21  ;;  %v521_v3 = vld [vmem:[%s2806_s0 + $0x48] sm:$0xff]  ;;  %v284_v21 = vld [vmem:[%s2802_s2 + $0x150] sm:$0xff] }
  0x1f   :  { %1296 = vmatpush3.bf16.msra.mxu0 %v1384_v25  ;;  %1376 = vmatpush3.bf16.msra.mxu1 %v1384_v25  ;;  %v485_v13 = vadd.f32 %v1501_v20, %v414_v0  ;;  %v518_v25 = vld [vmem:[%s2806_s0 + $0x30] sm:$0xff]  ;;  %v352_v32 = vmul.f32 %v1483_v12, %v281_v16  ;;  %v115_v33 = vmul.f32 %v1465_v6, %v44_v17 }
  0x20   :  { %v455_v36 = vadd.f32 %v1501_v20, %v384_v24  ;;  %v415_v37 = vadd.f32 %v351_v27, %v216_v26  ;;  %v116_v38 = vmul.f32 %v1465_v6, %v45_v22  ;;  %v582_v41 = vadd.f32 %v518_v25, %v454_v29  ;;  %v252_v0 = vld [vmem:[%s2802_s2 + $0x50] sm:$0xff]  ;;  %v552_v24 = vld [vmem:[%s2806_s0 + $0x140] sm:$0xff] }
  0x21   :  { %v613_v23 = vadd.f32 %v549_v4, %v485_v13  ;;  %v416_v42 = vadd.f32 %v352_v32, %v217_v31  ;;  %v186_v44 = vadd.f32 %v1472_v9, %v115_v33  ;;  %v321_v45 = vmul.f32 %v1483_v12, %v250_v28  ;;  %v253_v13 = vld [vmem:[%s2802_s2 + $0x58] sm:$0xff]  ;;  %v553_v28 = vld [vmem:[%s2806_s0 + $0x148] sm:$0xff]  ;;  %v48_v33 = vld [vmem:[%s2800_s1 + $0x60] sm:$0xff] }
  0x22   :  { %1298 = vmatmul.mubr.bf16.vlgmr.msra.gmra.mxu0 %v641_v30  ;;  %1330 = vmatmul.mubr.bf16.vlgmr.msra.gmra.mxu1 %v657_v56  ;;  %v519_v30 = vld [vmem:[%s2806_s0 + $0x38] sm:$0xff]  ;;  %v486_v48 = vadd.f32 %v1501_v20, %v415_v37  ;;  %v187_v50 = vadd.f32 %v1472_v9, %v116_v38  ;;  %v322_v51 = vmul.f32 %v1483_v12, %v251_v34  ;;  %v283_v56 = vld [vmem:[%s2802_s2 + $0x148] sm:$0xff] }
  0x23   :  { %1301 = vmatprep.mubr.bf16.mxu0 %v642_v11  ;;  %v658_v35 = vpack.c.bf16 %v613_v23, %v612_v18  ;;  %v583_v47 = vadd.f32 %v519_v30, %v455_v36  ;;  %v487_v52 = vadd.f32 %v1501_v20, %v416_v42  ;;  %v385_v53 = vadd.f32 %v321_v45, %v186_v44  ;;  %v285_v32 = vld [vmem:[%s2802_s2 + $0x158] sm:$0xff]  ;;  %v49_v38 = vld [vmem:[%s2800_s1 + $0x68] sm:$0xff]  ;;  %v522_v42 = vld [vmem:[%s2806_s0 + $0x50] sm:$0xff] }
  0x24   :  { %v147_v54 = vmul.f32 %v1465_v6, %v76_v39  ;;  %v148_v55 = vmul.f32 %v1465_v6, %v77_v40  ;;  %v614_v60 = vadd.f32 %v550_v43, %v486_v48  ;;  %v386_v61 = vadd.f32 %v322_v51, %v187_v50  ;;  %v254_v39 = vld [vmem:[%s2802_s2 + $0x60] sm:$0xff]  ;;  %v255_v50 = vld [vmem:[%s2802_s2 + $0x68] sm:$0xff] }
  0x25   :  { %1333 = vmatprep.mubr.bf16.mxu1 %v658_v35  ;;  %v643_v59 = vpack.c.bf16 %v583_v47, %v582_v41  ;;  %v353_v63 = vmul.f32 %v1483_v12, %v282_v46  ;;  %v615_v1 = vadd.f32 %v551_v49, %v487_v52  ;;  %v456_v2 = vadd.f32 %v1501_v20, %v385_v53  ;;  %v523_v47 = vld [vmem:[%s2806_s0 + $0x58] sm:$0xff] }
  0x26   :  { %v218_v4 = vadd.f32 %v1472_v9, %v147_v54  ;;  %v219_v5 = vadd.f32 %v1472_v9, %v148_v55  ;;  %v457_v7 = vadd.f32 %v1501_v20, %v386_v61  ;;  %v354_v8 = vmul.f32 %v1483_v12, %v283_v56  ;;  %v80_v55 = vld [vmem:[%s2800_s1 + $0x160] sm:$0xff]  ;;  %v81_v56 = vld [vmem:[%s2800_s1 + $0x168] sm:$0xff] }
  0x27   :  { %v117_v10 = vmul.f32 %v1465_v6, %v46_v57  ;;  %v118_v11 = vmul.f32 %v1465_v6, %v47_v58  ;;  %v659_v16 = vpack.c.bf16 %v615_v1, %v614_v60  ;;  %v584_v17 = vadd.f32 %v520_v62, %v456_v2  ;;  %v554_v60 = vld [vmem:[%s2806_s0 + $0x150] sm:$0xff]  ;;  %v286_v62 = vld [vmem:[%s2802_s2 + $0x160] sm:$0xff]  ;;  %v555_v1 = vld [vmem:[%s2806_s0 + $0x158] sm:$0xff] }
  0x28   :  { %v417_v18 = vadd.f32 %v353_v63, %v218_v4  ;;  %v323_v19 = vmul.f32 %v1483_v12, %v252_v0  ;;  %v585_v22 = vadd.f32 %v521_v3, %v457_v7  ;;  %v418_v23 = vadd.f32 %v354_v8, %v219_v5 }
  0x29   :  { %v188_v25 = vadd.f32 %v1472_v9, %v117_v10  ;;  %v189_v26 = vadd.f32 %v1472_v9, %v118_v11  ;;  %v324_v29 = vmul.f32 %v1483_v12, %v253_v13  ;;  %v149_v30 = vmul.f32 %v1465_v6, %v78_v14  ;;  %v287_v10 = vld [vmem:[%s2802_s2 + $0x168] sm:$0xff]  ;;  %v50_v11 = vld [vmem:[%s2800_s1 + $0x70] sm:$0xff]  ;;  %v51_v13 = vld [vmem:[%s2800_s1 + $0x78] sm:$0xff] }
  0x2a   :  { %1302 = vmatmul.mubr.bf16.gmra.mxu0 %v643_v59  ;;  %1334 = vmatmul.mubr.bf16.gmra.mxu1 %v659_v16  ;;  %v488_v27 = vadd.f32 %v1501_v20, %v417_v18  ;;  %v150_v31 = vmul.f32 %v1465_v6, %v79_v15  ;;  %v644_v34 = vpack.c.bf16 %v585_v22, %v584_v17  ;;  %v524_v17 = vld [vmem:[%s2806_s0 + $0x60] sm:$0xff] }
  0x2b   :  { %v489_v35 = vadd.f32 %v1501_v20, %v418_v23  ;;  %v387_v36 = vadd.f32 %v323_v19, %v188_v25  ;;  %v355_v37 = vmul.f32 %v1483_v12, %v284_v21  ;;  %v388_v41 = vadd.f32 %v324_v29, %v189_v26  ;;  %v256_v19 = vld [vmem:[%s2802_s2 + $0x70] sm:$0xff]  ;;  %v525_v23 = vld [vmem:[%s2806_s0 + $0x68] sm:$0xff] }
  0x2c   :  { %v616_v40 = vadd.f32 %v552_v24, %v488_v27  ;;  %v220_v43 = vadd.f32 %v1472_v9, %v149_v30  ;;  %v221_v44 = vadd.f32 %v1472_v9, %v150_v31  ;;  %1305 = vmatprep.mubr.bf16.mxu0 %v644_v34  ;;  %v356_v48 = vmul.f32 %v1483_v12, %v285_v32  ;;  %v257_v30 = vld [vmem:[%s2802_s2 + $0x78] sm:$0xff]  ;;  %v82_v31 = vld [vmem:[%s2800_s1 + $0x170] sm:$0xff] }
  0x2d   :  { %v617_v45 = vadd.f32 %v553_v28, %v489_v35  ;;  %v458_v46 = vadd.f32 %v1501_v20, %v387_v36  ;;  %v119_v49 = vmul.f32 %v1465_v6, %v48_v33  ;;  %v459_v51 = vadd.f32 %v1501_v20, %v388_v41  ;;  %v83_v32 = vld [vmem:[%s2800_s1 + $0x178] sm:$0xff] }
  0x2e   :  { %v419_v52 = vadd.f32 %v355_v37, %v220_v43  ;;  %v120_v53 = vmul.f32 %v1465_v6, %v49_v38  ;;  %v325_v54 = vmul.f32 %v1483_v12, %v254_v39  ;;  %v420_v59 = vadd.f32 %v356_v48, %v221_v44  ;;  %v288_v37 = vld [vmem:[%s2802_s2 + $0x170] sm:$0xff]  ;;  %v557_v44 = vld [vmem:[%s2806_s0 + $0x168] sm:$0xff]  ;;  %v289_v48 = vld [vmem:[%s2802_s2 + $0x178] sm:$0xff] }
  0x2f   :  { %v660_v57 = vpack.c.bf16 %v617_v45, %v616_v40  ;;  %v586_v58 = vadd.f32 %v522_v42, %v458_v46  ;;  %v190_v61 = vadd.f32 %v1472_v9, %v119_v49  ;;  %v587_v63 = vadd.f32 %v523_v47, %v459_v51  ;;  %v556_v40 = vld [vmem:[%s2806_s0 + $0x160] sm:$0xff] }
  0x30   :  { %v490_v0 = vadd.f32 %v1501_v20, %v419_v52  ;;  %v191_v2 = vadd.f32 %v1472_v9, %v120_v53  ;;  %v326_v3 = vmul.f32 %v1483_v12, %v255_v50  ;;  %v491_v4 = vadd.f32 %v1501_v20, %v420_v59  ;;  %v52_v49 = vld [vmem:[%s2800_s1 + $0x80] sm:$0xff] }
  0x31   :  { %1337 = vmatprep.mubr.bf16.mxu1 %v660_v57  ;;  %v389_v5 = vadd.f32 %v325_v54, %v190_v61  ;;  %v151_v7 = vmul.f32 %v1465_v6, %v80_v55  ;;  %v152_v8 = vmul.f32 %v1465_v6, %v81_v56  ;;  %v645_v14 = vpack.c.bf16 %v587_v63, %v586_v58  ;;  %v53_v54 = vld [vmem:[%s2800_s1 + $0x88] sm:$0xff]  ;;  %v258_v55 = vld [vmem:[%s2802_s2 + $0x80] sm:$0xff]  ;;  %v526_v58 = vld [vmem:[%s2806_s0 + $0x70] sm:$0xff] }
  0x32   :  { %v618_v15 = vadd.f32 %v554_v60, %v490_v0  ;;  %v390_v16 = vadd.f32 %v326_v3, %v191_v2  ;;  %v357_v18 = vmul.f32 %v1483_v12, %v286_v62  ;;  %v619_v21 = vadd.f32 %v555_v1, %v491_v4  ;;  %v527_v63 = vld [vmem:[%s2806_s0 + $0x78] sm:$0xff]  ;;  %v259_v2 = vld [vmem:[%s2802_s2 + $0x88] sm:$0xff] }
  0x33   :  { %v460_v22 = vadd.f32 %v1501_v20, %v389_v5  ;;  %v222_v24 = vadd.f32 %v1472_v9, %v151_v7  ;;  %v223_v25 = vadd.f32 %v1472_v9, %v152_v8  ;;  %1306 = vmatmul.mubr.bf16.gmra.mxu0 %v645_v14  ;;  %v358_v27 = vmul.f32 %v1483_v12, %v287_v10  ;;  %v84_v8 = vld [vmem:[%s2800_s1 + $0x180] sm:$0xff]  ;;  %v85_v10 = vld [vmem:[%s2800_s1 + $0x188] sm:$0xff] }
  0x34   :  { %v461_v26 = vadd.f32 %v1501_v20, %v390_v16  ;;  %v121_v28 = vmul.f32 %v1465_v6, %v50_v11  ;;  %v122_v29 = vmul.f32 %v1465_v6, %v51_v13  ;;  %v661_v33 = vpack.c.bf16 %v619_v21, %v618_v15  ;;  %v558_v15 = vld [vmem:[%s2806_s0 + $0x170] sm:$0xff]  ;;  %v559_v21 = vld [vmem:[%s2806_s0 + $0x178] sm:$0xff] }
  0x35   :  { %v588_v34 = vadd.f32 %v524_v17, %v460_v22  ;;  %v421_v35 = vadd.f32 %v357_v18, %v222_v24  ;;  %v327_v36 = vmul.f32 %v1483_v12, %v256_v19  ;;  %v422_v39 = vadd.f32 %v358_v27, %v223_v25  ;;  %v290_v17 = vld [vmem:[%s2802_s2 + $0x180] sm:$0xff] }
  0x36   :  { %v589_v38 = vadd.f32 %v525_v23, %v461_v26  ;;  %v192_v41 = vadd.f32 %v1472_v9, %v121_v28  ;;  %v193_v42 = vadd.f32 %v1472_v9, %v122_v29  ;;  %1338 = vmatmul.mubr.bf16.gmra.mxu1 %v661_v33  ;;  %v328_v45 = vmul.f32 %v1483_v12, %v257_v30  ;;  %v291_v28 = vld [vmem:[%s2802_s2 + $0x188] sm:$0xff]  ;;  %v54_v29 = vld [vmem:[%s2800_s1 + $0x90] sm:$0xff]  ;;  %v55_v30 = vld [vmem:[%s2800_s1 + $0x98] sm:$0xff] }
  0x37   :  { %v492_v43 = vadd.f32 %v1501_v20, %v421_v35  ;;  %v153_v46 = vmul.f32 %v1465_v6, %v82_v31  ;;  %v154_v47 = vmul.f32 %v1465_v6, %v83_v32  ;;  %v493_v51 = vadd.f32 %v1501_v20, %v422_v39  ;;  %v529_v39 = vld [vmem:[%s2806_s0 + $0x88] sm:$0xff] }
  0x38   :  { %v646_v50 = vpack.c.bf16 %v589_v38, %v588_v34  ;;  %v391_v52 = vadd.f32 %v327_v36, %v192_v41  ;;  %v359_v53 = vmul.f32 %v1483_v12, %v288_v37  ;;  %v392_v57 = vadd.f32 %v328_v45, %v193_v42  ;;  %v528_v34 = vld [vmem:[%s2806_s0 + $0x80] sm:$0xff]  ;;  %v260_v36 = vld [vmem:[%s2802_s2 + $0x90] sm:$0xff] }
  0x39   :  { %v620_v56 = vadd.f32 %v556_v40, %v492_v43  ;;  %v224_v59 = vadd.f32 %v1472_v9, %v153_v46  ;;  %v225_v60 = vadd.f32 %v1472_v9, %v154_v47  ;;  %v621_v61 = vadd.f32 %v557_v44, %v493_v51  ;;  %v261_v46 = vld [vmem:[%s2802_s2 + $0x98] sm:$0xff]  ;;  %v86_v47 = vld [vmem:[%s2800_s1 + $0x190] sm:$0xff] }
  0x3a   :  { %1309 = vmatprep.mubr.bf16.mxu0 %v646_v50  ;;  %v462_v62 = vadd.f32 %v1501_v20, %v391_v52  ;;  %v360_v0 = vmul.f32 %v1483_v12, %v289_v48  ;;  %v123_v1 = vmul.f32 %v1465_v6, %v52_v49  ;;  %v463_v3 = vadd.f32 %v1501_v20, %v392_v57  ;;  %v87_v48 = vld [vmem:[%s2800_s1 + $0x198] sm:$0xff] }
  0x3b   :  { %v423_v4 = vadd.f32 %v359_v53, %v224_v59  ;;  %v124_v5 = vmul.f32 %v1465_v6, %v53_v54  ;;  %v329_v7 = vmul.f32 %v1483_v12, %v258_v55  ;;  %v662_v11 = vpack.c.bf16 %v621_v61, %v620_v56  ;;  %v292_v53 = vld [vmem:[%s2802_s2 + $0x190] sm:$0xff]  ;;  %v560_v56 = vld [vmem:[%s2806_s0 + $0x180] sm:$0xff] }
  0x3c   :  { %v590_v13 = vadd.f32 %v526_v58, %v462_v62  ;;  %v424_v14 = vadd.f32 %v360_v0, %v225_v60  ;;  %v194_v16 = vadd.f32 %v1472_v9, %v123_v1  ;;  %v591_v18 = vadd.f32 %v527_v63, %v463_v3  ;;  %v561_v60 = vld [vmem:[%s2806_s0 + $0x188] sm:$0xff]  ;;  %v293_v0 = vld [vmem:[%s2802_s2 + $0x198] sm:$0xff]  ;;  %v56_v1 = vld [vmem:[%s2800_s1 + $0xa0] sm:$0xff] }
  0x3d   :  { %v494_v19 = vadd.f32 %v1501_v20, %v423_v4  ;;  %v195_v22 = vadd.f32 %v1472_v9, %v124_v5  ;;  %v330_v23 = vmul.f32 %v1483_v12, %v259_v2  ;;  %1341 = vmatprep.mubr.bf16.mxu1 %v662_v11  ;;  %v155_v26 = vmul.f32 %v1465_v6, %v84_v8  ;;  %v262_v8 = vld [vmem:[%s2802_s2 + $0xa0] sm:$0xff] }
  0x3e   :  { %v495_v24 = vadd.f32 %v1501_v20, %v424_v14  ;;  %v393_v25 = vadd.f32 %v329_v7, %v194_v16  ;;  %v156_v27 = vmul.f32 %v1465_v6, %v85_v10  ;;  %v647_v31 = vpack.c.bf16 %v591_v18, %v590_v13  ;;  %v57_v7 = vld [vmem:[%s2800_s1 + $0xa8] sm:$0xff]  ;;  %v530_v13 = vld [vmem:[%s2806_s0 + $0x90] sm:$0xff]  ;;  %v531_v18 = vld [vmem:[%s2806_s0 + $0x98] sm:$0xff] }
  0x3f   :  { %v622_v32 = vadd.f32 %v558_v15, %v494_v19  ;;  %v394_v33 = vadd.f32 %v330_v23, %v195_v22  ;;  %v361_v35 = vmul.f32 %v1483_v12, %v290_v17  ;;  %v226_v40 = vadd.f32 %v1472_v9, %v155_v26  ;;  %v263_v22 = vld [vmem:[%s2802_s2 + $0xa8] sm:$0xff] }
  0x40   :  { %v623_v37 = vadd.f32 %v559_v21, %v495_v24  ;;  %v464_v38 = vadd.f32 %v1501_v20, %v393_v25  ;;  %v227_v41 = vadd.f32 %v1472_v9, %v156_v27  ;;  %1310 = vmatmul.mubr.bf16.gmra.mxu0 %v647_v31  ;;  %v362_v43 = vmul.f32 %v1483_v12, %v291_v28  ;;  %v88_v27 = vld [vmem:[%s2800_s1 + $0x1a0] sm:$0xff]  ;;  %v89_v28 = vld [vmem:[%s2800_s1 + $0x1a8] sm:$0xff] }
  0x41   :  { %v465_v42 = vadd.f32 %v1501_v20, %v394_v33  ;;  %v125_v44 = vmul.f32 %v1465_v6, %v54_v29  ;;  %v126_v45 = vmul.f32 %v1465_v6, %v55_v30  ;;  %v425_v51 = vadd.f32 %v361_v35, %v226_v40 }
  0x42   :  { %v663_v49 = vpack.c.bf16 %v623_v37, %v622_v32  ;;  %v592_v50 = vadd.f32 %v528_v34, %v464_v38  ;;  %v331_v52 = vmul.f32 %v1483_v12, %v260_v36  ;;  %v426_v55 = vadd.f32 %v362_v43, %v227_v41  ;;  %v562_v32 = vld [vmem:[%s2806_s0 + $0x190] sm:$0xff]  ;;  %v294_v34 = vld [vmem:[%s2802_s2 + $0x1a0] sm:$0xff]  ;;  %v563_v37 = vld [vmem:[%s2806_s0 + $0x198] sm:$0xff] }
  0x43   :  { %v593_v54 = vadd.f32 %v529_v39, %v465_v42  ;;  %v196_v57 = vadd.f32 %v1472_v9, %v125_v44  ;;  %v197_v58 = vadd.f32 %v1472_v9, %v126_v45  ;;  %v496_v59 = vadd.f32 %v1501_v20, %v425_v51  ;;  %v295_v44 = vld [vmem:[%s2802_s2 + $0x1a8] sm:$0xff]  ;;  %v58_v45 = vld [vmem:[%s2800_s1 + $0xb0] sm:$0xff] }
  0x44   :  { %1342 = vmatmul.mubr.bf16.gmra.mxu1 %v663_v49  ;;  %v332_v61 = vmul.f32 %v1483_v12, %v261_v46  ;;  %v157_v62 = vmul.f32 %v1465_v6, %v86_v47  ;;  %v158_v63 = vmul.f32 %v1465_v6, %v87_v48  ;;  %v497_v3 = vadd.f32 %v1501_v20, %v426_v55  ;;  %v59_v46 = vld [vmem:[%s2800_s1 + $0xb8] sm:$0xff]  ;;  %v533_v55 = vld [vmem:[%s2806_s0 + $0xa8] sm:$0xff] }
  0x45   :  { %v648_v2 = vpack.c.bf16 %v593_v54, %v592_v50  ;;  %v395_v4 = vadd.f32 %v331_v52, %v196_v57  ;;  %v363_v5 = vmul.f32 %v1483_v12, %v292_v53  ;;  %v624_v10 = vadd.f32 %v560_v56, %v496_v59  ;;  %v532_v50 = vld [vmem:[%s2806_s0 + $0xa0] sm:$0xff]  ;;  %v264_v52 = vld [vmem:[%s2802_s2 + $0xb0] sm:$0xff] }
  0x46   :  { %v396_v11 = vadd.f32 %v332_v61, %v197_v58  ;;  %v228_v14 = vadd.f32 %v1472_v9, %v157_v62  ;;  %v229_v15 = vadd.f32 %v1472_v9, %v158_v63  ;;  %v625_v16 = vadd.f32 %v561_v60, %v497_v3  ;;  %v265_v62 = vld [vmem:[%s2802_s2 + $0xb8] sm:$0xff]  ;;  %v90_v63 = vld [vmem:[%s2800_s1 + $0x1b0] sm:$0xff] }
  0x47   :  { %1313 = vmatprep.mubr.bf16.mxu0 %v648_v2  ;;  %v466_v17 = vadd.f32 %v1501_v20, %v395_v4  ;;  %v364_v19 = vmul.f32 %v1483_v12, %v293_v0  ;;  %v127_v21 = vmul.f32 %v1465_v6, %v56_v1  ;;  %v128_v25 = vmul.f32 %v1465_v6, %v57_v7  ;;  %v91_v0 = vld [vmem:[%s2800_s1 + $0x1b8] sm:$0xff] }
  0x48   :  { %v467_v23 = vadd.f32 %v1501_v20, %v396_v11  ;;  %v427_v24 = vadd.f32 %v363_v5, %v228_v14  ;;  %v333_v26 = vmul.f32 %v1483_v12, %v262_v8  ;;  %v664_v29 = vpack.c.bf16 %v625_v16, %v624_v10  ;;  %v296_v5 = vld [vmem:[%s2802_s2 + $0x1b0] sm:$0xff]  ;;  %v564_v10 = vld [vmem:[%s2806_s0 + $0x1a0] sm:$0xff] }
  0x49   :  { %v594_v30 = vadd.f32 %v530_v13, %v466_v17  ;;  %v428_v31 = vadd.f32 %v364_v19, %v229_v15  ;;  %v198_v33 = vadd.f32 %v1472_v9, %v127_v21  ;;  %v199_v38 = vadd.f32 %v1472_v9, %v128_v25  ;;  %v565_v15 = vld [vmem:[%s2806_s0 + $0x1a8] sm:$0xff]  ;;  %v297_v19 = vld [vmem:[%s2802_s2 + $0x1b8] sm:$0xff]  ;;  %v60_v21 = vld [vmem:[%s2800_s1 + $0xc0] sm:$0xff] }
  0x4a   :  { %v595_v35 = vadd.f32 %v531_v18, %v467_v23  ;;  %v498_v36 = vadd.f32 %v1501_v20, %v427_v24  ;;  %v334_v39 = vmul.f32 %v1483_v12, %v263_v22  ;;  %1345 = vmatprep.mubr.bf16.mxu1 %v664_v29  ;;  %v159_v42 = vmul.f32 %v1465_v6, %v88_v27  ;;  %v266_v27 = vld [vmem:[%s2802_s2 + $0xc0] sm:$0xff] }
  0x4b   :  { %v499_v40 = vadd.f32 %v1501_v20, %v428_v31  ;;  %v397_v41 = vadd.f32 %v333_v26, %v198_v33  ;;  %v160_v43 = vmul.f32 %v1465_v6, %v89_v28  ;;  %v365_v51 = vmul.f32 %v1483_v12, %v294_v34  ;;  %v61_v26 = vld [vmem:[%s2800_s1 + $0xc8] sm:$0xff] }
  0x4c   :  { %v649_v47 = vpack.c.bf16 %v595_v35, %v594_v30  ;;  %v626_v48 = vadd.f32 %v562_v32, %v498_v36  ;;  %v398_v49 = vadd.f32 %v334_v39, %v199_v38  ;;  %v230_v56 = vadd.f32 %v1472_v9, %v159_v42  ;;  %v534_v30 = vld [vmem:[%s2806_s0 + $0xb0] sm:$0xff]  ;;  %v535_v35 = vld [vmem:[%s2806_s0 + $0xb8] sm:$0xff]  ;;  %v267_v38 = vld [vmem:[%s2802_s2 + $0xc8] sm:$0xff] }
  0x4d   :  { %v627_v53 = vadd.f32 %v563_v37, %v499_v40  ;;  %v468_v54 = vadd.f32 %v1501_v20, %v397_v41  ;;  %v231_v57 = vadd.f32 %v1472_v9, %v160_v43  ;;  %v366_v59 = vmul.f32 %v1483_v12, %v295_v44  ;;  %v92_v43 = vld [vmem:[%s2800_s1 + $0x1c0] sm:$0xff]  ;;  %v93_v44 = vld [vmem:[%s2800_s1 + $0x1c8] sm:$0xff] }
  0x4e   :  { %1314 = vmatmul.mubr.bf16.gmra.mxu0 %v649_v47  ;;  %v469_v58 = vadd.f32 %v1501_v20, %v398_v49  ;;  %v129_v60 = vmul.f32 %v1465_v6, %v58_v45  ;;  %v130_v61 = vmul.f32 %v1465_v6, %v59_v46  ;;  %v429_v3 = vadd.f32 %v365_v51, %v230_v56 }
  0x4f   :  { %v665_v1 = vpack.c.bf16 %v627_v53, %v626_v48  ;;  %v596_v2 = vadd.f32 %v532_v50, %v468_v54  ;;  %v335_v4 = vmul.f32 %v1483_v12, %v264_v52  ;;  %v430_v8 = vadd.f32 %v366_v59, %v231_v57  ;;  %v566_v48 = vld [vmem:[%s2806_s0 + $0x1b0] sm:$0xff]  ;;  %v567_v52 = vld [vmem:[%s2806_s0 + $0x1b8] sm:$0xff]  ;;  %v2148_v57 = vld [vmem:[%s2801_s4] ss:$0 sm:$0xff] }
  0x50   :  { %v597_v7 = vadd.f32 %v533_v55, %v469_v58  ;;  %v200_v11 = vadd.f32 %v1472_v9, %v129_v60  ;;  %v201_v13 = vadd.f32 %v1472_v9, %v130_v61  ;;  %v500_v14 = vadd.f32 %v1501_v20, %v429_v3  ;;  %v299_v60 = vld [vmem:[%s2802_s2 + $0x1c8] sm:$0xff]  ;;  %v268_v3 = vld [vmem:[%s2802_s2 + $0xd0] sm:$0xff] }
  0x51   :  { %1346 = vmatmul.mubr.bf16.gmra.mxu1 %v665_v1  ;;  %v336_v16 = vmul.f32 %v1483_v12, %v265_v62  ;;  %v161_v17 = vmul.f32 %v1465_v6, %v90_v63  ;;  %v162_v18 = vmul.f32 %v1465_v6, %v91_v0  ;;  %v501_v23 = vadd.f32 %v1501_v20, %v430_v8  ;;  %v536_v0 = vld [vmem:[%s2806_s0 + $0xc0] sm:$0xff] }
  0x52   :  { %v650_v22 = vpack.c.bf16 %v597_v7, %v596_v2  ;;  %v399_v24 = vadd.f32 %v335_v4, %v200_v11  ;;  %v367_v25 = vmul.f32 %v1483_v12, %v296_v5  ;;  %v628_v28 = vadd.f32 %v564_v10, %v500_v14  ;;  %v2167_v1 = vld [vmem:[%s2804_s6] ss:$0 sm:$0xff]  ;;  %v537_v7 = vld [vmem:[%s2806_s0 + $0xc8] sm:$0xff] }
  0x53   :  { %v400_v29 = vadd.f32 %v336_v16, %v201_v13  ;;  %v232_v31 = vadd.f32 %v1472_v9, %v161_v17  ;;  %v233_v32 = vadd.f32 %v1472_v9, %v162_v18  ;;  %v629_v33 = vadd.f32 %v565_v15, %v501_v23  ;;  %v2180_v8 = vld [vmem:[%s2803_s5] ss:$0 sm:$0xff]  ;;  %v269_v17 = vld [vmem:[%s2802_s2 + $0xd8] sm:$0xff]  ;;  %v94_v18 = vld [vmem:[%s2800_s1 + $0x1d0] sm:$0xff] }
  0x54   :  { %1317 = vmatprep.mubr.bf16.mxu0 %v650_v22  ;;  %v470_v34 = vadd.f32 %v1501_v20, %v399_v24  ;;  %v368_v36 = vmul.f32 %v1483_v12, %v297_v19  ;;  %v131_v37 = vmul.f32 %v1465_v6, %v60_v21  ;;  %v132_v41 = vmul.f32 %v1465_v6, %v61_v26  ;;  %v298_v6 = vld [vmem:[%s2802_s2 + $0x1c0] sm:$0xff]  ;;  %v95_v19 = vld [vmem:[%s2800_s1 + $0x1d8] sm:$0xff] }
  0x55   :  { %v471_v39 = vadd.f32 %v1501_v20, %v400_v29  ;;  %v431_v40 = vadd.f32 %v367_v25, %v232_v31  ;;  %v337_v42 = vmul.f32 %v1483_v12, %v266_v27  ;;  %v666_v45 = vpack.c.bf16 %v629_v33, %v628_v28  ;;  %v2187_v13 = vld [vmem:[%s2805_s7] ss:$0 sm:$0xff]  ;;  %v300_v25 = vld [vmem:[%s2802_s2 + $0x1d0] sm:$0xff] }
  0x56   :  { %v598_v46 = vadd.f32 %v534_v30, %v470_v34  ;;  %v432_v47 = vadd.f32 %v368_v36, %v233_v32  ;;  %v202_v49 = vadd.f32 %v1472_v9, %v131_v37  ;;  %v203_v53 = vadd.f32 %v1472_v9, %v132_v41  ;;  %v62_v9 = vld [vmem:[%s2800_s1 + $0xd0] sm:$0xff]  ;;  %v568_v28 = vld [vmem:[%s2806_s0 + $0x1c0] sm:$0xff]  ;;  %v569_v32 = vld [vmem:[%s2806_s0 + $0x1c8] sm:$0xff] }
  0x57   :  { %v599_v50 = vadd.f32 %v535_v35, %v471_v39  ;;  %v502_v51 = vadd.f32 %v1501_v20, %v431_v40  ;;  %v338_v54 = vmul.f32 %v1483_v12, %v267_v38  ;;  %1349 = vmatprep.mubr.bf16.mxu1 %v666_v45  ;;  %v163_v58 = vmul.f32 %v2148_v57, %v92_v43  ;;  %v63_v12 = vld [vmem:[%s2800_s1 + $0xd8] sm:$0xff]  ;;  %v64_v37 = vld [vmem:[%s2800_s1 + $0xe0] sm:$0xff] }
  0x58   :  { %v503_v55 = vadd.f32 %v1501_v20, %v432_v47  ;;  %v401_v56 = vadd.f32 %v337_v42, %v202_v49  ;;  %v164_v59 = vmul.f32 %v2148_v57, %v93_v44  ;;  %v369_v2 = vmul.f32 %v2167_v1, %v298_v6  ;;  %v301_v36 = vld [vmem:[%s2802_s2 + $0x1d8] sm:$0xff]  ;;  %v65_v42 = vld [vmem:[%s2800_s1 + $0xe8] sm:$0xff]  ;;  %v270_v43 = vld [vmem:[%s2802_s2 + $0xe0] sm:$0xff] }
  0x59   :  { %v651_v61 = vpack.c.bf16 %v599_v50, %v598_v46  ;;  %v630_v62 = vadd.f32 %v566_v48, %v502_v51  ;;  %v402_v63 = vadd.f32 %v338_v54, %v203_v53  ;;  %v234_v10 = vadd.f32 %v2180_v8, %v163_v58  ;;  %v538_v46 = vld [vmem:[%s2806_s0 + $0xd0] sm:$0xff]  ;;  %v539_v50 = vld [vmem:[%s2806_s0 + $0xd8] sm:$0xff]  ;;  %v271_v53 = vld [vmem:[%s2802_s2 + $0xe8] sm:$0xff] }
  0x5a   :  { %v631_v4 = vadd.f32 %v567_v52, %v503_v55  ;;  %v472_v5 = vadd.f32 %v1501_v20, %v401_v56  ;;  %v235_v11 = vadd.f32 %v2180_v8, %v164_v59  ;;  %v370_v14 = vmul.f32 %v2167_v1, %v299_v60  ;;  %v96_v59 = vld [vmem:[%s2800_s1 + $0x1e0] sm:$0xff]  ;;  %v97_v60 = vld [vmem:[%s2800_s1 + $0x1e8] sm:$0xff] }
  0x5b   :  { %1318 = vmatmul.mubr.bf16.gmra.mxu0 %v651_v61  ;;  %v473_v20 = vadd.f32 %v2187_v13, %v402_v63  ;;  %v133_v15 = vmul.f32 %v2148_v57, %v62_v9  ;;  %v134_v16 = vmul.f32 %v2148_v57, %v63_v12  ;;  %v433_v23 = vadd.f32 %v369_v2, %v234_v10 }
  0x5c   :  { %v667_v21 = vpack.c.bf16 %v631_v4, %v630_v62  ;;  %v600_v22 = vadd.f32 %v536_v0, %v472_v5  ;;  %v339_v24 = vmul.f32 %v2167_v1, %v268_v3  ;;  %v434_v27 = vadd.f32 %v370_v14, %v235_v11  ;;  %v570_v62 = vld [vmem:[%s2806_s0 + $0x1d0] sm:$0xff]  ;;  %v302_v0 = vld [vmem:[%s2802_s2 + $0x1e0] sm:$0xff]  ;;  %v571_v4 = vld [vmem:[%s2806_s0 + $0x1d8] sm:$0xff] }
  0x5d   :  { %v601_v26 = vadd.f32 %v537_v7, %v473_v20  ;;  %v204_v29 = vadd.f32 %v2180_v8, %v133_v15  ;;  %v205_v30 = vadd.f32 %v2180_v8, %v134_v16  ;;  %v504_v31 = vadd.f32 %v2187_v13, %v433_v23  ;;  %v303_v15 = vld [vmem:[%s2802_s2 + $0x1e8] sm:$0xff]  ;;  %v66_v16 = vld [vmem:[%s2800_s1 + $0xf0] sm:$0xff] }
  0x5e   :  { %1350 = vmatmul.mubr.bf16.gmra.mxu1 %v667_v21  ;;  %v340_v33 = vmul.f32 %v2167_v1, %v269_v17  ;;  %v165_v34 = vmul.f32 %v2148_v57, %v94_v18  ;;  %v166_v35 = vmul.f32 %v2148_v57, %v95_v19  ;;  %v505_v39 = vadd.f32 %v2187_v13, %v434_v27  ;;  %v67_v17 = vld [vmem:[%s2800_s1 + $0xf8] sm:$0xff]  ;;  %v541_v27 = vld [vmem:[%s2806_s0 + $0xe8] sm:$0xff] }
  0x5f   :  { %v652_v38 = vpack.c.bf16 %v601_v26, %v600_v22  ;;  %v403_v40 = vadd.f32 %v339_v24, %v204_v29  ;;  %v371_v41 = vmul.f32 %v2167_v1, %v300_v25  ;;  %v632_v44 = vadd.f32 %v568_v28, %v504_v31  ;;  %v540_v22 = vld [vmem:[%s2806_s0 + $0xe0] sm:$0xff]  ;;  %v272_v24 = vld [vmem:[%s2802_s2 + $0xf0] sm:$0xff] }
  0x60   :  { %v404_v45 = vadd.f32 %v340_v33, %v205_v30  ;;  %v236_v47 = vadd.f32 %v2180_v8, %v165_v34  ;;  %v237_v48 = vadd.f32 %v2180_v8, %v166_v35  ;;  %v633_v49 = vadd.f32 %v569_v32, %v505_v39  ;;  %v273_v34 = vld [vmem:[%s2802_s2 + $0xf8] sm:$0xff]  ;;  %v98_v35 = vld [vmem:[%s2800_s1 + $0x1f0] sm:$0xff] }
  0x61   :  { %1321 = vmatprep.mubr.bf16.mxu0 %v652_v38  ;;  %v474_v6 = vadd.f32 %v2187_v13, %v403_v40  ;;  %v372_v51 = vmul.f32 %v2167_v1, %v301_v36  ;;  %v135_v52 = vmul.f32 %v2148_v57, %v64_v37  ;;  %v136_v56 = vmul.f32 %v2148_v57, %v65_v42  ;;  %v99_v36 = vld [vmem:[%s2800_s1 + $0x1f8] sm:$0xff] }
  0x62   :  { %v475_v54 = vadd.f32 %v2187_v13, %v404_v45  ;;  %v435_v55 = vadd.f32 %v371_v41, %v236_v47  ;;  %v341_v58 = vmul.f32 %v2167_v1, %v270_v43  ;;  %v668_v9 = vpack.c.bf16 %v633_v49, %v632_v44  ;;  %v304_v41 = vld [vmem:[%s2802_s2 + $0x1f0] sm:$0xff]  ;;  %v572_v44 = vld [vmem:[%s2806_s0 + $0x1e0] sm:$0xff] }
  0x63   :  { %v602_v12 = vadd.f32 %v538_v46, %v474_v6  ;;  %v436_v61 = vadd.f32 %v372_v51, %v237_v48  ;;  %v206_v63 = vadd.f32 %v2180_v8, %v135_v52  ;;  %v207_v5 = vadd.f32 %v2180_v8, %v136_v56  ;;  %v573_v48 = vld [vmem:[%s2806_s0 + $0x1e8] sm:$0xff]  ;;  %v305_v51 = vld [vmem:[%s2802_s2 + $0x1f8] sm:$0xff] }
  0x64   :  { %v603_v2 = vadd.f32 %v539_v50, %v475_v54  ;;  %v506_v3 = vadd.f32 %v2187_v13, %v435_v55  ;;  %v342_v7 = vmul.f32 %v2167_v1, %v271_v53  ;;  %1353 = vmatprep.mubr.bf16.mxu1 %v668_v9  ;;  %v167_v20 = vmul.f32 %v2148_v57, %v96_v59  ;;  %v542_v59 = vld [vmem:[%s2806_s0 + $0xf0] sm:$0xff] }
  0x65   :  { %v507_v10 = vadd.f32 %v2187_v13, %v436_v61  ;;  %v405_v11 = vadd.f32 %v341_v58, %v206_v63  ;;  %v168_v14 = vmul.f32 %v2148_v57, %v97_v60  ;;  %v373_v23 = vmul.f32 %v2167_v1, %v302_v0  ;;  %v543_v61 = vld [vmem:[%s2806_s0 + $0xf8] sm:$0xff] }
  0x66   :  { %v653_v18 = vpack.c.bf16 %v603_v2, %v602_v12  ;;  %v634_v19 = vadd.f32 %v570_v62, %v506_v3  ;;  %v406_v21 = vadd.f32 %v342_v7, %v207_v5  ;;  %v238_v28 = vadd.f32 %v2180_v8, %v167_v20 }
  0x67   :  { %v635_v25 = vadd.f32 %v571_v4, %v507_v10  ;;  %v476_v26 = vadd.f32 %v2187_v13, %v405_v11  ;;  %v239_v29 = vadd.f32 %v2180_v8, %v168_v14  ;;  %v374_v31 = vmul.f32 %v2167_v1, %v303_v15  ;;  %v575_v10 = vld [vmem:[%s2806_s0 + $0x1f8] sm:$0xff] }
  0x68   :  { %1322 = vmatmul.mubr.bf16.gmra.mxu0 %v653_v18  ;;  %v477_v30 = vadd.f32 %v2187_v13, %v406_v21  ;;  %v137_v32 = vmul.f32 %v2148_v57, %v66_v16  ;;  %v138_v33 = vmul.f32 %v2148_v57, %v67_v17  ;;  %v437_v39 = vadd.f32 %v373_v23, %v238_v28  ;;  %v2349_v16 = vld [vmem:[%s2807_s9] ss:$0 sm:$0xff]  ;;  %v1034_v18 = vld [vmem:[%s2808_s3 + $0x10] sm:$0xff] }
  0x69   :  { %v669_v37 = vpack.c.bf16 %v635_v25, %v634_v19  ;;  %v604_v38 = vadd.f32 %v540_v22, %v476_v26  ;;  %v343_v40 = vmul.f32 %v2167_v1, %v272_v24  ;;  %v438_v43 = vadd.f32 %v374_v31, %v239_v29  ;;  %v1032_v24 = vld [vmem:[%s2808_s3] sm:$0xff] }
  0x6a   :  { %v605_v42 = vadd.f32 %v541_v27, %v477_v30  ;;  %v208_v45 = vadd.f32 %v2180_v8, %v137_v32  ;;  %v209_v46 = vadd.f32 %v2180_v8, %v138_v33  ;;  %v508_v47 = vadd.f32 %v2187_v13, %v437_v39  ;;  %v1064_v26 = vld [vmem:[%s2808_s3 + $0x100] sm:$0xff]  ;;  %v1035_v32 = vld [vmem:[%s2808_s3 + $0x18] sm:$0xff] }
  0x6b   :  { %1354 = vmatmul.mubr.bf16.gmra.mxu1 %v669_v37  ;;  %v344_v49 = vmul.f32 %v2167_v1, %v273_v34  ;;  %v169_v6 = vmul.f32 %v2148_v57, %v98_v35  ;;  %v170_v50 = vmul.f32 %v2148_v57, %v99_v36  ;;  %v509_v53 = vadd.f32 %v2187_v13, %v438_v43  ;;  %v1067_v34 = vld [vmem:[%s2808_s3 + $0x118] sm:$0xff] }
  0x6c   :  { %v654_v52 = vpack.c.bf16 %v605_v42, %v604_v38  ;;  %v407_v54 = vadd.f32 %v343_v40, %v208_v45  ;;  %v375_v55 = vmul.f32 %v2167_v1, %v304_v41  ;;  %v636_v56 = vadd.f32 %v572_v44, %v508_v47  ;;  %v1033_v40 = vld [vmem:[%s2808_s3 + $0x8] sm:$0xff] }
  0x6d   :  { %v408_v58 = vadd.f32 %v344_v49, %v209_v46  ;;  %v240_v60 = vadd.f32 %v2180_v8, %v169_v6  ;;  %v241_v57 = vadd.f32 %v2180_v8, %v170_v50  ;;  %v637_v9 = vadd.f32 %v573_v48, %v509_v53  ;;  %v574_v8 = vld [vmem:[%s2806_s0 + $0x1f0] sm:$0xff]  ;;  %v1065_v42 = vld [vmem:[%s2808_s3 + $0x108] sm:$0xff] }
  0x6e   :  { %1325 = vmatprep.mubr.bf16.mxu0 %v654_v52  ;;  %v478_v12 = vadd.f32 %v2187_v13, %v407_v54  ;;  %v376_v62 = vmul.f32 %v2167_v1, %v305_v51  ;;  %v1038_v6 = vld [vmem:[%s2808_s3 + $0x30] sm:$0xff]  ;;  %v1036_v52 = vld [vmem:[%s2808_s3 + $0x20] sm:$0xff] }
  0x6f   :  { %v479_v63 = vadd.f32 %v2187_v13, %v408_v58  ;;  %v439_v0 = vadd.f32 %v375_v55, %v240_v60  ;;  %v670_v2 = vpack.c.bf16 %v637_v9, %v636_v56  ;;  %v1070_v55 = vld [vmem:[%s2808_s3 + $0x130] sm:$0xff]  ;;  %v1039_v60 = vld [vmem:[%s2808_s3 + $0x38] sm:$0xff] }
  0x70   :  { %v606_v3 = vadd.f32 %v542_v59, %v478_v12  ;;  %v440_v4 = vadd.f32 %v376_v62, %v241_v57  ;;  %v1068_v12 = vld [vmem:[%s2808_s3 + $0x120] sm:$0xff] }
  0x71   :  { %v607_v5 = vadd.f32 %v543_v61, %v479_v63  ;;  %v510_v7 = vadd.f32 %v2187_v13, %v439_v0  ;;  %1357 = vmatprep.mubr.bf16.mxu1 %v670_v2  ;;  %v1037_v2 = vld [vmem:[%s2808_s3 + $0x28] sm:$0xff] }
  0x72   :  { %v511_v1 = vadd.f32 %v2187_v13, %v440_v4  ;;  %v1066_v13 = vld [vmem:[%s2808_s3 + $0x110] sm:$0xff] }
  0x73   :  { %v655_v11 = vpack.c.bf16 %v607_v5, %v606_v3  ;;  %v638_v20 = vadd.f32 %v574_v8, %v510_v7  ;;  %v1071_v8 = vld [vmem:[%s2808_s3 + $0x138] sm:$0xff] }
  0x74   :  { %v639_v14 = vadd.f32 %v575_v10, %v511_v1 }
  0x75   :  { %1326 = vmatmul.mubr.bf16.gmra.mxu0 %v655_v11 }
  0x76   :  { %v671_v15 = vpack.c.bf16 %v639_v14, %v638_v20  ;;  %v1069_v20 = vld [vmem:[%s2808_s3 + $0x128] sm:$0xff] }
  0x78   :  { %1358 = vmatmul.mubr.bf16.gmra.mxu1 %v671_v15 }
  0xe2   :  { %v1299_v17 = vpop.f32.mrf.mxu0  ;;  %v1331_v19 = vpop.f32.mrf.mxu1 }
  0xe3   :  { %v786_v21 = vadd.f32 %v1299_v17, %v2349_v16  ;;  %v914_v22 = vadd.f32 %v1331_v19, %v2349_v16  ;;  %v1042_v19 = vld [vmem:[%s2808_s3 + $0x50] sm:$0xff] }
  0xe4   :  { %v777_v23 = vpop.f32.mrf.mxu0  ;;  %v905_v25 = vpop.f32.mrf.mxu1 }
  0xe5   :  { %v1098_v27 = vadd.f32 %v1034_v18, %v786_v21  ;;  %v1130_v28 = vadd.f32 %v1066_v13, %v914_v22  ;;  %v778_v29 = vadd.f32 %v2349_v16, %v777_v23  ;;  %v906_v30 = vadd.f32 %v2349_v16, %v905_v25  ;;  %v1040_v22 = vld [vmem:[%s2808_s3 + $0x40] sm:$0xff]  ;;  %v1074_v25 = vld [vmem:[%s2808_s3 + $0x150] sm:$0xff] }
  0xe6   :  { %v1300_v31 = vpop.f32.mrf.mxu0  ;;  %v1332_v33 = vpop.f32.mrf.mxu1 }
  0xe7   :  { %1162 = vst [vmem:[%s2809_s10 + $0x10] sm:$0xff] %v1098_v27  ;;  %1194 = vst [vmem:[%s2809_s10 + $0x110] sm:$0xff] %v1130_v28  ;;  %v1096_v35 = vadd.f32 %v1032_v24, %v778_v29  ;;  %v1128_v36 = vadd.f32 %v1064_v26, %v906_v30  ;;  %v789_v37 = vadd.f32 %v1300_v31, %v2349_v16  ;;  %v1043_v29 = vld [vmem:[%s2808_s3 + $0x58] sm:$0xff] }
  0xe8   :  { %v917_v38 = vadd.f32 %v1332_v33, %v2349_v16  ;;  %v780_v39 = vpop.f32.mrf.mxu0  ;;  %v908_v41 = vpop.f32.mrf.mxu1 }
  0xe9   :  { %1160 = vst [vmem:[%s2809_s10] sm:$0xff] %v1096_v35  ;;  %1192 = vst [vmem:[%s2809_s10 + $0x100] sm:$0xff] %v1128_v36  ;;  %v1099_v43 = vadd.f32 %v1035_v32, %v789_v37  ;;  %v781_v45 = vadd.f32 %v2349_v16, %v780_v39  ;;  %v909_v46 = vadd.f32 %v2349_v16, %v908_v41  ;;  %v1072_v32 = vld [vmem:[%s2808_s3 + $0x140] sm:$0xff]  ;;  %v1041_v37 = vld [vmem:[%s2808_s3 + $0x48] sm:$0xff] }
  0xea   :  { %v1131_v44 = vadd.f32 %v1067_v34, %v917_v38  ;;  %v1303_v49 = vpop.f32.mrf.mxu0  ;;  %v1335_v54 = vpop.f32.mrf.mxu1 }
  0xeb   :  { %1163 = vst [vmem:[%s2809_s10 + $0x18] sm:$0xff] %v1099_v43  ;;  %v1097_v47 = vadd.f32 %v1033_v40, %v781_v45  ;;  %v1129_v48 = vadd.f32 %v1065_v42, %v909_v46  ;;  %v802_v50 = vadd.f32 %v1303_v49, %v2349_v16  ;;  %v930_v58 = vadd.f32 %v1335_v54, %v2349_v16  ;;  %v1075_v40 = vld [vmem:[%s2808_s3 + $0x158] sm:$0xff]  ;;  %v1073_v46 = vld [vmem:[%s2808_s3 + $0x148] sm:$0xff] }
  0xec   :  { %1195 = vst [vmem:[%s2809_s10 + $0x118] sm:$0xff] %v1131_v44  ;;  %v793_v51 = vpop.f32.mrf.mxu0  ;;  %v921_v9 = vpop.f32.mrf.mxu1 }
  0xed   :  { %1161 = vst [vmem:[%s2809_s10 + $0x8] sm:$0xff] %v1097_v47  ;;  %1193 = vst [vmem:[%s2809_s10 + $0x108] sm:$0xff] %v1129_v48  ;;  %v1102_v53 = vadd.f32 %v1038_v6, %v802_v50  ;;  %v794_v56 = vadd.f32 %v2349_v16, %v793_v51  ;;  %v1134_v62 = vadd.f32 %v1070_v55, %v930_v58  ;;  %v1046_v50 = vld [vmem:[%s2808_s3 + $0x70] sm:$0xff] }
  0xee   :  { %v1304_v59 = vpop.f32.mrf.mxu0  ;;  %v922_v63 = vadd.f32 %v2349_v16, %v921_v9  ;;  %v1336_v4 = vpop.f32.mrf.mxu1 }
  0xef   :  { %1166 = vst [vmem:[%s2809_s10 + $0x30] sm:$0xff] %v1102_v53  ;;  %v1100_v57 = vadd.f32 %v1036_v52, %v794_v56  ;;  %v805_v61 = vadd.f32 %v1304_v59, %v2349_v16  ;;  %1198 = vst [vmem:[%s2809_s10 + $0x130] sm:$0xff] %v1134_v62  ;;  %v933_v10 = vadd.f32 %v1336_v4, %v2349_v16  ;;  %v1044_v53 = vld [vmem:[%s2808_s3 + $0x60] sm:$0xff]  ;;  %v1078_v56 = vld [vmem:[%s2808_s3 + $0x170] sm:$0xff] }
  0xf0   :  { %v796_v0 = vpop.f32.mrf.mxu0  ;;  %v1132_v7 = vadd.f32 %v1068_v12, %v922_v63  ;;  %v924_v11 = vpop.f32.mrf.mxu1 }
  0xf1   :  { %1164 = vst [vmem:[%s2809_s10 + $0x20] sm:$0xff] %v1100_v57  ;;  %v1103_v3 = vadd.f32 %v1039_v60, %v805_v61  ;;  %v797_v5 = vadd.f32 %v2349_v16, %v796_v0  ;;  %v1135_v14 = vadd.f32 %v1071_v8, %v933_v10  ;;  %v925_v15 = vadd.f32 %v2349_v16, %v924_v11  ;;  %v1047_v57 = vld [vmem:[%s2808_s3 + $0x78] sm:$0xff]  ;;  %v1076_v61 = vld [vmem:[%s2808_s3 + $0x160] sm:$0xff] }
  0xf2   :  { %1196 = vst [vmem:[%s2809_s10 + $0x120] sm:$0xff] %v1132_v7 }
  0xf3   :  { %1167 = vst [vmem:[%s2809_s10 + $0x38] sm:$0xff] %v1103_v3  ;;  %v1101_v1 = vadd.f32 %v1037_v2, %v797_v5  ;;  %1199 = vst [vmem:[%s2809_s10 + $0x138] sm:$0xff] %v1135_v14  ;;  %v1133_v17 = vadd.f32 %v1069_v20, %v925_v15  ;;  %v1307_v18 = vpop.f32.mrf.mxu0  ;;  %v1045_v3 = vld [vmem:[%s2808_s3 + $0x68] sm:$0xff]  ;;  %v1079_v5 = vld [vmem:[%s2808_s3 + $0x178] sm:$0xff] }
  0xf4   :  { %v818_v13 = vadd.f32 %v1307_v18, %v2349_v16  ;;  %v1077_v14 = vld [vmem:[%s2808_s3 + $0x168] sm:$0xff] }
  0xf5   :  { %1165 = vst [vmem:[%s2809_s10 + $0x28] sm:$0xff] %v1101_v1  ;;  %1197 = vst [vmem:[%s2809_s10 + $0x128] sm:$0xff] %v1133_v17  ;;  %v809_v21 = vpop.f32.mrf.mxu0 }
  0xf6   :  { %v1106_v23 = vadd.f32 %v1042_v19, %v818_v13  ;;  %v1339_v24 = vpop.f32.mrf.mxu1  ;;  %v810_v26 = vadd.f32 %v2349_v16, %v809_v21  ;;  %v1050_v13 = vld [vmem:[%s2808_s3 + $0x90] sm:$0xff] }
  0xf7   :  { %v946_v27 = vadd.f32 %v1339_v24, %v2349_v16  ;;  %v1308_v28 = vpop.f32.mrf.mxu0 }
  0xf8   :  { %1170 = vst [vmem:[%s2809_s10 + $0x50] sm:$0xff] %v1106_v23  ;;  %v1104_v30 = vadd.f32 %v1040_v22, %v810_v26  ;;  %v937_v31 = vpop.f32.mrf.mxu1  ;;  %v821_v33 = vadd.f32 %v1308_v28, %v2349_v16  ;;  %v1048_v23 = vld [vmem:[%s2808_s3 + $0x80] sm:$0xff]  ;;  %v1082_v26 = vld [vmem:[%s2808_s3 + $0x190] sm:$0xff] }
  0xf9   :  { %v1138_v34 = vadd.f32 %v1074_v25, %v946_v27  ;;  %v938_v35 = vadd.f32 %v2349_v16, %v937_v31  ;;  %v812_v36 = vpop.f32.mrf.mxu0 }
  0xfa   :  { %1168 = vst [vmem:[%s2809_s10 + $0x40] sm:$0xff] %v1104_v30  ;;  %v1107_v38 = vadd.f32 %v1043_v29, %v821_v33  ;;  %v1340_v39 = vpop.f32.mrf.mxu1  ;;  %v813_v41 = vadd.f32 %v2349_v16, %v812_v36  ;;  %v1051_v30 = vld [vmem:[%s2808_s3 + $0x98] sm:$0xff]  ;;  %v1080_v33 = vld [vmem:[%s2808_s3 + $0x180] sm:$0xff] }
  0xfb   :  { %1202 = vst [vmem:[%s2809_s10 + $0x150] sm:$0xff] %v1138_v34  ;;  %v1136_v42 = vadd.f32 %v1072_v32, %v938_v35  ;;  %v949_v43 = vadd.f32 %v1340_v39, %v2349_v16 }
  0xfc   :  { %1171 = vst [vmem:[%s2809_s10 + $0x58] sm:$0xff] %v1107_v38  ;;  %v1105_v44 = vadd.f32 %v1041_v37, %v813_v41  ;;  %v940_v45 = vpop.f32.mrf.mxu1  ;;  %v1049_v38 = vld [vmem:[%s2808_s3 + $0x88] sm:$0xff]  ;;  %v1083_v41 = vld [vmem:[%s2808_s3 + $0x198] sm:$0xff] }
  0xfd   :  { %1200 = vst [vmem:[%s2809_s10 + $0x140] sm:$0xff] %v1136_v42  ;;  %v1139_v47 = vadd.f32 %v1075_v40, %v949_v43  ;;  %v941_v48 = vadd.f32 %v2349_v16, %v940_v45 }
  0xfe   :  { %1169 = vst [vmem:[%s2809_s10 + $0x48] sm:$0xff] %v1105_v44 }
  0xff   :  { %1203 = vst [vmem:[%s2809_s10 + $0x158] sm:$0xff] %v1139_v47  ;;  %v1137_v49 = vadd.f32 %v1073_v46, %v941_v48  ;;  %v1081_v47 = vld [vmem:[%s2808_s3 + $0x188] sm:$0xff] }
 0x100   :  { %v1311_v6 = vpop.f32.mrf.mxu0 }
 0x101   :  { %1201 = vst [vmem:[%s2809_s10 + $0x148] sm:$0xff] %v1137_v49  ;;  %v834_v51 = vadd.f32 %v1311_v6, %v2349_v16 }
 0x102   :  { %v825_v52 = vpop.f32.mrf.mxu0 }
 0x103   :  { %v1110_v54 = vadd.f32 %v1046_v50, %v834_v51  ;;  %v826_v58 = vadd.f32 %v2349_v16, %v825_v52  ;;  %v1054_v51 = vld [vmem:[%s2808_s3 + $0xb0] sm:$0xff] }
 0x104   :  { %v1343_v55 = vpop.f32.mrf.mxu1  ;;  %v1312_v60 = vpop.f32.mrf.mxu0 }
 0x105   :  { %v962_v59 = vadd.f32 %v1343_v55, %v2349_v16  ;;  %1174 = vst [vmem:[%s2809_s10 + $0x70] sm:$0xff] %v1110_v54  ;;  %v1108_v9 = vadd.f32 %v1044_v53, %v826_v58  ;;  %v837_v62 = vadd.f32 %v1312_v60, %v2349_v16  ;;  %v1052_v54 = vld [vmem:[%s2808_s3 + $0xa0] sm:$0xff]  ;;  %v1086_v58 = vld [vmem:[%s2808_s3 + $0x1b0] sm:$0xff] }
 0x106   :  { %v953_v12 = vpop.f32.mrf.mxu1  ;;  %v828_v2 = vpop.f32.mrf.mxu0 }
 0x107   :  { %v1142_v63 = vadd.f32 %v1078_v56, %v962_v59  ;;  %v954_v0 = vadd.f32 %v2349_v16, %v953_v12  ;;  %1172 = vst [vmem:[%s2809_s10 + $0x60] sm:$0xff] %v1108_v9  ;;  %v1111_v4 = vadd.f32 %v1047_v57, %v837_v62  ;;  %v829_v7 = vadd.f32 %v2349_v16, %v828_v2  ;;  %v1055_v9 = vld [vmem:[%s2808_s3 + $0xb8] sm:$0xff]  ;;  %v1084_v62 = vld [vmem:[%s2808_s3 + $0x1a0] sm:$0xff] }
 0x108   :  { %v1344_v8 = vpop.f32.mrf.mxu1 }
 0x109   :  { %1206 = vst [vmem:[%s2809_s10 + $0x170] sm:$0xff] %v1142_v63  ;;  %v1140_v10 = vadd.f32 %v1076_v61, %v954_v0  ;;  %v965_v1 = vadd.f32 %v1344_v8, %v2349_v16  ;;  %1175 = vst [vmem:[%s2809_s10 + $0x78] sm:$0xff] %v1111_v4  ;;  %v1109_v11 = vadd.f32 %v1045_v3, %v829_v7  ;;  %v1053_v4 = vld [vmem:[%s2808_s3 + $0xa8] sm:$0xff]  ;;  %v1087_v7 = vld [vmem:[%s2808_s3 + $0x1b8] sm:$0xff] }
 0x10a   :  { %v956_v20 = vpop.f32.mrf.mxu1 }
 0x10b   :  { %1204 = vst [vmem:[%s2809_s10 + $0x160] sm:$0xff] %v1140_v10  ;;  %v1143_v15 = vadd.f32 %v1079_v5, %v965_v1  ;;  %v957_v17 = vadd.f32 %v2349_v16, %v956_v20  ;;  %1173 = vst [vmem:[%s2809_s10 + $0x68] sm:$0xff] %v1109_v11 }
 0x10d   :  { %1207 = vst [vmem:[%s2809_s10 + $0x178] sm:$0xff] %v1143_v15  ;;  %v1141_v18 = vadd.f32 %v1077_v14, %v957_v17  ;;  %v1085_v15 = vld [vmem:[%s2808_s3 + $0x1a8] sm:$0xff] }
 0x10e   :  { %v1315_v19 = vpop.f32.mrf.mxu0 }
 0x10f   :  { %1205 = vst [vmem:[%s2809_s10 + $0x168] sm:$0xff] %v1141_v18  ;;  %v850_v21 = vadd.f32 %v1315_v19, %v2349_v16 }
 0x110   :  { %v841_v22 = vpop.f32.mrf.mxu0 }
 0x111   :  { %v1114_v24 = vadd.f32 %v1050_v13, %v850_v21  ;;  %v1347_v25 = vpop.f32.mrf.mxu1  ;;  %v842_v27 = vadd.f32 %v2349_v16, %v841_v22  ;;  %v1058_v21 = vld [vmem:[%s2808_s3 + $0xd0] sm:$0xff] }
 0x112   :  { %v978_v28 = vadd.f32 %v1347_v25, %v2349_v16  ;;  %v1316_v29 = vpop.f32.mrf.mxu0 }
 0x113   :  { %1178 = vst [vmem:[%s2809_s10 + $0x90] sm:$0xff] %v1114_v24  ;;  %v1112_v31 = vadd.f32 %v1048_v23, %v842_v27  ;;  %v969_v32 = vpop.f32.mrf.mxu1  ;;  %v853_v34 = vadd.f32 %v1316_v29, %v2349_v16  ;;  %v1056_v24 = vld [vmem:[%s2808_s3 + $0xc0] sm:$0xff]  ;;  %v1090_v27 = vld [vmem:[%s2808_s3 + $0x1d0] sm:$0xff] }
 0x114   :  { %v1146_v35 = vadd.f32 %v1082_v26, %v978_v28  ;;  %v970_v36 = vadd.f32 %v2349_v16, %v969_v32  ;;  %v844_v37 = vpop.f32.mrf.mxu0 }
 0x115   :  { %1176 = vst [vmem:[%s2809_s10 + $0x80] sm:$0xff] %v1112_v31  ;;  %v1115_v39 = vadd.f32 %v1051_v30, %v853_v34  ;;  %v1348_v40 = vpop.f32.mrf.mxu1  ;;  %v845_v42 = vadd.f32 %v2349_v16, %v844_v37  ;;  %v1059_v31 = vld [vmem:[%s2808_s3 + $0xd8] sm:$0xff]  ;;  %v1088_v34 = vld [vmem:[%s2808_s3 + $0x1c0] sm:$0xff] }
 0x116   :  { %1210 = vst [vmem:[%s2809_s10 + $0x190] sm:$0xff] %v1146_v35  ;;  %v1144_v43 = vadd.f32 %v1080_v33, %v970_v36  ;;  %v981_v44 = vadd.f32 %v1348_v40, %v2349_v16 }
 0x117   :  { %1179 = vst [vmem:[%s2809_s10 + $0x98] sm:$0xff] %v1115_v39  ;;  %v1113_v45 = vadd.f32 %v1049_v38, %v845_v42  ;;  %v972_v46 = vpop.f32.mrf.mxu1  ;;  %v1057_v39 = vld [vmem:[%s2808_s3 + $0xc8] sm:$0xff]  ;;  %v1091_v42 = vld [vmem:[%s2808_s3 + $0x1d8] sm:$0xff] }
 0x118   :  { %1208 = vst [vmem:[%s2809_s10 + $0x180] sm:$0xff] %v1144_v43  ;;  %v1147_v48 = vadd.f32 %v1083_v41, %v981_v44  ;;  %v973_v49 = vadd.f32 %v2349_v16, %v972_v46 }
 0x119   :  { %1177 = vst [vmem:[%s2809_s10 + $0x88] sm:$0xff] %v1113_v45 }
 0x11a   :  { %1211 = vst [vmem:[%s2809_s10 + $0x198] sm:$0xff] %v1147_v48  ;;  %v1145_v6 = vadd.f32 %v1081_v47, %v973_v49  ;;  %v1089_v48 = vld [vmem:[%s2808_s3 + $0x1c8] sm:$0xff] }
 0x11b   :  { %v1319_v50 = vpop.f32.mrf.mxu0 }
 0x11c   :  { %1209 = vst [vmem:[%s2809_s10 + $0x188] sm:$0xff] %v1145_v6  ;;  %v866_v52 = vadd.f32 %v1319_v50, %v2349_v16 }
 0x11d   :  { %v857_v53 = vpop.f32.mrf.mxu0 }
 0x11e   :  { %v1118_v55 = vadd.f32 %v1054_v51, %v866_v52  ;;  %v1351_v56 = vpop.f32.mrf.mxu1  ;;  %v858_v59 = vadd.f32 %v2349_v16, %v857_v53  ;;  %v1062_v52 = vld [vmem:[%s2808_s3 + $0xf0] sm:$0xff] }
 0x11f   :  { %v994_v60 = vadd.f32 %v1351_v56, %v2349_v16  ;;  %v1320_v57 = vpop.f32.mrf.mxu0 }
 0x120   :  { %1182 = vst [vmem:[%s2809_s10 + $0xb0] sm:$0xff] %v1118_v55  ;;  %v1116_v12 = vadd.f32 %v1052_v54, %v858_v59  ;;  %v985_v61 = vpop.f32.mrf.mxu1  ;;  %v869_v63 = vadd.f32 %v1320_v57, %v2349_v16  ;;  %v1060_v55 = vld [vmem:[%s2808_s3 + $0xe0] sm:$0xff]  ;;  %v1094_v59 = vld [vmem:[%s2808_s3 + $0x1f0] sm:$0xff] }
 0x121   :  { %v1150_v0 = vadd.f32 %v1086_v58, %v994_v60  ;;  %v986_v2 = vadd.f32 %v2349_v16, %v985_v61  ;;  %v860_v3 = vpop.f32.mrf.mxu0 }
 0x122   :  { %1180 = vst [vmem:[%s2809_s10 + $0xa0] sm:$0xff] %v1116_v12  ;;  %v1119_v8 = vadd.f32 %v1055_v9, %v869_v63  ;;  %v1352_v5 = vpop.f32.mrf.mxu1  ;;  %v861_v10 = vadd.f32 %v2349_v16, %v860_v3  ;;  %v1063_v12 = vld [vmem:[%s2808_s3 + $0xf8] sm:$0xff]  ;;  %v1092_v63 = vld [vmem:[%s2808_s3 + $0x1e0] sm:$0xff] }
 0x123   :  { %1214 = vst [vmem:[%s2809_s10 + $0x1b0] sm:$0xff] %v1150_v0  ;;  %v1148_v1 = vadd.f32 %v1084_v62, %v986_v2  ;;  %v997_v11 = vadd.f32 %v1352_v5, %v2349_v16 }
 0x124   :  { %1183 = vst [vmem:[%s2809_s10 + $0xb8] sm:$0xff] %v1119_v8  ;;  %v1117_v20 = vadd.f32 %v1053_v4, %v861_v10  ;;  %v988_v14 = vpop.f32.mrf.mxu1  ;;  %v1061_v8 = vld [vmem:[%s2808_s3 + $0xe8] sm:$0xff]  ;;  %v1095_v10 = vld [vmem:[%s2808_s3 + $0x1f8] sm:$0xff] }
 0x125   :  { %1212 = vst [vmem:[%s2809_s10 + $0x1a0] sm:$0xff] %v1148_v1  ;;  %v1151_v17 = vadd.f32 %v1087_v7, %v997_v11  ;;  %v989_v18 = vadd.f32 %v2349_v16, %v988_v14 }
 0x126   :  { %1181 = vst [vmem:[%s2809_s10 + $0xa8] sm:$0xff] %v1117_v20 }
 0x127   :  { %1215 = vst [vmem:[%s2809_s10 + $0x1b8] sm:$0xff] %v1151_v17  ;;  %v1149_v19 = vadd.f32 %v1085_v15, %v989_v18  ;;  %v1093_v17 = vld [vmem:[%s2808_s3 + $0x1e8] sm:$0xff] }
 0x128   :  { %v1323_v13 = vpop.f32.mrf.mxu0 }
 0x129   :  { %1213 = vst [vmem:[%s2809_s10 + $0x1a8] sm:$0xff] %v1149_v19  ;;  %v882_v22 = vadd.f32 %v1323_v13, %v2349_v16 }
 0x12a   :  { %v873_v23 = vpop.f32.mrf.mxu0 }
 0x12b   :  { %v1122_v25 = vadd.f32 %v1058_v21, %v882_v22  ;;  %v1355_v26 = vpop.f32.mrf.mxu1  ;;  %v874_v28 = vadd.f32 %v2349_v16, %v873_v23 }
 0x12c   :  { %v1010_v29 = vadd.f32 %v1355_v26, %v2349_v16  ;;  %v1324_v30 = vpop.f32.mrf.mxu0 }
 0x12d   :  { %1186 = vst [vmem:[%s2809_s10 + $0xd0] sm:$0xff] %v1122_v25  ;;  %v1120_v32 = vadd.f32 %v1056_v24, %v874_v28  ;;  %v1001_v33 = vpop.f32.mrf.mxu1  ;;  %v885_v35 = vadd.f32 %v1324_v30, %v2349_v16 }
 0x12e   :  { %v1154_v36 = vadd.f32 %v1090_v27, %v1010_v29  ;;  %v1002_v37 = vadd.f32 %v2349_v16, %v1001_v33  ;;  %v876_v38 = vpop.f32.mrf.mxu0 }
 0x12f   :  { %1184 = vst [vmem:[%s2809_s10 + $0xc0] sm:$0xff] %v1120_v32  ;;  %v1123_v40 = vadd.f32 %v1059_v31, %v885_v35  ;;  %v1356_v41 = vpop.f32.mrf.mxu1  ;;  %v877_v43 = vadd.f32 %v2349_v16, %v876_v38 }
 0x130   :  { %1218 = vst [vmem:[%s2809_s10 + $0x1d0] sm:$0xff] %v1154_v36  ;;  %v1152_v44 = vadd.f32 %v1088_v34, %v1002_v37  ;;  %v1013_v45 = vadd.f32 %v1356_v41, %v2349_v16 }
 0x131   :  { %1187 = vst [vmem:[%s2809_s10 + $0xd8] sm:$0xff] %v1123_v40  ;;  %v1121_v46 = vadd.f32 %v1057_v39, %v877_v43  ;;  %v1004_v47 = vpop.f32.mrf.mxu1 }
 0x132   :  { %1216 = vst [vmem:[%s2809_s10 + $0x1c0] sm:$0xff] %v1152_v44  ;;  %v1155_v49 = vadd.f32 %v1091_v42, %v1013_v45  ;;  %v1005_v6 = vadd.f32 %v2349_v16, %v1004_v47 }
 0x133   :  { %1185 = vst [vmem:[%s2809_s10 + $0xc8] sm:$0xff] %v1121_v46 }
 0x134   :  { %1219 = vst [vmem:[%s2809_s10 + $0x1d8] sm:$0xff] %v1155_v49  ;;  %v1153_v50 = vadd.f32 %v1089_v48, %v1005_v6 }
 0x135   :  { %v1327_v51 = vpop.f32.mrf.mxu0 }
 0x136   :  { %1217 = vst [vmem:[%s2809_s10 + $0x1c8] sm:$0xff] %v1153_v50  ;;  %v898_v53 = vadd.f32 %v1327_v51, %v2349_v16 }
 0x137   :  { %v889_v54 = vpop.f32.mrf.mxu0 }
 0x138   :  { %v1126_v56 = vadd.f32 %v1062_v52, %v898_v53  ;;  %v1359_v58 = vpop.f32.mrf.mxu1  ;;  %v890_v60 = vadd.f32 %v2349_v16, %v889_v54 }
 0x139   :  { %v1026_v57 = vadd.f32 %v1359_v58, %v2349_v16  ;;  %v1328_v9 = vpop.f32.mrf.mxu0 }
 0x13a   :  { %1190 = vst [vmem:[%s2809_s10 + $0xf0] sm:$0xff] %v1126_v56  ;;  %v1124_v61 = vadd.f32 %v1060_v55, %v890_v60  ;;  %v1017_v62 = vpop.f32.mrf.mxu1  ;;  %v901_v0 = vadd.f32 %v1328_v9, %v2349_v16 }
 0x13b   :  { %v1158_v2 = vadd.f32 %v1094_v59, %v1026_v57  ;;  %v1018_v3 = vadd.f32 %v2349_v16, %v1017_v62  ;;  %v892_v4 = vpop.f32.mrf.mxu0 }
 0x13c   :  { %1188 = vst [vmem:[%s2809_s10 + $0xe0] sm:$0xff] %v1124_v61  ;;  %v1127_v5 = vadd.f32 %v1063_v12, %v901_v0  ;;  %v1360_v7 = vpop.f32.mrf.mxu1  ;;  %v893_v1 = vadd.f32 %v2349_v16, %v892_v4 }
 0x13d   :  { %1222 = vst [vmem:[%s2809_s10 + $0x1f0] sm:$0xff] %v1158_v2  ;;  %v1156_v11 = vadd.f32 %v1092_v63, %v1018_v3  ;;  %v1029_v20 = vadd.f32 %v1360_v7, %v2349_v16 }
 0x13e   :  { %1191 = vst [vmem:[%s2809_s10 + $0xf8] sm:$0xff] %v1127_v5  ;;  %v1125_v14 = vadd.f32 %v1061_v8, %v893_v1  ;;  %v1020_v15 = vpop.f32.mrf.mxu1 }
 0x13f   :  { %1220 = vst [vmem:[%s2809_s10 + $0x1e0] sm:$0xff] %v1156_v11  ;;  %v1159_v18 = vadd.f32 %v1095_v10, %v1029_v20  ;;  %v1021_v19 = vadd.f32 %v2349_v16, %v1020_v15 }
 0x140   :  { %1189 = vst [vmem:[%s2809_s10 + $0xe8] sm:$0xff] %v1125_v14 }
 0x141   :  { %1223 = vst [vmem:[%s2809_s10 + $0x1f8] sm:$0xff] %v1159_v18  ;;  %v1157_v13 = vadd.f32 %v1093_v17, %v1021_v19 }
 0x143   :  { %1221 = vst [vmem:[%s2809_s10 + $0x1e8] sm:$0xff] %v1157_v13 }

// kernel: cross_nonlocal_forward.2
= control target key start
LH: loop header
LB: loop body
LE: loop exit
PB: predicated region body
PF: predicated region fallthrough
CT: control target
= control target key end

     0   :  { %s9115_s21 = smov 0   ;;  %s13570_s0 = inlined_call_operand.vmem [shape: f32[2,256,128], index: 0, kind: input, shape index: {}]   ;;  %s13571_s1 = inlined_call_operand.vmem [shape: f32[2,256,128], index: 1, kind: input, shape index: {}]   ;;  %s13572_s2 = inlined_call_operand.vmem [shape: f32[2,256,128], index: 2, kind: input, shape index: {}]   ;;  %s13573_s3 = inlined_call_operand.vmem [shape: bf16[128,128], index: 3, kind: input, shape index: {}]   ;;  %s13574_s4 = inlined_call_operand.vmem [shape: bf16[128,128], index: 4, kind: input, shape index: {}]   ;;  %s13575_s5 = inlined_call_operand.vmem [shape: bf16[3,128,128], index: 5, kind: input, shape index: {}]   ;;  %s13576_s6 = inlined_call_operand.vmem [shape: f32[3,128], index: 6, kind: input, shape index: {}]   ;;  %s13577_s7 = inlined_call_operand.vmem [shape: bf16[5,128,128], index: 7, kind: input, shape index: {}]   ;;  %s13578_s8 = inlined_call_operand.vmem [shape: f32[5,128], index: 8, kind: input, shape index: {}]   ;;  %s13579_s9 = inlined_call_operand.vmem [shape: f32[2,256,128], index: 9, kind: output, shape index: {0}]   ;;  %s13580_s10 = inlined_call_operand.vmem [shape: f32[2,256,128], index: 10, kind: output, shape index: {1}]   ;;  %s13581_s11 = inlined_call_operand.vmem [shape: f32[2,256,128], index: 11, kind: output, shape index: {2}]   ;;  %s13582_s12 = inlined_call_operand.vmem [shape: f32[2,4,128], index: 12, kind: output, shape index: {3}]  }
   0x1 LB: > { %s7391_s22 = sadd.s32 4294967295, %s9048_s21   ;;  %p7395_p0 = scmp.ge.s32.totalorder %s9048_s21, 1  ;;  %s9048_s21 = sphi %s9115_s21, %s23_s21  }
   0x2   : > { %p389_p1 = scmp.lt.s32.totalorder %s9048_s21, 3 }
   0x4   : > { %p390_p2 = pnand %p7395_p0, %p389_p1 }
   0x6   : > { %393 = sbr.rel (%p390_p2) target bundleno = 3038 (0xbde), region = 56 }
   0xb   : > { %v8737_v0 = vld [vmem:[%s13575_s5 + $0x38] sm:$0xff]   ;;  %p455_p3 = scmp.lt.s32.totalorder %s7391_s22, 1  ;;  %v8738_v1 = vld [vmem:[%s13575_s5 + $0x30] sm:$0xff]   ;;  %v8739_v2 = vld [vmem:[%s13575_s5 + $0x28] sm:$0xff]  }
   0xc   : > { %8041 = vmatprep.subr.bf16.mxu0 %v8737_v0  ;;  %8713 = vmatprep.subr.bf16.mxu1 %v8737_v0  ;;  %v8740_v3 = vld [vmem:[%s13575_s5 + $0x20] sm:$0xff]   ;;  %v8741_v10 = vld [vmem:[%s13575_s5 + $0x18] sm:$0xff]   ;;  %v8742_v11 = vld [vmem:[%s13575_s5 + $0x10] sm:$0xff]  }
   0xd   : > { %s14436_s22 = smov (!%p455_p3, %s7391_s22), 1  ;;  %8042 = vmatpush3.bf16.msra.mxu0 %v8737_v0  ;;  %8721 = vmatpush3.bf16.msra.mxu1 %v8737_v0  ;;  %v8743_v12 = vld [vmem:[%s13575_s5 + $0x8] sm:$0xff]   ;;  %v8744_v13 = vld [vmem:[%s13575_s5] sm:$0xff]   ;;  %v8745_v18 = vld [vmem:[%s13575_s5 + $0x78] sm:$0xff]  }
   0xe   : > { %8043 = vmatprep.subr.bf16.mxu0 %v8738_v1  ;;  %8714 = vmatprep.subr.bf16.mxu1 %v8738_v1  ;;  %s9135_s29 = sshll.u32 %s14436_s22, 8  ;;  %v8746_v19 = vld [vmem:[%s13575_s5 + $0xb8] sm:$0xff]   ;;  %v8747_v26 = vld [vmem:[%s13575_s5 + $0x70] sm:$0xff]   ;;  %v8749_v34 = vld [vmem:[%s13575_s5 + $0x68] sm:$0xff]  }
   0xf   : > { %s9141_s14 = scalar_lea.vmem %s13570_s0, %s9135_s29  ;;  %v8748_v27 = vld [vmem:[%s13575_s5 + $0xb0] sm:$0xff]   ;;  %v8750_v35 = vld [vmem:[%s13575_s5 + $0xa8] sm:$0xff]   ;;  %v8751_v42 = vld [vmem:[%s13575_s5 + $0x60] sm:$0xff]   ;;  %s9270_s25 = scalar_lea.vmem %s13571_s1, %s9135_s29 }
  0x10   : > { %v490_v4 = vld [vmem:[%s9141_s14] sm:$0xff]  ;;  %v491_v5 = vld [vmem:[%s9141_s14 + $0x8] sm:$0xff]  ;;  %v492_v14 = vld [vmem:[%s9141_s14 + $0x10] sm:$0xff]  ;;  %s9279_s13 = scalar_lea.vmem %s13572_s2, %s9135_s29  ;;  %s10799_s20 = scalar_lea.vmem %s13579_s9, %s9135_s29 }
  0x11   : > { %8044 = vmatpush3.bf16.msra.mxu0 %v8738_v1  ;;  %8722 = vmatpush3.bf16.msra.mxu1 %v8738_v1  ;;  %v506_v6 = vld [vmem:[%s9141_s14 + $0x80] sm:$0xff]  ;;  %v9149_v7 = vpack.c.bf16 %v491_v5, %v490_v4  ;;  %v507_v8 = vld [vmem:[%s9141_s14 + $0x88] sm:$0xff]  ;;  %v493_v15 = vld [vmem:[%s9141_s14 + $0x18] sm:$0xff]  ;;  %s13304_s16 = scalar_lea.vmem %s13580_s10, %s9135_s29  ;;  %s13314_s19 = scalar_lea.vmem %s13581_s11, %s9135_s29 }
  0x12   : > { %8045 = vmatprep.subr.bf16.mxu0 %v8739_v2  ;;  %8715 = vmatprep.subr.bf16.mxu1 %v8739_v2  ;;  %v9152_v9 = vpack.c.bf16 %v507_v8, %v506_v6  ;;  %v508_v16 = vld [vmem:[%s9141_s14 + $0x90] sm:$0xff]  ;;  %v509_v17 = vld [vmem:[%s9141_s14 + $0x98] sm:$0xff]  ;;  %v494_v20 = vld [vmem:[%s9141_s14 + $0x20] sm:$0xff]  ;;  %v9180_v22 = vpack.c.bf16 %v493_v15, %v492_v14  ;;  %s7408_s29 = sshll.u32 %s14436_s22, 2 }
  0x13   : > { %8057 = vmatprep.mubr.bf16.mxu0 %v9149_v7  ;;  %v495_v21 = vld [vmem:[%s9141_s14 + $0x28] sm:$0xff]  ;;  %v9182_v23 = vpack.c.bf16 %v509_v17, %v508_v16  ;;  %v510_v24 = vld [vmem:[%s9141_s14 + $0xa0] sm:$0xff]  ;;  %v496_v30 = vld [vmem:[%s9141_s14 + $0x30] sm:$0xff]  ;;  %s488_s24 = scalar_lea.vmem %s13582_s12, %s7408_s29 }
  0x14   : > { %8073 = vmatprep.mubr.bf16.mxu1 %v9152_v9  ;;  %v511_v25 = vld [vmem:[%s9141_s14 + $0xa8] sm:$0xff]  ;;  %v9192_v28 = vpack.c.bf16 %v495_v21, %v494_v20  ;;  %v497_v31 = vld [vmem:[%s9141_s14 + $0x38] sm:$0xff]  ;;  %v512_v32 = vld [vmem:[%s9141_s14 + $0xb0] sm:$0xff] }
  0x15   : > { %8046 = vmatpush3.bf16.msra.mxu0 %v8739_v2  ;;  %8723 = vmatpush3.bf16.msra.mxu1 %v8739_v2  ;;  %v9194_v29 = vpack.c.bf16 %v511_v25, %v510_v24  ;;  %v513_v33 = vld [vmem:[%s9141_s14 + $0xb8] sm:$0xff]  ;;  %v498_v36 = vld [vmem:[%s9141_s14 + $0x40] sm:$0xff]  ;;  %v499_v37 = vld [vmem:[%s9141_s14 + $0x48] sm:$0xff]  ;;  %v9213_v39 = vpack.c.bf16 %v497_v31, %v496_v30 }
  0x16   : > { %8047 = vmatprep.subr.bf16.mxu0 %v8740_v3  ;;  %8716 = vmatprep.subr.bf16.mxu1 %v8740_v3  ;;  %v514_v38 = vld [vmem:[%s9141_s14 + $0xc0] sm:$0xff]  ;;  %v9215_v40 = vpack.c.bf16 %v513_v33, %v512_v32  ;;  %v515_v41 = vld [vmem:[%s9141_s14 + $0xc8] sm:$0xff]  ;;  %v9224_v44 = vpack.c.bf16 %v499_v37, %v498_v36  ;;  %v500_v46 = vld [vmem:[%s9141_s14 + $0x50] sm:$0xff] }
  0x17   : > { %v8752_v43 = vld [vmem:[%s13575_s5 + $0xa0] sm:$0xff]   ;;  %v9226_v45 = vpack.c.bf16 %v515_v41, %v514_v38  ;;  %v501_v47 = vld [vmem:[%s9141_s14 + $0x58] sm:$0xff]  ;;  %v516_v48 = vld [vmem:[%s9141_s14 + $0xd0] sm:$0xff] }
  0x18   : > { %v517_v49 = vld [vmem:[%s9141_s14 + $0xd8] sm:$0xff]  ;;  %v502_v52 = vld [vmem:[%s9141_s14 + $0x60] sm:$0xff]  ;;  %v503_v53 = vld [vmem:[%s9141_s14 + $0x68] sm:$0xff]  ;;  %v9244_v54 = vpack.c.bf16 %v501_v47, %v500_v46 }
  0x19   : > { %8048 = vmatpush3.bf16.msra.mxu0 %v8740_v3  ;;  %8724 = vmatpush3.bf16.msra.mxu1 %v8740_v3  ;;  %v8753_v50 = vld [vmem:[%s13575_s5 + $0x58] sm:$0xff]   ;;  %v9246_v55 = vpack.c.bf16 %v517_v49, %v516_v48  ;;  %v518_v56 = vld [vmem:[%s9141_s14 + $0xe0] sm:$0xff]  ;;  %v519_v57 = vld [vmem:[%s9141_s14 + $0xe8] sm:$0xff]  ;;  %v9256_v60 = vpack.c.bf16 %v503_v53, %v502_v52 }
  0x1a   : > { %8049 = vmatprep.subr.bf16.mxu0 %v8741_v10  ;;  %8717 = vmatprep.subr.bf16.mxu1 %v8741_v10  ;;  %v8754_v51 = vld [vmem:[%s13575_s5 + $0x98] sm:$0xff]   ;;  %v8755_v58 = vld [vmem:[%s13575_s5 + $0x50] sm:$0xff]   ;;  %v9258_v61 = vpack.c.bf16 %v519_v57, %v518_v56  ;;  %v8757_v2 = vld [vmem:[%s13575_s5 + $0x48] sm:$0xff]  }
  0x1b   : > { %v8756_v59 = vld [vmem:[%s13575_s5 + $0x90] sm:$0xff]   ;;  %v505_v63 = vld [vmem:[%s9141_s14 + $0x78] sm:$0xff]  ;;  %v8758_v3 = vld [vmem:[%s13575_s5 + $0x88] sm:$0xff]  }
  0x1c   : > { %v504_v62 = vld [vmem:[%s9141_s14 + $0x70] sm:$0xff]  ;;  %v521_v1 = vld [vmem:[%s9141_s14 + $0xf8] sm:$0xff]  ;;  %v522_v4 = vld [vmem:[%s9270_s25] sm:$0xff] }
  0x1d   : > { %8050 = vmatpush3.bf16.msra.mxu0 %v8741_v10  ;;  %8725 = vmatpush3.bf16.msra.mxu1 %v8741_v10  ;;  %v520_v0 = vld [vmem:[%s9141_s14 + $0xf0] sm:$0xff]  ;;  %v9287_v5 = vpack.c.bf16 %v505_v63, %v504_v62  ;;  %v523_v8 = vld [vmem:[%s9270_s25 + $0x8] sm:$0xff]  ;;  %v554_v10 = vld [vmem:[%s9279_s13] sm:$0xff] }
  0x1e   : > { %8051 = vmatprep.subr.bf16.mxu0 %v8742_v11  ;;  %8718 = vmatprep.subr.bf16.mxu1 %v8742_v11  ;;  %v9289_v6 = vpack.c.bf16 %v521_v1, %v520_v0  ;;  %v9300_v14 = vpack.c.bf16 %v523_v8, %v522_v4  ;;  %v524_v16 = vld [vmem:[%s9270_s25 + $0x10] sm:$0xff]  ;;  %v525_v17 = vld [vmem:[%s9270_s25 + $0x18] sm:$0xff]  ;;  %v526_v24 = vld [vmem:[%s9270_s25 + $0x20] sm:$0xff] }
  0x1f   : > { %v8761_v20 = vld [vmem:[%s13573_s3 + $0x38] sm:$0xff]   ;;  %v527_v25 = vld [vmem:[%s9270_s25 + $0x28] sm:$0xff]  ;;  %v9322_v30 = vpack.c.bf16 %v525_v17, %v524_v16  ;;  %v560_v37 = vld [vmem:[%s9279_s13 + $0x30] sm:$0xff] }
  0x20   : > { %13794 = vst [vmem:[#allocation2_spill] sm:$0xff] %v9300_v14  ;;  %v8762_v21 = vld [vmem:[%s13574_s4 + $0x38] sm:$0xff]   ;;  %v9326_v32 = vpack.c.bf16 %v527_v25, %v526_v24  ;;  %v8764_v38 = vld [vmem:[%s13574_s4 + $0x30] sm:$0xff]   ;;  %v562_v46 = vld [vmem:[%s9279_s13 + $0x40] sm:$0xff] }
  0x21   : > { %8052 = vmatpush3.bf16.msra.mxu0 %v8742_v11  ;;  %8726 = vmatpush3.bf16.msra.mxu1 %v8742_v11  ;;  %v555_v11 = vld [vmem:[%s9279_s13 + $0x8] sm:$0xff]  ;;  %13796 = vst [vmem:[#allocation4_spill] sm:$0xff] %v9322_v30  ;;  %v529_v36 = vld [vmem:[%s9270_s25 + $0x38] sm:$0xff]  ;;  %v8767_v56 = vld [vmem:[%s13573_s3 + $0x20] sm:$0xff]  }
  0x22   : > { %8053 = vmatprep.subr.bf16.mxu0 %v8743_v12  ;;  %8719 = vmatprep.subr.bf16.mxu1 %v8743_v12  ;;  %v9302_v15 = vpack.c.bf16 %v555_v11, %v554_v10  ;;  %13798 = vst [vmem:[#allocation6_spill] sm:$0xff] %v9326_v32  ;;  %v561_v41 = vld [vmem:[%s9279_s13 + $0x38] sm:$0xff]  ;;  %v563_v47 = vld [vmem:[%s9279_s13 + $0x48] sm:$0xff]  ;;  %v8768_v57 = vld [vmem:[%s13574_s4 + $0x20] sm:$0xff]  }
  0x23   : > { %v8765_v48 = vld [vmem:[%s13573_s3 + $0x28] sm:$0xff]   ;;  %v9360_v53 = vpack.c.bf16 %v563_v47, %v562_v46  ;;  %v564_v62 = vld [vmem:[%s9279_s13 + $0x50] sm:$0xff]  ;;  %v565_v63 = vld [vmem:[%s9279_s13 + $0x58] sm:$0xff] }
  0x24   : > { %13795 = vst [vmem:[#allocation3_spill] sm:$0xff] %v9302_v15  ;;  %v8766_v49 = vld [vmem:[%s13574_s4 + $0x28] sm:$0xff]   ;;  %v534_v0 = vld [vmem:[%s9270_s25 + $0x60] sm:$0xff]  ;;  %v8769_v4 = vld [vmem:[%s13573_s3 + $0x18] sm:$0xff]   ;;  %v9388_v11 = vpack.c.bf16 %v565_v63, %v564_v62 }
  0x25   : > { %8054 = vmatpush3.bf16.msra.mxu0 %v8743_v12  ;;  %8727 = vmatpush3.bf16.msra.mxu1 %v8743_v12  ;;  %v8759_v12 = vld [vmem:[%s13575_s5 + $0x40] sm:$0xff]   ;;  %13803 = vst [vmem:[#allocation11_spill] sm:$0xff] %v9360_v53  ;;  %v535_v1 = vld [vmem:[%s9270_s25 + $0x68] sm:$0xff]  ;;  %v8770_v8 = vld [vmem:[%s13574_s4 + $0x18] sm:$0xff]  }
  0x26   : > { %8055 = vmatprep.subr.bf16.mxu0 %v8744_v13  ;;  %8720 = vmatprep.subr.bf16.mxu1 %v8744_v13  ;;  %13805 = vst [vmem:[#allocation13_spill] sm:$0xff] %v9388_v11  ;;  %v8771_v16 = vld [vmem:[%s13573_s3 + $0x10] sm:$0xff]   ;;  %v538_v24 = vld [vmem:[%s9270_s25 + $0x80] sm:$0xff]  ;;  %v539_v25 = vld [vmem:[%s9270_s25 + $0x88] sm:$0xff] }
  0x27   : > { %v8772_v17 = vld [vmem:[%s13574_s4 + $0x10] sm:$0xff]   ;;  %v541_v47 = vld [vmem:[%s9270_s25 + $0x98] sm:$0xff] }
  0x28   : > { %v540_v46 = vld [vmem:[%s9270_s25 + $0x90] sm:$0xff] }
  0x29   : > { %8056 = vmatpush3.bf16.msra.mxu0 %v8744_v13  ;;  %8728 = vmatpush3.bf16.msra.mxu1 %v8744_v13  ;;  %v8760_v13 = vld [vmem:[%s13575_s5 + $0x80] sm:$0xff]   ;;  %v9444_v62 = vpack.c.bf16 %v541_v47, %v540_v46  ;;  %v583_v47 = vld [vmem:[%s9279_s13 + $0xe8] sm:$0xff] }
  0x2a   : > { %8089 = vmatprep.subr.bf16.mxu1 %v8745_v18  ;;  %8137 = vmatprep.subr.bf16.mxu0 %v8746_v19  ;;  %v582_v46 = vld [vmem:[%s9279_s13 + $0xe0] sm:$0xff] }
  0x2b   : > { %13812 = vst [vmem:[#allocation20_spill] sm:$0xff] %v9444_v62 }
  0x2c   : > { %8058 = vmatmul.mubr.bf16.vlgmr.msra.gmra.mxu0 %v9180_v22  ;;  %8074 = vmatmul.mubr.bf16.vlgmr.msra.gmra.mxu1 %v9182_v23 }
  0x2d   : > { %8090 = vmatpush3.bf16.msra.mxu1 %v8745_v18  ;;  %8138 = vmatpush3.bf16.msra.mxu0 %v8746_v19  ;;  %v556_v18 = vld [vmem:[%s9279_s13 + $0x10] sm:$0xff]  ;;  %v557_v19 = vld [vmem:[%s9279_s13 + $0x18] sm:$0xff] }
  0x2e   : > { %8091 = vmatprep.subr.bf16.mxu1 %v8747_v26  ;;  %8139 = vmatprep.subr.bf16.mxu0 %v8748_v27  ;;  %v9324_v31 = vpack.c.bf16 %v557_v19, %v556_v18  ;;  %v536_v18 = vld [vmem:[%s9270_s25 + $0x70] sm:$0xff]  ;;  %v537_v19 = vld [vmem:[%s9270_s25 + $0x78] sm:$0xff] }
  0x2f   : > { %8061 = vmatprep.mubr.bf16.mxu0 %v9192_v28  ;;  %8077 = vmatprep.mubr.bf16.mxu1 %v9194_v29 }
  0x30   : > { %13797 = vst [vmem:[#allocation5_spill] sm:$0xff] %v9324_v31 }
  0x31   : > { %8092 = vmatpush3.bf16.msra.mxu1 %v8747_v26  ;;  %8140 = vmatpush3.bf16.msra.mxu0 %v8748_v27  ;;  %v558_v26 = vld [vmem:[%s9279_s13 + $0x20] sm:$0xff]  ;;  %v559_v27 = vld [vmem:[%s9279_s13 + $0x28] sm:$0xff] }
  0x32   : > { %8093 = vmatprep.subr.bf16.mxu1 %v8749_v34  ;;  %8141 = vmatprep.subr.bf16.mxu0 %v8750_v35  ;;  %v9328_v33 = vpack.c.bf16 %v559_v27, %v558_v26  ;;  %v570_v26 = vld [vmem:[%s9279_s13 + $0x80] sm:$0xff]  ;;  %v571_v27 = vld [vmem:[%s9279_s13 + $0x88] sm:$0xff] }
  0x34   : > { %8062 = vmatmul.mubr.bf16.gmra.mxu0 %v9213_v39  ;;  %8078 = vmatmul.mubr.bf16.gmra.mxu1 %v9215_v40  ;;  %13799 = vst [vmem:[#allocation7_spill] sm:$0xff] %v9328_v33 }
  0x35   : > { %8094 = vmatpush3.bf16.msra.mxu1 %v8749_v34  ;;  %8142 = vmatpush3.bf16.msra.mxu0 %v8750_v35  ;;  %v8763_v34 = vld [vmem:[%s13573_s3 + $0x30] sm:$0xff]  }
  0x36   : > { %8095 = vmatprep.subr.bf16.mxu1 %v8751_v42  ;;  %8143 = vmatprep.subr.bf16.mxu0 %v8752_v43  ;;  %v528_v35 = vld [vmem:[%s9270_s25 + $0x30] sm:$0xff] }
  0x37   : > { %8065 = vmatprep.mubr.bf16.mxu0 %v9224_v44  ;;  %8081 = vmatprep.mubr.bf16.mxu1 %v9226_v45 }
  0x39   : > { %8096 = vmatpush3.bf16.msra.mxu1 %v8751_v42  ;;  %8144 = vmatpush3.bf16.msra.mxu0 %v8752_v43  ;;  %v530_v42 = vld [vmem:[%s9270_s25 + $0x40] sm:$0xff]  ;;  %v531_v43 = vld [vmem:[%s9270_s25 + $0x48] sm:$0xff] }
  0x3a   : > { %8097 = vmatprep.subr.bf16.mxu1 %v8753_v50  ;;  %8145 = vmatprep.subr.bf16.mxu0 %v8754_v51  ;;  %v9358_v52 = vpack.c.bf16 %v531_v43, %v530_v42  ;;  %v8775_v42 = vld [vmem:[%s13573_s3] sm:$0xff]  }
  0x3b   : > { %v8776_v43 = vld [vmem:[%s13574_s4] sm:$0xff]  }
  0x3c   : > { %8066 = vmatmul.mubr.bf16.gmra.mxu0 %v9244_v54  ;;  %8082 = vmatmul.mubr.bf16.gmra.mxu1 %v9246_v55  ;;  %13802 = vst [vmem:[#allocation10_spill] sm:$0xff] %v9358_v52 }
  0x3d   : > { %8098 = vmatpush3.bf16.msra.mxu1 %v8753_v50  ;;  %8146 = vmatpush3.bf16.msra.mxu0 %v8754_v51  ;;  %v9354_v50 = vpack.c.bf16 %v529_v36, %v528_v35  ;;  %v9356_v51 = vpack.c.bf16 %v561_v41, %v560_v37  ;;  %v8774_v35 = vld [vmem:[%s13574_s4 + $0x8] sm:$0xff]   ;;  %v9418_v36 = vpack.c.bf16 %v537_v19, %v536_v18  ;;  %v578_v18 = vld [vmem:[%s9279_s13 + $0xc0] sm:$0xff] }
  0x3e   : > { %8099 = vmatprep.subr.bf16.mxu1 %v8755_v58  ;;  %8147 = vmatprep.subr.bf16.mxu0 %v8756_v59  ;;  %v9424_v41 = vpack.c.bf16 %v571_v27, %v570_v26  ;;  %v579_v19 = vld [vmem:[%s9279_s13 + $0xc8] sm:$0xff]  ;;  %v548_v26 = vld [vmem:[%s9270_s25 + $0xd0] sm:$0xff]  ;;  %v549_v27 = vld [vmem:[%s9270_s25 + $0xd8] sm:$0xff] }
  0x3f   : > { %8069 = vmatprep.mubr.bf16.mxu0 %v9256_v60  ;;  %8085 = vmatprep.mubr.bf16.mxu1 %v9258_v61  ;;  %13800 = vst [vmem:[#allocation8_spill] sm:$0xff] %v9354_v50  ;;  %13801 = vst [vmem:[#allocation9_spill] sm:$0xff] %v9356_v51 }
  0x40   : > { %13808 = vst [vmem:[#allocation16_spill] sm:$0xff] %v9418_v36  ;;  %13811 = vst [vmem:[#allocation19_spill] sm:$0xff] %v9424_v41 }
  0x41   : > { %8100 = vmatpush3.bf16.msra.mxu1 %v8755_v58  ;;  %8148 = vmatpush3.bf16.msra.mxu0 %v8756_v59  ;;  %v532_v58 = vld [vmem:[%s9270_s25 + $0x50] sm:$0xff]  ;;  %v533_v59 = vld [vmem:[%s9270_s25 + $0x58] sm:$0xff] }
  0x42   : > { %8101 = vmatprep.subr.bf16.mxu1 %v8757_v2  ;;  %8149 = vmatprep.subr.bf16.mxu0 %v8758_v3  ;;  %v9386_v10 = vpack.c.bf16 %v533_v59, %v532_v58  ;;  %v574_v58 = vld [vmem:[%s9279_s13 + $0xa0] sm:$0xff]  ;;  %v575_v59 = vld [vmem:[%s9279_s13 + $0xa8] sm:$0xff] }
  0x44   : > { %8070 = vmatmul.mubr.bf16.gmra.mxu0 %v9287_v5  ;;  %8086 = vmatmul.mubr.bf16.gmra.mxu1 %v9289_v6  ;;  %13804 = vst [vmem:[#allocation12_spill] sm:$0xff] %v9386_v10 }
  0x45   : > { %8102 = vmatpush3.bf16.msra.mxu1 %v8757_v2  ;;  %8150 = vmatpush3.bf16.msra.mxu0 %v8758_v3  ;;  %v566_v2 = vld [vmem:[%s9279_s13 + $0x60] sm:$0xff]  ;;  %v567_v3 = vld [vmem:[%s9279_s13 + $0x68] sm:$0xff] }
  0x46   : > { %8103 = vmatprep.subr.bf16.mxu1 %v8759_v12  ;;  %8151 = vmatprep.subr.bf16.mxu0 %v8760_v13 }
  0x47   : > { %8105 = vmatprep.mubr.bf16.mxu1 %v9300_v14  ;;  %8153 = vmatprep.mubr.bf16.mxu0 %v9302_v15 }
  0x49   : > { %8104 = vmatpush3.bf16.msra.mxu1 %v8759_v12  ;;  %8152 = vmatpush3.bf16.msra.mxu0 %v8760_v13  ;;  %v9390_v12 = vpack.c.bf16 %v535_v1, %v534_v0  ;;  %v9392_v13 = vpack.c.bf16 %v567_v3, %v566_v2  ;;  %v9450_v1 = vpack.c.bf16 %v575_v59, %v574_v58  ;;  %v544_v2 = vld [vmem:[%s9270_s25 + $0xb0] sm:$0xff]  ;;  %v545_v3 = vld [vmem:[%s9270_s25 + $0xb8] sm:$0xff] }
  0x4a   : > { %8185 = vmatprep.subr.bf16.mxu1 %v8761_v20  ;;  %8233 = vmatprep.subr.bf16.mxu0 %v8762_v21  ;;  %v552_v58 = vld [vmem:[%s9270_s25 + $0xf0] sm:$0xff]  ;;  %v553_v59 = vld [vmem:[%s9270_s25 + $0xf8] sm:$0xff] }
  0x4b   : > { %13806 = vst [vmem:[#allocation14_spill] sm:$0xff] %v9390_v12  ;;  %13807 = vst [vmem:[#allocation15_spill] sm:$0xff] %v9392_v13 }
  0x4c   : > { %8106 = vmatmul.mubr.bf16.vlgmr.msra.gmra.mxu1 %v9322_v30  ;;  %8154 = vmatmul.mubr.bf16.vlgmr.msra.gmra.mxu0 %v9324_v31  ;;  %13815 = vst [vmem:[#allocation23_spill] sm:$0xff] %v9450_v1 }
  0x4d   : > { %8186 = vmatpush3.bf16.msra.mxu1 %v8761_v20  ;;  %8234 = vmatpush3.bf16.msra.mxu0 %v8762_v21  ;;  %v568_v20 = vld [vmem:[%s9279_s13 + $0x70] sm:$0xff]  ;;  %v569_v21 = vld [vmem:[%s9279_s13 + $0x78] sm:$0xff] }
  0x4e   : > { %8109 = vmatprep.mubr.bf16.mxu1 %v9326_v32  ;;  %8157 = vmatprep.mubr.bf16.mxu0 %v9328_v33  ;;  %v9420_v37 = vpack.c.bf16 %v569_v21, %v568_v20  ;;  %v9464_v20 = vpack.c.bf16 %v545_v3, %v544_v2  ;;  %v584_v2 = vld [vmem:[%s9279_s13 + $0xf0] sm:$0xff]  ;;  %v585_v3 = vld [vmem:[%s9279_s13 + $0xf8] sm:$0xff] }
  0x4f   : > { %8187 = vmatprep.subr.bf16.mxu1 %v8763_v34  ;;  %8235 = vmatprep.subr.bf16.mxu0 %v8764_v38 }
  0x50   : > { %13809 = vst [vmem:[#allocation17_spill] sm:$0xff] %v9420_v37  ;;  %13816 = vst [vmem:[#allocation24_spill] sm:$0xff] %v9464_v20 }
  0x51   : > { %8188 = vmatpush3.bf16.msra.mxu1 %v8763_v34  ;;  %8236 = vmatpush3.bf16.msra.mxu0 %v8764_v38  ;;  %v8773_v34 = vld [vmem:[%s13573_s3 + $0x8] sm:$0xff]   ;;  %v9422_v38 = vpack.c.bf16 %v539_v25, %v538_v24  ;;  %v9470_v25 = vpack.c.bf16 %v579_v19, %v578_v18 }
  0x52   : > { %8189 = vmatprep.subr.bf16.mxu1 %v8765_v48  ;;  %8237 = vmatprep.subr.bf16.mxu0 %v8766_v49 }
  0x53   : > { %13810 = vst [vmem:[#allocation18_spill] sm:$0xff] %v9422_v38  ;;  %13819 = vst [vmem:[#allocation27_spill] sm:$0xff] %v9470_v25 }
  0x54   : > { %8110 = vmatmul.mubr.bf16.gmra.mxu1 %v9354_v50  ;;  %8158 = vmatmul.mubr.bf16.gmra.mxu0 %v9356_v51 }
  0x55   : > { %8113 = vmatprep.mubr.bf16.mxu1 %v9358_v52  ;;  %8161 = vmatprep.mubr.bf16.mxu0 %v9360_v53 }
  0x56   : > { %8190 = vmatpush3.bf16.msra.mxu1 %v8765_v48  ;;  %8238 = vmatpush3.bf16.msra.mxu0 %v8766_v49  ;;  %v572_v48 = vld [vmem:[%s9279_s13 + $0x90] sm:$0xff]  ;;  %v573_v49 = vld [vmem:[%s9279_s13 + $0x98] sm:$0xff] }
  0x57   : > { %8191 = vmatprep.subr.bf16.mxu1 %v8767_v56  ;;  %8239 = vmatprep.subr.bf16.mxu0 %v8768_v57  ;;  %v9446_v63 = vpack.c.bf16 %v573_v49, %v572_v48  ;;  %v9484_v48 = vpack.c.bf16 %v549_v27, %v548_v26 }
  0x59   : > { %13813 = vst [vmem:[#allocation21_spill] sm:$0xff] %v9446_v63  ;;  %13820 = vst [vmem:[#allocation28_spill] sm:$0xff] %v9484_v48 }
  0x5a   : > { %8192 = vmatpush3.bf16.msra.mxu1 %v8767_v56  ;;  %8240 = vmatpush3.bf16.msra.mxu0 %v8768_v57  ;;  %v542_v56 = vld [vmem:[%s9270_s25 + $0xa0] sm:$0xff]  ;;  %v543_v57 = vld [vmem:[%s9270_s25 + $0xa8] sm:$0xff] }
  0x5b   : > { %8193 = vmatprep.subr.bf16.mxu1 %v8769_v4  ;;  %8241 = vmatprep.subr.bf16.mxu0 %v8770_v8  ;;  %v9448_v0 = vpack.c.bf16 %v543_v57, %v542_v56  ;;  %v9490_v57 = vpack.c.bf16 %v583_v47, %v582_v46 }
  0x5c   : > { %8114 = vmatmul.mubr.bf16.gmra.mxu1 %v9386_v10  ;;  %8162 = vmatmul.mubr.bf16.gmra.mxu0 %v9388_v11 }
  0x5d   : > { %8117 = vmatprep.mubr.bf16.mxu1 %v9390_v12  ;;  %8165 = vmatprep.mubr.bf16.mxu0 %v9392_v13  ;;  %13814 = vst [vmem:[#allocation22_spill] sm:$0xff] %v9448_v0  ;;  %13823 = vst [vmem:[#allocation31_spill] sm:$0xff] %v9490_v57 }
  0x5e   : > { %8194 = vmatpush3.bf16.msra.mxu1 %v8769_v4  ;;  %8242 = vmatpush3.bf16.msra.mxu0 %v8770_v8  ;;  %v576_v4 = vld [vmem:[%s9279_s13 + $0xb0] sm:$0xff]  ;;  %v577_v8 = vld [vmem:[%s9279_s13 + $0xb8] sm:$0xff] }
  0x5f   : > { %8195 = vmatprep.subr.bf16.mxu1 %v8771_v16  ;;  %8243 = vmatprep.subr.bf16.mxu0 %v8772_v17  ;;  %v9466_v21 = vpack.c.bf16 %v577_v8, %v576_v4  ;;  %v9500_v4 = vpack.c.bf16 %v553_v59, %v552_v58  ;;  %v9502_v8 = vpack.c.bf16 %v585_v3, %v584_v2 }
  0x61   : > { %13817 = vst [vmem:[#allocation25_spill] sm:$0xff] %v9466_v21  ;;  %13824 = vst [vmem:[#allocation32_spill] sm:$0xff] %v9500_v4 }
  0x62   : > { %8196 = vmatpush3.bf16.msra.mxu1 %v8771_v16  ;;  %8244 = vmatpush3.bf16.msra.mxu0 %v8772_v17  ;;  %v546_v16 = vld [vmem:[%s9270_s25 + $0xc0] sm:$0xff]  ;;  %v547_v17 = vld [vmem:[%s9270_s25 + $0xc8] sm:$0xff]  ;;  %13825 = vst [vmem:[#allocation33_spill] sm:$0xff] %v9502_v8 }
  0x63   : > { %8197 = vmatprep.subr.bf16.mxu1 %v8773_v34  ;;  %8245 = vmatprep.subr.bf16.mxu0 %v8774_v35  ;;  %v9468_v24 = vpack.c.bf16 %v547_v17, %v546_v16 }
  0x64   : > { %8118 = vmatmul.mubr.bf16.gmra.mxu1 %v9418_v36  ;;  %8166 = vmatmul.mubr.bf16.gmra.mxu0 %v9420_v37 }
  0x65   : > { %8121 = vmatprep.mubr.bf16.mxu1 %v9422_v38  ;;  %8169 = vmatprep.mubr.bf16.mxu0 %v9424_v41  ;;  %13818 = vst [vmem:[#allocation26_spill] sm:$0xff] %v9468_v24 }
  0x66   : > { %8198 = vmatpush3.bf16.msra.mxu1 %v8773_v34  ;;  %8246 = vmatpush3.bf16.msra.mxu0 %v8774_v35  ;;  %v580_v34 = vld [vmem:[%s9279_s13 + $0xd0] sm:$0xff]  ;;  %v581_v35 = vld [vmem:[%s9279_s13 + $0xd8] sm:$0xff] }
  0x67   : > { %8199 = vmatprep.subr.bf16.mxu1 %v8775_v42  ;;  %8247 = vmatprep.subr.bf16.mxu0 %v8776_v43  ;;  %v9486_v49 = vpack.c.bf16 %v581_v35, %v580_v34 }
  0x69   : > { %13821 = vst [vmem:[#allocation29_spill] sm:$0xff] %v9486_v49 }
  0x6a   : > { %8200 = vmatpush3.bf16.msra.mxu1 %v8775_v42  ;;  %8248 = vmatpush3.bf16.msra.mxu0 %v8776_v43  ;;  %v550_v42 = vld [vmem:[%s9270_s25 + $0xe0] sm:$0xff]  ;;  %v551_v43 = vld [vmem:[%s9270_s25 + $0xe8] sm:$0xff] }
  0x6b   : > { %v9488_v56 = vpack.c.bf16 %v551_v43, %v550_v42 }
  0x6c   : > { %8122 = vmatmul.mubr.bf16.gmra.mxu1 %v9444_v62  ;;  %8170 = vmatmul.mubr.bf16.gmra.mxu0 %v9446_v63 }
  0x6d   : > { %8125 = vmatprep.mubr.bf16.mxu1 %v9448_v0  ;;  %8173 = vmatprep.mubr.bf16.mxu0 %v9450_v1  ;;  %13822 = vst [vmem:[#allocation30_spill] sm:$0xff] %v9488_v56 }
  0x74   : > { %8126 = vmatmul.mubr.bf16.gmra.mxu1 %v9464_v20  ;;  %8174 = vmatmul.mubr.bf16.gmra.mxu0 %v9466_v21 }
  0x75   : > { %8129 = vmatprep.mubr.bf16.mxu1 %v9468_v24  ;;  %8177 = vmatprep.mubr.bf16.mxu0 %v9470_v25 }
  0x7c   : > { %8130 = vmatmul.mubr.bf16.gmra.mxu1 %v9484_v48  ;;  %8178 = vmatmul.mubr.bf16.gmra.mxu0 %v9486_v49 }
  0x7d   : > { %8133 = vmatprep.mubr.bf16.mxu1 %v9488_v56  ;;  %8181 = vmatprep.mubr.bf16.mxu0 %v9490_v57 }
  0x84   : > { %8134 = vmatmul.mubr.bf16.gmra.mxu1 %v9500_v4  ;;  %8182 = vmatmul.mubr.bf16.gmra.mxu0 %v9502_v8 }
  0x85   : > { %8201 = vmatprep.mubr.bf16.mxu1 %v9149_v7  ;;  %8249 = vmatprep.mubr.bf16.mxu0 %v9149_v7  ;;  %v652_v7 = vlaneseq }
  0x8c   : > { %8202 = vmatmul.mubr.bf16.vlgmr.msra.gmra.mxu1 %v9180_v22  ;;  %8250 = vmatmul.mubr.bf16.vlgmr.msra.gmra.mxu0 %v9180_v22 }
  0x8d   : > { %8205 = vmatprep.mubr.bf16.mxu1 %v9192_v28  ;;  %8253 = vmatprep.mubr.bf16.mxu0 %v9192_v28 }
  0x94   : > { %8206 = vmatmul.mubr.bf16.gmra.mxu1 %v9213_v39  ;;  %8254 = vmatmul.mubr.bf16.gmra.mxu0 %v9213_v39 }
  0x95   : > { %8209 = vmatprep.mubr.bf16.mxu1 %v9224_v44  ;;  %8257 = vmatprep.mubr.bf16.mxu0 %v9224_v44 }
  0x9c   : > { %8210 = vmatmul.mubr.bf16.gmra.mxu1 %v9244_v54  ;;  %8258 = vmatmul.mubr.bf16.gmra.mxu0 %v9244_v54 }
  0x9d   : > { %8213 = vmatprep.mubr.bf16.mxu1 %v9256_v60  ;;  %8261 = vmatprep.mubr.bf16.mxu0 %v9256_v60 }
  0xa4   : > { %8214 = vmatmul.mubr.bf16.gmra.mxu1 %v9287_v5  ;;  %8262 = vmatmul.mubr.bf16.gmra.mxu0 %v9287_v5 }
  0xa5   : > { %8217 = vmatprep.mubr.bf16.mxu1 %v9152_v9  ;;  %8265 = vmatprep.mubr.bf16.mxu0 %v9152_v9  ;;  %v9538_v9 = vshrl.u32 %v652_v7, 7 }
  0xa7   : > { %13826 = vst [vmem:[#allocation34_spill] sm:$0xff] %v9538_v9  ;;  %v13583_v22 = vsub.s32 0, %v9538_v9 }
  0xac   : > { %8218 = vmatmul.mubr.bf16.gmra.mxu1 %v9182_v23  ;;  %8266 = vmatmul.mubr.bf16.gmra.mxu0 %v9182_v23  ;;  %v618_v23 = vld [vmem:[%s13576_s6] sm:$0x7] }
  0xad   : > { %8221 = vmatprep.mubr.bf16.mxu1 %v9194_v29  ;;  %8269 = vmatprep.mubr.bf16.mxu0 %v9194_v29  ;;  %v9546_v28 = vrot.slane %v618_v23, %v13583_v22 }
  0xaf   : > { %13827 = vst [vmem:[#allocation35_spill] sm:$0xff] %v9546_v28 }
  0xb4   : > { %8222 = vmatmul.mubr.bf16.gmra.mxu1 %v9215_v40  ;;  %8270 = vmatmul.mubr.bf16.gmra.mxu0 %v9215_v40 }
  0xb5   : > { %8225 = vmatprep.mubr.bf16.mxu1 %v9226_v45  ;;  %8273 = vmatprep.mubr.bf16.mxu0 %v9226_v45 }
  0xbc   : > { %8226 = vmatmul.mubr.bf16.gmra.mxu1 %v9246_v55  ;;  %8274 = vmatmul.mubr.bf16.gmra.mxu0 %v9246_v55 }
  0xbd   : > { %8229 = vmatprep.mubr.bf16.mxu1 %v9258_v61  ;;  %8277 = vmatprep.mubr.bf16.mxu0 %v9258_v61 }
  0xc4   : > { %8230 = vmatmul.mubr.bf16.gmra.mxu1 %v9289_v6  ;;  %8278 = vmatmul.mubr.bf16.gmra.mxu0 %v9289_v6 }
  0xec   : > { %v8059_v29 = vpop.f32.mrf.mxu0  ;;  %v8075_v39 = vpop.f32.mrf.mxu1 }
  0xed   : > { %v9549_v40 = vadd.f32 %v8059_v29, %v9546_v28  ;;  %v9552_v44 = vadd.f32 %v8075_v39, %v9546_v28 }
  0xee   : > { %v738_v45 = vpop.f32.mrf.mxu0  ;;  %v802_v54 = vpop.f32.mrf.mxu1 }
  0xef   : > { %13828 = vst [vmem:[#allocation36_spill] sm:$0xff] %v9549_v40  ;;  %13829 = vst [vmem:[#allocation37_spill] sm:$0xff] %v9552_v44  ;;  %v9555_v55 = vadd.f32 %v738_v45, %v9546_v28  ;;  %v9558_v60 = vadd.f32 %v802_v54, %v9546_v28 }
  0xf0   : > { %v8060_v61 = vpop.f32.mrf.mxu0  ;;  %v8076_v5 = vpop.f32.mrf.mxu1 }
  0xf1   : > { %13830 = vst [vmem:[#allocation38_spill] sm:$0xff] %v9555_v55  ;;  %13831 = vst [vmem:[#allocation39_spill] sm:$0xff] %v9558_v60  ;;  %v9561_v6 = vadd.f32 %v8060_v61, %v9546_v28  ;;  %v9564_v16 = vadd.f32 %v8076_v5, %v9546_v28 }
  0xf2   : > { %v9566_v17 = vpop.f32.mrf.mxu0  ;;  %v9568_v18 = vpop.f32.mrf.mxu1 }
  0xf3   : > { %13832 = vst [vmem:[#allocation40_spill] sm:$0xff] %v9561_v6  ;;  %13833 = vst [vmem:[#allocation41_spill] sm:$0xff] %v9564_v16 }
  0xf4   : > { %13834 = vst [vmem:[#allocation42_spill] sm:$0xff] %v9566_v17  ;;  %13835 = vst [vmem:[#allocation43_spill] sm:$0xff] %v9568_v18  ;;  %v8063_v19 = vpop.f32.mrf.mxu0  ;;  %v8079_v26 = vpop.f32.mrf.mxu1 }
  0xf5   : > { %v9571_v27 = vadd.f32 %v8063_v19, %v9546_v28  ;;  %v9574_v34 = vadd.f32 %v8079_v26, %v9546_v28 }
  0xf6   : > { %v754_v35 = vpop.f32.mrf.mxu0  ;;  %v818_v42 = vpop.f32.mrf.mxu1 }
  0xf7   : > { %13836 = vst [vmem:[#allocation44_spill] sm:$0xff] %v9571_v27  ;;  %13837 = vst [vmem:[#allocation45_spill] sm:$0xff] %v9574_v34  ;;  %v9577_v43 = vadd.f32 %v754_v35, %v9546_v28  ;;  %v9580_v46 = vadd.f32 %v818_v42, %v9546_v28 }
  0xf8   : > { %v8064_v47 = vpop.f32.mrf.mxu0  ;;  %v8080_v58 = vpop.f32.mrf.mxu1 }
  0xf9   : > { %13838 = vst [vmem:[#allocation46_spill] sm:$0xff] %v9577_v43  ;;  %13839 = vst [vmem:[#allocation47_spill] sm:$0xff] %v9580_v46  ;;  %v9583_v59 = vadd.f32 %v8064_v47, %v9546_v28  ;;  %v9586_v2 = vadd.f32 %v8080_v58, %v9546_v28  ;;  %v13610_v47 = vsub.s32 1, %v9538_v9  ;;  %v13611_v58 = vsub.s32 2, %v9538_v9 }
  0xfa   : > { %v9588_v3 = vpop.f32.mrf.mxu0  ;;  %v9590_v7 = vpop.f32.mrf.mxu1 }
  0xfb   : > { %13840 = vst [vmem:[#allocation48_spill] sm:$0xff] %v9583_v59  ;;  %13841 = vst [vmem:[#allocation49_spill] sm:$0xff] %v9586_v2  ;;  %v9624_v25 = vrot.slane %v618_v23, %v13610_v47  ;;  %v9628_v21 = vrot.slane %v618_v23, %v13611_v58 }
  0xfc   : > { %13842 = vst [vmem:[#allocation50_spill] sm:$0xff] %v9588_v3  ;;  %13843 = vst [vmem:[#allocation51_spill] sm:$0xff] %v9590_v7  ;;  %v9592_v29 = vpop.f32.mrf.mxu0  ;;  %v9594_v39 = vpop.f32.mrf.mxu1 }
  0xfd   : > { %13844 = vst [vmem:[#allocation52_spill] sm:$0xff] %v9592_v29  ;;  %13845 = vst [vmem:[#allocation53_spill] sm:$0xff] %v9594_v39 }
  0xfe   : > { %v9596_v45 = vpop.f32.mrf.mxu0  ;;  %v9598_v54 = vpop.f32.mrf.mxu1  ;;  %13858 = vst [vmem:[#allocation66_spill] sm:$0xff] %v9624_v25  ;;  %13859 = vst [vmem:[#allocation67_spill] sm:$0xff] %v9628_v21 }
  0xff   : > { %13846 = vst [vmem:[#allocation54_spill] sm:$0xff] %v9596_v45  ;;  %13847 = vst [vmem:[#allocation55_spill] sm:$0xff] %v9598_v54 }
 0x100   : > { %v9600_v61 = vpop.f32.mrf.mxu0  ;;  %v9602_v5 = vpop.f32.mrf.mxu1 }
 0x101   : > { %13848 = vst [vmem:[#allocation56_spill] sm:$0xff] %v9600_v61  ;;  %13849 = vst [vmem:[#allocation57_spill] sm:$0xff] %v9602_v5 }
 0x102   : > { %v9604_v19 = vpop.f32.mrf.mxu0  ;;  %v9606_v26 = vpop.f32.mrf.mxu1 }
 0x103   : > { %13850 = vst [vmem:[#allocation58_spill] sm:$0xff] %v9604_v19  ;;  %13851 = vst [vmem:[#allocation59_spill] sm:$0xff] %v9606_v26 }
 0x104   : > { %v9608_v35 = vpop.f32.mrf.mxu0  ;;  %v9610_v42 = vpop.f32.mrf.mxu1 }
 0x105   : > { %13852 = vst [vmem:[#allocation60_spill] sm:$0xff] %v9608_v35  ;;  %13853 = vst [vmem:[#allocation61_spill] sm:$0xff] %v9610_v42 }
 0x106   : > { %v9614_v22 = vpop.f32.mrf.mxu0  ;;  %v9616_v8 = vpop.f32.mrf.mxu1 }
 0x107   : > { %13854 = vst [vmem:[#allocation62_spill] sm:$0xff] %v9614_v22  ;;  %13855 = vst [vmem:[#allocation63_spill] sm:$0xff] %v9616_v8 }
 0x108   : > { %v9618_v57 = vpop.f32.mrf.mxu0  ;;  %v9620_v49 = vpop.f32.mrf.mxu1 }
 0x109   : > { %13856 = vst [vmem:[#allocation64_spill] sm:$0xff] %v9618_v57  ;;  %13857 = vst [vmem:[#allocation65_spill] sm:$0xff] %v9620_v49 }
 0x10a   : > { %v9630_v1 = vpop.f32.mrf.mxu0  ;;  %v9632_v63 = vpop.f32.mrf.mxu1 }
 0x10b   : > { %13860 = vst [vmem:[#allocation68_spill] sm:$0xff] %v9630_v1  ;;  %13861 = vst [vmem:[#allocation69_spill] sm:$0xff] %v9632_v63 }
 0x10c   : > { %v8107_v41 = vpop.f32.mrf.mxu1  ;;  %v8155_v37 = vpop.f32.mrf.mxu0 }
 0x10d   : > { %v9635_v13 = vadd.f32 %v8107_v41, %v9624_v25  ;;  %v9638_v11 = vadd.f32 %v8155_v37, %v9628_v21 }
 0x10e   : > { %v984_v53 = vpop.f32.mrf.mxu1  ;;  %v1230_v51 = vpop.f32.mrf.mxu0 }
 0x10f   : > { %13862 = vst [vmem:[#allocation70_spill] sm:$0xff] %v9635_v13  ;;  %13863 = vst [vmem:[#allocation71_spill] sm:$0xff] %v9638_v11  ;;  %v9641_v47 = vadd.f32 %v984_v53, %v9624_v25  ;;  %v9644_v23 = vadd.f32 %v1230_v51, %v9628_v21 }
 0x110   : > { %v8108_v58 = vpop.f32.mrf.mxu1  ;;  %v8156_v33 = vpop.f32.mrf.mxu0 }
 0x111   : > { %13864 = vst [vmem:[#allocation72_spill] sm:$0xff] %v9641_v47  ;;  %13865 = vst [vmem:[#allocation73_spill] sm:$0xff] %v9644_v23  ;;  %v9647_v31 = vadd.f32 %v8108_v58, %v9624_v25  ;;  %v9650_v15 = vadd.f32 %v8156_v33, %v9628_v21 }
 0x112   : > { %v9652_v41 = vpop.f32.mrf.mxu1  ;;  %v9654_v37 = vpop.f32.mrf.mxu0 }
 0x113   : > { %13866 = vst [vmem:[#allocation74_spill] sm:$0xff] %v9647_v31  ;;  %13867 = vst [vmem:[#allocation75_spill] sm:$0xff] %v9650_v15 }
 0x114   : > { %13868 = vst [vmem:[#allocation76_spill] sm:$0xff] %v9652_v41  ;;  %13869 = vst [vmem:[#allocation77_spill] sm:$0xff] %v9654_v37  ;;  %v8111_v11 = vpop.f32.mrf.mxu1  ;;  %v8159_v13 = vpop.f32.mrf.mxu0 }
 0x115   : > { %v9657_v53 = vadd.f32 %v8111_v11, %v9624_v25  ;;  %v9660_v51 = vadd.f32 %v8159_v13, %v9628_v21 }
 0x116   : > { %v1000_v23 = vpop.f32.mrf.mxu1  ;;  %v1246_v47 = vpop.f32.mrf.mxu0 }
 0x117   : > { %13870 = vst [vmem:[#allocation78_spill] sm:$0xff] %v9657_v53  ;;  %13871 = vst [vmem:[#allocation79_spill] sm:$0xff] %v9660_v51  ;;  %v9663_v58 = vadd.f32 %v1000_v23, %v9624_v25  ;;  %v9666_v33 = vadd.f32 %v1246_v47, %v9628_v21 }
 0x118   : > { %v8112_v15 = vpop.f32.mrf.mxu1  ;;  %v8160_v31 = vpop.f32.mrf.mxu0 }
 0x119   : > { %13872 = vst [vmem:[#allocation80_spill] sm:$0xff] %v9663_v58  ;;  %13873 = vst [vmem:[#allocation81_spill] sm:$0xff] %v9666_v33  ;;  %v9669_v37 = vadd.f32 %v8112_v15, %v9624_v25  ;;  %v9672_v41 = vadd.f32 %v8160_v31, %v9628_v21 }
 0x11a   : > { %v9674_v11 = vpop.f32.mrf.mxu1  ;;  %v9676_v13 = vpop.f32.mrf.mxu0 }
 0x11b   : > { %13874 = vst [vmem:[#allocation82_spill] sm:$0xff] %v9669_v37  ;;  %13875 = vst [vmem:[#allocation83_spill] sm:$0xff] %v9672_v41 }
 0x11c   : > { %13876 = vst [vmem:[#allocation84_spill] sm:$0xff] %v9674_v11  ;;  %13877 = vst [vmem:[#allocation85_spill] sm:$0xff] %v9676_v13  ;;  %v8115_v51 = vpop.f32.mrf.mxu1  ;;  %v8163_v53 = vpop.f32.mrf.mxu0 }
 0x11d   : > { %v9679_v23 = vadd.f32 %v8115_v51, %v9624_v25  ;;  %v9682_v47 = vadd.f32 %v8163_v53, %v9628_v21 }
 0x11e   : > { %v1016_v33 = vpop.f32.mrf.mxu1  ;;  %v1262_v58 = vpop.f32.mrf.mxu0 }
 0x11f   : > { %13878 = vst [vmem:[#allocation86_spill] sm:$0xff] %v9679_v23  ;;  %13879 = vst [vmem:[#allocation87_spill] sm:$0xff] %v9682_v47  ;;  %v9685_v15 = vadd.f32 %v1016_v33, %v9624_v25  ;;  %v9688_v31 = vadd.f32 %v1262_v58, %v9628_v21 }
 0x120   : > { %v8116_v41 = vpop.f32.mrf.mxu1  ;;  %v8164_v37 = vpop.f32.mrf.mxu0 }
 0x121   : > { %13880 = vst [vmem:[#allocation88_spill] sm:$0xff] %v9685_v15  ;;  %13881 = vst [vmem:[#allocation89_spill] sm:$0xff] %v9688_v31  ;;  %v9691_v13 = vadd.f32 %v8116_v41, %v9624_v25  ;;  %v9694_v11 = vadd.f32 %v8164_v37, %v9628_v21 }
 0x122   : > { %v9696_v51 = vpop.f32.mrf.mxu1  ;;  %v9698_v53 = vpop.f32.mrf.mxu0 }
 0x123   : > { %13882 = vst [vmem:[#allocation90_spill] sm:$0xff] %v9691_v13  ;;  %13883 = vst [vmem:[#allocation91_spill] sm:$0xff] %v9694_v11 }
 0x124   : > { %13884 = vst [vmem:[#allocation92_spill] sm:$0xff] %v9696_v51  ;;  %13885 = vst [vmem:[#allocation93_spill] sm:$0xff] %v9698_v53  ;;  %v8119_v47 = vpop.f32.mrf.mxu1  ;;  %v8167_v23 = vpop.f32.mrf.mxu0 }
 0x125   : > { %v9701_v33 = vadd.f32 %v8119_v47, %v9624_v25  ;;  %v9704_v58 = vadd.f32 %v8167_v23, %v9628_v21 }
 0x126   : > { %v1032_v31 = vpop.f32.mrf.mxu1  ;;  %v1278_v15 = vpop.f32.mrf.mxu0 }
 0x127   : > { %13886 = vst [vmem:[#allocation94_spill] sm:$0xff] %v9701_v33  ;;  %13887 = vst [vmem:[#allocation95_spill] sm:$0xff] %v9704_v58  ;;  %v9707_v41 = vadd.f32 %v1032_v31, %v9624_v25  ;;  %v9710_v37 = vadd.f32 %v1278_v15, %v9628_v21 }
 0x128   : > { %v8120_v11 = vpop.f32.mrf.mxu1  ;;  %v8168_v13 = vpop.f32.mrf.mxu0 }
 0x129   : > { %13888 = vst [vmem:[#allocation96_spill] sm:$0xff] %v9707_v41  ;;  %13889 = vst [vmem:[#allocation97_spill] sm:$0xff] %v9710_v37  ;;  %v9713_v53 = vadd.f32 %v8120_v11, %v9624_v25  ;;  %v9716_v51 = vadd.f32 %v8168_v13, %v9628_v21 }
 0x12a   : > { %v9718_v47 = vpop.f32.mrf.mxu1  ;;  %v9720_v23 = vpop.f32.mrf.mxu0 }
 0x12b   : > { %13890 = vst [vmem:[#allocation98_spill] sm:$0xff] %v9713_v53  ;;  %13891 = vst [vmem:[#allocation99_spill] sm:$0xff] %v9716_v51 }
 0x12c   : > { %13892 = vst [vmem:[#allocation100_spill] sm:$0xff] %v9718_v47  ;;  %13893 = vst [vmem:[#allocation101_spill] sm:$0xff] %v9720_v23  ;;  %v8123_v58 = vpop.f32.mrf.mxu1  ;;  %v8171_v33 = vpop.f32.mrf.mxu0 }
 0x12d   : > { %v9723_v31 = vadd.f32 %v8123_v58, %v9624_v25  ;;  %v9726_v15 = vadd.f32 %v8171_v33, %v9628_v21 }
 0x12e   : > { %v1048_v37 = vpop.f32.mrf.mxu1  ;;  %v1294_v41 = vpop.f32.mrf.mxu0 }
 0x12f   : > { %13894 = vst [vmem:[#allocation102_spill] sm:$0xff] %v9723_v31  ;;  %13895 = vst [vmem:[#allocation103_spill] sm:$0xff] %v9726_v15  ;;  %v9729_v11 = vadd.f32 %v1048_v37, %v9624_v25  ;;  %v9732_v13 = vadd.f32 %v1294_v41, %v9628_v21 }
 0x130   : > { %v8124_v51 = vpop.f32.mrf.mxu1  ;;  %v8172_v53 = vpop.f32.mrf.mxu0 }
 0x131   : > { %13896 = vst [vmem:[#allocation104_spill] sm:$0xff] %v9729_v11  ;;  %13897 = vst [vmem:[#allocation105_spill] sm:$0xff] %v9732_v13  ;;  %v9735_v23 = vadd.f32 %v8124_v51, %v9624_v25  ;;  %v9738_v47 = vadd.f32 %v8172_v53, %v9628_v21 }
 0x132   : > { %v9740_v58 = vpop.f32.mrf.mxu1  ;;  %v9742_v33 = vpop.f32.mrf.mxu0 }
 0x133   : > { %13898 = vst [vmem:[#allocation106_spill] sm:$0xff] %v9735_v23  ;;  %13899 = vst [vmem:[#allocation107_spill] sm:$0xff] %v9738_v47 }
 0x134   : > { %13900 = vst [vmem:[#allocation108_spill] sm:$0xff] %v9740_v58  ;;  %13901 = vst [vmem:[#allocation109_spill] sm:$0xff] %v9742_v33  ;;  %v8127_v15 = vpop.f32.mrf.mxu1  ;;  %v8175_v31 = vpop.f32.mrf.mxu0 }
 0x135   : > { %v9745_v37 = vadd.f32 %v8127_v15, %v9624_v25  ;;  %v9748_v41 = vadd.f32 %v8175_v31, %v9628_v21 }
 0x136   : > { %v1064_v13 = vpop.f32.mrf.mxu1  ;;  %v1310_v11 = vpop.f32.mrf.mxu0 }
 0x137   : > { %13902 = vst [vmem:[#allocation110_spill] sm:$0xff] %v9745_v37  ;;  %13903 = vst [vmem:[#allocation111_spill] sm:$0xff] %v9748_v41  ;;  %v9751_v51 = vadd.f32 %v1064_v13, %v9624_v25  ;;  %v9754_v53 = vadd.f32 %v1310_v11, %v9628_v21 }
 0x138   : > { %v8128_v47 = vpop.f32.mrf.mxu1  ;;  %v8176_v58 = vpop.f32.mrf.mxu0 }
 0x139   : > { %13904 = vst [vmem:[#allocation112_spill] sm:$0xff] %v9751_v51  ;;  %13905 = vst [vmem:[#allocation113_spill] sm:$0xff] %v9754_v53  ;;  %v9757_v33 = vadd.f32 %v8128_v47, %v9624_v25  ;;  %v9760_v23 = vadd.f32 %v8176_v58, %v9628_v21 }
 0x13a   : > { %v9762_v15 = vpop.f32.mrf.mxu1  ;;  %v9764_v31 = vpop.f32.mrf.mxu0 }
 0x13b   : > { %13906 = vst [vmem:[#allocation114_spill] sm:$0xff] %v9757_v33  ;;  %13907 = vst [vmem:[#allocation115_spill] sm:$0xff] %v9760_v23 }
 0x13c   : > { %13908 = vst [vmem:[#allocation116_spill] sm:$0xff] %v9762_v15  ;;  %13909 = vst [vmem:[#allocation117_spill] sm:$0xff] %v9764_v31  ;;  %v8131_v41 = vpop.f32.mrf.mxu1  ;;  %v8179_v37 = vpop.f32.mrf.mxu0 }
 0x13d   : > { %v9767_v13 = vadd.f32 %v8131_v41, %v9624_v25  ;;  %v9770_v11 = vadd.f32 %v8179_v37, %v9628_v21 }
 0x13e   : > { %v1080_v53 = vpop.f32.mrf.mxu1  ;;  %v1326_v51 = vpop.f32.mrf.mxu0 }
 0x13f   : > { %13910 = vst [vmem:[#allocation118_spill] sm:$0xff] %v9767_v13  ;;  %13911 = vst [vmem:[#allocation119_spill] sm:$0xff] %v9770_v11  ;;  %v9773_v47 = vadd.f32 %v1080_v53, %v9624_v25  ;;  %v9776_v58 = vadd.f32 %v1326_v51, %v9628_v21 }
 0x140   : > { %v8132_v23 = vpop.f32.mrf.mxu1  ;;  %v8180_v15 = vpop.f32.mrf.mxu0 }
 0x141   : > { %13912 = vst [vmem:[#allocation120_spill] sm:$0xff] %v9773_v47  ;;  %13913 = vst [vmem:[#allocation121_spill] sm:$0xff] %v9776_v58  ;;  %v9779_v31 = vadd.f32 %v8132_v23, %v9624_v25  ;;  %v9782_v33 = vadd.f32 %v8180_v15, %v9628_v21 }
 0x142   : > { %v9784_v41 = vpop.f32.mrf.mxu1  ;;  %v9786_v37 = vpop.f32.mrf.mxu0 }
 0x143   : > { %13914 = vst [vmem:[#allocation122_spill] sm:$0xff] %v9779_v31  ;;  %13915 = vst [vmem:[#allocation123_spill] sm:$0xff] %v9782_v33 }
 0x144   : > { %13916 = vst [vmem:[#allocation124_spill] sm:$0xff] %v9784_v41  ;;  %13917 = vst [vmem:[#allocation125_spill] sm:$0xff] %v9786_v37  ;;  %v8135_v11 = vpop.f32.mrf.mxu1  ;;  %v8183_v13 = vpop.f32.mrf.mxu0 }
 0x145   : > { %v9789_v53 = vadd.f32 %v8135_v11, %v9624_v25  ;;  %v9792_v51 = vadd.f32 %v8183_v13, %v9628_v21 }
 0x146   : > { %v1096_v58 = vpop.f32.mrf.mxu1  ;;  %v1342_v47 = vpop.f32.mrf.mxu0 }
 0x147   : > { %13918 = vst [vmem:[#allocation126_spill] sm:$0xff] %v9789_v53  ;;  %13919 = vst [vmem:[#allocation127_spill] sm:$0xff] %v9792_v51  ;;  %v9795_v23 = vadd.f32 %v1096_v58, %v9624_v25  ;;  %v9798_v15 = vadd.f32 %v1342_v47, %v9628_v21 }
 0x148   : > { %v8136_v33 = vpop.f32.mrf.mxu1  ;;  %v8184_v31 = vpop.f32.mrf.mxu0 }
 0x149   : > { %13920 = vst [vmem:[#allocation128_spill] sm:$0xff] %v9795_v23  ;;  %13921 = vst [vmem:[#allocation129_spill] sm:$0xff] %v9798_v15  ;;  %v9801_v37 = vadd.f32 %v8136_v33, %v9624_v25  ;;  %v9804_v41 = vadd.f32 %v8184_v31, %v9628_v21 }
 0x14a   : > { %v9806_v11 = vpop.f32.mrf.mxu1  ;;  %v9808_v13 = vpop.f32.mrf.mxu0 }
 0x14b   : > { %13922 = vst [vmem:[#allocation130_spill] sm:$0xff] %v9801_v37  ;;  %13923 = vst [vmem:[#allocation131_spill] sm:$0xff] %v9804_v41 }
 0x14c   : > { %13924 = vst [vmem:[#allocation132_spill] sm:$0xff] %v9806_v11  ;;  %13925 = vst [vmem:[#allocation133_spill] sm:$0xff] %v9808_v13  ;;  %v8203_v51 = vpop.f32.mrf.mxu1  ;;  %v8251_v53 = vpop.f32.mrf.mxu0 }
 0x14d   : > { %v9818_v37 = vmax.f32 %v8203_v51, 0.0  ;;  %v9820_v13 = vmax.f32 %v8251_v53, 0.0 }
 0x14e   : > { %v1439_v9 = vpop.f32.mrf.mxu1  ;;  %v1680_v58 = vpop.f32.mrf.mxu0 }
 0x14f   : > { %v9810_v17 = vmax.f32 %v1439_v9, 0.0  ;;  %v9812_v60 = vmax.f32 %v1680_v58, 0.0 }
 0x150   : > { %v8204_v23 = vpop.f32.mrf.mxu1  ;;  %v8252_v55 = vpop.f32.mrf.mxu0 }
 0x151   : > { %13926 = vst [vmem:[#allocation134_spill] sm:$0xff] %v9812_v60 }
 0x152   : > { %v1442_v47 = vpop.f32.mrf.mxu1  ;;  %v1683_v15 = vpop.f32.mrf.mxu0 }
 0x153   : > { %v9814_v33 = vmax.f32 %v1442_v47, 0.0  ;;  %v9816_v31 = vmax.f32 %v1683_v15, 0.0  ;;  %v9830_v15 = vmax.f32 %v8204_v23, 0.0  ;;  %v9832_v47 = vmax.f32 %v8252_v55, 0.0 }
 0x154   : > { %v8207_v41 = vpop.f32.mrf.mxu1  ;;  %v8255_v21 = vpop.f32.mrf.mxu0 }
 0x155   : > { %13927 = vst [vmem:[#allocation135_spill] sm:$0xff] %v9816_v31  ;;  %v1839_v11 = vadd.f32 %v9814_v33, %v9810_v17  ;;  %v1876_v25 = vadd.f32 %v9816_v31, %v9812_v60  ;;  %v9828_v58 = vpack.c.bf16 %v9816_v31, %v9812_v60 }
 0x156   : > { %v1455_v9 = vpop.f32.mrf.mxu1  ;;  %v1696_v18 = vpop.f32.mrf.mxu0 }
 0x157   : > { %v1840_v51 = vadd.f32 %v1839_v11, %v9818_v37  ;;  %v1877_v53 = vadd.f32 %v1876_v25, %v9820_v13  ;;  %2329 = vmatprep.mubr.bf16.mxu1 %v9828_v58  ;;  %v9837_v4 = vmax.f32 %v1455_v9, 0.0  ;;  %v9840_v16 = vmax.f32 %v1696_v18, 0.0 }
 0x158   : > { %v8208_v40 = vpop.f32.mrf.mxu1  ;;  %v8256_v6 = vpop.f32.mrf.mxu0  ;;  %v9849_v9 = vmax.f32 %v8207_v41, 0.0  ;;  %v9852_v18 = vmax.f32 %v8255_v21, 0.0 }
 0x159   : > { %v1841_v44 = vadd.f32 %v1840_v51, %v9830_v15  ;;  %v1878_v56 = vadd.f32 %v1877_v53, %v9832_v47  ;;  %v9855_v7 = vmax.f32 %v8208_v40, 0.0 }
 0x15a   : > { %v1458_v23 = vpop.f32.mrf.mxu1  ;;  %v1699_v48 = vpop.f32.mrf.mxu0  ;;  %13928 = vst [vmem:[#allocation136_spill] sm:$0xff] %v9849_v9  ;;  %13929 = vst [vmem:[#allocation137_spill] sm:$0xff] %v9852_v18 }
 0x15b   : > { %v1842_v55 = vadd.f32 %v1841_v44, %v9837_v4  ;;  %v1879_v11 = vadd.f32 %v1878_v56, %v9840_v16  ;;  %v9845_v43 = vmax.f32 %v1458_v23, 0.0  ;;  %v9847_v25 = vmax.f32 %v1699_v48, 0.0  ;;  %13930 = vst [vmem:[#allocation138_spill] sm:$0xff] %v9855_v7 }
 0x15c   : > { %v8211_v3 = vpop.f32.mrf.mxu1  ;;  %v8259_v24 = vpop.f32.mrf.mxu0  ;;  %v9858_v44 = vmax.f32 %v8256_v6, 0.0 }
 0x15d   : > { %v1843_v51 = vadd.f32 %v1842_v55, %v9845_v43  ;;  %v1880_v53 = vadd.f32 %v1879_v11, %v9847_v25 }
 0x15e   : > { %v1471_v20 = vpop.f32.mrf.mxu1  ;;  %v1712_v46 = vpop.f32.mrf.mxu0  ;;  %13931 = vst [vmem:[#allocation139_spill] sm:$0xff] %v9858_v44 }
 0x15f   : > { %v1844_v56 = vadd.f32 %v1843_v51, %v9849_v9  ;;  %v1881_v48 = vadd.f32 %v1880_v53, %v9852_v18  ;;  %v9861_v41 = vmax.f32 %v1471_v20, 0.0  ;;  %v9864_v21 = vmax.f32 %v1712_v46, 0.0 }
 0x160   : > { %v8212_v23 = vpop.f32.mrf.mxu1  ;;  %v8260_v0 = vpop.f32.mrf.mxu0  ;;  %v9873_v20 = vmax.f32 %v8211_v3, 0.0  ;;  %v9876_v46 = vmax.f32 %v8259_v24, 0.0 }
 0x161   : > { %13932 = vst [vmem:[#allocation140_spill] sm:$0xff] %v9861_v41  ;;  %v1845_v55 = vadd.f32 %v1844_v56, %v9855_v7  ;;  %13933 = vst [vmem:[#allocation141_spill] sm:$0xff] %v9864_v21  ;;  %v1882_v11 = vadd.f32 %v1881_v48, %v9858_v44  ;;  %v9879_v2 = vmax.f32 %v8212_v23, 0.0 }
 0x162   : > { %v1474_v62 = vpop.f32.mrf.mxu1  ;;  %v1715_v27 = vpop.f32.mrf.mxu0  ;;  %13936 = vst [vmem:[#allocation144_spill] sm:$0xff] %v9873_v20  ;;  %13937 = vst [vmem:[#allocation145_spill] sm:$0xff] %v9876_v46 }
 0x163   : > { %v1846_v40 = vadd.f32 %v1845_v55, %v9861_v41  ;;  %v9868_v59 = vmax.f32 %v1474_v62, 0.0  ;;  %v9870_v6 = vmax.f32 %v1715_v27, 0.0  ;;  %v1883_v51 = vadd.f32 %v1882_v11, %v9864_v21  ;;  %13938 = vst [vmem:[#allocation146_spill] sm:$0xff] %v9879_v2 }
 0x164   : > { %v8215_v53 = vpop.f32.mrf.mxu1  ;;  %v8263_v38 = vpop.f32.mrf.mxu0  ;;  %v9882_v27 = vmax.f32 %v8260_v0, 0.0  ;;  %v9964_v1 = vpack.c.bf16 %v9879_v2, %v9873_v20 }
 0x165   : > { %13934 = vst [vmem:[#allocation142_spill] sm:$0xff] %v9868_v59  ;;  %13935 = vst [vmem:[#allocation143_spill] sm:$0xff] %v9870_v6  ;;  %v1847_v56 = vadd.f32 %v1846_v40, %v9868_v59  ;;  %v1884_v48 = vadd.f32 %v1883_v51, %v9870_v6  ;;  %v9885_v11 = vmax.f32 %v8263_v38, 0.0  ;;  %v9894_v23 = vmax.f32 %v8215_v53, 0.0 }
 0x166   : > { %v1487_v36 = vpop.f32.mrf.mxu1  ;;  %v1728_v34 = vpop.f32.mrf.mxu0  ;;  %13939 = vst [vmem:[#allocation147_spill] sm:$0xff] %v9882_v27  ;;  %13947 = vst [vmem:[#allocation155_spill] sm:$0xff] %v9964_v1 }
 0x167   : > { %v1848_v62 = vadd.f32 %v1847_v56, %v9873_v20  ;;  %v1885_v55 = vadd.f32 %v1884_v48, %v9876_v46  ;;  %v9887_v10 = vmax.f32 %v1487_v36, 0.0  ;;  %v9896_v45 = vmax.f32 %v1728_v34, 0.0 }
 0x168   : > { %v8216_v3 = vpop.f32.mrf.mxu1  ;;  %v8264_v12 = vpop.f32.mrf.mxu0  ;;  %v10052_v20 = vpack.c.bf16 %v9855_v7, %v9849_v9 }
 0x169   : > { %v1849_v24 = vadd.f32 %v1848_v62, %v9879_v2  ;;  %v9890_v40 = vmax.f32 %v8216_v3, 0.0  ;;  %v9892_v51 = vmax.f32 %v8264_v12, 0.0  ;;  %v1886_v0 = vadd.f32 %v1885_v55, %v9882_v27 }
 0x16a   : > { %v1490_v56 = vpop.f32.mrf.mxu1  ;;  %v1731_v48 = vpop.f32.mrf.mxu0  ;;  %13959 = vst [vmem:[#allocation167_spill] sm:$0xff] %v10052_v20  ;;  %v10082_v2 = vpack.c.bf16 %v9845_v43, %v9837_v4 }
 0x16b   : > { %v1850_v38 = vadd.f32 %v1849_v24, %v9887_v10  ;;  %v9902_v36 = vpack.c.bf16 %v9892_v51, %v9885_v11  ;;  %v9904_v19 = vmax.f32 %v1490_v56, 0.0  ;;  %v9906_v62 = vmax.f32 %v1731_v48, 0.0 }
 0x16c   : > { %v1887_v12 = vadd.f32 %v1886_v0, %v9896_v45  ;;  %v8219_v53 = vpop.f32.mrf.mxu1  ;;  %v8267_v3 = vpop.f32.mrf.mxu0  ;;  %v9911_v34 = vpack.c.bf16 %v9890_v40, %v9894_v23  ;;  %13961 = vst [vmem:[#allocation169_spill] sm:$0xff] %v10082_v2 }
 0x16d   : > { %13940 = vst [vmem:[#allocation148_spill] sm:$0xff] %v9902_v36  ;;  %v1851_v55 = vadd.f32 %v1850_v38, %v9904_v19  ;;  %v9918_v56 = vpack.c.bf16 %v9904_v19, %v9887_v10  ;;  %v9923_v54 = vmax.f32 %v8267_v3, 0.0  ;;  %v9933_v61 = vmax.f32 %v8219_v53, 0.0 }
 0x16e   : > { %13941 = vst [vmem:[#allocation149_spill] sm:$0xff] %v9911_v34  ;;  %v1888_v24 = vadd.f32 %v1887_v12, %v9906_v62  ;;  %2297 = vmatprep.subr.bf16.mxu1 %v9911_v34  ;;  %v1503_v52 = vpop.f32.mrf.mxu1  ;;  %v1744_v50 = vpop.f32.mrf.mxu0 }
 0x16f   : > { %13942 = vst [vmem:[#allocation150_spill] sm:$0xff] %v9918_v56  ;;  %v1852_v0 = vadd.f32 %v1851_v55, %v9894_v23  ;;  %2298 = vmatpush1.bf16.xpose.msra.mxu1 %v9902_v36  ;;  %v9926_v26 = vmax.f32 %v1503_v52, 0.0  ;;  %v9935_v55 = vmax.f32 %v1744_v50, 0.0 }
 0x170   : > { %v1889_v48 = vadd.f32 %v1888_v24, %v9885_v11  ;;  %2299 = vmatprep.subr.bf16.mxu1 %v9918_v56  ;;  %v8220_v38 = vpop.f32.mrf.mxu1  ;;  %v8268_v12 = vpop.f32.mrf.mxu0 }
 0x171   : > { %v1853_v32 = vadd.f32 %v1852_v0, %v9890_v40  ;;  %v9929_v30 = vmax.f32 %v8220_v38, 0.0  ;;  %v9931_v29 = vmax.f32 %v8268_v12, 0.0 }
 0x172   : > { %v1890_v24 = vadd.f32 %v1889_v48, %v9892_v51  ;;  %v1506_v3 = vpop.f32.mrf.mxu1  ;;  %v1747_v14 = vpop.f32.mrf.mxu0  ;;  %v9954_v48 = vpack.c.bf16 %v9906_v62, %v9896_v45 }
 0x173   : > { %v1854_v39 = vadd.f32 %v1853_v32, %v9926_v26  ;;  %v9941_v52 = vpack.c.bf16 %v9931_v29, %v9923_v54  ;;  %v9943_v5 = vmax.f32 %v1506_v3, 0.0  ;;  %v9945_v0 = vmax.f32 %v1747_v14, 0.0 }
 0x174   : > { %v1891_v38 = vadd.f32 %v1890_v24, %v9935_v55  ;;  %v8223_v53 = vpop.f32.mrf.mxu1  ;;  %v8271_v12 = vpop.f32.mrf.mxu0  ;;  %v9950_v50 = vpack.c.bf16 %v9929_v30, %v9933_v61  ;;  %13945 = vst [vmem:[#allocation153_spill] sm:$0xff] %v9954_v48 }
 0x175   : > { %13943 = vst [vmem:[#allocation151_spill] sm:$0xff] %v9941_v52  ;;  %v1855_v32 = vadd.f32 %v1854_v39, %v9943_v5  ;;  %v9959_v3 = vpack.c.bf16 %v9945_v0, %v9935_v55  ;;  %v9968_v8 = vpack.c.bf16 %v9943_v5, %v9926_v26  ;;  %v9973_v35 = vmax.f32 %v8271_v12, 0.0 }
 0x176   : > { %13944 = vst [vmem:[#allocation152_spill] sm:$0xff] %v9950_v50  ;;  %v1892_v14 = vadd.f32 %v1891_v38, %v9945_v0  ;;  %v1519_v22 = vpop.f32.mrf.mxu1  ;;  %v1760_v24 = vpop.f32.mrf.mxu0  ;;  %v9983_v36 = vmax.f32 %v8223_v53, 0.0 }
 0x177   : > { %13946 = vst [vmem:[#allocation154_spill] sm:$0xff] %v9959_v3  ;;  %13948 = vst [vmem:[#allocation156_spill] sm:$0xff] %v9968_v8  ;;  %v1856_v63 = vadd.f32 %v1855_v32, %v9933_v61  ;;  %2300 = vmatpush1.bf16.xpose.msra.mxu1 %v9954_v48  ;;  %v9976_v49 = vmax.f32 %v1519_v22, 0.0  ;;  %v9985_v32 = vmax.f32 %v1760_v24, 0.0 }
 0x178   : > { %v1893_v39 = vadd.f32 %v1892_v14, %v9923_v54  ;;  %2301 = vmatprep.subr.bf16.mxu1 %v9964_v1  ;;  %v8224_v38 = vpop.f32.mrf.mxu1  ;;  %v8272_v57 = vpop.f32.mrf.mxu0  ;;  %v10014_v1 = vpack.c.bf16 %v9868_v59, %v9861_v41 }
 0x179   : > { %v1857_v42 = vadd.f32 %v1856_v63, %v9929_v30  ;;  %v9979_v28 = vmax.f32 %v8224_v38, 0.0  ;;  %v9981_v34 = vmax.f32 %v8272_v57, 0.0 }
 0x17a   : > { %v1894_v14 = vadd.f32 %v1893_v39, %v9931_v29  ;;  %v1522_v12 = vpop.f32.mrf.mxu1  ;;  %v1763_v56 = vpop.f32.mrf.mxu0  ;;  %v10004_v39 = vpack.c.bf16 %v9882_v27, %v9876_v46  ;;  %13953 = vst [vmem:[#allocation161_spill] sm:$0xff] %v10014_v1 }
 0x17b   : > { %v1858_v60 = vadd.f32 %v1857_v42, %v9976_v49  ;;  %v9991_v22 = vpack.c.bf16 %v9981_v34, %v9973_v35  ;;  %v9993_v31 = vmax.f32 %v1522_v12, 0.0  ;;  %v9995_v63 = vmax.f32 %v1763_v56, 0.0 }
 0x17c   : > { %v1895_v57 = vadd.f32 %v1894_v14, %v9985_v32  ;;  %v8227_v53 = vpop.f32.mrf.mxu1  ;;  %v8275_v38 = vpop.f32.mrf.mxu0  ;;  %v10000_v24 = vpack.c.bf16 %v9979_v28, %v9983_v36  ;;  %13951 = vst [vmem:[#allocation159_spill] sm:$0xff] %v10004_v39 }
 0x17d   : > { %13949 = vst [vmem:[#allocation157_spill] sm:$0xff] %v9991_v22  ;;  %v1859_v42 = vadd.f32 %v1858_v60, %v9993_v31  ;;  %v10009_v12 = vpack.c.bf16 %v9995_v63, %v9985_v32  ;;  %v10018_v3 = vpack.c.bf16 %v9993_v31, %v9976_v49 }
 0x17e   : > { %13950 = vst [vmem:[#allocation158_spill] sm:$0xff] %v10000_v24  ;;  %v1896_v56 = vadd.f32 %v1895_v57, %v9995_v63  ;;  %v1535_v48 = vpop.f32.mrf.mxu1  ;;  %v1776_v14 = vpop.f32.mrf.mxu0 }
 0x17f   : > { %13952 = vst [vmem:[#allocation160_spill] sm:$0xff] %v10009_v12  ;;  %13954 = vst [vmem:[#allocation162_spill] sm:$0xff] %v10018_v3  ;;  %v1860_v8 = vadd.f32 %v1859_v42, %v9983_v36  ;;  %2302 = vmatpush1.bf16.xpose.msra.mxu1 %v10004_v39  ;;  %v10024_v50 = vmax.f32 %v1535_v48, 0.0  ;;  %v10027_v41 = vmax.f32 %v1776_v14, 0.0  ;;  %v10038_v48 = vpack.c.bf16 %v9870_v6, %v9864_v21 }
 0x180   : > { %v1897_v60 = vadd.f32 %v1896_v56, %v9973_v35  ;;  %2303 = vmatprep.subr.bf16.mxu1 %v10014_v1  ;;  %v8228_v52 = vpop.f32.mrf.mxu1  ;;  %v8276_v57 = vpop.f32.mrf.mxu0 }
 0x181   : > { %v1861_v12 = vadd.f32 %v1860_v8, %v9979_v28  ;;  %13955 = vst [vmem:[#allocation163_spill] sm:$0xff] %v10027_v41  ;;  %13957 = vst [vmem:[#allocation165_spill] sm:$0xff] %v10038_v48  ;;  %v10040_v8 = vmax.f32 %v8227_v53, 0.0  ;;  %v10054_v21 = vmax.f32 %v8228_v52, 0.0 }
 0x182   : > { %v1898_v59 = vadd.f32 %v1897_v60, %v9981_v34  ;;  %v1538_v22 = vpop.f32.mrf.mxu1  ;;  %v1779_v3 = vpop.f32.mrf.mxu0 }
 0x183   : > { %v1862_v42 = vadd.f32 %v1861_v12, %v10024_v50  ;;  %v10031_v46 = vmax.f32 %v1538_v22, 0.0  ;;  %v10033_v39 = vmax.f32 %v1779_v3, 0.0  ;;  %v10047_v22 = vmax.f32 %v8275_v38, 0.0 }
 0x184   : > { %v1899_v56 = vadd.f32 %v1898_v59, %v10027_v41  ;;  %v8231_v1 = vpop.f32.mrf.mxu1  ;;  %v8279_v27 = vpop.f32.mrf.mxu0 }
 0x185   : > { %13956 = vst [vmem:[#allocation164_spill] sm:$0xff] %v10033_v39  ;;  %v1863_v14 = vadd.f32 %v1862_v42, %v10031_v46  ;;  %v10045_v60 = vpack.c.bf16 %v10033_v39, %v10027_v41  ;;  %v10058_v42 = vmax.f32 %v8276_v57, 0.0 }
 0x186   : > { %v1900_v3 = vadd.f32 %v1899_v56, %v10033_v39  ;;  %v1551_v12 = vpop.f32.mrf.mxu1  ;;  %v1792_v59 = vpop.f32.mrf.mxu0 }
 0x187   : > { %13958 = vst [vmem:[#allocation166_spill] sm:$0xff] %v10045_v60  ;;  %v1864_v53 = vadd.f32 %v1863_v14, %v10040_v8  ;;  %2304 = vmatpush1.bf16.xpose.msra.mxu1 %v10038_v48  ;;  %v10062_v41 = vmax.f32 %v1551_v12, 0.0  ;;  %v10065_v9 = vmax.f32 %v1792_v59, 0.0  ;;  %v10076_v12 = vpack.c.bf16 %v9858_v44, %v9852_v18 }
 0x188   : > { %v1901_v6 = vadd.f32 %v1900_v3, %v10047_v22  ;;  %2305 = vmatprep.subr.bf16.mxu1 %v10052_v20  ;;  %v8232_v38 = vpop.f32.mrf.mxu1  ;;  %v8280_v56 = vpop.f32.mrf.mxu0  ;;  %v1596_v20 = vmax.f32 %v8231_v1, 0.0 }
 0x189   : > { %v1865_v39 = vadd.f32 %v1864_v53, %v10054_v21  ;;  %13960 = vst [vmem:[#allocation168_spill] sm:$0xff] %v10076_v12  ;;  %v1837_v53 = vmax.f32 %v8279_v27, 0.0  ;;  %v10088_v27 = vpack.c.bf16 %v9847_v25, %v9840_v16 }
 0x18a   : > { %v1902_v52 = vadd.f32 %v1901_v6, %v10058_v42  ;;  %v1554_v7 = vpop.f32.mrf.mxu1  ;;  %v1795_v14 = vpop.f32.mrf.mxu0 }
 0x18b   : > { %v1866_v48 = vadd.f32 %v1865_v39, %v10062_v41  ;;  %v10069_v57 = vmax.f32 %v1554_v7, 0.0  ;;  %v10071_v24 = vmax.f32 %v1795_v14, 0.0  ;;  %v1597_v7 = vmax.f32 %v8232_v38, 0.0 }
 0x18c   : > { %v1903_v3 = vadd.f32 %v1902_v52, %v10065_v9  ;;  %v1838_v14 = vmax.f32 %v8280_v56, 0.0  ;;  %v10092_v38 = vpack.c.bf16 %v9830_v15, %v9818_v37 }
 0x18d   : > { %v1867_v59 = vadd.f32 %v1866_v48, %v10069_v57 }
 0x18e   : > { %v1904_v6 = vadd.f32 %v1903_v3, %v10071_v24 }
 0x18f   : > { %v1868_v39 = vadd.f32 %v1867_v59, %v1596_v20  ;;  %2306 = vmatpush1.bf16.xpose.msra.mxu1 %v10076_v12 }
 0x190   : > { %v1905_v52 = vadd.f32 %v1904_v6, %v1837_v53  ;;  %2307 = vmatprep.subr.bf16.mxu1 %v10082_v2  ;;  %v10098_v2 = vpack.c.bf16 %v9832_v47, %v9820_v13 }
 0x191   : > { %v1869_v18 = vadd.f32 %v1868_v39, %v1597_v7 }
 0x192   : > { %v1906_v44 = vadd.f32 %v1905_v52, %v1838_v14 }
 0x193   : > { %v1870_v1 = vrot.slane %v1869_v18, 4 }
 0x194   : > { %v1907_v60 = vrot.slane %v1906_v44, 4 }
 0x195   : > { %v1871_v48 = vadd.f32 %v1870_v1, %v1869_v18 }
 0x196   : > { %v1908_v3 = vadd.f32 %v1907_v60, %v1906_v44  ;;  %v10106_v60 = vpack.c.bf16 %v9814_v33, %v9810_v17 }
 0x197   : > { %v1872_v59 = vrot.slane %v1871_v48, 2  ;;  %2308 = vmatpush1.bf16.xpose.msra.mxu1 %v10088_v27 }
 0x198   : > { %v1909_v56 = vrot.slane %v1908_v3, 2  ;;  %2309 = vmatprep.subr.bf16.mxu1 %v10092_v38 }
 0x199   : > { %v1873_v6 = vadd.f32 %v1872_v59, %v1871_v48 }
 0x19a   : > { %v1910_v39 = vadd.f32 %v1909_v56, %v1908_v3 }
 0x19b   : > { %v1874_v52 = vrot.slane %v1873_v6, 1 }
 0x19c   : > { %v1911_v12 = vrot.slane %v1910_v39, 1 }
 0x19d   : > { %v10100_v18 = vadd.f32 %v1874_v52, %v1873_v6 }
 0x19e   : > { %v10102_v44 = vadd.f32 %v1911_v12, %v1910_v39  ;;  %v10114_v12 = vpack.c.bf16 %v1597_v7, %v1596_v20 }
 0x19f   : > { %2310 = vmatpush1.bf16.xpose.msra.mxu1 %v10098_v2  ;;  %v2039_v1 = vmul.f32 %v10100_v18, %v1837_v53  ;;  %v2040_v3 = vmul.f32 %v10100_v18, %v1838_v14  ;;  %v10129_v52 = vmul.f32 %v10100_v18, %v9981_v34  ;;  %v10166_v34 = vmul.f32 %v10100_v18, %v9931_v29 }
 0x1a0   : > { %2311 = vmatprep.subr.bf16.mxu1 %v10106_v60  ;;  %v1943_v48 = vmul.f32 %v10102_v44, %v1596_v20  ;;  %v1944_v59 = vmul.f32 %v10102_v44, %v1597_v7  ;;  %v1928_v56 = vmul.f32 %v10102_v44, %v9890_v40  ;;  %v10121_v6 = vmul.f32 %v10102_v44, %v9979_v28 }
 0x1a1   : > { %2101 = vadd.xlane.f32.xlu1 %v2039_v1  ;;  %v10125_v39 = vmul.f32 %v10102_v44, %v9983_v36  ;;  %v10133_v20 = vmul.f32 %v10100_v18, %v9973_v35  ;;  %v10140_v28 = vmul.f32 %v10102_v44, %v9993_v31  ;;  %v10144_v40 = vmul.f32 %v10102_v44, %v9976_v49 }
 0x1a2   : > { %2005 = vadd.xlane.f32.xlu0 %v1943_v48  ;;  %v10148_v36 = vmul.f32 %v10100_v18, %v9995_v63  ;;  %v10152_v35 = vmul.f32 %v10100_v18, %v9985_v32  ;;  %v10158_v31 = vmul.f32 %v10102_v44, %v9929_v30  ;;  %v10162_v49 = vmul.f32 %v10102_v44, %v9933_v61  ;;  %v13962_v48 = vld [vmem:[#allocation166_spill] sm:$0xff] }
 0x1a3   : > { %v10170_v32 = vmul.f32 %v10100_v18, %v9923_v54  ;;  %v10172_v63 = vpack.c.bf16 %v1838_v14, %v1837_v53  ;;  %v10178_v30 = vmul.f32 %v10102_v44, %v9943_v5  ;;  %v10182_v61 = vmul.f32 %v10102_v44, %v9926_v26 }
 0x1a4   : > { %v10186_v29 = vmul.f32 %v10100_v18, %v9945_v0  ;;  %v10190_v54 = vmul.f32 %v10100_v18, %v9935_v55  ;;  %v1942_v5 = vmul.f32 %v10102_v44, %v10069_v57  ;;  %v1941_v26 = vmul.f32 %v10102_v44, %v10062_v41 }
 0x1a5   : > { %2103 = vadd.xlane.f32.xlu1 %v2040_v3  ;;  %v2038_v55 = vmul.f32 %v10100_v18, %v10071_v24  ;;  %v2037_v0 = vmul.f32 %v10100_v18, %v10065_v9  ;;  %v10208_v53 = vpack.c.bf16 %v10071_v24, %v10065_v9  ;;  %v1925_v7 = vmul.f32 %v10102_v44, %v9887_v10  ;;  %v13963_v3 = vld [vmem:[#allocation146_spill] sm:$0xff] }
 0x1a6   : > { %2007 = vadd.xlane.f32.xlu0 %v1944_v59  ;;  %v2022_v9 = vmul.f32 %v10100_v18, %v9906_v62  ;;  %v2021_v24 = vmul.f32 %v10100_v18, %v9896_v45  ;;  %v10226_v14 = vpack.c.bf16 %v10058_v42, %v10047_v22  ;;  %v1940_v10 = vmul.f32 %v10102_v44, %v10054_v21  ;;  %v13964_v59 = vld [vmem:[#allocation158_spill] sm:$0xff] }
 0x1a7   : > { %2312 = vmatpush1.bf16.xpose.msra.mxu1 %v9828_v58  ;;  %v1927_v58 = vmul.f32 %v10102_v44, %v9894_v23  ;;  %v2024_v23 = vmul.f32 %v10100_v18, %v9892_v51  ;;  %v2023_v51 = vmul.f32 %v10100_v18, %v9885_v11  ;;  %v10194_v11 = vpack.c.bf16 %v10069_v57, %v10062_v41 }
 0x1a8   : > { %2313 = vmatprep.subr.bf16.mxu1 %v10114_v12  ;;  %v10212_v57 = vpack.c.bf16 %v10054_v21, %v10040_v8  ;;  %v1926_v41 = vmul.f32 %v10102_v44, %v9904_v19  ;;  %v10230_v19 = vpack.c.bf16 %v10031_v46, %v10024_v50  ;;  %v1939_v45 = vmul.f32 %v10102_v44, %v10040_v8 }
 0x1a9   : > { %1975 = vadd.xlane.f32.xlu1 %v1928_v56  ;;  %v2036_v62 = vmul.f32 %v10100_v18, %v10058_v42  ;;  %v2035_v1 = vmul.f32 %v10100_v18, %v10047_v22  ;;  %v1924_v21 = vmul.f32 %v10102_v44, %v13963_v3  ;;  %v13965_v56 = vld [vmem:[#allocation144_spill] sm:$0xff] }
 0x1aa   : > { %1973 = vadd.xlane.f32.xlu0 %v1927_v58  ;;  %v1923_v8 = vmul.f32 %v10102_v44, %v13965_v56  ;;  %v13966_v58 = vld [vmem:[#allocation147_spill] sm:$0xff] }
 0x1ab   : > { %v2020_v42 = vmul.f32 %v10100_v18, %v13966_v58  ;;  %v13979_v58 = vld [vmem:[#allocation156_spill] sm:$0xff] }
 0x1ad   : > { %2071 = vadd.xlane.f32.xlu1 %v2024_v23  ;;  %v13967_v23 = vld [vmem:[#allocation145_spill] sm:$0xff] }
 0x1ae   : > { %2069 = vadd.xlane.f32.xlu0 %v2023_v51  ;;  %v2019_v22 = vmul.f32 %v10100_v18, %v13967_v23  ;;  %v13968_v51 = vld [vmem:[#allocation157_spill] sm:$0xff]  ;;  %v13981_v23 = vld [vmem:[#allocation138_spill] sm:$0xff] }
 0x1af   : > { %2314 = vmatpush2.bf16.xpose.msra.mxu1 %v10172_v63 }
 0x1b0   : > { %2315 = vmatprep.subr.bf16.mxu1 %v10194_v11 }
 0x1b1   : > { %2003 = vadd.xlane.f32.xlu1 %v1942_v5  ;;  %v1938_v5 = vmul.f32 %v10102_v44, %v10031_v46 }
 0x1b2   : > { %2001 = vadd.xlane.f32.xlu0 %v1941_v26  ;;  %v13969_v26 = vld [vmem:[#allocation162_spill] sm:$0xff] }
 0x1b5   : > { %2099 = vadd.xlane.f32.xlu1 %v2038_v55  ;;  %v1937_v55 = vmul.f32 %v10102_v44, %v10024_v50 }
 0x1b6   : > { %2097 = vadd.xlane.f32.xlu0 %v2037_v0  ;;  %v13970_v0 = vld [vmem:[#allocation164_spill] sm:$0xff] }
 0x1b7   : > { %2316 = vmatpush2.bf16.xpose.msra.mxu1 %v10208_v53 }
 0x1b8   : > { %2317 = vmatprep.subr.bf16.mxu1 %v10212_v57 }
 0x1b9   : > { %1971 = vadd.xlane.f32.xlu1 %v1926_v41  ;;  %v2034_v41 = vmul.f32 %v10100_v18, %v13970_v0  ;;  %v9009_v0 = vld [vmem:[%s13573_s3 + $0x38] sm:$0xff]  }
 0x1ba   : > { %1969 = vadd.xlane.f32.xlu0 %v1925_v7  ;;  %v13971_v7 = vld [vmem:[#allocation163_spill] sm:$0xff] }
 0x1bd   : > { %2067 = vadd.xlane.f32.xlu1 %v2022_v9  ;;  %v2033_v9 = vmul.f32 %v10100_v18, %v13971_v7  ;;  %v9011_v7 = vld [vmem:[%s13573_s3 + $0x28] sm:$0xff]  }
 0x1be   : > { %2065 = vadd.xlane.f32.xlu0 %v2021_v24  ;;  %v13972_v24 = vld [vmem:[#allocation160_spill] sm:$0xff] }
 0x1bf   : > { %2318 = vmatpush2.bf16.xpose.msra.mxu1 %v10226_v14 }
 0x1c0   : > { %2319 = vmatprep.subr.bf16.mxu1 %v10230_v19 }
 0x1c1   : > { %1999 = vadd.xlane.f32.xlu1 %v1940_v10  ;;  %v13973_v10 = vld [vmem:[#allocation142_spill] sm:$0xff] }
 0x1c2   : > { %1997 = vadd.xlane.f32.xlu0 %v1939_v45  ;;  %v1922_v46 = vmul.f32 %v10102_v44, %v13973_v10  ;;  %v13974_v45 = vld [vmem:[#allocation152_spill] sm:$0xff]  ;;  %v13990_v10 = vld [vmem:[#allocation159_spill] sm:$0xff] }
 0x1c5   : > { %2095 = vadd.xlane.f32.xlu1 %v2036_v62  ;;  %v13975_v62 = vld [vmem:[#allocation140_spill] sm:$0xff] }
 0x1c6   : > { %2093 = vadd.xlane.f32.xlu0 %v2035_v1  ;;  %v1921_v50 = vmul.f32 %v10102_v44, %v13975_v62  ;;  %v13976_v1 = vld [vmem:[#allocation143_spill] sm:$0xff] }
 0x1c7   : > { %2320 = vmatpush2.bf16.xpose.msra.mxu1 %v13962_v48  ;;  %v2018_v3 = vmul.f32 %v10100_v18, %v13976_v1  ;;  %v13993_v62 = vld [vmem:[#allocation135_spill] sm:$0xff]  ;;  %v13997_v1 = vld [vmem:[#allocation149_spill] sm:$0xff] }
 0x1c8   : > { %2321 = vmatprep.subr.bf16.mxu1 %v13964_v59 }
 0x1c9   : > { %1967 = vadd.xlane.f32.xlu1 %v1924_v21  ;;  %v13977_v21 = vld [vmem:[#allocation141_spill] sm:$0xff] }
 0x1ca   : > { %1965 = vadd.xlane.f32.xlu0 %v1923_v8  ;;  %v2017_v56 = vmul.f32 %v10100_v18, %v13977_v21  ;;  %v13978_v8 = vld [vmem:[#allocation151_spill] sm:$0xff] }
 0x1cd   : > { %2063 = vadd.xlane.f32.xlu1 %v2020_v42  ;;  %v13980_v42 = vld [vmem:[#allocation154_spill] sm:$0xff] }
 0x1ce   : > { %2061 = vadd.xlane.f32.xlu0 %v2019_v22  ;;  %v1920_v22 = vmul.f32 %v10102_v44, %v13981_v23 }
 0x1cf   : > { %2322 = vmatpush2.bf16.xpose.msra.mxu1 %v13968_v51 }
 0x1d0   : > { %2323 = vmatprep.subr.bf16.mxu1 %v13969_v26 }
 0x1d1   : > { %1995 = vadd.xlane.f32.xlu1 %v1938_v5  ;;  %v13982_v5 = vld [vmem:[#allocation136_spill] sm:$0xff] }
 0x1d2   : > { %1993 = vadd.xlane.f32.xlu0 %v1937_v55  ;;  %v1919_v55 = vmul.f32 %v10102_v44, %v13982_v5 }
 0x1d5   : > { %2091 = vadd.xlane.f32.xlu1 %v2034_v41  ;;  %v9010_v41 = vld [vmem:[%s13573_s3 + $0x30] sm:$0xff]  }
 0x1d6   : > { %2089 = vadd.xlane.f32.xlu0 %v2033_v9  ;;  %v1916_v9 = vmul.f32 %v10102_v44, %v9830_v15  ;;  %v13989_v15 = vld [vmem:[#allocation161_spill] sm:$0xff] }
 0x1d7   : > { %2324 = vmatpush2.bf16.xpose.msra.mxu1 %v13972_v24 }
 0x1d8   : > { %2325 = vmatprep.subr.bf16.mxu1 %v13974_v45 }
 0x1d9   : > { %1963 = vadd.xlane.f32.xlu1 %v1922_v46  ;;  %v1913_v46 = vmul.f32 %v10102_v44, %v9810_v17 }
 0x1da   : > { %1961 = vadd.xlane.f32.xlu0 %v1921_v50  ;;  %v13995_v50 = vld [vmem:[#allocation150_spill] sm:$0xff] }
 0x1dd   : > { %2059 = vadd.xlane.f32.xlu1 %v2018_v3 }
 0x1de   : > { %2057 = vadd.xlane.f32.xlu0 %v2017_v56 }
 0x1df   : > { %2326 = vmatpush2.bf16.xpose.msra.mxu1 %v13978_v8 }
 0x1e0   : > { %2327 = vmatprep.subr.bf16.mxu1 %v13979_v58 }
 0x1e1   : > { %1991 = vadd.xlane.f32.xlu1 %v10121_v6  ;;  %v13983_v6 = vld [vmem:[#allocation139_spill] sm:$0xff] }
 0x1e2   : > { %1989 = vadd.xlane.f32.xlu0 %v10125_v39  ;;  %v2016_v39 = vmul.f32 %v10100_v18, %v13983_v6 }
 0x1e5   : > { %2087 = vadd.xlane.f32.xlu1 %v10129_v52  ;;  %v13984_v52 = vld [vmem:[#allocation137_spill] sm:$0xff] }
 0x1e6   : > { %2085 = vadd.xlane.f32.xlu0 %v10133_v20  ;;  %v2015_v20 = vmul.f32 %v10100_v18, %v13984_v52 }
 0x1e7   : > { %2328 = vmatpush2.bf16.xpose.msra.mxu1 %v13980_v42 }
 0x1e8   : > { %8329 = vmatprep.subr.bf16.mxu1 %v9009_v0 }
 0x1e9   : > { %1959 = vadd.xlane.f32.xlu1 %v1920_v22 }
 0x1ea   : > { %1957 = vadd.xlane.f32.xlu0 %v1919_v55 }
 0x1ed   : > { %2055 = vadd.xlane.f32.xlu1 %v2016_v39 }
 0x1ee   : > { %2330 = vmatmul.mubr.bf16.vlgmr.msra.gmra.mxu1 %v10106_v60  ;;  %2053 = vadd.xlane.f32.xlu0 %v2015_v20  ;;  %v1917_v60 = vmul.f32 %v10102_v44, %v9837_v4  ;;  %v13985_v4 = vld [vmem:[#allocation169_spill] sm:$0xff] }
 0x1ef   : > { %2339 = vmatprep.mubr.bf16.mxu1 %v10098_v2  ;;  %8330 = vmatpush3.bf16.msra.mxu1 %v9009_v0  ;;  %v1918_v2 = vmul.f32 %v10102_v44, %v9845_v43  ;;  %v9013_v43 = vld [vmem:[%s13573_s3 + $0x18] sm:$0xff]  }
 0x1f0   : > { %8331 = vmatprep.subr.bf16.mxu1 %v9010_v41 }
 0x1f1   : > { %1987 = vadd.xlane.f32.xlu1 %v10140_v28  ;;  %v9012_v28 = vld [vmem:[%s13573_s3 + $0x20] sm:$0xff]  }
 0x1f2   : > { %1985 = vadd.xlane.f32.xlu0 %v10144_v40  ;;  %v13986_v40 = vld [vmem:[#allocation168_spill] sm:$0xff] }
 0x1f3   : > { %8332 = vmatpush3.bf16.msra.mxu1 %v9010_v41 }
 0x1f4   : > { %8333 = vmatprep.subr.bf16.mxu1 %v9011_v7 }
 0x1f5   : > { %2083 = vadd.xlane.f32.xlu1 %v10148_v36  ;;  %v13987_v36 = vld [vmem:[#allocation167_spill] sm:$0xff] }
 0x1f6   : > { %2340 = vmatmul.mubr.bf16.gmra.mxu1 %v10092_v38  ;;  %2081 = vadd.xlane.f32.xlu0 %v10152_v35  ;;  %v2014_v38 = vmul.f32 %v10100_v18, %v9847_v25  ;;  %v9014_v25 = vld [vmem:[%s13573_s3 + $0x10] sm:$0xff]   ;;  %v13988_v35 = vld [vmem:[#allocation165_spill] sm:$0xff] }
 0x1f7   : > { %2349 = vmatprep.mubr.bf16.mxu1 %v10088_v27  ;;  %8334 = vmatpush3.bf16.msra.mxu1 %v9011_v7  ;;  %v2013_v27 = vmul.f32 %v10100_v18, %v9840_v16  ;;  %v9015_v16 = vld [vmem:[%s13573_s3 + $0x8] sm:$0xff]  }
 0x1f8   : > { %8335 = vmatprep.subr.bf16.mxu1 %v9012_v28 }
 0x1f9   : > { %1955 = vadd.xlane.f32.xlu1 %v1918_v2 }
 0x1fa   : > { %1953 = vadd.xlane.f32.xlu0 %v1917_v60 }
 0x1fb   : > { %8336 = vmatpush3.bf16.msra.mxu1 %v9012_v28  ;;  %v13998_v28 = vld [vmem:[#allocation35_spill] sm:$0xff] }
 0x1fc   : > { %8337 = vmatprep.subr.bf16.mxu1 %v9013_v43 }
 0x1fd   : > { %2051 = vadd.xlane.f32.xlu1 %v2014_v38  ;;  %v13999_v38 = vld [vmem:[#allocation61_spill] sm:$0xff] }
 0x1fe   : > { %2350 = vmatmul.mubr.bf16.gmra.mxu1 %v13985_v4  ;;  %2049 = vadd.xlane.f32.xlu0 %v2013_v27  ;;  %v10378_v27 = vadd.f32 %v13999_v38, %v13998_v28 }
 0x1ff   : > { %2359 = vmatprep.mubr.bf16.mxu1 %v13986_v40  ;;  %8338 = vmatpush3.bf16.msra.mxu1 %v9013_v43  ;;  %v14001_v43 = vld [vmem:[#allocation65_spill] sm:$0xff] }
 0x200   : > { %8339 = vmatprep.subr.bf16.mxu1 %v9014_v25  ;;  %14000 = vst [vmem:[#allocation166_spill] sm:$0xff] %v10378_v27  ;;  %v10382_v4 = vadd.f32 %v14001_v43, %v13998_v28  ;;  %v14013_v43 = vld [vmem:[#allocation62_spill] sm:$0xff] }
 0x201   : > { %1983 = vadd.xlane.f32.xlu1 %v10158_v31  ;;  %v1915_v31 = vmul.f32 %v10102_v44, %v9818_v37  ;;  %v13991_v37 = vld [vmem:[#allocation155_spill] sm:$0xff] }
 0x202   : > { %1981 = vadd.xlane.f32.xlu0 %v10162_v49  ;;  %v9016_v49 = vld [vmem:[%s13573_s3] sm:$0xff]   ;;  %14002 = vst [vmem:[#allocation146_spill] sm:$0xff] %v10382_v4 }
 0x203   : > { %8340 = vmatpush3.bf16.msra.mxu1 %v9014_v25 }
 0x204   : > { %8341 = vmatprep.subr.bf16.mxu1 %v9015_v16 }
 0x205   : > { %2079 = vadd.xlane.f32.xlu1 %v10166_v34  ;;  %v2012_v34 = vmul.f32 %v10100_v18, %v9832_v47  ;;  %v13992_v47 = vld [vmem:[#allocation153_spill] sm:$0xff] }
 0x206   : > { %2360 = vmatmul.mubr.bf16.gmra.mxu1 %v13987_v36  ;;  %2077 = vadd.xlane.f32.xlu0 %v10170_v32  ;;  %v2011_v32 = vmul.f32 %v10100_v18, %v9820_v13  ;;  %v1914_v13 = vmul.f32 %v10102_v44, %v9814_v33 }
 0x207   : > { %2369 = vmatprep.mubr.bf16.mxu1 %v13988_v35  ;;  %8342 = vmatpush3.bf16.msra.mxu1 %v9015_v16 }
 0x208   : > { %8343 = vmatprep.subr.bf16.mxu1 %v9016_v49 }
 0x209   : > { %1951 = vadd.xlane.f32.xlu1 %v1916_v9 }
 0x20a   : > { %1949 = vadd.xlane.f32.xlu0 %v1915_v31 }
 0x20b   : > { %8344 = vmatpush3.bf16.msra.mxu1 %v9016_v49 }
 0x20d   : > { %2047 = vadd.xlane.f32.xlu1 %v2012_v34 }
 0x20e   : > { %2370 = vmatmul.mubr.bf16.gmra.mxu1 %v13989_v15  ;;  %2045 = vadd.xlane.f32.xlu0 %v2011_v32  ;;  %v14003_v15 = vld [vmem:[#allocation64_spill] sm:$0xff] }
 0x20f   : > { %2379 = vmatprep.mubr.bf16.mxu1 %v13990_v10  ;;  %v10397_v10 = vadd.f32 %v14003_v15, %v13998_v28 }
 0x211   : > { %1979 = vadd.xlane.f32.xlu1 %v10178_v30  ;;  %v2010_v30 = vmul.f32 %v10100_v18, %v13993_v62  ;;  %14004 = vst [vmem:[#allocation158_spill] sm:$0xff] %v10397_v10 }
 0x212   : > { %1977 = vadd.xlane.f32.xlu0 %v10182_v61  ;;  %v13994_v61 = vld [vmem:[#allocation134_spill] sm:$0xff] }
 0x215   : > { %2075 = vadd.xlane.f32.xlu1 %v10186_v29  ;;  %v2009_v29 = vmul.f32 %v10100_v18, %v13994_v61 }
 0x216   : > { %2380 = vmatmul.mubr.bf16.gmra.mxu1 %v13991_v37  ;;  %2073 = vadd.xlane.f32.xlu0 %v10190_v54  ;;  %v13996_v54 = vld [vmem:[#allocation148_spill] sm:$0xff] }
 0x217   : > { %2389 = vmatprep.mubr.bf16.mxu1 %v13992_v47 }
 0x219   : > { %1947 = vadd.xlane.f32.xlu1 %v1914_v13  ;;  %v14005_v13 = vld [vmem:[#allocation60_spill] sm:$0xff] }
 0x21a   : > { %1945 = vadd.xlane.f32.xlu0 %v1913_v46  ;;  %v10401_v46 = vadd.f32 %v14005_v13, %v13998_v28 }
 0x21c   : > { %14006 = vst [vmem:[#allocation144_spill] sm:$0xff] %v10401_v46 }
 0x21d   : > { %2043 = vadd.xlane.f32.xlu1 %v2010_v30 }
 0x21e   : > { %2390 = vmatmul.mubr.bf16.gmra.mxu1 %v13995_v50  ;;  %2041 = vadd.xlane.f32.xlu0 %v2009_v29 }
 0x21f   : > { %2399 = vmatprep.mubr.bf16.mxu1 %v13996_v54 }
 0x226   : > { %2400 = vmatmul.mubr.bf16.gmra.mxu1 %v13997_v1 }
 0x227   : > { %2409 = vmatprep.mubr.bf16.mxu1 %v13980_v42 }
 0x22a   : > { %v2102_v33 = vpop.xlane.xlu1 %2101 }
 0x22b   : > { %v2006_v17 = vpop.xlane.xlu0 %2005 }
 0x22c   : > { %v2135_v44 = vadd.f32 %v2102_v33, %v2006_v17 }
 0x22e   : > { %vm2167_vm0 = vcmp.gt.f32.partialorder %v2135_v44, 0.0  ;;  %2410 = vmatmul.mubr.bf16.gmra.mxu1 %v13979_v58  ;;  %v2104_v3 = vpop.xlane.xlu1 %2103 }
 0x22f   : > { %v2199_v21 = vsel %vm2167_vm0, %v2135_v44, 1.0  ;;  %2419 = vmatprep.mubr.bf16.mxu1 %v13978_v8  ;;  %v2008_v18 = vpop.xlane.xlu0 %2007 }
 0x230   : > { %8817 = vrsqrt.f32 %v2199_v21  ;;  %v2136_v56 = vadd.f32 %v2104_v3, %v2008_v18  ;;  %v14007_v21 = vld [vmem:[#allocation69_spill] sm:$0xff] }
 0x231   : > { %v10419_v18 = vadd.f32 %v14007_v21, %v13998_v28 }
 0x232   : > { %vm2168_vm1 = vcmp.gt.f32.partialorder %v2136_v56, 0.0  ;;  %v1976_v23 = vpop.xlane.xlu1 %1975 }
 0x233   : > { %v2200_v22 = vsel %vm2168_vm1, %v2136_v56, 1.0  ;;  %v1974_v5 = vpop.xlane.xlu0 %1973  ;;  %14008 = vst [vmem:[#allocation147_spill] sm:$0xff] %v10419_v18 }
 0x234   : > { %8819 = vrsqrt.f32 %v2200_v22  ;;  %v14009_v22 = vld [vmem:[#allocation63_spill] sm:$0xff] }
 0x236   : > { %2420 = vmatmul.mubr.bf16.gmra.mxu1 %v13974_v45  ;;  %v2072_v42 = vpop.xlane.xlu1 %2071 }
 0x237   : > { %2429 = vmatprep.mubr.bf16.mxu1 %v13972_v24  ;;  %v2120_v58 = vadd.f32 %v2072_v42, %v1976_v23  ;;  %v2070_v55 = vpop.xlane.xlu0 %2069 }
 0x238   : > { %v2119_v0 = vadd.f32 %v2070_v55, %v1974_v5  ;;  %v10423_v5 = vadd.f32 %v14009_v22, %v13998_v28 }
 0x239   : > { %vm2152_vm2 = vcmp.gt.f32.partialorder %v2120_v58, 0.0 }
 0x23a   : > { %v2184_v8 = vsel %vm2152_vm2, %v2120_v58, 1.0  ;;  %vm2151_vm3 = vcmp.gt.f32.partialorder %v2119_v0, 0.0  ;;  %v2004_v6 = vpop.xlane.xlu1 %2003  ;;  %14010 = vst [vmem:[#allocation145_spill] sm:$0xff] %v10423_v5 }
 0x23b   : > { %8821 = vrsqrt.f32 %v2184_v8  ;;  %v2183_v39 = vsel %vm2151_vm3, %v2119_v0, 1.0  ;;  %v2002_v52 = vpop.xlane.xlu0 %2001 }
 0x23c   : > { %8823 = vrsqrt.f32 %v2183_v39 }
 0x23d   : > { %v8818_v20 = vpop.eup %8817 }
 0x23e   : > { %2430 = vmatmul.mubr.bf16.gmra.mxu1 %v13969_v26  ;;  %v2100_v45 = vpop.xlane.xlu1 %2099  ;;  %v10374_v7 = vsel %vm2167_vm0, %v8818_v20, 0.0 }
 0x23f   : > { %2439 = vmatprep.mubr.bf16.mxu1 %v13968_v51  ;;  %v2134_v24 = vadd.f32 %v2100_v45, %v2004_v6  ;;  %v2098_v41 = vpop.xlane.xlu0 %2097  ;;  %v2552_v25 = vmul.f32 %v10374_v7, %v10378_v27 }
 0x240   : > { %v2133_v2 = vadd.f32 %v2098_v41, %v2002_v52  ;;  %v14011_v41 = vld [vmem:[#allocation68_spill] sm:$0xff] }
 0x241   : > { %v8820_v60 = vpop.eup %8819  ;;  %vm2166_vm4 = vcmp.gt.f32.partialorder %v2134_v24, 0.0 }
 0x242   : > { %v10385_v26 = vsel %vm2168_vm1, %v8820_v60, 0.0  ;;  %v2198_v51 = vsel %vm2166_vm4, %v2134_v24, 1.0  ;;  %vm2165_vm5 = vcmp.gt.f32.partialorder %v2133_v2, 0.0  ;;  %v1972_v40 = vpop.xlane.xlu1 %1971 }
 0x243   : > { %v2553_v16 = vmul.f32 %v10385_v26, %v10382_v4  ;;  %8825 = vrsqrt.f32 %v2198_v51  ;;  %v2197_v36 = vsel %vm2165_vm5, %v2133_v2, 1.0  ;;  %v1970_v35 = vpop.xlane.xlu0 %1969  ;;  %v10441_v2 = vadd.f32 %v14011_v41, %v13998_v28  ;;  %v14051_v4 = vld [vmem:[#allocation50_spill] sm:$0xff] }
 0x244   : > { %8827 = vrsqrt.f32 %v2197_v36  ;;  %v10445_v51 = vadd.f32 %v14013_v43, %v13998_v28  ;;  %v10597_v27 = vadd.f32 %v14051_v4, %v13998_v28 }
 0x245   : > { %v2569_v9 = vpack.c.bf16 %v2553_v16, %v2552_v25  ;;  %14012 = vst [vmem:[#allocation157_spill] sm:$0xff] %v10441_v2 }
 0x246   : > { %2440 = vmatmul.mubr.bf16.gmra.mxu1 %v13964_v59  ;;  %v2068_v31 = vpop.xlane.xlu1 %2067  ;;  %14014 = vst [vmem:[#allocation162_spill] sm:$0xff] %v10445_v51  ;;  %14052 = vst [vmem:[#allocation156_spill] sm:$0xff] %v10597_v27 }
 0x247   : > { %2449 = vmatprep.mubr.bf16.mxu1 %v13962_v48  ;;  %7713 = vmatprep.subr.bf16.mxu0 %v2569_v9  ;;  %v2118_v49 = vadd.f32 %v2068_v31, %v1972_v40  ;;  %v2066_v34 = vpop.xlane.xlu0 %2065 }
 0x248   : > { %v8822_v32 = vpop.eup %8821  ;;  %v2117_v37 = vadd.f32 %v2066_v34, %v1970_v35 }
 0x249   : > { %v8824_v47 = vpop.eup %8823  ;;  %v10404_v62 = vsel %vm2152_vm2, %v8822_v32, 0.0  ;;  %vm2150_vm6 = vcmp.gt.f32.partialorder %v2118_v49, 0.0 }
 0x24a   : > { %v2537_v48 = vmul.f32 %v10404_v62, %v10397_v10  ;;  %v10409_v59 = vsel %vm2151_vm3, %v8824_v47, 0.0  ;;  %v2182_v30 = vsel %vm2150_vm6, %v2118_v49, 1.0  ;;  %vm2149_vm7 = vcmp.gt.f32.partialorder %v2117_v37, 0.0  ;;  %v2000_v61 = vpop.xlane.xlu1 %1999 }
 0x24b   : > { %v2536_v29 = vmul.f32 %v10409_v59, %v10401_v46  ;;  %8829 = vrsqrt.f32 %v2182_v30  ;;  %v2181_v50 = vsel %vm2149_vm7, %v2117_v37, 1.0  ;;  %v1998_v54 = vpop.xlane.xlu0 %1997  ;;  %v14015_v37 = vld [vmem:[#allocation57_spill] sm:$0xff] }
 0x24c   : > { %8831 = vrsqrt.f32 %v2181_v50  ;;  %v10463_v47 = vadd.f32 %v14015_v37, %v13998_v28  ;;  %v14017_v30 = vld [vmem:[#allocation53_spill] sm:$0xff] }
 0x24d   : > { %v2561_v1 = vpack.c.bf16 %v2537_v48, %v2536_v29 }
 0x24e   : > { %2450 = vmatmul.mubr.bf16.gmra.mxu1 %v10230_v19  ;;  %v2096_v33 = vpop.xlane.xlu1 %2095  ;;  %14016 = vst [vmem:[#allocation164_spill] sm:$0xff] %v10463_v47 }
 0x24f   : > { %2459 = vmatprep.mubr.bf16.mxu1 %v10226_v14  ;;  %7714 = vmatpush3.bf16.msra.mxu0 %v2561_v1  ;;  %v2132_v17 = vadd.f32 %v2096_v33, %v2000_v61  ;;  %v2094_v44 = vpop.xlane.xlu0 %2093  ;;  %v10467_v61 = vadd.f32 %v14017_v30, %v13998_v28 }
 0x250   : > { %v8826_v3 = vpop.eup %8825  ;;  %v2131_v56 = vadd.f32 %v2094_v44, %v1998_v54 }
 0x251   : > { %v8828_v23 = vpop.eup %8827  ;;  %v10426_v42 = vsel %vm2166_vm4, %v8826_v3, 0.0  ;;  %vm2164_vm8 = vcmp.gt.f32.partialorder %v2132_v17, 0.0  ;;  %14018 = vst [vmem:[#allocation163_spill] sm:$0xff] %v10467_v61 }
 0x252   : > { %v2551_v14 = vmul.f32 %v10426_v42, %v10419_v18  ;;  %v10431_v19 = vsel %vm2165_vm5, %v8828_v23, 0.0  ;;  %v2196_v58 = vsel %vm2164_vm8, %v2132_v17, 1.0  ;;  %vm2163_vm9 = vcmp.gt.f32.partialorder %v2131_v56, 0.0  ;;  %v1968_v55 = vpop.xlane.xlu1 %1967  ;;  %v14019_v23 = vld [vmem:[#allocation2_spill] sm:$0xff] }
 0x253   : > { %v2550_v0 = vmul.f32 %v10431_v19, %v10423_v5  ;;  %8833 = vrsqrt.f32 %v2196_v58  ;;  %v2195_v8 = vsel %vm2163_vm9, %v2131_v56, 1.0  ;;  %v1966_v6 = vpop.xlane.xlu0 %1965 }
 0x254   : > { %8835 = vrsqrt.f32 %v2195_v8  ;;  %v14022_v8 = vld [vmem:[#allocation52_spill] sm:$0xff] }
 0x255   : > { %v2568_v39 = vpack.c.bf16 %v2551_v14, %v2550_v0  ;;  %v14020_v14 = vld [vmem:[#allocation56_spill] sm:$0xff] }
 0x256   : > { %2460 = vmatmul.mubr.bf16.gmra.mxu1 %v10212_v57  ;;  %v2064_v52 = vpop.xlane.xlu1 %2063  ;;  %v10485_v58 = vadd.f32 %v14020_v14, %v13998_v28 }
 0x257   : > { %2469 = vmatprep.mubr.bf16.mxu1 %v10208_v53  ;;  %7715 = vmatprep.subr.bf16.mxu0 %v2568_v39  ;;  %v2116_v20 = vadd.f32 %v2064_v52, %v1968_v55  ;;  %v2062_v45 = vpop.xlane.xlu0 %2061 }
 0x258   : > { %v8830_v24 = vpop.eup %8829  ;;  %v2115_v60 = vadd.f32 %v2062_v45, %v1966_v6  ;;  %14021 = vst [vmem:[#allocation160_spill] sm:$0xff] %v10485_v58  ;;  %v10489_v6 = vadd.f32 %v14022_v8, %v13998_v28 }
 0x259   : > { %v8832_v38 = vpop.eup %8831  ;;  %v10448_v40 = vsel %vm2150_vm6, %v8830_v24, 0.0  ;;  %vm2148_vm10 = vcmp.gt.f32.partialorder %v2116_v20, 0.0 }
 0x25a   : > { %v2535_v53 = vmul.f32 %v10448_v40, %v10441_v2  ;;  %v10453_v57 = vsel %vm2149_vm7, %v8832_v38, 0.0  ;;  %v2180_v25 = vsel %vm2148_vm10, %v2116_v20, 1.0  ;;  %vm2147_vm11 = vcmp.gt.f32.partialorder %v2115_v60, 0.0  ;;  %v1996_v16 = vpop.xlane.xlu1 %1995  ;;  %14023 = vst [vmem:[#allocation142_spill] sm:$0xff] %v10489_v6 }
 0x25b   : > { %v2534_v36 = vmul.f32 %v10453_v57, %v10445_v51  ;;  %8837 = vrsqrt.f32 %v2180_v25  ;;  %v2179_v35 = vsel %vm2147_vm11, %v2115_v60, 1.0  ;;  %v1994_v9 = vpop.xlane.xlu0 %1993  ;;  %v14024_v25 = vld [vmem:[#allocation4_spill] sm:$0xff] }
 0x25c   : > { %8839 = vrsqrt.f32 %v2179_v35 }
 0x25d   : > { %v2560_v31 = vpack.c.bf16 %v2535_v53, %v2534_v36  ;;  %v14025_v36 = vld [vmem:[#allocation6_spill] sm:$0xff] }
 0x25e   : > { %2470 = vmatmul.mubr.bf16.gmra.mxu1 %v10194_v11  ;;  %v2092_v49 = vpop.xlane.xlu1 %2091 }
 0x25f   : > { %2479 = vmatprep.mubr.bf16.mxu1 %v10172_v63  ;;  %v2130_v34 = vadd.f32 %v2092_v49, %v1996_v16  ;;  %v2090_v32 = vpop.xlane.xlu0 %2089  ;;  %7716 = vmatpush3.bf16.msra.mxu0 %v2560_v31 }
 0x260   : > { %v8834_v15 = vpop.eup %8833  ;;  %v2129_v13 = vadd.f32 %v2090_v32, %v1994_v9  ;;  %v14026_v9 = vld [vmem:[#allocation59_spill] sm:$0xff] }
 0x261   : > { %v8836_v48 = vpop.eup %8835  ;;  %v10470_v29 = vsel %vm2164_vm8, %v8834_v15, 0.0  ;;  %vm2162_vm12 = vcmp.gt.f32.partialorder %v2130_v34, 0.0  ;;  %v10507_v31 = vadd.f32 %v14026_v9, %v13998_v28  ;;  %v14028_v15 = vld [vmem:[#allocation55_spill] sm:$0xff] }
 0x262   : > { %v2549_v63 = vmul.f32 %v10470_v29, %v10463_v47  ;;  %v10475_v11 = vsel %vm2163_vm9, %v8836_v48, 0.0  ;;  %v2194_v50 = vsel %vm2162_vm12, %v2130_v34, 1.0  ;;  %vm2161_vm13 = vcmp.gt.f32.partialorder %v2129_v13, 0.0  ;;  %v1964_v54 = vpop.xlane.xlu1 %1963 }
 0x263   : > { %v2548_v1 = vmul.f32 %v10475_v11, %v10467_v61  ;;  %8841 = vrsqrt.f32 %v2194_v50  ;;  %v2193_v33 = vsel %vm2161_vm13, %v2129_v13, 1.0  ;;  %v1962_v17 = vpop.xlane.xlu0 %1961  ;;  %14027 = vst [vmem:[#allocation152_spill] sm:$0xff] %v10507_v31  ;;  %v10511_v37 = vadd.f32 %v14028_v15, %v13998_v28 }
 0x264   : > { %8843 = vrsqrt.f32 %v2193_v33 }
 0x265   : > { %v2567_v44 = vpack.c.bf16 %v2549_v63, %v2548_v1  ;;  %14029 = vst [vmem:[#allocation140_spill] sm:$0xff] %v10511_v37 }
 0x266   : > { %2480 = vmatmul.mubr.bf16.gmra.mxu1 %v10114_v12  ;;  %v2060_v3 = vpop.xlane.xlu1 %2059 }
 0x267   : > { %v2114_v21 = vadd.f32 %v2060_v3, %v1964_v54  ;;  %v2058_v56 = vpop.xlane.xlu0 %2057  ;;  %7717 = vmatprep.subr.bf16.mxu0 %v2567_v44  ;;  %8345 = vmatprep.mubr.bf16.mxu1 %v14019_v23  ;;  %v14030_v3 = vld [vmem:[#allocation8_spill] sm:$0xff] }
 0x268   : > { %v8838_v22 = vpop.eup %8837  ;;  %v2113_v55 = vadd.f32 %v2058_v56, %v1962_v17 }
 0x269   : > { %v8840_v0 = vpop.eup %8839  ;;  %v10492_v39 = vsel %vm2148_vm10, %v8838_v22, 0.0  ;;  %vm2146_vm14 = vcmp.gt.f32.partialorder %v2114_v21, 0.0  ;;  %v14031_v22 = vld [vmem:[#allocation10_spill] sm:$0xff] }
 0x26a   : > { %v2533_v12 = vmul.f32 %v10492_v39, %v10485_v58  ;;  %v10497_v52 = vsel %vm2147_vm11, %v8840_v0, 0.0  ;;  %v2178_v45 = vsel %vm2146_vm14, %v2114_v21, 1.0  ;;  %vm2145_vm15 = vcmp.gt.f32.partialorder %v2113_v55, 0.0  ;;  %v1992_v24 = vpop.xlane.xlu1 %1991  ;;  %v14032_v0 = vld [vmem:[#allocation58_spill] sm:$0xff] }
 0x26b   : > { %v2532_v41 = vmul.f32 %v10497_v52, %v10489_v6  ;;  %8845 = vrsqrt.f32 %v2178_v45  ;;  %v2177_v38 = vsel %vm2145_vm15, %v2113_v55, 1.0  ;;  %v1990_v20 = vpop.xlane.xlu0 %1989  ;;  %v10529_v8 = vadd.f32 %v14032_v0, %v13998_v28 }
 0x26c   : > { %8847 = vrsqrt.f32 %v2177_v38 }
 0x26d   : > { %v2559_v43 = vpack.c.bf16 %v2533_v12, %v2532_v41  ;;  %14033 = vst [vmem:[#allocation143_spill] sm:$0xff] %v10529_v8 }
 0x26e   : > { %v2088_v53 = vpop.xlane.xlu1 %2087  ;;  %8346 = vmatmul.mubr.bf16.vlgmr.msra.gmra.mxu1 %v14024_v25 }
 0x26f   : > { %v2128_v16 = vadd.f32 %v2088_v53, %v1992_v24  ;;  %v2086_v60 = vpop.xlane.xlu0 %2085  ;;  %7718 = vmatpush3.bf16.msra.mxu0 %v2559_v43  ;;  %8349 = vmatprep.mubr.bf16.mxu1 %v14025_v36  ;;  %v14034_v24 = vld [vmem:[#allocation54_spill] sm:$0xff] }
 0x270   : > { %v8842_v35 = vpop.eup %8841  ;;  %v2127_v49 = vadd.f32 %v2086_v60, %v1990_v20  ;;  %v10533_v41 = vadd.f32 %v14034_v24, %v13998_v28  ;;  %v14039_v24 = vld [vmem:[#allocation45_spill] sm:$0xff] }
 0x271   : > { %v8844_v32 = vpop.eup %8843  ;;  %v10514_v48 = vsel %vm2162_vm12, %v8842_v35, 0.0  ;;  %vm2160_vm0 = vcmp.gt.f32.partialorder %v2128_v16, 0.0 }
 0x272   : > { %v2547_v30 = vmul.f32 %v10514_v48, %v10507_v31  ;;  %v10519_v63 = vsel %vm2161_vm13, %v8844_v32, 0.0  ;;  %v2192_v50 = vsel %vm2160_vm0, %v2128_v16, 1.0  ;;  %vm2159_vm1 = vcmp.gt.f32.partialorder %v2127_v49, 0.0  ;;  %v1960_v54 = vpop.xlane.xlu1 %1959  ;;  %14035 = vst [vmem:[#allocation141_spill] sm:$0xff] %v10533_v41 }
 0x273   : > { %v2546_v1 = vmul.f32 %v10519_v63, %v10511_v37  ;;  %8849 = vrsqrt.f32 %v2192_v50  ;;  %v2191_v33 = vsel %vm2159_vm1, %v2127_v49, 1.0  ;;  %v1958_v34 = vpop.xlane.xlu0 %1957  ;;  %v14046_v37 = vld [vmem:[#allocation51_spill] sm:$0xff] }
 0x274   : > { %8851 = vrsqrt.f32 %v2191_v33  ;;  %v10579_v47 = vadd.f32 %v14046_v37, %v13998_v28 }
 0x275   : > { %v2566_v17 = vpack.c.bf16 %v2547_v30, %v2546_v1  ;;  %v14036_v30 = vld [vmem:[#allocation12_spill] sm:$0xff] }
 0x276   : > { %v2056_v44 = vpop.xlane.xlu1 %2055  ;;  %8350 = vmatmul.mubr.bf16.gmra.mxu1 %v14030_v3  ;;  %14047 = vst [vmem:[#allocation151_spill] sm:$0xff] %v10579_v47 }
 0x277   : > { %v2112_v56 = vadd.f32 %v2056_v44, %v1960_v54  ;;  %v2054_v13 = vpop.xlane.xlu0 %2053  ;;  %7719 = vmatprep.subr.bf16.mxu0 %v2566_v17  ;;  %8353 = vmatprep.mubr.bf16.mxu1 %v14031_v22  ;;  %v14037_v54 = vld [vmem:[#allocation14_spill] sm:$0xff]  ;;  %v14038_v44 = vld [vmem:[#allocation49_spill] sm:$0xff] }
 0x278   : > { %v8846_v14 = vpop.eup %8845  ;;  %v2111_v12 = vadd.f32 %v2054_v13, %v1958_v34 }
 0x279   : > { %v8848_v45 = vpop.eup %8847  ;;  %v10536_v38 = vsel %vm2146_vm14, %v8846_v14, 0.0  ;;  %vm2144_vm2 = vcmp.gt.f32.partialorder %v2112_v56, 0.0 }
 0x27a   : > { %v2531_v20 = vmul.f32 %v10536_v38, %v10529_v8  ;;  %v10541_v43 = vsel %vm2145_vm15, %v8848_v45, 0.0  ;;  %v2176_v53 = vsel %vm2144_vm2, %v2112_v56, 1.0  ;;  %vm2143_vm3 = vcmp.gt.f32.partialorder %v2111_v12, 0.0  ;;  %v1988_v60 = vpop.xlane.xlu1 %1987 }
 0x27b   : > { %v2530_v35 = vmul.f32 %v10541_v43, %v10533_v41  ;;  %8853 = vrsqrt.f32 %v2176_v53  ;;  %v2175_v9 = vsel %vm2143_vm3, %v2111_v12, 1.0  ;;  %v1986_v21 = vpop.xlane.xlu0 %1985 }
 0x27c   : > { %8855 = vrsqrt.f32 %v2175_v9  ;;  %v14040_v9 = vld [vmem:[#allocation16_spill] sm:$0xff] }
 0x27d   : > { %v2558_v32 = vpack.c.bf16 %v2531_v20, %v2530_v35 }
 0x27e   : > { %v2084_v15 = vpop.xlane.xlu1 %2083  ;;  %8354 = vmatmul.mubr.bf16.gmra.mxu1 %v14036_v30 }
 0x27f   : > { %v2126_v50 = vadd.f32 %v2084_v15, %v1988_v60  ;;  %v2082_v55 = vpop.xlane.xlu0 %2081  ;;  %7720 = vmatpush3.bf16.msra.mxu0 %v2558_v32  ;;  %8357 = vmatprep.mubr.bf16.mxu1 %v14037_v54  ;;  %v14041_v32 = vld [vmem:[#allocation18_spill] sm:$0xff] }
 0x280   : > { %v8850_v1 = vpop.eup %8849  ;;  %v2125_v33 = vadd.f32 %v2082_v55, %v1986_v21 }
 0x281   : > { %v8852_v34 = vpop.eup %8851  ;;  %v10550_v17 = vsel %vm2160_vm0, %v8850_v1, 0.0  ;;  %vm2158_vm4 = vcmp.gt.f32.partialorder %v2126_v50, 0.0 }
 0x282   : > { %v2545_v13 = vmul.f32 %v10550_v17, %v14038_v44  ;;  %v10555_v14 = vsel %vm2159_vm1, %v8852_v34, 0.0  ;;  %v2190_v0 = vsel %vm2158_vm4, %v2126_v50, 1.0  ;;  %vm2157_vm5 = vcmp.gt.f32.partialorder %v2125_v33, 0.0  ;;  %v1956_v45 = vpop.xlane.xlu1 %1955 }
 0x283   : > { %v2544_v20 = vmul.f32 %v10555_v14, %v14039_v24  ;;  %8857 = vrsqrt.f32 %v2190_v0  ;;  %v2189_v53 = vsel %vm2157_vm5, %v2125_v33, 1.0  ;;  %v1954_v16 = vpop.xlane.xlu0 %1953  ;;  %v14042_v0 = vld [vmem:[#allocation48_spill] sm:$0xff] }
 0x284   : > { %8859 = vrsqrt.f32 %v2189_v53  ;;  %v14043_v53 = vld [vmem:[#allocation44_spill] sm:$0xff] }
 0x285   : > { %v2565_v60 = vpack.c.bf16 %v2545_v13, %v2544_v20 }
 0x286   : > { %v2052_v35 = vpop.xlane.xlu1 %2051  ;;  %8358 = vmatmul.mubr.bf16.gmra.mxu1 %v14040_v9 }
 0x287   : > { %v2110_v21 = vadd.f32 %v2052_v35, %v1956_v45  ;;  %v2050_v49 = vpop.xlane.xlu0 %2049  ;;  %7721 = vmatprep.subr.bf16.mxu0 %v2565_v60  ;;  %8361 = vmatprep.mubr.bf16.mxu1 %v14041_v32 }
 0x288   : > { %v8854_v15 = vpop.eup %8853  ;;  %v2109_v55 = vadd.f32 %v2050_v49, %v1954_v16 }
 0x289   : > { %v8856_v1 = vpop.eup %8855  ;;  %v10564_v34 = vsel %vm2144_vm2, %v8854_v15, 0.0  ;;  %vm2142_vm6 = vcmp.gt.f32.partialorder %v2110_v21, 0.0  ;;  %v14044_v15 = vld [vmem:[#allocation20_spill] sm:$0xff] }
 0x28a   : > { %v2529_v24 = vmul.f32 %v10564_v34, %v14042_v0  ;;  %v10569_v13 = vsel %vm2143_vm3, %v8856_v1, 0.0  ;;  %v2174_v20 = vsel %vm2142_vm6, %v2110_v21, 1.0  ;;  %vm2141_vm7 = vcmp.gt.f32.partialorder %v2109_v55, 0.0  ;;  %v1984_v45 = vpop.xlane.xlu1 %1983  ;;  %v14045_v1 = vld [vmem:[#allocation22_spill] sm:$0xff] }
 0x28b   : > { %v2528_v60 = vmul.f32 %v10569_v13, %v14043_v53  ;;  %8861 = vrsqrt.f32 %v2174_v20  ;;  %v2173_v16 = vsel %vm2141_vm7, %v2109_v55, 1.0  ;;  %v1982_v56 = vpop.xlane.xlu0 %1981 }
 0x28c   : > { %8863 = vrsqrt.f32 %v2173_v16 }
 0x28d   : > { %v2557_v35 = vpack.c.bf16 %v2529_v24, %v2528_v60 }
 0x28e   : > { %v2080_v49 = vpop.xlane.xlu1 %2079  ;;  %8362 = vmatmul.mubr.bf16.gmra.mxu1 %v14044_v15 }
 0x28f   : > { %v2124_v44 = vadd.f32 %v2080_v49, %v1984_v45  ;;  %v2078_v12 = vpop.xlane.xlu0 %2077  ;;  %7722 = vmatpush3.bf16.msra.mxu0 %v2557_v35  ;;  %8365 = vmatprep.mubr.bf16.mxu1 %v14045_v1  ;;  %v14048_v35 = vld [vmem:[#allocation47_spill] sm:$0xff] }
 0x290   : > { %v8858_v31 = vpop.eup %8857  ;;  %v2123_v61 = vadd.f32 %v2078_v12, %v1982_v56  ;;  %v14049_v12 = vld [vmem:[#allocation24_spill] sm:$0xff] }
 0x291   : > { %v8860_v20 = vpop.eup %8859  ;;  %v10582_v18 = vsel %vm2158_vm4, %v8858_v31, 0.0  ;;  %vm2156_vm8 = vcmp.gt.f32.partialorder %v2124_v44, 0.0 }
 0x292   : > { %v2543_v24 = vmul.f32 %v10582_v18, %v10579_v47  ;;  %v10587_v45 = vsel %vm2157_vm5, %v8860_v20, 0.0  ;;  %v2188_v60 = vsel %vm2156_vm8, %v2124_v44, 1.0  ;;  %vm2155_vm9 = vcmp.gt.f32.partialorder %v2123_v61, 0.0  ;;  %v1952_v16 = vpop.xlane.xlu1 %1951  ;;  %v14050_v20 = vld [vmem:[#allocation26_spill] sm:$0xff] }
 0x293   : > { %v2542_v37 = vmul.f32 %v10587_v45, %v14048_v35  ;;  %8865 = vrsqrt.f32 %v2188_v60  ;;  %v2187_v56 = vsel %vm2155_vm9, %v2123_v61, 1.0  ;;  %v1950_v50 = vpop.xlane.xlu0 %1949 }
 0x294   : > { %8867 = vrsqrt.f32 %v2187_v56 }
 0x295   : > { %v2564_v31 = vpack.c.bf16 %v2543_v24, %v2542_v37 }
 0x296   : > { %v2048_v49 = vpop.xlane.xlu1 %2047  ;;  %8366 = vmatmul.mubr.bf16.gmra.mxu1 %v14049_v12 }
 0x297   : > { %v2108_v47 = vadd.f32 %v2048_v49, %v1952_v16  ;;  %v2046_v33 = vpop.xlane.xlu0 %2045  ;;  %7723 = vmatprep.subr.bf16.mxu0 %v2564_v31  ;;  %8369 = vmatprep.mubr.bf16.mxu1 %v14050_v20  ;;  %v14053_v31 = vld [vmem:[#allocation46_spill] sm:$0xff] }
 0x298   : > { %v8862_v5 = vpop.eup %8861  ;;  %v2107_v35 = vadd.f32 %v2046_v33, %v1950_v50  ;;  %v14054_v33 = vld [vmem:[#allocation28_spill] sm:$0xff] }
 0x299   : > { %v8864_v60 = vpop.eup %8863  ;;  %v10600_v0 = vsel %vm2142_vm6, %v8862_v5, 0.0  ;;  %vm2140_vm10 = vcmp.gt.f32.partialorder %v2108_v47, 0.0 }
 0x29a   : > { %v2527_v24 = vmul.f32 %v10600_v0, %v10597_v27  ;;  %v10605_v16 = vsel %vm2141_vm7, %v8864_v60, 0.0  ;;  %v2172_v37 = vsel %vm2140_vm10, %v2108_v47, 1.0  ;;  %vm2139_vm11 = vcmp.gt.f32.partialorder %v2107_v35, 0.0  ;;  %v1980_v56 = vpop.xlane.xlu1 %1979  ;;  %v14055_v60 = vld [vmem:[#allocation30_spill] sm:$0xff] }
 0x29b   : > { %v2526_v4 = vmul.f32 %v10605_v16, %v14053_v31  ;;  %8869 = vrsqrt.f32 %v2172_v37  ;;  %v2171_v50 = vsel %vm2139_vm11, %v2107_v35, 1.0  ;;  %v1978_v21 = vpop.xlane.xlu0 %1977  ;;  %v14056_v37 = vld [vmem:[#allocation41_spill] sm:$0xff] }
 0x29c   : > { %8871 = vrsqrt.f32 %v2171_v50  ;;  %v14057_v50 = vld [vmem:[#allocation37_spill] sm:$0xff] }
 0x29d   : > { %v2556_v5 = vpack.c.bf16 %v2527_v24, %v2526_v4 }
 0x29e   : > { %v2076_v49 = vpop.xlane.xlu1 %2075  ;;  %8370 = vmatmul.mubr.bf16.gmra.mxu1 %v14054_v33 }
 0x29f   : > { %v2122_v27 = vadd.f32 %v2076_v49, %v1980_v56  ;;  %v2074_v55 = vpop.xlane.xlu0 %2073  ;;  %7724 = vmatpush3.bf16.msra.mxu0 %v2556_v5  ;;  %8373 = vmatprep.mubr.bf16.mxu1 %v14055_v60 }
 0x2a0   : > { %v8866_v53 = vpop.eup %8865  ;;  %v2121_v8 = vadd.f32 %v2074_v55, %v1978_v21  ;;  %v14058_v55 = vld [vmem:[#allocation32_spill] sm:$0xff] }
 0x2a1   : > { %v8868_v41 = vpop.eup %8867  ;;  %v10614_v58 = vsel %vm2156_vm8, %v8866_v53, 0.0  ;;  %vm2154_vm12 = vcmp.gt.f32.partialorder %v2122_v27, 0.0 }
 0x2a2   : > { %v2541_v31 = vmul.f32 %v10614_v58, %v14056_v37  ;;  %v10619_v24 = vsel %vm2155_vm9, %v8868_v41, 0.0  ;;  %v2186_v4 = vsel %vm2154_vm12, %v2122_v27, 1.0  ;;  %vm2153_vm13 = vcmp.gt.f32.partialorder %v2121_v8, 0.0  ;;  %v1948_v56 = vpop.xlane.xlu1 %1947  ;;  %v14064_v27 = vld [vmem:[#allocation42_spill] sm:$0xff] }
 0x2a3   : > { %v2540_v5 = vmul.f32 %v10619_v24, %v14057_v50  ;;  %8873 = vrsqrt.f32 %v2186_v4  ;;  %v2185_v21 = vsel %vm2153_vm13, %v2121_v8, 1.0  ;;  %v1946_v44 = vpop.xlane.xlu0 %1945  ;;  %v14059_v50 = vld [vmem:[#allocation40_spill] sm:$0xff] }
 0x2a4   : > { %8875 = vrsqrt.f32 %v2185_v21 }
 0x2a5   : > { %v2563_v53 = vpack.c.bf16 %v2541_v31, %v2540_v5  ;;  %v14060_v5 = vld [vmem:[#allocation36_spill] sm:$0xff] }
 0x2a6   : > { %v2044_v49 = vpop.xlane.xlu1 %2043  ;;  %8374 = vmatmul.mubr.bf16.gmra.mxu1 %v14058_v55 }
 0x2a7   : > { %v2106_v37 = vadd.f32 %v2044_v49, %v1948_v56  ;;  %v2042_v61 = vpop.xlane.xlu0 %2041  ;;  %7725 = vmatprep.subr.bf16.mxu0 %v2563_v53  ;;  %v14061_v49 = vld [vmem:[#allocation43_spill] sm:$0xff] }
 0x2a8   : > { %v8870_v41 = vpop.eup %8869  ;;  %v2105_v6 = vadd.f32 %v2042_v61, %v1946_v44  ;;  %v10640_v61 = vadd.f32 %v14061_v49, %v13998_v28 }
 0x2a9   : > { %v8872_v2 = vpop.eup %8871  ;;  %v10627_v51 = vsel %vm2140_vm10, %v8870_v41, 0.0  ;;  %vm2138_vm14 = vcmp.gt.f32.partialorder %v2106_v37, 0.0 }
 0x2aa   : > { %v2525_v4 = vmul.f32 %v10627_v51, %v14059_v50  ;;  %v10632_v10 = vsel %vm2139_vm11, %v8872_v2, 0.0  ;;  %v2170_v31 = vsel %vm2138_vm14, %v2106_v37, 1.0  ;;  %vm2137_vm15 = vcmp.gt.f32.partialorder %v2105_v6, 0.0  ;;  %14062 = vst [vmem:[#allocation154_spill] sm:$0xff] %v10640_v61 }
 0x2ab   : > { %v2524_v56 = vmul.f32 %v10632_v10, %v14060_v5  ;;  %8877 = vrsqrt.f32 %v2170_v31  ;;  %v2169_v21 = vsel %vm2137_vm15, %v2105_v6, 1.0  ;;  %v8778_v6 = vld [vmem:[%s13577_s7 + $0x30] sm:$0xff]  }
 0x2ac   : > { %8879 = vrsqrt.f32 %v2169_v21 }
 0x2ad   : > { %v2555_v47 = vpack.c.bf16 %v2525_v4, %v2524_v56  ;;  %v14063_v4 = vld [vmem:[#allocation39_spill] sm:$0xff] }
 0x2ae   : > { %v2331_v44 = vpop.f32.mrf.mxu1 }
 0x2af   : > { %7726 = vmatpush3.bf16.msra.mxu0 %v2555_v47 }
 0x2b0   : > { %v8874_v53 = vpop.eup %8873  ;;  %v2333_v2 = vpop.f32.mrf.mxu1 }
 0x2b1   : > { %v8876_v35 = vpop.eup %8875  ;;  %v10643_v41 = vsel %vm2154_vm12, %v8874_v53, 0.0  ;;  %v10654_v53 = vadd.f32 %v14064_v27, %v13998_v28  ;;  %v8777_v28 = vld [vmem:[%s13577_s7 + $0x38] sm:$0xff]  }
 0x2b2   : > { %v2539_v50 = vmul.f32 %v10643_v41, %v10640_v61  ;;  %v10648_v31 = vsel %vm2153_vm13, %v8876_v35, 0.0  ;;  %v2335_v21 = vpop.f32.mrf.mxu1 }
 0x2b3   : > { %v2538_v56 = vmul.f32 %v10648_v31, %v14063_v4  ;;  %14065 = vst [vmem:[#allocation138_spill] sm:$0xff] %v10654_v53  ;;  %v2490_v37 = vpack.c.bf16 %v2335_v21, %v2331_v44 }
 0x2b4   : > { %v2337_v47 = vpop.f32.mrf.mxu1 }
 0x2b5   : > { %v2491_v5 = vpack.c.bf16 %v2337_v47, %v2333_v2  ;;  %v2562_v46 = vpack.c.bf16 %v2539_v50, %v2538_v56  ;;  %v14066_v2 = vld [vmem:[#allocation38_spill] sm:$0xff] }
 0x2b6   : > { %v2341_v49 = vpop.f32.mrf.mxu1 }
 0x2b7   : > { %7727 = vmatprep.subr.bf16.mxu0 %v2562_v46  ;;  %2602 = vmatprep.mubr.bf16.mxu0 %v2491_v5 }
 0x2b8   : > { %v8878_v55 = vpop.eup %8877  ;;  %v2343_v60 = vpop.f32.mrf.mxu1 }
 0x2b9   : > { %v8880_v61 = vpop.eup %8879  ;;  %v10657_v8 = vsel %vm2138_vm14, %v8878_v55, 0.0 }
 0x2ba   : > { %v2523_v35 = vmul.f32 %v10657_v8, %v10654_v53  ;;  %v10662_v4 = vsel %vm2137_vm15, %v8880_v61, 0.0  ;;  %v2345_v50 = vpop.f32.mrf.mxu1 }
 0x2bb   : > { %v2522_v46 = vmul.f32 %v10662_v4, %v14066_v2  ;;  %v2492_v44 = vpack.c.bf16 %v2345_v50, %v2341_v49 }
 0x2bc   : > { %v2347_v5 = vpop.f32.mrf.mxu1 }
 0x2bd   : > { %v2554_v56 = vpack.c.bf16 %v2523_v35, %v2522_v46  ;;  %v2493_v61 = vpack.c.bf16 %v2347_v5, %v2343_v60  ;;  %v8779_v35 = vld [vmem:[%s13577_s7 + $0x28] sm:$0xff]  }
 0x2be   : > { %v2351_v47 = vpop.f32.mrf.mxu1 }
 0x2bf   : > { %7728 = vmatpush3.bf16.msra.mxu0 %v2554_v56 }
 0x2c0   : > { %v2353_v55 = vpop.f32.mrf.mxu1  ;;  %8281 = vmatprep.subr.bf16.mxu0 %v8777_v28 }
 0x2c2   : > { %v2355_v27 = vpop.f32.mrf.mxu1  ;;  %2603 = vmatmul.mubr.bf16.vlgmr.msra.gmra.mxu0 %v2490_v37 }
 0x2c3   : > { %2610 = vmatprep.mubr.bf16.mxu0 %v2493_v61  ;;  %8282 = vmatpush3.bf16.msra.mxu0 %v8777_v28  ;;  %v2494_v37 = vpack.c.bf16 %v2355_v27, %v2351_v47 }
 0x2c4   : > { %v2357_v53 = vpop.f32.mrf.mxu1  ;;  %8283 = vmatprep.subr.bf16.mxu0 %v8778_v6 }
 0x2c5   : > { %v2495_v56 = vpack.c.bf16 %v2357_v53, %v2353_v55 }
 0x2c6   : > { %v2361_v46 = vpop.f32.mrf.mxu1 }
 0x2c7   : > { %8284 = vmatpush3.bf16.msra.mxu0 %v8778_v6 }
 0x2c8   : > { %v2363_v21 = vpop.f32.mrf.mxu1  ;;  %8285 = vmatprep.subr.bf16.mxu0 %v8779_v35 }
 0x2ca   : > { %v2365_v2 = vpop.f32.mrf.mxu1  ;;  %2611 = vmatmul.mubr.bf16.gmra.mxu0 %v2492_v44 }
 0x2cb   : > { %2618 = vmatprep.mubr.bf16.mxu0 %v2495_v56  ;;  %8286 = vmatpush3.bf16.msra.mxu0 %v8779_v35  ;;  %v2496_v1 = vpack.c.bf16 %v2365_v2, %v2361_v46 }
 0x2cc   : > { %v2367_v60 = vpop.f32.mrf.mxu1 }
 0x2cd   : > { %v2497_v61 = vpack.c.bf16 %v2367_v60, %v2363_v21 }
 0x2ce   : > { %v2371_v5 = vpop.f32.mrf.mxu1 }
 0x2d0   : > { %v2373_v28 = vpop.f32.mrf.mxu1 }
 0x2d2   : > { %v2375_v33 = vpop.f32.mrf.mxu1  ;;  %2619 = vmatmul.mubr.bf16.gmra.mxu0 %v2494_v37 }
 0x2d3   : > { %2626 = vmatprep.mubr.bf16.mxu0 %v2497_v61  ;;  %v2498_v44 = vpack.c.bf16 %v2375_v33, %v2371_v5 }
 0x2d4   : > { %v2377_v20 = vpop.f32.mrf.mxu1 }
 0x2d5   : > { %v2499_v49 = vpack.c.bf16 %v2377_v20, %v2373_v28 }
 0x2d6   : > { %v2381_v12 = vpop.f32.mrf.mxu1 }
 0x2d8   : > { %v2383_v6 = vpop.f32.mrf.mxu1 }
 0x2da   : > { %v2385_v50 = vpop.f32.mrf.mxu1  ;;  %2627 = vmatmul.mubr.bf16.gmra.mxu0 %v2496_v1 }
 0x2db   : > { %2634 = vmatprep.mubr.bf16.mxu0 %v2499_v49  ;;  %v2500_v21 = vpack.c.bf16 %v2385_v50, %v2381_v12 }
 0x2dc   : > { %v2387_v53 = vpop.f32.mrf.mxu1 }
 0x2dd   : > { %v2501_v56 = vpack.c.bf16 %v2387_v53, %v2383_v6 }
 0x2de   : > { %v2391_v55 = vpop.f32.mrf.mxu1 }
 0x2e0   : > { %v2393_v35 = vpop.f32.mrf.mxu1 }
 0x2e2   : > { %v2395_v15 = vpop.f32.mrf.mxu1  ;;  %2635 = vmatmul.mubr.bf16.gmra.mxu0 %v2498_v44 }
 0x2e3   : > { %2642 = vmatprep.mubr.bf16.mxu0 %v2501_v56  ;;  %v2502_v1 = vpack.c.bf16 %v2395_v15, %v2391_v55  ;;  %v8780_v15 = vld [vmem:[%s13577_s7 + $0x20] sm:$0xff]  }
 0x2e4   : > { %v2397_v47 = vpop.f32.mrf.mxu1  ;;  %8287 = vmatprep.subr.bf16.mxu0 %v8780_v15 }
 0x2e5   : > { %v2503_v37 = vpack.c.bf16 %v2397_v47, %v2393_v35  ;;  %8288 = vmatpush3.bf16.msra.mxu0 %v8780_v15 }
 0x2e6   : > { %v2401_v27 = vpop.f32.mrf.mxu1 }
 0x2e8   : > { %v2403_v60 = vpop.f32.mrf.mxu1 }
 0x2ea   : > { %v2405_v61 = vpop.f32.mrf.mxu1  ;;  %2643 = vmatmul.mubr.bf16.gmra.mxu0 %v2500_v21 }
 0x2eb   : > { %2650 = vmatprep.mubr.bf16.mxu0 %v2503_v37  ;;  %v2504_v6 = vpack.c.bf16 %v2405_v61, %v2401_v27 }
 0x2ec   : > { %v2407_v20 = vpop.f32.mrf.mxu1 }
 0x2ed   : > { %v2505_v28 = vpack.c.bf16 %v2407_v20, %v2403_v60  ;;  %v8781_v60 = vld [vmem:[%s13577_s7 + $0x18] sm:$0xff]  }
 0x2ee   : > { %v2411_v2 = vpop.f32.mrf.mxu1  ;;  %8289 = vmatprep.subr.bf16.mxu0 %v8781_v60 }
 0x2ef   : > { %8290 = vmatpush3.bf16.msra.mxu0 %v8781_v60 }
 0x2f0   : > { %v2413_v46 = vpop.f32.mrf.mxu1 }
 0x2f2   : > { %v2415_v49 = vpop.f32.mrf.mxu1  ;;  %2651 = vmatmul.mubr.bf16.gmra.mxu0 %v2502_v1 }
 0x2f3   : > { %2658 = vmatprep.mubr.bf16.mxu0 %v2505_v28  ;;  %v2506_v35 = vpack.c.bf16 %v2415_v49, %v2411_v2 }
 0x2f4   : > { %v2417_v33 = vpop.f32.mrf.mxu1 }
 0x2f5   : > { %v2507_v44 = vpack.c.bf16 %v2417_v33, %v2413_v46  ;;  %v8782_v46 = vld [vmem:[%s13577_s7 + $0x10] sm:$0xff]   ;;  %v8783_v33 = vld [vmem:[%s13577_s7 + $0x8] sm:$0xff]  }
 0x2f6   : > { %v2421_v5 = vpop.f32.mrf.mxu1  ;;  %8291 = vmatprep.subr.bf16.mxu0 %v8782_v46 }
 0x2f7   : > { %8292 = vmatpush3.bf16.msra.mxu0 %v8782_v46 }
 0x2f8   : > { %v2423_v53 = vpop.f32.mrf.mxu1  ;;  %8293 = vmatprep.subr.bf16.mxu0 %v8783_v33 }
 0x2fa   : > { %v2425_v56 = vpop.f32.mrf.mxu1  ;;  %2659 = vmatmul.mubr.bf16.gmra.mxu0 %v2504_v6 }
 0x2fb   : > { %2666 = vmatprep.mubr.bf16.mxu0 %v2507_v44  ;;  %v2508_v61 = vpack.c.bf16 %v2425_v56, %v2421_v5  ;;  %8294 = vmatpush3.bf16.msra.mxu0 %v8783_v33 }
 0x2fc   : > { %v2427_v12 = vpop.f32.mrf.mxu1 }
 0x2fd   : > { %v2509_v21 = vpack.c.bf16 %v2427_v12, %v2423_v53  ;;  %v8784_v12 = vld [vmem:[%s13577_s7] sm:$0xff]  }
 0x2fe   : > { %v2431_v50 = vpop.f32.mrf.mxu1  ;;  %8295 = vmatprep.subr.bf16.mxu0 %v8784_v12 }
 0x2ff   : > { %8296 = vmatpush3.bf16.msra.mxu0 %v8784_v12 }
 0x300   : > { %v2433_v47 = vpop.f32.mrf.mxu1 }
 0x302   : > { %v2435_v37 = vpop.f32.mrf.mxu1  ;;  %2667 = vmatmul.mubr.bf16.gmra.mxu0 %v2506_v35 }
 0x303   : > { %2674 = vmatprep.mubr.bf16.mxu0 %v2509_v21  ;;  %v2510_v5 = vpack.c.bf16 %v2435_v37, %v2431_v50  ;;  %v9017_v50 = vld [vmem:[%s13574_s4 + $0x38] sm:$0xff]  }
 0x304   : > { %v2437_v55 = vpop.f32.mrf.mxu1  ;;  %8377 = vmatprep.subr.bf16.mxu0 %v9017_v50 }
 0x305   : > { %v2511_v2 = vpack.c.bf16 %v2437_v55, %v2433_v47 }
 0x306   : > { %v2441_v27 = vpop.f32.mrf.mxu1 }
 0x308   : > { %v2443_v20 = vpop.f32.mrf.mxu1 }
 0x30a   : > { %v2445_v1 = vpop.f32.mrf.mxu1  ;;  %2675 = vmatmul.mubr.bf16.gmra.mxu0 %v2508_v61 }
 0x30b   : > { %2682 = vmatprep.mubr.bf16.mxu0 %v2511_v2  ;;  %v2512_v47 = vpack.c.bf16 %v2445_v1, %v2441_v27 }
 0x30c   : > { %v2447_v28 = vpop.f32.mrf.mxu1 }
 0x30d   : > { %v2513_v53 = vpack.c.bf16 %v2447_v28, %v2443_v20 }
 0x30e   : > { %v2451_v49 = vpop.f32.mrf.mxu1 }
 0x310   : > { %v2453_v6 = vpop.f32.mrf.mxu1 }
 0x312   : > { %v2455_v44 = vpop.f32.mrf.mxu1  ;;  %2683 = vmatmul.mubr.bf16.gmra.mxu0 %v2510_v5 }
 0x313   : > { %2690 = vmatprep.mubr.bf16.mxu0 %v2513_v53  ;;  %v2514_v61 = vpack.c.bf16 %v2455_v44, %v2451_v49 }
 0x314   : > { %v2457_v56 = vpop.f32.mrf.mxu1 }
 0x315   : > { %v2515_v15 = vpack.c.bf16 %v2457_v56, %v2453_v6 }
 0x316   : > { %v2461_v35 = vpop.f32.mrf.mxu1 }
 0x318   : > { %v2463_v21 = vpop.f32.mrf.mxu1 }
 0x31a   : > { %v2465_v37 = vpop.f32.mrf.mxu1  ;;  %2691 = vmatmul.mubr.bf16.gmra.mxu0 %v2512_v47 }
 0x31b   : > { %2698 = vmatprep.mubr.bf16.mxu0 %v2515_v15  ;;  %v2516_v28 = vpack.c.bf16 %v2465_v37, %v2461_v35 }
 0x31c   : > { %v2467_v55 = vpop.f32.mrf.mxu1 }
 0x31d   : > { %v2517_v2 = vpack.c.bf16 %v2467_v55, %v2463_v21 }
 0x31e   : > { %v2471_v60 = vpop.f32.mrf.mxu1 }
 0x320   : > { %v2473_v20 = vpop.f32.mrf.mxu1 }
 0x322   : > { %v2475_v46 = vpop.f32.mrf.mxu1  ;;  %2699 = vmatmul.mubr.bf16.gmra.mxu0 %v2514_v61 }
 0x323   : > { %2706 = vmatprep.mubr.bf16.mxu0 %v2517_v2  ;;  %v2518_v56 = vpack.c.bf16 %v2475_v46, %v2471_v60 }
 0x324   : > { %v2477_v27 = vpop.f32.mrf.mxu1 }
 0x325   : > { %v2519_v5 = vpack.c.bf16 %v2477_v27, %v2473_v20 }
 0x326   : > { %v2481_v1 = vpop.f32.mrf.mxu1 }
 0x328   : > { %v2483_v33 = vpop.f32.mrf.mxu1 }
 0x32a   : > { %v2485_v6 = vpop.f32.mrf.mxu1  ;;  %2707 = vmatmul.mubr.bf16.gmra.mxu0 %v2516_v28 }
 0x32b   : > { %2714 = vmatprep.mubr.bf16.mxu0 %v2519_v5  ;;  %v2520_v47 = vpack.c.bf16 %v2485_v6, %v2481_v1 }
 0x32c   : > { %v2487_v53 = vpop.f32.mrf.mxu1 }
 0x32d   : > { %v2521_v12 = vpack.c.bf16 %v2487_v53, %v2483_v33 }
 0x332   : > { %2715 = vmatmul.mubr.bf16.gmra.mxu0 %v2518_v56 }
 0x333   : > { %2722 = vmatprep.mubr.bf16.mxu0 %v2521_v12 }
 0x33a   : > { %2723 = vmatmul.mubr.bf16.gmra.mxu0 %v2520_v47 }
 0x382   : > { %v7729_v49 = vpop.f32.mrf.mxu0 }
 0x384   : > { %v7730_v44 = vpop.f32.mrf.mxu0 }
 0x385   : > { %v7731_v15 = vadd.f32 %v7730_v44, %v7729_v49  ;;  %v9018_v49 = vld [vmem:[%s13574_s4 + $0x30] sm:$0xff]  }
 0x386   : > { %v7732_v21 = vpop.f32.mrf.mxu0 }
 0x387   : > { %v2731_v35 = vmul.f32 %v7731_v15, %v10662_v4 }
 0x388   : > { %v7733_v55 = vpop.f32.mrf.mxu0 }
 0x389   : > { %v7734_v61 = vadd.f32 %v7733_v55, %v7732_v21  ;;  %v9019_v55 = vld [vmem:[%s13574_s4 + $0x28] sm:$0xff]  }
 0x38a   : > { %v7735_v2 = vpop.f32.mrf.mxu0 }
 0x38b   : > { %v2732_v37 = vmul.f32 %v7734_v61, %v10657_v8 }
 0x38c   : > { %v7736_v20 = vpop.f32.mrf.mxu0 }
 0x38d   : > { %v2779_v27 = vpack.c.bf16 %v2732_v37, %v2731_v35  ;;  %v7737_v60 = vadd.f32 %v7736_v20, %v7735_v2 }
 0x38e   : > { %v7738_v28 = vpop.f32.mrf.mxu0 }
 0x38f   : > { %8297 = vmatprep.mubr.bf16.mxu0 %v2779_v27  ;;  %v2733_v5 = vmul.f32 %v7737_v60, %v10632_v10  ;;  %v9021_v60 = vld [vmem:[%s13574_s4 + $0x18] sm:$0xff]  }
 0x390   : > { %v7739_v46 = vpop.f32.mrf.mxu0 }
 0x391   : > { %v7740_v33 = vadd.f32 %v7739_v46, %v7738_v28 }
 0x392   : > { %v7741_v1 = vpop.f32.mrf.mxu0 }
 0x393   : > { %v2734_v6 = vmul.f32 %v7740_v33, %v10627_v51 }
 0x394   : > { %v7742_v53 = vpop.f32.mrf.mxu0 }
 0x395   : > { %v2780_v56 = vpack.c.bf16 %v2734_v6, %v2733_v5  ;;  %v7743_v47 = vadd.f32 %v7742_v53, %v7741_v1 }
 0x396   : > { %v7744_v12 = vpop.f32.mrf.mxu0 }
 0x397   : > { %8298 = vmatmul.mubr.bf16.vlgmr.msra.gmra.mxu0 %v2780_v56  ;;  %v2735_v21 = vmul.f32 %v7743_v47, %v10605_v16  ;;  %v9020_v16 = vld [vmem:[%s13574_s4 + $0x20] sm:$0xff]   ;;  %v9023_v47 = vld [vmem:[%s13574_s4 + $0x8] sm:$0xff]  }
 0x398   : > { %v7745_v4 = vpop.f32.mrf.mxu0  ;;  %8378 = vmatpush3.bf16.msra.mxu0 %v9017_v50 }
 0x399   : > { %v7746_v8 = vadd.f32 %v7745_v4, %v7744_v12  ;;  %8379 = vmatprep.subr.bf16.mxu0 %v9018_v49 }
 0x39a   : > { %v7747_v44 = vpop.f32.mrf.mxu0 }
 0x39b   : > { %v2736_v10 = vmul.f32 %v7746_v8, %v10600_v0 }
 0x39c   : > { %v7748_v15 = vpop.f32.mrf.mxu0  ;;  %8380 = vmatpush3.bf16.msra.mxu0 %v9018_v49 }
 0x39d   : > { %v2781_v51 = vpack.c.bf16 %v2736_v10, %v2735_v21  ;;  %8381 = vmatprep.subr.bf16.mxu0 %v9019_v55  ;;  %v7749_v61 = vadd.f32 %v7748_v15, %v7747_v44 }
 0x39e   : > { %v7750_v50 = vpop.f32.mrf.mxu0 }
 0x39f   : > { %8301 = vmatprep.mubr.bf16.mxu0 %v2781_v51  ;;  %v2737_v37 = vmul.f32 %v7749_v61, %v10569_v13  ;;  %v9022_v13 = vld [vmem:[%s13574_s4 + $0x10] sm:$0xff]  }
 0x3a0   : > { %v7751_v2 = vpop.f32.mrf.mxu0  ;;  %8382 = vmatpush3.bf16.msra.mxu0 %v9019_v55 }
 0x3a1   : > { %v7752_v35 = vadd.f32 %v7751_v2, %v7750_v50  ;;  %8383 = vmatprep.subr.bf16.mxu0 %v9020_v16 }
 0x3a2   : > { %v7753_v0 = vpop.f32.mrf.mxu0 }
 0x3a3   : > { %v2738_v20 = vmul.f32 %v7752_v35, %v10564_v34 }
 0x3a4   : > { %v7754_v27 = vpop.f32.mrf.mxu0  ;;  %8384 = vmatpush3.bf16.msra.mxu0 %v9020_v16 }
 0x3a5   : > { %v2782_v28 = vpack.c.bf16 %v2738_v20, %v2737_v37  ;;  %8385 = vmatprep.subr.bf16.mxu0 %v9021_v60  ;;  %v7755_v33 = vadd.f32 %v7754_v27, %v7753_v0 }
 0x3a6   : > { %v7756_v46 = vpop.f32.mrf.mxu0 }
 0x3a7   : > { %8302 = vmatmul.mubr.bf16.gmra.mxu0 %v2782_v28  ;;  %v2739_v6 = vmul.f32 %v7755_v33, %v10541_v43  ;;  %v9024_v43 = vld [vmem:[%s13574_s4] sm:$0xff]  }
 0x3a8   : > { %v7757_v1 = vpop.f32.mrf.mxu0  ;;  %8386 = vmatpush3.bf16.msra.mxu0 %v9021_v60 }
 0x3a9   : > { %v7758_v5 = vadd.f32 %v7757_v1, %v7756_v46  ;;  %8387 = vmatprep.subr.bf16.mxu0 %v9022_v13 }
 0x3aa   : > { %v7759_v34 = vpop.f32.mrf.mxu0 }
 0x3ab   : > { %v2740_v53 = vmul.f32 %v7758_v5, %v10536_v38 }
 0x3ac   : > { %v7760_v56 = vpop.f32.mrf.mxu0  ;;  %8388 = vmatpush3.bf16.msra.mxu0 %v9022_v13 }
 0x3ad   : > { %v2783_v12 = vpack.c.bf16 %v2740_v53, %v2739_v6  ;;  %8389 = vmatprep.subr.bf16.mxu0 %v9023_v47  ;;  %v7761_v8 = vadd.f32 %v7760_v56, %v7759_v34 }
 0x3ae   : > { %v7762_v4 = vpop.f32.mrf.mxu0 }
 0x3af   : > { %8305 = vmatprep.mubr.bf16.mxu0 %v2783_v12  ;;  %v2741_v21 = vmul.f32 %v7761_v8, %v10497_v52 }
 0x3b0   : > { %v7763_v49 = vpop.f32.mrf.mxu0  ;;  %8390 = vmatpush3.bf16.msra.mxu0 %v9023_v47 }
 0x3b1   : > { %v7764_v44 = vadd.f32 %v7763_v49, %v7762_v4  ;;  %8391 = vmatprep.subr.bf16.mxu0 %v9024_v43 }
 0x3b2   : > { %v7765_v38 = vpop.f32.mrf.mxu0 }
 0x3b3   : > { %v2742_v10 = vmul.f32 %v7764_v44, %v10492_v39 }
 0x3b4   : > { %v7766_v15 = vpop.f32.mrf.mxu0  ;;  %8392 = vmatpush3.bf16.msra.mxu0 %v9024_v43 }
 0x3b5   : > { %v2784_v51 = vpack.c.bf16 %v2742_v10, %v2741_v21  ;;  %v7767_v50 = vadd.f32 %v7766_v15, %v7765_v38 }
 0x3b6   : > { %v7768_v55 = vpop.f32.mrf.mxu0 }
 0x3b7   : > { %8306 = vmatmul.mubr.bf16.gmra.mxu0 %v2784_v51  ;;  %v2743_v16 = vmul.f32 %v7767_v50, %v10453_v57 }
 0x3b8   : > { %v7769_v61 = vpop.f32.mrf.mxu0 }
 0x3b9   : > { %v7770_v2 = vadd.f32 %v7769_v61, %v7768_v55 }
 0x3ba   : > { %v7771_v35 = vpop.f32.mrf.mxu0 }
 0x3bb   : > { %v2744_v0 = vmul.f32 %v7770_v2, %v10448_v40 }
 0x3bc   : > { %v7772_v37 = vpop.f32.mrf.mxu0 }
 0x3bd   : > { %v2785_v20 = vpack.c.bf16 %v2744_v0, %v2743_v16  ;;  %v7773_v28 = vadd.f32 %v7772_v37, %v7771_v35 }
 0x3be   : > { %v7774_v27 = vpop.f32.mrf.mxu0 }
 0x3bf   : > { %8309 = vmatprep.mubr.bf16.mxu0 %v2785_v20  ;;  %v2745_v46 = vmul.f32 %v7773_v28, %v10409_v59 }
 0x3c0   : > { %v7775_v52 = vpop.f32.mrf.mxu0 }
 0x3c1   : > { %v7776_v39 = vadd.f32 %v7775_v52, %v7774_v27 }
 0x3c2   : > { %v7777_v60 = vpop.f32.mrf.mxu0 }
 0x3c3   : > { %v2746_v33 = vmul.f32 %v7776_v39, %v10404_v62 }
 0x3c4   : > { %v7778_v1 = vpop.f32.mrf.mxu0 }
 0x3c5   : > { %v2786_v5 = vpack.c.bf16 %v2746_v33, %v2745_v46  ;;  %v7779_v34 = vadd.f32 %v7778_v1, %v7777_v60 }
 0x3c6   : > { %v7780_v13 = vpop.f32.mrf.mxu0 }
 0x3c7   : > { %8310 = vmatmul.mubr.bf16.gmra.mxu0 %v2786_v5  ;;  %v2747_v53 = vmul.f32 %v7779_v34, %v10648_v31 }
 0x3c8   : > { %v7781_v57 = vpop.f32.mrf.mxu0 }
 0x3c9   : > { %v7782_v6 = vadd.f32 %v7781_v57, %v7780_v13 }
 0x3ca   : > { %v7783_v40 = vpop.f32.mrf.mxu0 }
 0x3cb   : > { %v2748_v56 = vmul.f32 %v7782_v6, %v10643_v41 }
 0x3cc   : > { %v7784_v12 = vpop.f32.mrf.mxu0 }
 0x3cd   : > { %v2787_v47 = vpack.c.bf16 %v2748_v56, %v2747_v53  ;;  %v7785_v8 = vadd.f32 %v7784_v12, %v7783_v40 }
 0x3ce   : > { %v7786_v4 = vpop.f32.mrf.mxu0 }
 0x3cf   : > { %8313 = vmatprep.mubr.bf16.mxu0 %v2787_v47  ;;  %v2749_v44 = vmul.f32 %v7785_v8, %v10619_v24 }
 0x3d0   : > { %v7787_v59 = vpop.f32.mrf.mxu0 }
 0x3d1   : > { %v7788_v49 = vadd.f32 %v7787_v59, %v7786_v4 }
 0x3d2   : > { %v7789_v62 = vpop.f32.mrf.mxu0 }
 0x3d3   : > { %v2750_v43 = vmul.f32 %v7788_v49, %v10614_v58 }
 0x3d4   : > { %v7790_v38 = vpop.f32.mrf.mxu0 }
 0x3d5   : > { %v2788_v21 = vpack.c.bf16 %v2750_v43, %v2749_v44  ;;  %v7791_v15 = vadd.f32 %v7790_v38, %v7789_v62 }
 0x3d6   : > { %v7792_v10 = vpop.f32.mrf.mxu0 }
 0x3d7   : > { %8314 = vmatmul.mubr.bf16.gmra.mxu0 %v2788_v21  ;;  %v2751_v55 = vmul.f32 %v7791_v15, %v10587_v45  ;;  %v14071_v15 = vld [vmem:[#allocation28_spill] sm:$0xff] }
 0x3d8   : > { %v7793_v31 = vpop.f32.mrf.mxu0 }
 0x3d9   : > { %v7794_v51 = vadd.f32 %v7793_v31, %v7792_v10 }
 0x3da   : > { %v7795_v41 = vpop.f32.mrf.mxu0 }
 0x3db   : > { %v2752_v50 = vmul.f32 %v7794_v51, %v10582_v18  ;;  %v14072_v51 = vld [vmem:[#allocation30_spill] sm:$0xff] }
 0x3dc   : > { %v7796_v61 = vpop.f32.mrf.mxu0 }
 0x3dd   : > { %v2789_v2 = vpack.c.bf16 %v2752_v50, %v2751_v55  ;;  %v7797_v16 = vadd.f32 %v7796_v61, %v7795_v41 }
 0x3de   : > { %v7798_v35 = vpop.f32.mrf.mxu0 }
 0x3df   : > { %8317 = vmatprep.mubr.bf16.mxu0 %v2789_v2  ;;  %v2753_v37 = vmul.f32 %v7797_v16, %v10555_v14 }
 0x3e0   : > { %v7799_v24 = vpop.f32.mrf.mxu0 }
 0x3e1   : > { %v7800_v0 = vadd.f32 %v7799_v24, %v7798_v35  ;;  %v14073_v35 = vld [vmem:[#allocation32_spill] sm:$0xff] }
 0x3e2   : > { %v7801_v58 = vpop.f32.mrf.mxu0 }
 0x3e3   : > { %v2754_v20 = vmul.f32 %v7800_v0, %v10550_v17 }
 0x3e4   : > { %v7802_v27 = vpop.f32.mrf.mxu0 }
 0x3e5   : > { %v2790_v28 = vpack.c.bf16 %v2754_v20, %v2753_v37  ;;  %v7803_v39 = vadd.f32 %v7802_v27, %v7801_v58 }
 0x3e6   : > { %v7804_v52 = vpop.f32.mrf.mxu0 }
 0x3e7   : > { %8318 = vmatmul.mubr.bf16.gmra.mxu0 %v2790_v28  ;;  %v2755_v46 = vmul.f32 %v7803_v39, %v10519_v63  ;;  %v619_v28 = vld [vmem:[%s13578_s8] sm:$0x1f] }
 0x3e8   : > { %v7805_v45 = vpop.f32.mrf.mxu0 }
 0x3e9   : > { %v7806_v60 = vadd.f32 %v7805_v45, %v7804_v52 }
 0x3ea   : > { %v7807_v18 = vpop.f32.mrf.mxu0 }
 0x3eb   : > { %v2756_v33 = vmul.f32 %v7806_v60, %v10514_v48  ;;  %v14074_v60 = vld [vmem:[#allocation34_spill] sm:$0xff] }
 0x3ec   : > { %v7808_v1 = vpop.f32.mrf.mxu0 }
 0x3ed   : > { %v2791_v5 = vpack.c.bf16 %v2756_v33, %v2755_v46  ;;  %v7809_v34 = vadd.f32 %v7808_v1, %v7807_v18  ;;  %v14075_v18 = vsub.s32 0, %v14074_v60 }
 0x3ee   : > { %v7810_v13 = vpop.f32.mrf.mxu0 }
 0x3ef   : > { %8321 = vmatprep.mubr.bf16.mxu0 %v2791_v5  ;;  %v2757_v6 = vmul.f32 %v7809_v34, %v10475_v11  ;;  %v10790_v46 = vrot.slane %v619_v28, %v14075_v18 }
 0x3f0   : > { %v7811_v14 = vpop.f32.mrf.mxu0 }
 0x3f1   : > { %v7812_v57 = vadd.f32 %v7811_v14, %v7810_v13 }
 0x3f2   : > { %v7813_v17 = vpop.f32.mrf.mxu0 }
 0x3f3   : > { %v2758_v40 = vmul.f32 %v7812_v57, %v10470_v29 }
 0x3f4   : > { %v7814_v53 = vpop.f32.mrf.mxu0 }
 0x3f5   : > { %v2792_v56 = vpack.c.bf16 %v2758_v40, %v2757_v6  ;;  %v7815_v47 = vadd.f32 %v7814_v53, %v7813_v17 }
 0x3f6   : > { %v7816_v12 = vpop.f32.mrf.mxu0 }
 0x3f7   : > { %8322 = vmatmul.mubr.bf16.gmra.mxu0 %v2792_v56  ;;  %v2759_v8 = vmul.f32 %v7815_v47, %v10431_v19  ;;  %v14068_v19 = vld [vmem:[#allocation22_spill] sm:$0xff] }
 0x3f8   : > { %v7817_v63 = vpop.f32.mrf.mxu0 }
 0x3f9   : > { %v7818_v4 = vadd.f32 %v7817_v63, %v7816_v12 }
 0x3fa   : > { %v7819_v48 = vpop.f32.mrf.mxu0 }
 0x3fb   : > { %v2760_v59 = vmul.f32 %v7818_v4, %v10426_v42 }
 0x3fc   : > { %v7820_v49 = vpop.f32.mrf.mxu0 }
 0x3fd   : > { %v2793_v62 = vpack.c.bf16 %v2760_v59, %v2759_v8  ;;  %v7821_v43 = vadd.f32 %v7820_v49, %v7819_v48 }
 0x3fe   : > { %v7822_v44 = vpop.f32.mrf.mxu0 }
 0x3ff   : > { %8325 = vmatprep.mubr.bf16.mxu0 %v2793_v62  ;;  %v2761_v29 = vmul.f32 %v7821_v43, %v10374_v7  ;;  %v8347_v7 = vpop.f32.mrf.mxu1 }
 0x400   : > { %v7823_v11 = vpop.f32.mrf.mxu0 }
 0x401   : > { %v7824_v38 = vadd.f32 %v7823_v11, %v7822_v44  ;;  %v3074_v42 = vpop.f32.mrf.mxu1 }
 0x403   : > { %v2762_v21 = vmul.f32 %v7824_v38, %v10385_v26  ;;  %v14067_v26 = vld [vmem:[#allocation20_spill] sm:$0xff] }
 0x405   : > { %v2794_v10 = vpack.c.bf16 %v2762_v21, %v2761_v29 }
 0x407   : > { %8326 = vmatmul.mubr.bf16.gmra.mxu0 %v2794_v10 }
 0x408   : > { %8393 = vmatprep.mubr.bf16.mxu0 %v14019_v23  ;;  %v8348_v23 = vpop.f32.mrf.mxu1 }
 0x409   : > { %v10769_v41 = vmax.f32 %v8348_v23, 0.0 }
 0x40f   : > { %8394 = vmatmul.mubr.bf16.vlgmr.msra.gmra.mxu0 %v14024_v25  ;;  %v14069_v25 = vld [vmem:[#allocation24_spill] sm:$0xff] }
 0x410   : > { %8397 = vmatprep.mubr.bf16.mxu0 %v14025_v36  ;;  %v3077_v36 = vpop.f32.mrf.mxu1 }
 0x417   : > { %8398 = vmatmul.mubr.bf16.gmra.mxu0 %v14030_v3  ;;  %v14070_v3 = vld [vmem:[#allocation26_spill] sm:$0xff] }
 0x418   : > { %8401 = vmatprep.mubr.bf16.mxu0 %v14031_v22  ;;  %v10759_v22 = vmax.f32 %v3074_v42, 0.0 }
 0x41f   : > { %8402 = vmatmul.mubr.bf16.gmra.mxu0 %v14036_v30  ;;  %v10761_v30 = vmax.f32 %v3077_v36, 0.0 }
 0x420   : > { %8405 = vmatprep.mubr.bf16.mxu0 %v14037_v54  ;;  %v8351_v54 = vpop.f32.mrf.mxu1 }
 0x421   : > { %v10779_v37 = vmax.f32 %v8351_v54, 0.0 }
 0x422   : > { %v3090_v31 = vpop.f32.mrf.mxu1 }
 0x423   : > { %v10772_v61 = vmax.f32 %v3090_v31, 0.0 }
 0x424   : > { %v8352_v50 = vpop.f32.mrf.mxu1 }
 0x425   : > { %v10785_v52 = vmax.f32 %v8352_v50, 0.0 }
 0x426   : > { %v3093_v16 = vpop.f32.mrf.mxu1 }
 0x427   : > { %8406 = vmatmul.mubr.bf16.gmra.mxu0 %v14040_v9  ;;  %v10763_v9 = vmax.f32 %v8347_v7, 0.0  ;;  %v10777_v0 = vmax.f32 %v3093_v16, 0.0 }
 0x428   : > { %8409 = vmatprep.mubr.bf16.mxu0 %v14041_v32  ;;  %v3426_v32 = vadd.f32 %v10761_v30, %v10759_v22  ;;  %v8355_v58 = vpop.f32.mrf.mxu1 }
 0x429   : > { %v10811_v63 = vmax.f32 %v8355_v58, 0.0 }
 0x42a   : > { %v3427_v55 = vadd.f32 %v3426_v32, %v10763_v9  ;;  %v3106_v27 = vpop.f32.mrf.mxu1 }
 0x42b   : > { %v10792_v33 = vmax.f32 %v3106_v27, 0.0 }
 0x42c   : > { %v3428_v2 = vadd.f32 %v3427_v55, %v10769_v41  ;;  %v8356_v45 = vpop.f32.mrf.mxu1 }
 0x42d   : > { %v10815_v8 = vmax.f32 %v8356_v45, 0.0 }
 0x42e   : > { %v3429_v24 = vadd.f32 %v3428_v2, %v10772_v61  ;;  %v3109_v13 = vpop.f32.mrf.mxu1 }
 0x42f   : > { %8410 = vmatmul.mubr.bf16.gmra.mxu0 %v14067_v26  ;;  %v10805_v6 = vmax.f32 %v3109_v13, 0.0 }
 0x430   : > { %8413 = vmatprep.mubr.bf16.mxu0 %v14068_v19  ;;  %v3430_v20 = vadd.f32 %v3429_v24, %v10777_v0  ;;  %v8359_v53 = vpop.f32.mrf.mxu1 }
 0x431   : > { %v10818_v62 = vmax.f32 %v8359_v53, 0.0 }
 0x432   : > { %v3431_v39 = vadd.f32 %v3430_v20, %v10779_v37  ;;  %v3122_v48 = vpop.f32.mrf.mxu1 }
 0x433   : > { %v10822_v43 = vmax.f32 %v3122_v48, 0.0 }
 0x434   : > { %v3432_v1 = vadd.f32 %v3431_v39, %v10785_v52  ;;  %v8360_v49 = vpop.f32.mrf.mxu1 }
 0x435   : > { %v10820_v44 = vmax.f32 %v8360_v49, 0.0 }
 0x436   : > { %v3433_v17 = vadd.f32 %v3432_v1, %v10792_v33  ;;  %v3125_v21 = vpop.f32.mrf.mxu1 }
 0x437   : > { %8414 = vmatmul.mubr.bf16.gmra.mxu0 %v14069_v25  ;;  %v10827_v38 = vpack.c.bf16 %v10820_v44, %v10818_v62  ;;  %v10834_v19 = vmax.f32 %v3125_v21, 0.0 }
 0x438   : > { %8417 = vmatprep.mubr.bf16.mxu0 %v14070_v3  ;;  %v3434_v4 = vadd.f32 %v3433_v17, %v10805_v6  ;;  %v8363_v25 = vpop.f32.mrf.mxu1 }
 0x439   : > { %14076 = vst [vmem:[#allocation136_spill] sm:$0xff] %v10827_v38  ;;  %3884 = vmatprep.subr.bf16.mxu1 %v10827_v38 }
 0x43a   : > { %v3435_v59 = vadd.f32 %v3434_v4, %v10811_v63 }
 0x43c   : > { %v3436_v11 = vadd.f32 %v3435_v59, %v10815_v8 }
 0x43e   : > { %v3437_v42 = vadd.f32 %v3436_v11, %v10822_v43 }
 0x43f   : > { %8418 = vmatmul.mubr.bf16.gmra.mxu0 %v14071_v15  ;;  %v3138_v15 = vpop.f32.mrf.mxu1 }
 0x440   : > { %8421 = vmatprep.mubr.bf16.mxu0 %v14072_v51  ;;  %v3438_v32 = vadd.f32 %v3437_v42, %v10834_v19  ;;  %v10843_v55 = vmax.f32 %v3138_v15, 0.0 }
 0x441   : > { %v8364_v51 = vpop.f32.mrf.mxu1 }
 0x442   : > { %v3439_v31 = vadd.f32 %v3438_v32, %v10818_v62 }
 0x444   : > { %v3440_v50 = vadd.f32 %v3439_v31, %v10820_v44 }
 0x446   : > { %v3441_v20 = vadd.f32 %v3440_v50, %v10843_v55 }
 0x447   : > { %8422 = vmatmul.mubr.bf16.gmra.mxu0 %v14073_v35  ;;  %v3141_v35 = vpop.f32.mrf.mxu1 }
 0x448   : > { %v10850_v27 = vmax.f32 %v3141_v35, 0.0 }
 0x449   : > { %v8367_v39 = vpop.f32.mrf.mxu1 }
 0x44a   : > { %v3442_v13 = vadd.f32 %v3441_v20, %v10850_v27 }
 0x457   : > { %v8299_v5 = vpop.f32.mrf.mxu0 }
 0x458   : > { %v2890_v34 = vadd.f32 %v8299_v5, %v10790_v46  ;;  %v10856_v5 = vmax.f32 %v8363_v25, 0.0 }
 0x459   : > { %v2881_v14 = vpop.f32.mrf.mxu0 }
 0x45a   : > { %3010 = vst [vmem:[%s10799_s20 + $0x10] sm:$0xff] %v2890_v34  ;;  %v2882_v57 = vadd.f32 %v2881_v14, %v10790_v46  ;;  %v3154_v34 = vpop.f32.mrf.mxu1  ;;  %v10860_v14 = vmax.f32 %v8364_v51, 0.0 }
 0x45b   : > { %v8300_v40 = vpop.f32.mrf.mxu0 }
 0x45c   : > { %3008 = vst [vmem:[%s10799_s20] sm:$0xff] %v2882_v57  ;;  %v2893_v56 = vadd.f32 %v8300_v40, %v10790_v46  ;;  %v3443_v57 = vadd.f32 %v3442_v13, %v10856_v5  ;;  %v8368_v17 = vpop.f32.mrf.mxu1  ;;  %v10863_v40 = vmax.f32 %v3154_v34, 0.0 }
 0x45d   : > { %v2884_v12 = vpop.f32.mrf.mxu0  ;;  %v10880_v25 = vmax.f32 %v8368_v17, 0.0 }
 0x45e   : > { %3011 = vst [vmem:[%s10799_s20 + $0x18] sm:$0xff] %v2893_v56  ;;  %v2885_v47 = vadd.f32 %v2884_v12, %v10790_v46  ;;  %v3444_v53 = vadd.f32 %v3443_v57, %v10860_v14  ;;  %v3157_v12 = vpop.f32.mrf.mxu1 }
 0x45f   : > { %v10870_v49 = vmax.f32 %v3157_v12, 0.0 }
 0x460   : > { %3009 = vst [vmem:[%s10799_s20 + $0x8] sm:$0xff] %v2885_v47  ;;  %v3445_v59 = vadd.f32 %v3444_v53, %v10863_v40 }
 0x462   : > { %v3446_v42 = vadd.f32 %v3445_v59, %v10870_v49 }
 0x467   : > { %v8303_v29 = vpop.f32.mrf.mxu0 }
 0x468   : > { %v2906_v10 = vadd.f32 %v8303_v29, %v10790_v46  ;;  %v8371_v29 = vpop.f32.mrf.mxu1 }
 0x469   : > { %v2897_v7 = vpop.f32.mrf.mxu0 }
 0x46a   : > { %3014 = vst [vmem:[%s10799_s20 + $0x30] sm:$0xff] %v2906_v10  ;;  %v2898_v26 = vadd.f32 %v2897_v7, %v10790_v46 }
 0x46b   : > { %v8304_v23 = vpop.f32.mrf.mxu0 }
 0x46c   : > { %3012 = vst [vmem:[%s10799_s20 + $0x20] sm:$0xff] %v2898_v26  ;;  %v2909_v36 = vadd.f32 %v8304_v23, %v10790_v46  ;;  %v10876_v26 = vmax.f32 %v8367_v39, 0.0  ;;  %v3170_v23 = vpop.f32.mrf.mxu1 }
 0x46d   : > { %v2900_v3 = vpop.f32.mrf.mxu0 }
 0x46e   : > { %3015 = vst [vmem:[%s10799_s20 + $0x38] sm:$0xff] %v2909_v36  ;;  %v2901_v54 = vadd.f32 %v2900_v3, %v10790_v46  ;;  %v3447_v36 = vadd.f32 %v3446_v42, %v10876_v26  ;;  %v8372_v3 = vpop.f32.mrf.mxu1 }
 0x46f   : > { %v10900_v13 = vmax.f32 %v8372_v3, 0.0 }
 0x470   : > { %3013 = vst [vmem:[%s10799_s20 + $0x28] sm:$0xff] %v2901_v54  ;;  %v10883_v54 = vmax.f32 %v3170_v23, 0.0  ;;  %v3448_v32 = vadd.f32 %v3447_v36, %v10880_v25  ;;  %v3173_v31 = vpop.f32.mrf.mxu1 }
 0x472   : > { %v3449_v35 = vadd.f32 %v3448_v32, %v10883_v54 }
 0x477   : > { %v8307_v2 = vpop.f32.mrf.mxu0 }
 0x478   : > { %v2922_v16 = vadd.f32 %v8307_v2, %v10790_v46 }
 0x479   : > { %v2913_v24 = vpop.f32.mrf.mxu0 }
 0x47a   : > { %3018 = vst [vmem:[%s10799_s20 + $0x50] sm:$0xff] %v2922_v16  ;;  %v2914_v58 = vadd.f32 %v2913_v24, %v10790_v46  ;;  %v10890_v16 = vmax.f32 %v3173_v31, 0.0 }
 0x47b   : > { %v8308_v28 = vpop.f32.mrf.mxu0 }
 0x47c   : > { %3016 = vst [vmem:[%s10799_s20 + $0x40] sm:$0xff] %v2914_v58  ;;  %v2925_v45 = vadd.f32 %v8308_v28, %v10790_v46  ;;  %v8375_v58 = vpop.f32.mrf.mxu1 }
 0x47d   : > { %v2916_v18 = vpop.f32.mrf.mxu0  ;;  %v10916_v42 = vmax.f32 %v8375_v58, 0.0 }
 0x47e   : > { %3019 = vst [vmem:[%s10799_s20 + $0x58] sm:$0xff] %v2925_v45  ;;  %v2917_v1 = vadd.f32 %v2916_v18, %v10790_v46  ;;  %v10896_v45 = vmax.f32 %v8371_v29, 0.0  ;;  %v3450_v18 = vadd.f32 %v3449_v35, %v10890_v16 }
 0x480   : > { %3017 = vst [vmem:[%s10799_s20 + $0x48] sm:$0xff] %v2917_v1  ;;  %v3186_v1 = vpop.f32.mrf.mxu1  ;;  %v3451_v34 = vadd.f32 %v3450_v18, %v10896_v45 }
 0x481   : > { %v10903_v17 = vmax.f32 %v3186_v1, 0.0 }
 0x482   : > { %v8376_v57 = vpop.f32.mrf.mxu1  ;;  %v3452_v53 = vadd.f32 %v3451_v34, %v10900_v13 }
 0x483   : > { %v10920_v36 = vmax.f32 %v8376_v57, 0.0 }
 0x484   : > { %v3189_v12 = vpop.f32.mrf.mxu1  ;;  %v3453_v59 = vadd.f32 %v3452_v53, %v10903_v17 }
 0x487   : > { %v8311_v56 = vpop.f32.mrf.mxu0 }
 0x488   : > { %v2938_v47 = vadd.f32 %v8311_v56, %v10790_v46 }
 0x489   : > { %v2929_v4 = vpop.f32.mrf.mxu0 }
 0x48a   : > { %3022 = vst [vmem:[%s10799_s20 + $0x70] sm:$0xff] %v2938_v47  ;;  %v2930_v48 = vadd.f32 %v2929_v4, %v10790_v46 }
 0x48b   : > { %v8312_v11 = vpop.f32.mrf.mxu0 }
 0x48c   : > { %3020 = vst [vmem:[%s10799_s20 + $0x60] sm:$0xff] %v2930_v48  ;;  %v2941_v21 = vadd.f32 %v8312_v11, %v10790_v46  ;;  %v10910_v11 = vmax.f32 %v3189_v12, 0.0 }
 0x48d   : > { %v2932_v10 = vpop.f32.mrf.mxu0 }
 0x48e   : > { %3023 = vst [vmem:[%s10799_s20 + $0x78] sm:$0xff] %v2941_v21  ;;  %v2933_v7 = vadd.f32 %v2932_v10, %v10790_v46  ;;  %v3454_v23 = vadd.f32 %v3453_v59, %v10910_v11 }
 0x490   : > { %3021 = vst [vmem:[%s10799_s20 + $0x68] sm:$0xff] %v2933_v7  ;;  %v3455_v3 = vadd.f32 %v3454_v23, %v10916_v42 }
 0x492   : > { %v3456_v32 = vadd.f32 %v3455_v3, %v10920_v36 }
 0x497   : > { %v8315_v15 = vpop.f32.mrf.mxu0 }
 0x498   : > { %v2954_v51 = vadd.f32 %v8315_v15, %v10790_v46 }
 0x499   : > { %v2945_v50 = vpop.f32.mrf.mxu0 }
 0x49a   : > { %3026 = vst [vmem:[%s10799_s20 + $0x90] sm:$0xff] %v2954_v51  ;;  %v2946_v2 = vadd.f32 %v2945_v50, %v10790_v46 }
 0x49b   : > { %v8316_v24 = vpop.f32.mrf.mxu0 }
 0x49c   : > { %3024 = vst [vmem:[%s10799_s20 + $0x80] sm:$0xff] %v2946_v2  ;;  %v2957_v20 = vadd.f32 %v8316_v24, %v10790_v46  ;;  %v3457_v2 = vrot.slane %v3456_v32, 4 }
 0x49d   : > { %v2948_v28 = vpop.f32.mrf.mxu0 }
 0x49e   : > { %3027 = vst [vmem:[%s10799_s20 + $0x98] sm:$0xff] %v2957_v20  ;;  %v2949_v39 = vadd.f32 %v2948_v28, %v10790_v46  ;;  %v3458_v28 = vadd.f32 %v3457_v2, %v3456_v32 }
 0x4a0   : > { %3025 = vst [vmem:[%s10799_s20 + $0x88] sm:$0xff] %v2949_v39  ;;  %v3459_v39 = vrot.slane %v3458_v28, 2 }
 0x4a2   : > { %v3460_v18 = vadd.f32 %v3459_v39, %v3458_v28 }
 0x4a4   : > { %v3461_v53 = vrot.slane %v3460_v18, 1 }
 0x4a7   : > { %v8319_v56 = vpop.f32.mrf.mxu0 }
 0x4a8   : > { %v2970_v47 = vadd.f32 %v8319_v56, %v10790_v46 }
 0x4a9   : > { %v2961_v4 = vpop.f32.mrf.mxu0 }
 0x4aa   : > { %3030 = vst [vmem:[%s10799_s20 + $0xb0] sm:$0xff] %v2970_v47  ;;  %v2962_v48 = vadd.f32 %v2961_v4, %v10790_v46 }
 0x4ab   : > { %v8320_v29 = vpop.f32.mrf.mxu0 }
 0x4ac   : > { %3028 = vst [vmem:[%s10799_s20 + $0xa0] sm:$0xff] %v2962_v48  ;;  %v2973_v21 = vadd.f32 %v8320_v29, %v10790_v46  ;;  %v10937_v48 = vadd.f32 %v3461_v53, %v3460_v18 }
 0x4ad   : > { %v2964_v10 = vpop.f32.mrf.mxu0 }
 0x4ae   : > { %3031 = vst [vmem:[%s10799_s20 + $0xb8] sm:$0xff] %v2973_v21  ;;  %v2965_v7 = vadd.f32 %v2964_v10, %v10790_v46 }
 0x4b0   : > { %3029 = vst [vmem:[%s10799_s20 + $0xa8] sm:$0xff] %v2965_v7 }
 0x4b7   : > { %v8323_v15 = vpop.f32.mrf.mxu0 }
 0x4b8   : > { %v2986_v31 = vadd.f32 %v8323_v15, %v10790_v46 }
 0x4b9   : > { %v2977_v51 = vpop.f32.mrf.mxu0 }
 0x4ba   : > { %3034 = vst [vmem:[%s10799_s20 + $0xd0] sm:$0xff] %v2986_v31  ;;  %v2978_v50 = vadd.f32 %v2977_v51, %v10790_v46 }
 0x4bb   : > { %v8324_v35 = vpop.f32.mrf.mxu0 }
 0x4bc   : > { %3032 = vst [vmem:[%s10799_s20 + $0xc0] sm:$0xff] %v2978_v50  ;;  %v2989_v24 = vadd.f32 %v8324_v35, %v10790_v46 }
 0x4bd   : > { %v2980_v58 = vpop.f32.mrf.mxu0 }
 0x4be   : > { %3035 = vst [vmem:[%s10799_s20 + $0xd8] sm:$0xff] %v2989_v24  ;;  %v2981_v20 = vadd.f32 %v2980_v58, %v10790_v46 }
 0x4c0   : > { %3033 = vst [vmem:[%s10799_s20 + $0xc8] sm:$0xff] %v2981_v20 }
 0x4c7   : > { %v8327_v1 = vpop.f32.mrf.mxu0 }
 0x4c8   : > { %v3002_v34 = vadd.f32 %v8327_v1, %v10790_v46 }
 0x4c9   : > { %v2993_v57 = vpop.f32.mrf.mxu0 }
 0x4ca   : > { %3038 = vst [vmem:[%s10799_s20 + $0xf0] sm:$0xff] %v3002_v34  ;;  %v2994_v56 = vadd.f32 %v2993_v57, %v10790_v46 }
 0x4cb   : > { %v8328_v12 = vpop.f32.mrf.mxu0 }
 0x4cc   : > { %3036 = vst [vmem:[%s10799_s20 + $0xe0] sm:$0xff] %v2994_v56  ;;  %v3005_v47 = vadd.f32 %v8328_v12, %v10790_v46 }
 0x4cd   : > { %v2996_v4 = vpop.f32.mrf.mxu0 }
 0x4ce   : > { %3039 = vst [vmem:[%s10799_s20 + $0xf8] sm:$0xff] %v3005_v47  ;;  %v2997_v59 = vadd.f32 %v2996_v4, %v10790_v46 }
 0x4cf   : > { %v8395_v29 = vpop.f32.mrf.mxu0 }
 0x4d0   : > { %3037 = vst [vmem:[%s10799_s20 + $0xe8] sm:$0xff] %v2997_v59  ;;  %v3396_v21 = vmax.f32 %v8395_v29, 0.0 }
 0x4d1   : > { %v3267_v10 = vpop.f32.mrf.mxu0 }
 0x4d2   : > { %v3394_v7 = vmax.f32 %v3267_v10, 0.0  ;;  %v3598_v23 = vmul.f32 %v10937_v48, %v3396_v21 }
 0x4d3   : > { %v8396_v3 = vpop.f32.mrf.mxu0 }
 0x4d4   : > { %v3397_v32 = vmax.f32 %v8396_v3, 0.0  ;;  %3632 = vadd.xlane.f32.xlu0 %v3598_v23  ;;  %v3596_v50 = vmul.f32 %v10937_v48, %v3394_v7 }
 0x4d5   : > { %v3270_v15 = vpop.f32.mrf.mxu0 }
 0x4d6   : > { %v10943_v31 = vpack.c.bf16 %v3397_v32, %v3396_v21  ;;  %v3395_v51 = vmax.f32 %v3270_v15, 0.0  ;;  %v3599_v2 = vmul.f32 %v10937_v48, %v3397_v32 }
 0x4d7   : > { %v8399_v35 = vpop.f32.mrf.mxu0 }
 0x4d8   : > { %v3463_v46 = vadd.f32 %v3395_v51, %v3394_v7  ;;  %v10947_v24 = vmax.f32 %v8399_v35, 0.0  ;;  %3628 = vadd.xlane.f32.xlu0 %v3596_v50  ;;  %3634 = vadd.xlane.f32.xlu1 %v3599_v2  ;;  %v10949_v58 = vpack.c.bf16 %v3395_v51, %v3394_v7  ;;  %v3597_v18 = vmul.f32 %v10937_v48, %v3395_v51 }
 0x4d9   : > { %v3283_v20 = vpop.f32.mrf.mxu0 }
 0x4da   : > { %v3464_v28 = vadd.f32 %v3463_v46, %v3396_v21  ;;  %v10951_v39 = vmax.f32 %v3283_v20, 0.0  ;;  %3916 = vmatprep.mubr.bf16.mxu1 %v10949_v58  ;;  %v3602_v1 = vmul.f32 %v10937_v48, %v10947_v24 }
 0x4db   : > { %v8400_v34 = vpop.f32.mrf.mxu0 }
 0x4dc   : > { %v3465_v57 = vadd.f32 %v3464_v28, %v3397_v32  ;;  %v10957_v53 = vmax.f32 %v8400_v34, 0.0  ;;  %3630 = vadd.xlane.f32.xlu1 %v3597_v18  ;;  %3640 = vadd.xlane.f32.xlu0 %v3602_v1  ;;  %v3600_v4 = vmul.f32 %v10937_v48, %v10951_v39 }
 0x4dd   : > { %v3286_v56 = vpop.f32.mrf.mxu0 }
 0x4de   : > { %v3466_v12 = vadd.f32 %v3465_v57, %v10951_v39  ;;  %v10960_v47 = vmax.f32 %v3286_v56, 0.0  ;;  %v3603_v59 = vmul.f32 %v10937_v48, %v10957_v53 }
 0x4df   : > { %v8403_v29 = vpop.f32.mrf.mxu0 }
 0x4e0   : > { %v3467_v21 = vadd.f32 %v3466_v12, %v10960_v47  ;;  %v10967_v10 = vmax.f32 %v8403_v29, 0.0  ;;  %3636 = vadd.xlane.f32.xlu0 %v3600_v4  ;;  %3642 = vadd.xlane.f32.xlu1 %v3603_v59  ;;  %v3601_v32 = vmul.f32 %v10937_v48, %v10960_v47 }
 0x4e1   : > { %v3299_v7 = vpop.f32.mrf.mxu0 }
 0x4e2   : > { %v3468_v23 = vadd.f32 %v3467_v21, %v10947_v24  ;;  %v10970_v3 = vmax.f32 %v3299_v7, 0.0  ;;  %v3606_v15 = vmul.f32 %v10937_v48, %v10967_v10 }
 0x4e3   : > { %v8404_v51 = vpop.f32.mrf.mxu0 }
 0x4e4   : > { %v3469_v50 = vadd.f32 %v3468_v23, %v10957_v53  ;;  %v10977_v2 = vmax.f32 %v8404_v51, 0.0  ;;  %3638 = vadd.xlane.f32.xlu1 %v3601_v32  ;;  %3648 = vadd.xlane.f32.xlu0 %v3606_v15  ;;  %v3604_v28 = vmul.f32 %v10937_v48, %v10970_v3 }
 0x4e5   : > { %v3302_v35 = vpop.f32.mrf.mxu0 }
 0x4e6   : > { %v3470_v46 = vadd.f32 %v3469_v50, %v10970_v3  ;;  %v10980_v20 = vmax.f32 %v3302_v35, 0.0  ;;  %v3607_v18 = vmul.f32 %v10937_v48, %v10977_v2 }
 0x4e7   : > { %v8407_v1 = vpop.f32.mrf.mxu0 }
 0x4e8   : > { %v3471_v34 = vadd.f32 %v3470_v46, %v10980_v20  ;;  %v3408_v57 = vmax.f32 %v8407_v1, 0.0  ;;  %3644 = vadd.xlane.f32.xlu0 %v3604_v28  ;;  %3650 = vadd.xlane.f32.xlu1 %v3607_v18  ;;  %v3605_v59 = vmul.f32 %v10937_v48, %v10980_v20  ;;  %v10998_v18 = vpack.c.bf16 %v10834_v19, %v10822_v43 }
 0x4e9   : > { %v3315_v56 = vpop.f32.mrf.mxu0 }
 0x4ea   : > { %v3472_v12 = vadd.f32 %v3471_v34, %v10967_v10  ;;  %v3406_v4 = vmax.f32 %v3315_v56, 0.0  ;;  %v3610_v29 = vmul.f32 %v10937_v48, %v3408_v57  ;;  %14078 = vst [vmem:[#allocation137_spill] sm:$0xff] %v10998_v18 }
 0x4eb   : > { %v8408_v21 = vpop.f32.mrf.mxu0 }
 0x4ec   : > { %v3473_v7 = vadd.f32 %v3472_v12, %v10977_v2  ;;  %v3409_v23 = vmax.f32 %v8408_v21, 0.0  ;;  %3646 = vadd.xlane.f32.xlu1 %v3605_v59  ;;  %3656 = vadd.xlane.f32.xlu0 %v3610_v29  ;;  %v3608_v15 = vmul.f32 %v10937_v48, %v3406_v4 }
 0x4ed   : > { %v3318_v32 = vpop.f32.mrf.mxu0 }
 0x4ee   : > { %v3474_v51 = vadd.f32 %v3473_v7, %v3406_v4  ;;  %v10993_v50 = vpack.c.bf16 %v3409_v23, %v3408_v57  ;;  %v3407_v35 = vmax.f32 %v3318_v32, 0.0  ;;  %v3611_v46 = vmul.f32 %v10937_v48, %v3409_v23 }
 0x4ef   : > { %v8411_v28 = vpop.f32.mrf.mxu0 }
 0x4f0   : > { %14077 = vst [vmem:[#allocation139_spill] sm:$0xff] %v10993_v50  ;;  %v3475_v1 = vadd.f32 %v3474_v51, %v3407_v35  ;;  %v3412_v34 = vmax.f32 %v8411_v28, 0.0  ;;  %3652 = vadd.xlane.f32.xlu0 %v3608_v15  ;;  %3885 = vmatpush1.bf16.xpose.msra.mxu1 %v10993_v50  ;;  %v3609_v7 = vmul.f32 %v10937_v48, %v3407_v35 }
 0x4f1   : > { %3658 = vadd.xlane.f32.xlu1 %v3611_v46  ;;  %v3331_v56 = vpop.f32.mrf.mxu0  ;;  %3886 = vmatprep.subr.bf16.mxu1 %v10998_v18  ;;  %v11007_v15 = vpack.c.bf16 %v3407_v35, %v3406_v4  ;;  %v11014_v50 = vpack.c.bf16 %v10815_v8, %v10811_v63 }
 0x4f2   : > { %v3476_v12 = vadd.f32 %v3475_v1, %v3408_v57  ;;  %v3410_v59 = vmax.f32 %v3331_v56, 0.0  ;;  %v3614_v29 = vmul.f32 %v10937_v48, %v3412_v34 }
 0x4f3   : > { %v8412_v21 = vpop.f32.mrf.mxu0  ;;  %14080 = vst [vmem:[#allocation168_spill] sm:$0xff] %v11007_v15  ;;  %14081 = vst [vmem:[#allocation167_spill] sm:$0xff] %v11014_v50 }
 0x4f4   : > { %v3477_v32 = vadd.f32 %v3476_v12, %v3409_v23  ;;  %v3413_v60 = vmax.f32 %v8412_v21, 0.0  ;;  %3664 = vadd.xlane.f32.xlu0 %v3614_v29  ;;  %v11005_v51 = vmul.f32 %v10937_v48, %v3410_v59 }
 0x4f5   : > { %3654 = vadd.xlane.f32.xlu1 %v3609_v7  ;;  %v3334_v46 = vpop.f32.mrf.mxu0 }
 0x4f6   : > { %14079 = vst [vmem:[#allocation169_spill] sm:$0xff] %v11005_v51  ;;  %v3478_v28 = vadd.f32 %v3477_v32, %v3410_v59  ;;  %v11009_v38 = vpack.c.bf16 %v3413_v60, %v3412_v34  ;;  %v3411_v57 = vmax.f32 %v3334_v46, 0.0  ;;  %v3615_v1 = vmul.f32 %v10937_v48, %v3413_v60 }
 0x4f7   : > { %v8415_v56 = vpop.f32.mrf.mxu0 }
 0x4f8   : > { %v3479_v23 = vadd.f32 %v3478_v28, %v3411_v57  ;;  %v11016_v12 = vpack.c.bf16 %v3411_v57, %v3410_v59  ;;  %v3416_v29 = vmax.f32 %v8415_v56, 0.0  ;;  %3887 = vmatpush1.bf16.xpose.msra.mxu1 %v11007_v15  ;;  %v11020_v4 = vmul.f32 %v10937_v48, %v3411_v57 }
 0x4f9   : > { %v3347_v35 = vpop.f32.mrf.mxu0  ;;  %3888 = vmatprep.subr.bf16.mxu1 %v11014_v50  ;;  %3666 = vadd.xlane.f32.xlu1 %v3615_v1  ;;  %v11027_v28 = vpack.c.bf16 %v10977_v2, %v10967_v10 }
 0x4fa   : > { %v3480_v21 = vadd.f32 %v3479_v23, %v3412_v34  ;;  %v3414_v7 = vmax.f32 %v3347_v35, 0.0  ;;  %v3618_v32 = vmul.f32 %v10937_v48, %v3416_v29  ;;  %v11034_v23 = vpack.c.bf16 %v10805_v6, %v10792_v33 }
 0x4fb   : > { %v8416_v46 = vpop.f32.mrf.mxu0  ;;  %14082 = vst [vmem:[#allocation165_spill] sm:$0xff] %v11027_v28 }
 0x4fc   : > { %v3481_v18 = vadd.f32 %v3480_v21, %v3413_v60  ;;  %v3417_v51 = vmax.f32 %v8416_v46, 0.0  ;;  %3672 = vadd.xlane.f32.xlu0 %v3618_v32  ;;  %v3616_v59 = vmul.f32 %v10937_v48, %v3414_v7  ;;  %14083 = vst [vmem:[#allocation161_spill] sm:$0xff] %v11034_v23 }
 0x4fd   : > { %v3350_v57 = vpop.f32.mrf.mxu0 }
 0x4fe   : > { %v3482_v56 = vadd.f32 %v3481_v18, %v3414_v7  ;;  %v11029_v15 = vpack.c.bf16 %v3417_v51, %v3416_v29  ;;  %v3415_v50 = vmax.f32 %v3350_v57, 0.0  ;;  %v3619_v34 = vmul.f32 %v10937_v48, %v3417_v51 }
 0x4ff   : > { %v8419_v1 = vpop.f32.mrf.mxu0 }
 0x500   : > { %v3483_v60 = vadd.f32 %v3482_v56, %v3415_v50  ;;  %v11036_v35 = vpack.c.bf16 %v3415_v50, %v3414_v7  ;;  %v11038_v21 = vmax.f32 %v8419_v1, 0.0  ;;  %3889 = vmatpush1.bf16.xpose.msra.mxu1 %v11027_v28  ;;  %3668 = vadd.xlane.f32.xlu0 %v3616_v59  ;;  %v3617_v2 = vmul.f32 %v10937_v48, %v3415_v50 }
 0x501   : > { %3674 = vadd.xlane.f32.xlu1 %v3619_v34  ;;  %v3363_v10 = vpop.f32.mrf.mxu0  ;;  %3890 = vmatprep.subr.bf16.mxu1 %v11034_v23  ;;  %v11053_v1 = vpack.c.bf16 %v10980_v20, %v10970_v3 }
 0x502   : > { %v3484_v18 = vadd.f32 %v3483_v60, %v3416_v29  ;;  %v11043_v32 = vmax.f32 %v3363_v10, 0.0  ;;  %v3622_v46 = vmul.f32 %v10937_v48, %v11038_v21  ;;  %v11062_v10 = vpack.c.bf16 %v10785_v52, %v10779_v37 }
 0x503   : > { %v8420_v57 = vpop.f32.mrf.mxu0  ;;  %14084 = vst [vmem:[#allocation159_spill] sm:$0xff] %v11053_v1 }
 0x504   : > { %v3485_v7 = vadd.f32 %v3484_v18, %v3417_v51  ;;  %v11047_v56 = vmax.f32 %v8420_v57, 0.0  ;;  %3680 = vadd.xlane.f32.xlu0 %v3622_v46  ;;  %v3620_v59 = vmul.f32 %v10937_v48, %v11043_v32 }
 0x505   : > { %3670 = vadd.xlane.f32.xlu1 %v3617_v2  ;;  %v3366_v34 = vpop.f32.mrf.mxu0 }
 0x506   : > { %v3486_v50 = vadd.f32 %v3485_v7, %v11043_v32  ;;  %v11056_v29 = vmax.f32 %v3366_v34, 0.0  ;;  %v3623_v60 = vmul.f32 %v10937_v48, %v11047_v56 }
 0x507   : > { %v8423_v51 = vpop.f32.mrf.mxu0 }
 0x508   : > { %v3487_v18 = vadd.f32 %v3486_v50, %v11056_v29  ;;  %v3424_v2 = vmax.f32 %v8423_v51, 0.0  ;;  %3891 = vmatpush1.bf16.xpose.msra.mxu1 %v11053_v1  ;;  %3676 = vadd.xlane.f32.xlu0 %v3620_v59  ;;  %v3621_v34 = vmul.f32 %v10937_v48, %v11056_v29  ;;  %v11076_v59 = vpack.c.bf16 %v10957_v53, %v10947_v24 }
 0x509   : > { %3682 = vadd.xlane.f32.xlu1 %v3623_v60  ;;  %v3379_v3 = vpop.f32.mrf.mxu0  ;;  %3892 = vmatprep.subr.bf16.mxu1 %v11062_v10  ;;  %v11084_v1 = vpack.c.bf16 %v10777_v0, %v10772_v61 }
 0x50a   : > { %v3488_v20 = vadd.f32 %v3487_v18, %v11038_v21  ;;  %v11068_v46 = vmax.f32 %v3379_v3, 0.0  ;;  %v3626_v57 = vmul.f32 %v10937_v48, %v3424_v2 }
 0x50b   : > { %v8424_v7 = vpop.f32.mrf.mxu0 }
 0x50c   : > { %v3489_v50 = vadd.f32 %v3488_v20, %v11047_v56  ;;  %v3425_v51 = vmax.f32 %v8424_v7, 0.0  ;;  %3688 = vadd.xlane.f32.xlu0 %v3626_v57  ;;  %v3624_v28 = vmul.f32 %v10937_v48, %v11068_v46  ;;  %v11091_v7 = vpack.c.bf16 %v10960_v47, %v10951_v39 }
 0x50d   : > { %3678 = vadd.xlane.f32.xlu1 %v3621_v34  ;;  %v3382_v60 = vpop.f32.mrf.mxu0 }
 0x50e   : > { %v3490_v18 = vadd.f32 %v3489_v50, %v11068_v46  ;;  %v3423_v3 = vmax.f32 %v3382_v60, 0.0  ;;  %v3627_v23 = vmul.f32 %v10937_v48, %v3425_v51  ;;  %v11095_v50 = vpack.c.bf16 %v10769_v41, %v10763_v9 }
 0x510   : > { %v3491_v20 = vadd.f32 %v3490_v18, %v3423_v3  ;;  %3893 = vmatpush1.bf16.xpose.msra.mxu1 %v11076_v59  ;;  %3684 = vadd.xlane.f32.xlu0 %v3624_v28  ;;  %v3625_v53 = vmul.f32 %v10937_v48, %v3423_v3  ;;  %v11101_v48 = vpack.c.bf16 %v10761_v30, %v10759_v22 }
 0x511   : > { %3690 = vadd.xlane.f32.xlu1 %v3627_v23  ;;  %3894 = vmatprep.subr.bf16.mxu1 %v11084_v1 }
 0x512   : > { %v3492_v24 = vadd.f32 %v3491_v20, %v3424_v2 }
 0x514   : > { %v3493_v57 = vadd.f32 %v3492_v24, %v3425_v51 }
 0x515   : > { %3686 = vadd.xlane.f32.xlu1 %v3625_v53 }
 0x516   : > { %v3494_v34 = vrot.slane %v3493_v57, 4 }
 0x518   : > { %v3495_v60 = vadd.f32 %v3494_v34, %v3493_v57  ;;  %3895 = vmatpush1.bf16.xpose.msra.mxu1 %v11091_v7  ;;  %v11117_v57 = vpack.c.bf16 %v10920_v36, %v10916_v42  ;;  %v11133_v34 = vpack.c.bf16 %v10910_v11, %v10903_v17 }
 0x519   : > { %3896 = vmatprep.subr.bf16.mxu1 %v11095_v50 }
 0x51a   : > { %v3496_v28 = vrot.slane %v3495_v60, 2 }
 0x51c   : > { %v3497_v23 = vadd.f32 %v3496_v28, %v3495_v60  ;;  %v3860_v28 = vpack.c.bf16 %v10850_v27, %v10843_v55 }
 0x51e   : > { %v3498_v18 = vrot.slane %v3497_v23, 1 }
 0x520   : > { %v11103_v20 = vadd.f32 %v3498_v18, %v3497_v23  ;;  %3897 = vmatpush1.bf16.xpose.msra.mxu1 %v10943_v31  ;;  %v14085_v23 = vld [vmem:[#allocation169_spill] sm:$0xff] }
 0x521   : > { %3898 = vmatprep.subr.bf16.mxu1 %v11101_v48 }
 0x522   : > { %v3515_v39 = vmul.f32 %v11103_v20, %v10820_v44  ;;  %v3514_v47 = vmul.f32 %v11103_v20, %v10818_v62  ;;  %v3513_v24 = vmul.f32 %v11103_v20, %v10834_v19  ;;  %v3512_v53 = vmul.f32 %v11103_v20, %v10822_v43 }
 0x523   : > { %v3511_v62 = vmul.f32 %v11103_v20, %v10815_v8  ;;  %v3510_v44 = vmul.f32 %v11103_v20, %v10811_v63  ;;  %v11125_v19 = vpack.c.bf16 %v3425_v51, %v3424_v2  ;;  %v3509_v43 = vmul.f32 %v11103_v20, %v10805_v6 }
 0x524   : > { %3562 = vadd.xlane.f32.xlu1 %v3515_v39  ;;  %3560 = vadd.xlane.f32.xlu0 %v3514_v47  ;;  %v3507_v63 = vmul.f32 %v11103_v20, %v10785_v52  ;;  %v3506_v8 = vmul.f32 %v11103_v20, %v10779_v37  ;;  %v3505_v6 = vmul.f32 %v11103_v20, %v10777_v0 }
 0x525   : > { %v3504_v2 = vmul.f32 %v11103_v20, %v10772_v61  ;;  %v11150_v51 = vpack.c.bf16 %v10900_v13, %v10896_v45  ;;  %v3503_v37 = vmul.f32 %v11103_v20, %v10769_v41  ;;  %v3502_v52 = vmul.f32 %v11103_v20, %v10763_v9 }
 0x526   : > { %v11160_v61 = vpack.c.bf16 %v11047_v56, %v11038_v21  ;;  %v3501_v0 = vmul.f32 %v11103_v20, %v10761_v30  ;;  %v3531_v9 = vmul.f32 %v11103_v20, %v10920_v36  ;;  %v3530_v41 = vmul.f32 %v11103_v20, %v10916_v42 }
 0x527   : > { %v3529_v30 = vmul.f32 %v11103_v20, %v10910_v11  ;;  %v3528_v21 = vmul.f32 %v11103_v20, %v10903_v17  ;;  %v11186_v56 = vpack.c.bf16 %v10880_v25, %v10876_v26  ;;  %v3527_v42 = vmul.f32 %v11103_v20, %v10900_v13 }
 0x528   : > { %3899 = vmatpush1.bf16.xpose.msra.mxu1 %v10949_v58  ;;  %3558 = vadd.xlane.f32.xlu1 %v3513_v24  ;;  %v3508_v58 = vmul.f32 %v11103_v20, %v10792_v33  ;;  %v11142_v33 = vpack.c.bf16 %v3423_v3, %v11068_v46  ;;  %v3500_v46 = vmul.f32 %v11103_v20, %v10759_v22 }
 0x529   : > { %3556 = vadd.xlane.f32.xlu0 %v3512_v53  ;;  %3900 = vmatprep.subr.bf16.mxu1 %v11117_v57  ;;  %v11168_v3 = vpack.c.bf16 %v10890_v16, %v10883_v54  ;;  %v11178_v22 = vpack.c.bf16 %v11056_v29, %v11043_v32  ;;  %v3526_v36 = vmul.f32 %v11103_v20, %v10896_v45 }
 0x52a   : > { %v3525_v17 = vmul.f32 %v11103_v20, %v10890_v16  ;;  %v3524_v11 = vmul.f32 %v11103_v20, %v10883_v54  ;;  %v11200_v32 = vpack.c.bf16 %v10870_v49, %v10863_v40  ;;  %v3523_v45 = vmul.f32 %v11103_v20, %v10880_v25 }
 0x52b   : > { %v3522_v13 = vmul.f32 %v11103_v20, %v10876_v26  ;;  %v3521_v54 = vmul.f32 %v11103_v20, %v10870_v49  ;;  %v3520_v16 = vmul.f32 %v11103_v20, %v10863_v40  ;;  %v11214_v29 = vpack.c.bf16 %v10860_v14, %v10856_v5 }
 0x52c   : > { %3554 = vadd.xlane.f32.xlu1 %v3511_v62  ;;  %v3519_v26 = vmul.f32 %v11103_v20, %v10860_v14  ;;  %v3518_v25 = vmul.f32 %v11103_v20, %v10856_v5  ;;  %v3517_v40 = vmul.f32 %v11103_v20, %v10850_v27  ;;  %v3516_v60 = vmul.f32 %v11103_v20, %v10843_v55 }
 0x52d   : > { %3552 = vadd.xlane.f32.xlu0 %v3510_v44 }
 0x530   : > { %3901 = vmatpush2.bf16.xpose.msra.mxu1 %v11125_v19  ;;  %3550 = vadd.xlane.f32.xlu1 %v3509_v43 }
 0x531   : > { %3548 = vadd.xlane.f32.xlu0 %v3508_v58  ;;  %3902 = vmatprep.subr.bf16.mxu1 %v11133_v34 }
 0x534   : > { %3546 = vadd.xlane.f32.xlu1 %v3507_v63  ;;  %v14086_v63 = vld [vmem:[#allocation159_spill] sm:$0xff] }
 0x535   : > { %3544 = vadd.xlane.f32.xlu0 %v3506_v8 }
 0x538   : > { %3903 = vmatpush2.bf16.xpose.msra.mxu1 %v11142_v33  ;;  %3542 = vadd.xlane.f32.xlu1 %v3505_v6  ;;  %v14088_v6 = vld [vmem:[#allocation165_spill] sm:$0xff] }
 0x539   : > { %3540 = vadd.xlane.f32.xlu0 %v3504_v2  ;;  %3904 = vmatprep.subr.bf16.mxu1 %v11150_v51 }
 0x53c   : > { %3538 = vadd.xlane.f32.xlu1 %v3503_v37 }
 0x53d   : > { %3536 = vadd.xlane.f32.xlu0 %v3502_v52  ;;  %v14089_v52 = vld [vmem:[#allocation167_spill] sm:$0xff] }
 0x540   : > { %3905 = vmatpush2.bf16.xpose.msra.mxu1 %v11160_v61  ;;  %3534 = vadd.xlane.f32.xlu1 %v3501_v0 }
 0x541   : > { %3532 = vadd.xlane.f32.xlu0 %v3500_v46  ;;  %3906 = vmatprep.subr.bf16.mxu1 %v11168_v3 }
 0x544   : > { %3594 = vadd.xlane.f32.xlu1 %v3531_v9  ;;  %v14091_v9 = vld [vmem:[#allocation137_spill] sm:$0xff] }
 0x545   : > { %3592 = vadd.xlane.f32.xlu0 %v3530_v41  ;;  %v14092_v41 = vld [vmem:[#allocation139_spill] sm:$0xff] }
 0x548   : > { %3907 = vmatpush2.bf16.xpose.msra.mxu1 %v11178_v22  ;;  %3590 = vadd.xlane.f32.xlu1 %v3529_v30 }
 0x549   : > { %3588 = vadd.xlane.f32.xlu0 %v3528_v21  ;;  %3908 = vmatprep.subr.bf16.mxu1 %v11186_v56 }
 0x54c   : > { %3586 = vadd.xlane.f32.xlu1 %v3527_v42  ;;  %v14093_v42 = vld [vmem:[#allocation136_spill] sm:$0xff] }
 0x54d   : > { %3584 = vadd.xlane.f32.xlu0 %v3526_v36 }
 0x550   : > { %3909 = vmatpush2.bf16.xpose.msra.mxu1 %v11029_v15  ;;  %3582 = vadd.xlane.f32.xlu1 %v3525_v17 }
 0x551   : > { %3580 = vadd.xlane.f32.xlu0 %v3524_v11  ;;  %3910 = vmatprep.subr.bf16.mxu1 %v11200_v32 }
 0x554   : > { %3578 = vadd.xlane.f32.xlu1 %v3523_v45 }
 0x555   : > { %3576 = vadd.xlane.f32.xlu0 %v3522_v13 }
 0x558   : > { %3911 = vmatpush2.bf16.xpose.msra.mxu1 %v11036_v35  ;;  %3574 = vadd.xlane.f32.xlu1 %v3521_v54 }
 0x559   : > { %3572 = vadd.xlane.f32.xlu0 %v3520_v16  ;;  %3912 = vmatprep.subr.bf16.mxu1 %v11214_v29 }
 0x55c   : > { %3570 = vadd.xlane.f32.xlu1 %v3519_v26 }
 0x55d   : > { %3568 = vadd.xlane.f32.xlu0 %v3518_v25  ;;  %v11222_v49 = vpop.xlane.xlu0 %3632 }
 0x560   : > { %3913 = vmatpush2.bf16.xpose.msra.mxu1 %v11009_v38  ;;  %3566 = vadd.xlane.f32.xlu1 %v3517_v40 }
 0x561   : > { %3564 = vadd.xlane.f32.xlu0 %v3516_v60  ;;  %v11231_v14 = vpop.xlane.xlu0 %3628  ;;  %v11233_v5 = vpop.xlane.xlu1 %3634  ;;  %3914 = vmatprep.subr.bf16.mxu1 %v3860_v28 }
 0x564   : > { %3662 = vadd.xlane.f32.xlu1 %v11020_v4 }
 0x565   : > { %3660 = vadd.xlane.f32.xlu0 %v14085_v23  ;;  %v11237_v18 = vpop.xlane.xlu1 %3630  ;;  %v11239_v39 = vpop.xlane.xlu0 %3640 }
 0x568   : > { %3915 = vmatpush2.bf16.xpose.msra.mxu1 %v11016_v12 }
 0x569   : > { %v11242_v55 = vpop.xlane.xlu0 %3636  ;;  %v11244_v27 = vpop.xlane.xlu1 %3642 }
 0x56d   : > { %v11246_v20 = vpop.xlane.xlu1 %3638  ;;  %v11248_v47 = vpop.xlane.xlu0 %3648 }
 0x56f   : > { %3917 = vmatmul.mubr.bf16.vlgmr.msra.gmra.mxu1 %v11101_v48 }
 0x570   : > { %3926 = vmatprep.mubr.bf16.mxu1 %v10943_v31 }
 0x571   : > { %v3651_v4 = vpop.xlane.xlu1 %3650  ;;  %v11252_v24 = vpop.xlane.xlu0 %3644 }
 0x575   : > { %v11254_v53 = vpop.xlane.xlu1 %3646  ;;  %v3657_v62 = vpop.xlane.xlu0 %3656 }
 0x577   : > { %3927 = vmatmul.mubr.bf16.gmra.mxu1 %v11095_v50 }
 0x578   : > { %3936 = vmatprep.mubr.bf16.mxu1 %v11091_v7  ;;  %v14087_v7 = vld [vmem:[#allocation161_spill] sm:$0xff] }
 0x579   : > { %v3653_v43 = vpop.xlane.xlu0 %3652 }
 0x57a   : > { %v3659_v44 = vpop.xlane.xlu1 %3658 }
 0x57d   : > { %v11260_v48 = vpop.xlane.xlu0 %3664 }
 0x57e   : > { %v3655_v58 = vpop.xlane.xlu1 %3654 }
 0x57f   : > { %3937 = vmatmul.mubr.bf16.gmra.mxu1 %v11084_v1 }
 0x580   : > { %3946 = vmatprep.mubr.bf16.mxu1 %v11076_v59 }
 0x582   : > { %v11262_v31 = vpop.xlane.xlu1 %3666 }
 0x585   : > { %v11266_v8 = vpop.xlane.xlu0 %3672 }
 0x587   : > { %3947 = vmatmul.mubr.bf16.gmra.mxu1 %v11062_v10  ;;  %v14090_v10 = vld [vmem:[#allocation168_spill] sm:$0xff] }
 0x588   : > { %3956 = vmatprep.mubr.bf16.mxu1 %v14086_v63 }
 0x589   : > { %v11272_v1 = vpop.xlane.xlu0 %3668 }
 0x58a   : > { %v11268_v50 = vpop.xlane.xlu1 %3674 }
 0x58d   : > { %v11276_v2 = vpop.xlane.xlu0 %3680 }
 0x58e   : > { %v11274_v59 = vpop.xlane.xlu1 %3670 }
 0x58f   : > { %3957 = vmatmul.mubr.bf16.gmra.mxu1 %v14087_v7 }
 0x590   : > { %3966 = vmatprep.mubr.bf16.mxu1 %v14088_v6 }
 0x591   : > { %v11282_v0 = vpop.xlane.xlu0 %3676 }
 0x592   : > { %v11278_v37 = vpop.xlane.xlu1 %3682 }
 0x595   : > { %v11288_v30 = vpop.xlane.xlu0 %3688 }
 0x596   : > { %v11284_v46 = vpop.xlane.xlu1 %3678 }
 0x597   : > { %3967 = vmatmul.mubr.bf16.gmra.mxu1 %v14089_v52 }
 0x598   : > { %3976 = vmatprep.mubr.bf16.mxu1 %v14090_v10 }
 0x599   : > { %v11294_v36 = vpop.xlane.xlu0 %3684 }
 0x59a   : > { %v11290_v21 = vpop.xlane.xlu1 %3690 }
 0x59e   : > { %v11296_v17 = vpop.xlane.xlu1 %3686 }
 0x59f   : > { %3977 = vmatmul.mubr.bf16.gmra.mxu1 %v14091_v9 }
 0x5a0   : > { %3986 = vmatprep.mubr.bf16.mxu1 %v14092_v41 }
 0x5a7   : > { %3987 = vmatmul.mubr.bf16.gmra.mxu1 %v14093_v42  ;;  %v14094_v42 = vld [vmem:[#allocation66_spill] sm:$0xff] }
 0x5a8   : > { %3996 = vmatprep.mubr.bf16.mxu1 %v11016_v12 }
 0x5ad   : > { %v3563_v11 = vpop.xlane.xlu1 %3562  ;;  %v3561_v45 = vpop.xlane.xlu0 %3560 }
 0x5ae   : > { %v3707_v13 = vadd.f32 %v3659_v44, %v3563_v11  ;;  %v3706_v54 = vadd.f32 %v3657_v62, %v3561_v45  ;;  %v14095_v11 = vld [vmem:[#allocation100_spill] sm:$0xff] }
 0x5af   : > { %3997 = vmatmul.mubr.bf16.gmra.mxu1 %v3860_v28  ;;  %v1036_v45 = vadd.f32 %v14095_v11, %v14094_v42  ;;  %v14101_v11 = vld [vmem:[#allocation96_spill] sm:$0xff] }
 0x5b0   : > { %vm3739_vm0 = vcmp.gt.f32.partialorder %v3707_v13, 0.0  ;;  %vm3738_vm1 = vcmp.gt.f32.partialorder %v3706_v54, 0.0  ;;  %4006 = vmatprep.mubr.bf16.mxu1 %v11009_v38 }
 0x5b1   : > { %v3771_v16 = vsel %vm3739_vm0, %v3707_v13, 1.0  ;;  %v3770_v26 = vsel %vm3738_vm1, %v3706_v54, 1.0  ;;  %v3559_v25 = vpop.xlane.xlu1 %3558  ;;  %v14097_v13 = vld [vmem:[#allocation94_spill] sm:$0xff] }
 0x5b2   : > { %8881 = vrsqrt.f32 %v3771_v16  ;;  %v3705_v12 = vadd.f32 %v3655_v58, %v3559_v25  ;;  %v3557_v40 = vpop.xlane.xlu0 %3556 }
 0x5b3   : > { %8883 = vrsqrt.f32 %v3770_v26  ;;  %v3704_v60 = vadd.f32 %v3653_v43, %v3557_v40 }
 0x5b4   : > { %vm3737_vm2 = vcmp.gt.f32.partialorder %v3705_v12, 0.0 }
 0x5b5   : > { %v3769_v23 = vsel %vm3737_vm2, %v3705_v12, 1.0  ;;  %vm3736_vm3 = vcmp.gt.f32.partialorder %v3704_v60, 0.0  ;;  %v3555_v62 = vpop.xlane.xlu1 %3554 }
 0x5b6   : > { %8885 = vrsqrt.f32 %v3769_v23  ;;  %v3768_v28 = vsel %vm3736_vm3, %v3704_v60, 1.0  ;;  %v11303_v44 = vadd.f32 %v3651_v4, %v3555_v62  ;;  %v3553_v38 = vpop.xlane.xlu0 %3552 }
 0x5b7   : > { %8887 = vrsqrt.f32 %v3768_v28  ;;  %v11306_v63 = vadd.f32 %v11248_v47, %v3553_v38  ;;  %4007 = vmatmul.mubr.bf16.gmra.mxu1 %v11214_v29  ;;  %v14098_v38 = vld [vmem:[#allocation144_spill] sm:$0xff] }
 0x5b8   : > { %vm3735_vm4 = vcmp.gt.f32.partialorder %v11303_v44, 0.0  ;;  %4016 = vmatprep.mubr.bf16.mxu1 %v11036_v35 }
 0x5b9   : > { %v3767_v43 = vsel %vm3735_vm4, %v11303_v44, 1.0  ;;  %vm3734_vm5 = vcmp.gt.f32.partialorder %v11306_v63, 0.0  ;;  %v3551_v58 = vpop.xlane.xlu1 %3550 }
 0x5ba   : > { %8889 = vrsqrt.f32 %v3767_v43  ;;  %v3766_v4 = vsel %vm3734_vm5, %v11306_v63, 1.0  ;;  %v11319_v47 = vadd.f32 %v11254_v53, %v3551_v58  ;;  %v3549_v29 = vpop.xlane.xlu0 %3548  ;;  %v14099_v58 = vld [vmem:[#allocation158_spill] sm:$0xff] }
 0x5bb   : > { %8891 = vrsqrt.f32 %v3766_v4  ;;  %v11322_v7 = vadd.f32 %v11252_v24, %v3549_v29 }
 0x5bc   : > { %vm3733_vm6 = vcmp.gt.f32.partialorder %v11319_v47, 0.0 }
 0x5bd   : > { %v3765_v35 = vsel %vm3733_vm6, %v11319_v47, 1.0  ;;  %vm3732_vm7 = vcmp.gt.f32.partialorder %v11322_v7, 0.0  ;;  %v3547_v6 = vpop.xlane.xlu1 %3546 }
 0x5be   : > { %8893 = vrsqrt.f32 %v3765_v35  ;;  %v3764_v53 = vsel %vm3732_vm7, %v11322_v7, 1.0  ;;  %v11333_v52 = vadd.f32 %v11244_v27, %v3547_v6  ;;  %v3545_v10 = vpop.xlane.xlu0 %3544  ;;  %v14096_v27 = vld [vmem:[#allocation98_spill] sm:$0xff]  ;;  %v14100_v35 = vld [vmem:[#allocation84_spill] sm:$0xff] }
 0x5bf   : > { %v8882_v24 = vpop.eup %8881  ;;  %8895 = vrsqrt.f32 %v3764_v53  ;;  %v11336_v9 = vadd.f32 %v11239_v39, %v3545_v10  ;;  %4017 = vmatmul.mubr.bf16.gmra.mxu1 %v11200_v32  ;;  %v11372_v6 = vadd.f32 %v14100_v35, %v14094_v42 }
 0x5c0   : > { %v8884_v41 = vpop.eup %8883  ;;  %v11342_v16 = vsel %vm3739_vm0, %v8882_v24, 0.0  ;;  %vm3731_vm8 = vcmp.gt.f32.partialorder %v11333_v52, 0.0  ;;  %4026 = vmatprep.mubr.bf16.mxu1 %v11029_v15 }
 0x5c1   : > { %v4139_v26 = vmul.f32 %v11342_v16, %v14096_v27  ;;  %v11349_v25 = vsel %vm3738_vm1, %v8884_v41, 0.0  ;;  %v3763_v32 = vsel %vm3731_vm8, %v11333_v52, 1.0  ;;  %vm3730_vm9 = vcmp.gt.f32.partialorder %v11336_v9, 0.0  ;;  %v3543_v39 = vpop.xlane.xlu1 %3542 }
 0x5c2   : > { %v4137_v40 = vmul.f32 %v11349_v25, %v14097_v13  ;;  %8897 = vrsqrt.f32 %v3763_v32  ;;  %v3762_v15 = vsel %vm3730_vm9, %v11336_v9, 1.0  ;;  %v11361_v23 = vadd.f32 %v11246_v20, %v3543_v39  ;;  %v3541_v54 = vpop.xlane.xlu0 %3540  ;;  %v14102_v13 = vld [vmem:[#allocation162_spill] sm:$0xff] }
 0x5c3   : > { %v8886_v62 = vpop.eup %8885  ;;  %8899 = vrsqrt.f32 %v3762_v15  ;;  %v11364_v28 = vadd.f32 %v11242_v55, %v3541_v54  ;;  %v4138_v43 = vmul.f32 %v11349_v25, %v14098_v38  ;;  %v4140_v4 = vmul.f32 %v11342_v16, %v14099_v58  ;;  %v14103_v54 = vld [vmem:[#allocation92_spill] sm:$0xff] }
 0x5c4   : > { %v8888_v29 = vpop.eup %8887  ;;  %v11375_v20 = vsel %vm3737_vm2, %v8886_v62, 0.0  ;;  %vm3729_vm10 = vcmp.gt.f32.partialorder %v11361_v23, 0.0  ;;  %v4187_v53 = vpack.c.bf16 %v4139_v26, %v4137_v40  ;;  %v1020_v62 = vadd.f32 %v14103_v54, %v14094_v42 }
 0x5c5   : > { %v4135_v55 = vmul.f32 %v11375_v20, %v1036_v45  ;;  %v11380_v10 = vsel %vm3736_vm3, %v8888_v29, 0.0  ;;  %v3761_v24 = vsel %vm3729_vm10, %v11361_v23, 1.0  ;;  %vm3728_vm11 = vcmp.gt.f32.partialorder %v11364_v28, 0.0  ;;  %v3539_v41 = vpop.xlane.xlu1 %3538  ;;  %v14105_v29 = vld [vmem:[#allocation90_spill] sm:$0xff] }
 0x5c6   : > { %v4133_v12 = vmul.f32 %v11380_v10, %v14101_v11  ;;  %8901 = vrsqrt.f32 %v3761_v24  ;;  %v3760_v27 = vsel %vm3728_vm11, %v11364_v28, 1.0  ;;  %v4188_v26 = vpack.c.bf16 %v4140_v4, %v4138_v43  ;;  %v3537_v45 = vpop.xlane.xlu0 %3536  ;;  %v14106_v24 = vld [vmem:[#allocation86_spill] sm:$0xff] }
 0x5c7   : > { %v8890_v60 = vpop.eup %8889  ;;  %8903 = vrsqrt.f32 %v3760_v27  ;;  %v11392_v32 = vadd.f32 %v11233_v5, %v3539_v41  ;;  %v11395_v39 = vadd.f32 %v11222_v49, %v3537_v45  ;;  %4027 = vmatmul.mubr.bf16.gmra.mxu1 %v11186_v56  ;;  %v4134_v40 = vmul.f32 %v11380_v10, %v14102_v13  ;;  %v14104_v5 = vld [vmem:[#allocation157_spill] sm:$0xff] }
 0x5c8   : > { %v8892_v15 = vpop.eup %8891  ;;  %v11404_v43 = vsel %vm3735_vm4, %v8890_v60, 0.0  ;;  %4205 = vmatprep.subr.bf16.mxu0 %v4188_v26  ;;  %4036 = vmatprep.mubr.bf16.mxu1 %v11178_v22  ;;  %v4136_v49 = vmul.f32 %v11375_v20, %v14104_v5  ;;  %v4185_v4 = vpack.c.bf16 %v4135_v55, %v4133_v12  ;;  %v14107_v26 = vld [vmem:[#allocation142_spill] sm:$0xff] }
 0x5c9   : > { %v4131_v56 = vmul.f32 %v11404_v43, %v14105_v29  ;;  %v11413_v35 = vsel %vm3734_vm5, %v8892_v15, 0.0  ;;  %vm3727_vm12 = vcmp.gt.f32.partialorder %v11392_v32, 0.0  ;;  %vm3726_vm13 = vcmp.gt.f32.partialorder %v11395_v39, 0.0  ;;  %4206 = vmatpush1.bf16.msra.mxu0 %v4187_v53  ;;  %v3535_v44 = vpop.xlane.xlu1 %3534  ;;  %v14109_v29 = vld [vmem:[#allocation88_spill] sm:$0xff] }
 0x5ca   : > { %v4129_v22 = vmul.f32 %v11413_v35, %v14106_v24  ;;  %v3759_v55 = vsel %vm3727_vm12, %v11392_v32, 1.0  ;;  %v3758_v41 = vsel %vm3726_vm13, %v11395_v39, 1.0  ;;  %v4186_v63 = vpack.c.bf16 %v4136_v49, %v4134_v40  ;;  %v3533_v11 = vpop.xlane.xlu0 %3532  ;;  %v14108_v40 = vld [vmem:[#allocation160_spill] sm:$0xff] }
 0x5cb   : > { %v8894_v12 = vpop.eup %8893  ;;  %8905 = vrsqrt.f32 %v3759_v55  ;;  %v11426_v27 = vadd.f32 %v11237_v18, %v3535_v44  ;;  %v11429_v53 = vadd.f32 %v11231_v14, %v3533_v11  ;;  %v4130_v45 = vmul.f32 %v11413_v35, %v14107_v26 }
 0x5cc   : > { %v8896_v60 = vpop.eup %8895  ;;  %v11435_v15 = vsel %vm3733_vm6, %v8894_v12, 0.0  ;;  %8907 = vrsqrt.f32 %v3758_v41  ;;  %4207 = vmatprep.subr.bf16.mxu0 %v4186_v63  ;;  %v4132_v54 = vmul.f32 %v11404_v43, %v14108_v40  ;;  %v4183_v49 = vpack.c.bf16 %v4131_v56, %v4129_v22  ;;  %v14110_v41 = vld [vmem:[#allocation141_spill] sm:$0xff] }
 0x5cd   : > { %v4127_v18 = vmul.f32 %v11435_v15, %v1020_v62  ;;  %v11442_v14 = vsel %vm3732_vm7, %v8896_v60, 0.0  ;;  %vm3725_vm14 = vcmp.gt.f32.partialorder %v11426_v27, 0.0  ;;  %vm3724_vm15 = vcmp.gt.f32.partialorder %v11429_v53, 0.0  ;;  %4208 = vmatpush1.bf16.msra.mxu0 %v4185_v4  ;;  %v3595_v47 = vpop.xlane.xlu1 %3594 }
 0x5ce   : > { %v4125_v44 = vmul.f32 %v11442_v14, %v14109_v29  ;;  %v3757_v24 = vsel %vm3725_vm14, %v11426_v27, 1.0  ;;  %v3756_v62 = vsel %vm3724_vm15, %v11429_v53, 1.0  ;;  %v4184_v7 = vpack.c.bf16 %v4132_v54, %v4130_v45  ;;  %v3593_v56 = vpop.xlane.xlu0 %3592  ;;  %v14111_v45 = vld [vmem:[#allocation143_spill] sm:$0xff] }
 0x5cf   : > { %v8898_v22 = vpop.eup %8897  ;;  %8909 = vrsqrt.f32 %v3757_v24  ;;  %v11455_v55 = vadd.f32 %v11290_v21, %v3595_v47  ;;  %v11458_v4 = vadd.f32 %v11288_v30, %v3593_v56  ;;  %4037 = vmatmul.mubr.bf16.gmra.mxu1 %v11168_v3  ;;  %v4126_v63 = vmul.f32 %v11442_v14, %v14110_v41  ;;  %v14112_v30 = vld [vmem:[#allocation82_spill] sm:$0xff] }
 0x5d0   : > { %v8900_v11 = vpop.eup %8899  ;;  %v11465_v12 = vsel %vm3731_vm8, %v8898_v22, 0.0  ;;  %8911 = vrsqrt.f32 %v3756_v62  ;;  %4209 = vmatprep.subr.bf16.mxu0 %v4184_v7  ;;  %4046 = vmatprep.mubr.bf16.mxu1 %v11160_v61  ;;  %v4128_v21 = vmul.f32 %v11435_v15, %v14111_v45  ;;  %v4181_v60 = vpack.c.bf16 %v4127_v18, %v4125_v44  ;;  %v14113_v47 = vld [vmem:[#allocation78_spill] sm:$0xff]  ;;  %v14114_v7 = vld [vmem:[#allocation44_spill] sm:$0xff] }
 0x5d1   : > { %v4123_v54 = vmul.f32 %v11465_v12, %v14112_v30  ;;  %v11474_v3 = vsel %vm3730_vm9, %v8900_v11, 0.0  ;;  %vm3755_vm0 = vcmp.gt.f32.partialorder %v11455_v55, 0.0  ;;  %vm3754_vm1 = vcmp.gt.f32.partialorder %v11458_v4, 0.0  ;;  %4210 = vmatpush1.bf16.msra.mxu0 %v4183_v49  ;;  %v3591_v52 = vpop.xlane.xlu1 %3590 }
 0x5d2   : > { %v4121_v61 = vmul.f32 %v11474_v3, %v14113_v47  ;;  %v3787_v18 = vsel %vm3755_vm0, %v11455_v55, 1.0  ;;  %v3786_v29 = vsel %vm3754_vm1, %v11458_v4, 1.0  ;;  %v4182_v9 = vpack.c.bf16 %v4128_v21, %v4126_v63  ;;  %v3589_v44 = vpop.xlane.xlu0 %3588  ;;  %v14115_v63 = vld [vmem:[#allocation48_spill] sm:$0xff] }
 0x5d3   : > { %v8902_v24 = vpop.eup %8901  ;;  %8913 = vrsqrt.f32 %v3787_v18  ;;  %v11487_v62 = vadd.f32 %v11296_v17, %v3591_v52  ;;  %v11490_v49 = vadd.f32 %v11294_v36, %v3589_v44  ;;  %v4122_v56 = vmul.f32 %v11474_v3, %v14114_v7  ;;  %v14116_v52 = vld [vmem:[#allocation80_spill] sm:$0xff] }
 0x5d4   : > { %v8904_v22 = vpop.eup %8903  ;;  %v11496_v11 = vsel %vm3729_vm10, %v8902_v24, 0.0  ;;  %8915 = vrsqrt.f32 %v3786_v29  ;;  %4211 = vmatprep.subr.bf16.mxu0 %v4182_v9  ;;  %v4124_v21 = vmul.f32 %v11465_v12, %v14115_v63  ;;  %v4179_v30 = vpack.c.bf16 %v4123_v54, %v4121_v61  ;;  %v14117_v29 = vld [vmem:[#allocation46_spill] sm:$0xff]  ;;  %v14118_v24 = vld [vmem:[#allocation156_spill] sm:$0xff] }
 0x5d5   : > { %v4119_v17 = vmul.f32 %v11496_v11, %v11372_v6  ;;  %v11504_v36 = vsel %vm3728_vm11, %v8904_v22, 0.0  ;;  %vm3753_vm2 = vcmp.gt.f32.partialorder %v11487_v62, 0.0  ;;  %vm3752_vm3 = vcmp.gt.f32.partialorder %v11490_v49, 0.0  ;;  %4212 = vmatpush1.bf16.msra.mxu0 %v4181_v60  ;;  %v3587_v23 = vpop.xlane.xlu1 %3586  ;;  %v14124_v63 = vld [vmem:[#allocation124_spill] sm:$0xff] }
 0x5d6   : > { %v4117_v47 = vmul.f32 %v11504_v36, %v14116_v52  ;;  %v3785_v54 = vsel %vm3753_vm2, %v11487_v62, 1.0  ;;  %v3784_v6 = vsel %vm3752_vm3, %v11490_v49, 1.0  ;;  %v4180_v28 = vpack.c.bf16 %v4124_v21, %v4122_v56  ;;  %v3585_v61 = vpop.xlane.xlu0 %3584  ;;  %v14120_v52 = vld [vmem:[#allocation74_spill] sm:$0xff] }
 0x5d7   : > { %8917 = vrsqrt.f32 %v3785_v54  ;;  %v11517_v18 = vadd.f32 %v11278_v37, %v3587_v23  ;;  %v11520_v60 = vadd.f32 %v11276_v2, %v3585_v61  ;;  %4047 = vmatmul.mubr.bf16.gmra.mxu1 %v11150_v51  ;;  %v4118_v9 = vmul.f32 %v11504_v36, %v14117_v29  ;;  %v14119_v37 = vld [vmem:[#allocation76_spill] sm:$0xff] }
 0x5d8   : > { %v8906_v44 = vpop.eup %8905  ;;  %8919 = vrsqrt.f32 %v3784_v6  ;;  %4213 = vmatprep.subr.bf16.mxu0 %v4180_v28  ;;  %4056 = vmatprep.mubr.bf16.mxu1 %v11142_v33  ;;  %v4120_v56 = vmul.f32 %v11496_v11, %v14118_v24  ;;  %v4177_v22 = vpack.c.bf16 %v4119_v17, %v4117_v47  ;;  %v988_v23 = vadd.f32 %v14119_v37, %v14094_v42  ;;  %v14121_v6 = vld [vmem:[#allocation70_spill] sm:$0xff] }
 0x5d9   : > { %v8908_v21 = vpop.eup %8907  ;;  %v11532_v2 = vsel %vm3727_vm12, %v8906_v44, 0.0  ;;  %vm3751_vm4 = vcmp.gt.f32.partialorder %v11517_v18, 0.0  ;;  %vm3750_vm5 = vcmp.gt.f32.partialorder %v11520_v60, 0.0  ;;  %4214 = vmatpush1.bf16.msra.mxu0 %v4179_v30  ;;  %v3583_v51 = vpop.xlane.xlu1 %3582 }
 0x5da   : > { %v4115_v33 = vmul.f32 %v11532_v2, %v14120_v52  ;;  %v11540_v17 = vsel %vm3726_vm13, %v8908_v21, 0.0  ;;  %v3783_v47 = vsel %vm3751_vm4, %v11517_v18, 1.0  ;;  %v3782_v32 = vsel %vm3750_vm5, %v11520_v60, 1.0  ;;  %v3581_v54 = vpop.xlane.xlu0 %3580  ;;  %v14122_v21 = vld [vmem:[#allocation36_spill] sm:$0xff] }
 0x5db   : > { %v4113_v30 = vmul.f32 %v11540_v17, %v14121_v6  ;;  %8921 = vrsqrt.f32 %v3783_v47  ;;  %v4178_v28 = vpack.c.bf16 %v4120_v56, %v4118_v9  ;;  %v11551_v61 = vadd.f32 %v11284_v46, %v3583_v51  ;;  %v14123_v52 = vld [vmem:[#allocation40_spill] sm:$0xff] }
 0x5dc   : > { %v8910_v39 = vpop.eup %8909  ;;  %8923 = vrsqrt.f32 %v3782_v32  ;;  %v11554_v44 = vadd.f32 %v11282_v0, %v3581_v54  ;;  %v4114_v37 = vmul.f32 %v11540_v17, %v14122_v21  ;;  %v4116_v24 = vmul.f32 %v11532_v2, %v14123_v52  ;;  %v14125_v47 = vld [vmem:[#allocation72_spill] sm:$0xff] }
 0x5dd   : > { %v8912_v29 = vpop.eup %8911  ;;  %v11562_v6 = vadd.f32 %v14124_v63, %v14094_v42  ;;  %v11566_v46 = vsel %vm3725_vm14, %v8910_v39, 0.0  ;;  %4215 = vmatprep.subr.bf16.mxu0 %v4178_v28  ;;  %vm3749_vm6 = vcmp.gt.f32.partialorder %v11551_v61, 0.0  ;;  %v3579_v0 = vpop.xlane.xlu1 %3578  ;;  %v4175_v9 = vpack.c.bf16 %v4115_v33, %v4113_v30  ;;  %v14127_v39 = vld [vmem:[#allocation132_spill] sm:$0xff] }
 0x5de   : > { %v4111_v56 = vmul.f32 %v11566_v46, %v988_v23  ;;  %v11572_v51 = vsel %vm3724_vm15, %v8912_v29, 0.0  ;;  %v3781_v63 = vsel %vm3749_vm6, %v11551_v61, 1.0  ;;  %vm3748_vm7 = vcmp.gt.f32.partialorder %v11554_v44, 0.0  ;;  %4216 = vmatpush1.bf16.msra.mxu0 %v4177_v22  ;;  %v3577_v27 = vpop.xlane.xlu0 %3576  ;;  %v14126_v22 = vld [vmem:[#allocation38_spill] sm:$0xff] }
 0x5df   : > { %v4109_v32 = vmul.f32 %v11572_v51, %v14125_v47  ;;  %8925 = vrsqrt.f32 %v3781_v63  ;;  %v3780_v23 = vsel %vm3748_vm7, %v11554_v44, 1.0  ;;  %v4176_v33 = vpack.c.bf16 %v4116_v24, %v4114_v37  ;;  %4057 = vmatmul.mubr.bf16.gmra.mxu1 %v11133_v34  ;;  %v14130_v47 = vld [vmem:[#allocation126_spill] sm:$0xff] }
 0x5e0   : > { %v8914_v53 = vpop.eup %8913  ;;  %8927 = vrsqrt.f32 %v3780_v23  ;;  %v11585_v29 = vadd.f32 %v11268_v50, %v3579_v0  ;;  %v11588_v54 = vadd.f32 %v11266_v8, %v3577_v27  ;;  %4066 = vmatprep.mubr.bf16.mxu1 %v11125_v19  ;;  %v4110_v30 = vmul.f32 %v11572_v51, %v14126_v22  ;;  %v14128_v50 = vld [vmem:[#allocation138_spill] sm:$0xff] }
 0x5e1   : > { %v8916_v28 = vpop.eup %8915  ;;  %v1100_v63 = vadd.f32 %v14127_v39, %v14094_v42  ;;  %v11597_v34 = vsel %vm3755_vm0, %v8914_v53, 0.0  ;;  %4217 = vmatprep.subr.bf16.mxu0 %v4176_v33  ;;  %v3575_v24 = vpop.xlane.xlu1 %3574  ;;  %v4112_v37 = vmul.f32 %v11566_v46, %v14128_v50  ;;  %v4173_v8 = vpack.c.bf16 %v4111_v56, %v4109_v32  ;;  %v14129_v0 = vld [vmem:[#allocation130_spill] sm:$0xff] }
 0x5e2   : > { %v4171_v19 = vmul.f32 %v11597_v34, %v14129_v0  ;;  %v11605_v27 = vsel %vm3754_vm1, %v8916_v28, 0.0  ;;  %vm3747_vm8 = vcmp.gt.f32.partialorder %v11585_v29, 0.0  ;;  %vm3746_vm9 = vcmp.gt.f32.partialorder %v11588_v54, 0.0  ;;  %4218 = vmatpush1.bf16.msra.mxu0 %v4175_v9  ;;  %v3573_v55 = vpop.xlane.xlu0 %3572  ;;  %v14131_v28 = vld [vmem:[#allocation166_spill] sm:$0xff] }
 0x5e3   : > { %v4169_v23 = vmul.f32 %v11605_v27, %v14130_v47  ;;  %v3779_v56 = vsel %vm3747_vm8, %v11585_v29, 1.0  ;;  %v3778_v32 = vsel %vm3746_vm9, %v11588_v54, 1.0  ;;  %v11618_v4 = vadd.f32 %v11274_v59, %v3575_v24  ;;  %v14132_v59 = vld [vmem:[#allocation146_spill] sm:$0xff]  ;;  %v14145_v29 = vld [vmem:[#allocation116_spill] sm:$0xff] }
 0x5e4   : > { %v8918_v33 = vpop.eup %8917  ;;  %8929 = vrsqrt.f32 %v3779_v56  ;;  %v4174_v53 = vpack.c.bf16 %v4112_v37, %v4110_v30  ;;  %v11621_v9 = vadd.f32 %v11272_v1, %v3573_v55  ;;  %v4170_v39 = vmul.f32 %v11605_v27, %v14131_v28  ;;  %v14133_v55 = vld [vmem:[#allocation128_spill] sm:$0xff] }
 0x5e5   : > { %v8920_v0 = vpop.eup %8919  ;;  %v11627_v47 = vsel %vm3753_vm2, %v8918_v33, 0.0  ;;  %8931 = vrsqrt.f32 %v3778_v32  ;;  %vm3745_vm10 = vcmp.gt.f32.partialorder %v11618_v4, 0.0  ;;  %v3571_v50 = vpop.xlane.xlu1 %3570  ;;  %v4172_v24 = vmul.f32 %v11597_v34, %v14132_v59 }
 0x5e6   : > { %v4167_v30 = vmul.f32 %v11627_v47, %v1100_v63  ;;  %v11635_v1 = vsel %vm3752_vm3, %v8920_v0, 0.0  ;;  %v3777_v37 = vsel %vm3745_vm10, %v11618_v4, 1.0  ;;  %4219 = vmatprep.subr.bf16.mxu0 %v4174_v53  ;;  %vm3744_vm11 = vcmp.gt.f32.partialorder %v11621_v9, 0.0  ;;  %v3569_v62 = vpop.xlane.xlu0 %3568 }
 0x5e7   : > { %v4165_v56 = vmul.f32 %v11635_v1, %v14133_v55  ;;  %8933 = vrsqrt.f32 %v3777_v37  ;;  %v3776_v63 = vsel %vm3744_vm11, %v11621_v9, 1.0  ;;  %4220 = vmatpush1.bf16.msra.mxu0 %v4173_v8  ;;  %v11647_v49 = vadd.f32 %v11262_v31, %v3571_v50  ;;  %4067 = vmatmul.mubr.bf16.gmra.mxu1 %v11117_v57  ;;  %v14134_v55 = vld [vmem:[#allocation145_spill] sm:$0xff]  ;;  %v14135_v50 = vld [vmem:[#allocation147_spill] sm:$0xff] }
 0x5e8   : > { %v8922_v32 = vpop.eup %8921  ;;  %8935 = vrsqrt.f32 %v3776_v63  ;;  %v4204_v33 = vpack.c.bf16 %v4172_v24, %v4170_v39  ;;  %v11651_v53 = vadd.f32 %v11260_v48, %v3569_v62  ;;  %v4203_v0 = vpack.c.bf16 %v4171_v19, %v4169_v23  ;;  %v14136_v63 = vld [vmem:[#allocation122_spill] sm:$0xff] }
 0x5e9   : > { %v8924_v59 = vpop.eup %8923  ;;  %v11655_v37 = vsel %vm3751_vm4, %v8922_v32, 0.0  ;;  %vm3743_vm12 = vcmp.gt.f32.partialorder %v11647_v49, 0.0  ;;  %v3567_v8 = vpop.xlane.xlu1 %3566  ;;  %v4166_v31 = vmul.f32 %v11635_v1, %v14134_v55  ;;  %v4168_v57 = vmul.f32 %v11627_v47, %v14135_v50  ;;  %v14137_v23 = vld [vmem:[#allocation118_spill] sm:$0xff] }
 0x5ea   : > { %v4163_v39 = vmul.f32 %v11655_v37, %v14136_v63  ;;  %v11666_v48 = vsel %vm3750_vm5, %v8924_v59, 0.0  ;;  %v3775_v18 = vsel %vm3743_vm12, %v11647_v49, 1.0  ;;  %4221 = vmatprep.subr.bf16.mxu0 %v4204_v33  ;;  %vm3742_vm13 = vcmp.gt.f32.partialorder %v11651_v53, 0.0  ;;  %v3565_v19 = vpop.xlane.xlu0 %3564  ;;  %v14138_v63 = vld [vmem:[#allocation163_spill] sm:$0xff]  ;;  %v14139_v33 = vld [vmem:[#allocation164_spill] sm:$0xff] }
 0x5eb   : > { %v4161_v24 = vmul.f32 %v11666_v48, %v14137_v23  ;;  %8937 = vrsqrt.f32 %v3775_v18  ;;  %v3774_v62 = vsel %vm3742_vm13, %v11651_v53, 1.0  ;;  %4222 = vmatpush2.bf16.msra.mxu0 %v4203_v0  ;;  %v4202_v60 = vpack.c.bf16 %v4168_v57, %v4166_v31 }
 0x5ec   : > { %v8926_v59 = vpop.eup %8925  ;;  %8939 = vrsqrt.f32 %v3774_v62  ;;  %v4201_v32 = vpack.c.bf16 %v4167_v30, %v4165_v56  ;;  %v4162_v50 = vmul.f32 %v11666_v48, %v14138_v63  ;;  %v4164_v55 = vmul.f32 %v11655_v37, %v14139_v33  ;;  %v14140_v62 = vld [vmem:[#allocation120_spill] sm:$0xff] }
 0x5ed   : > { %v8928_v28 = vpop.eup %8927  ;;  %v11683_v23 = vsel %vm3749_vm6, %v8926_v59, 0.0  ;;  %4223 = vmatprep.subr.bf16.mxu0 %v4202_v60  ;;  %v3663_v18 = vpop.xlane.xlu1 %3662  ;;  %v4199_v22 = vpack.c.bf16 %v4163_v39, %v4161_v24  ;;  %v14141_v59 = vld [vmem:[#allocation140_spill] sm:$0xff]  ;;  %v14143_v24 = vld [vmem:[#allocation114_spill] sm:$0xff] }
 0x5ee   : > { %v4159_v0 = vmul.f32 %v11683_v23, %v11562_v6  ;;  %v11689_v30 = vsel %vm3748_vm7, %v8928_v28, 0.0  ;;  %v3709_v56 = vadd.f32 %v3663_v18, %v3567_v8  ;;  %v4200_v31 = vpack.c.bf16 %v4164_v55, %v4162_v50  ;;  %v3661_v57 = vpop.xlane.xlu0 %3660  ;;  %v14142_v63 = vld [vmem:[#allocation152_spill] sm:$0xff] }
 0x5ef   : > { %v4157_v33 = vmul.f32 %v11689_v30, %v14140_v62  ;;  %4224 = vmatpush2.bf16.msra.mxu0 %v4201_v32  ;;  %v3708_v61 = vadd.f32 %v3661_v57, %v3565_v19  ;;  %v4158_v60 = vmul.f32 %v11689_v30, %v14141_v59  ;;  %v4160_v39 = vmul.f32 %v11683_v23, %v14142_v63  ;;  %v14146_v62 = vld [vmem:[#allocation110_spill] sm:$0xff] }
 0x5f0   : > { %vm3741_vm14 = vcmp.gt.f32.partialorder %v3709_v56, 0.0  ;;  %4225 = vmatprep.subr.bf16.mxu0 %v4200_v31  ;;  %v14144_v31 = vld [vmem:[#allocation49_spill] sm:$0xff]  ;;  %v1068_v57 = vadd.f32 %v14145_v29, %v14094_v42  ;;  %v14148_v29 = vld [vmem:[#allocation112_spill] sm:$0xff] }
 0x5f1   : > { %v8930_v6 = vpop.eup %8929  ;;  %v3773_v44 = vsel %vm3741_vm14, %v3709_v56, 1.0  ;;  %vm3740_vm15 = vcmp.gt.f32.partialorder %v3708_v61, 0.0  ;;  %v4198_v28 = vpack.c.bf16 %v4160_v39, %v4158_v60  ;;  %v4197_v8 = vpack.c.bf16 %v4159_v0, %v4157_v33  ;;  %v14147_v39 = vld [vmem:[#allocation45_spill] sm:$0xff] }
 0x5f2   : > { %v8932_v55 = vpop.eup %8931  ;;  %v11700_v50 = vsel %vm3747_vm8, %v8930_v6, 0.0  ;;  %8941 = vrsqrt.f32 %v3773_v44  ;;  %v3772_v19 = vsel %vm3740_vm15, %v3708_v61, 1.0  ;;  %v8785_v61 = vld [vmem:[%s13577_s7 + $0x78] sm:$0xff]  }
 0x5f3   : > { %v4155_v32 = vmul.f32 %v11700_v50, %v14143_v24  ;;  %v11707_v18 = vsel %vm3746_vm9, %v8932_v55, 0.0  ;;  %8943 = vrsqrt.f32 %v3772_v19  ;;  %4226 = vmatpush2.bf16.msra.mxu0 %v4199_v22  ;;  %v4156_v33 = vmul.f32 %v11700_v50, %v14144_v31 }
 0x5f4   : > { %v8934_v0 = vpop.eup %8933  ;;  %v4153_v60 = vmul.f32 %v11707_v18, %v14146_v62  ;;  %4227 = vmatprep.subr.bf16.mxu0 %v4198_v28  ;;  %v4154_v6 = vmul.f32 %v11707_v18, %v14147_v39  ;;  %v14149_v28 = vld [vmem:[#allocation47_spill] sm:$0xff] }
 0x5f5   : > { %v8936_v44 = vpop.eup %8935  ;;  %v11719_v54 = vsel %vm3745_vm10, %v8934_v0, 0.0  ;;  %v14150_v39 = vld [vmem:[#allocation151_spill] sm:$0xff] }
 0x5f6   : > { %v4151_v22 = vmul.f32 %v11719_v54, %v1068_v57  ;;  %v11724_v55 = vsel %vm3744_vm11, %v8936_v44, 0.0  ;;  %v4196_v19 = vpack.c.bf16 %v4156_v33, %v4154_v6  ;;  %v4195_v24 = vpack.c.bf16 %v4155_v32, %v4153_v60  ;;  %v14151_v32 = vld [vmem:[#allocation106_spill] sm:$0xff]  ;;  %v14152_v6 = vld [vmem:[#allocation41_spill] sm:$0xff] }
 0x5f7   : > { %v4149_v62 = vmul.f32 %v11724_v55, %v14148_v29  ;;  %4228 = vmatpush2.bf16.msra.mxu0 %v4197_v8  ;;  %v4150_v31 = vmul.f32 %v11724_v55, %v14149_v28  ;;  %v4152_v4 = vmul.f32 %v11719_v54, %v14150_v39  ;;  %v14153_v29 = vld [vmem:[#allocation102_spill] sm:$0xff]  ;;  %v14154_v28 = vld [vmem:[#allocation37_spill] sm:$0xff] }
 0x5f8   : > { %v8938_v0 = vpop.eup %8937  ;;  %4229 = vmatprep.subr.bf16.mxu0 %v4196_v19 }
 0x5f9   : > { %v8940_v63 = vpop.eup %8939  ;;  %v11734_v9 = vsel %vm3743_vm12, %v8938_v0, 0.0  ;;  %v4194_v57 = vpack.c.bf16 %v4152_v4, %v4150_v31  ;;  %v4193_v33 = vpack.c.bf16 %v4151_v22, %v4149_v62  ;;  %v14155_v4 = vld [vmem:[#allocation108_spill] sm:$0xff] }
 0x5fa   : > { %v4147_v60 = vmul.f32 %v11734_v9, %v14151_v32  ;;  %v11740_v8 = vsel %vm3742_vm13, %v8940_v63, 0.0  ;;  %v4148_v44 = vmul.f32 %v11734_v9, %v14152_v6  ;;  %v1052_v0 = vadd.f32 %v14155_v4, %v14094_v42  ;;  %v8788_v4 = vld [vmem:[%s13577_s7 + $0xf0] sm:$0xff]  }
 0x5fb   : > { %v4145_v19 = vmul.f32 %v11740_v8, %v14153_v29  ;;  %4230 = vmatpush2.bf16.msra.mxu0 %v4195_v24  ;;  %v4146_v49 = vmul.f32 %v11740_v8, %v14154_v28  ;;  %v14156_v29 = vld [vmem:[#allocation154_spill] sm:$0xff] }
 0x5fc   : > { %4231 = vmatprep.subr.bf16.mxu0 %v4194_v57 }
 0x5fd   : > { %v4192_v31 = vpack.c.bf16 %v4148_v44, %v4146_v49  ;;  %v4191_v22 = vpack.c.bf16 %v4147_v60, %v4145_v19  ;;  %v14157_v44 = vld [vmem:[#allocation104_spill] sm:$0xff]  ;;  %v14158_v19 = vld [vmem:[#allocation39_spill] sm:$0xff] }
 0x5ff   : > { %v8942_v62 = vpop.eup %8941  ;;  %4232 = vmatpush2.bf16.msra.mxu0 %v4193_v33 }
 0x600   : > { %v8944_v53 = vpop.eup %8943  ;;  %v11751_v63 = vsel %vm3741_vm14, %v8942_v62, 0.0  ;;  %4233 = vmatprep.subr.bf16.mxu0 %v4192_v31  ;;  %v8786_v62 = vld [vmem:[%s13577_s7 + $0xf8] sm:$0xff]  }
 0x601   : > { %v4143_v32 = vmul.f32 %v11751_v63, %v1052_v0  ;;  %v11755_v24 = vsel %vm3740_vm15, %v8944_v53, 0.0  ;;  %v4144_v57 = vmul.f32 %v11751_v63, %v14156_v29  ;;  %8473 = vmatprep.subr.bf16.mxu1 %v8786_v62  ;;  %v8790_v53 = vld [vmem:[%s13577_s7 + $0xe8] sm:$0xff]  }
 0x602   : > { %v4141_v60 = vmul.f32 %v11755_v24, %v14157_v44  ;;  %v4142_v42 = vmul.f32 %v11755_v24, %v14158_v19  ;;  %8474 = vmatpush3.bf16.msra.mxu1 %v8786_v62 }
 0x603   : > { %4234 = vmatpush2.bf16.msra.mxu0 %v4191_v22  ;;  %8475 = vmatprep.subr.bf16.mxu1 %v8788_v4 }
 0x604   : > { %v4190_v33 = vpack.c.bf16 %v4144_v57, %v4142_v42  ;;  %v4189_v56 = vpack.c.bf16 %v4143_v32, %v4141_v60  ;;  %v8787_v60 = vld [vmem:[%s13577_s7 + $0x70] sm:$0xff]  }
 0x606   : > { %4235 = vmatprep.subr.bf16.mxu0 %v4190_v33  ;;  %8476 = vmatpush3.bf16.msra.mxu1 %v8788_v4  ;;  %v8792_v33 = vld [vmem:[%s13577_s7 + $0xe0] sm:$0xff]  }
 0x607   : > { %4236 = vmatpush2.bf16.msra.mxu0 %v4189_v56  ;;  %8477 = vmatprep.subr.bf16.mxu1 %v8790_v53 }
 0x608   : > { %8425 = vmatprep.subr.bf16.mxu0 %v8785_v61 }
 0x60a   : > { %8478 = vmatpush3.bf16.msra.mxu1 %v8790_v53 }
 0x60b   : > { %8479 = vmatprep.subr.bf16.mxu1 %v8792_v33 }
 0x60e   : > { %8480 = vmatpush3.bf16.msra.mxu1 %v8792_v33 }
 0x62f   : > { %v3918_v49 = vpop.f32.mrf.mxu1 }
 0x631   : > { %v3920_v31 = vpop.f32.mrf.mxu1 }
 0x633   : > { %v3922_v0 = vpop.f32.mrf.mxu1 }
 0x634   : > { %v4077_v57 = vpack.c.bf16 %v3922_v0, %v3918_v49  ;;  %v8789_v49 = vld [vmem:[%s13577_s7 + $0x68] sm:$0xff]  }
 0x635   : > { %v3924_v22 = vpop.f32.mrf.mxu1 }
 0x636   : > { %v4078_v32 = vpack.c.bf16 %v3924_v22, %v3920_v31  ;;  %v8791_v22 = vld [vmem:[%s13577_s7 + $0x60] sm:$0xff]  }
 0x637   : > { %v3928_v44 = vpop.f32.mrf.mxu1 }
 0x638   : > { %4237 = vmatprep.mubr.bf16.mxu0 %v4078_v32 }
 0x639   : > { %v3930_v42 = vpop.f32.mrf.mxu1  ;;  %4238 = vmatmul.mubr.bf16.vlgmr.msra.gmra.mxu0 %v4077_v57 }
 0x63a   : > { %8426 = vmatpush3.bf16.msra.mxu0 %v8785_v61 }
 0x63b   : > { %v3932_v56 = vpop.f32.mrf.mxu1  ;;  %8427 = vmatprep.subr.bf16.mxu0 %v8787_v60 }
 0x63c   : > { %v4079_v4 = vpack.c.bf16 %v3932_v56, %v3928_v44 }
 0x63d   : > { %v3934_v31 = vpop.f32.mrf.mxu1 }
 0x63e   : > { %v4080_v62 = vpack.c.bf16 %v3934_v31, %v3930_v42  ;;  %8428 = vmatpush3.bf16.msra.mxu0 %v8787_v60 }
 0x63f   : > { %v3938_v0 = vpop.f32.mrf.mxu1  ;;  %8429 = vmatprep.subr.bf16.mxu0 %v8789_v49 }
 0x640   : > { %4247 = vmatprep.mubr.bf16.mxu0 %v4080_v62 }
 0x641   : > { %v3940_v61 = vpop.f32.mrf.mxu1  ;;  %4248 = vmatmul.mubr.bf16.gmra.mxu0 %v4079_v4 }
 0x642   : > { %8430 = vmatpush3.bf16.msra.mxu0 %v8789_v49 }
 0x643   : > { %v3942_v32 = vpop.f32.mrf.mxu1  ;;  %8431 = vmatprep.subr.bf16.mxu0 %v8791_v22 }
 0x644   : > { %v4081_v19 = vpack.c.bf16 %v3942_v32, %v3938_v0 }
 0x645   : > { %v3944_v57 = vpop.f32.mrf.mxu1 }
 0x646   : > { %v4082_v53 = vpack.c.bf16 %v3944_v57, %v3940_v61  ;;  %8432 = vmatpush3.bf16.msra.mxu0 %v8791_v22 }
 0x647   : > { %v3948_v42 = vpop.f32.mrf.mxu1 }
 0x648   : > { %4257 = vmatprep.mubr.bf16.mxu0 %v4082_v53 }
 0x649   : > { %v3950_v44 = vpop.f32.mrf.mxu1  ;;  %4258 = vmatmul.mubr.bf16.gmra.mxu0 %v4081_v19 }
 0x64b   : > { %v3952_v60 = vpop.f32.mrf.mxu1 }
 0x64c   : > { %v4083_v29 = vpack.c.bf16 %v3952_v60, %v3948_v42 }
 0x64d   : > { %v3954_v56 = vpop.f32.mrf.mxu1 }
 0x64e   : > { %v4084_v31 = vpack.c.bf16 %v3954_v56, %v3950_v44 }
 0x64f   : > { %v3958_v28 = vpop.f32.mrf.mxu1 }
 0x650   : > { %4267 = vmatprep.mubr.bf16.mxu0 %v4084_v31 }
 0x651   : > { %v3960_v33 = vpop.f32.mrf.mxu1  ;;  %4268 = vmatmul.mubr.bf16.gmra.mxu0 %v4083_v29 }
 0x653   : > { %v3962_v62 = vpop.f32.mrf.mxu1 }
 0x654   : > { %v4085_v6 = vpack.c.bf16 %v3962_v62, %v3958_v28 }
 0x655   : > { %v3964_v49 = vpop.f32.mrf.mxu1 }
 0x656   : > { %v4086_v4 = vpack.c.bf16 %v3964_v49, %v3960_v33 }
 0x657   : > { %v3968_v39 = vpop.f32.mrf.mxu1 }
 0x658   : > { %4277 = vmatprep.mubr.bf16.mxu0 %v4086_v4 }
 0x659   : > { %v3970_v22 = vpop.f32.mrf.mxu1  ;;  %4278 = vmatmul.mubr.bf16.gmra.mxu0 %v4085_v6 }
 0x65b   : > { %v3972_v0 = vpop.f32.mrf.mxu1 }
 0x65c   : > { %v4087_v19 = vpack.c.bf16 %v3972_v0, %v3968_v39 }
 0x65d   : > { %v3974_v61 = vpop.f32.mrf.mxu1 }
 0x65e   : > { %v4088_v32 = vpack.c.bf16 %v3974_v61, %v3970_v22 }
 0x65f   : > { %v3978_v57 = vpop.f32.mrf.mxu1 }
 0x660   : > { %4287 = vmatprep.mubr.bf16.mxu0 %v4088_v32 }
 0x661   : > { %v3980_v53 = vpop.f32.mrf.mxu1  ;;  %4288 = vmatmul.mubr.bf16.gmra.mxu0 %v4087_v19 }
 0x663   : > { %v3982_v42 = vpop.f32.mrf.mxu1 }
 0x664   : > { %v4089_v29 = vpack.c.bf16 %v3982_v42, %v3978_v57  ;;  %v8793_v57 = vld [vmem:[%s13577_s7 + $0x58] sm:$0xff]  }
 0x665   : > { %v3984_v44 = vpop.f32.mrf.mxu1  ;;  %8433 = vmatprep.subr.bf16.mxu0 %v8793_v57  ;;  %v8794_v42 = vld [vmem:[%s13577_s7 + $0xd8] sm:$0xff]  }
 0x666   : > { %v4090_v60 = vpack.c.bf16 %v3984_v44, %v3980_v53  ;;  %8434 = vmatpush3.bf16.msra.mxu0 %v8793_v57  ;;  %8481 = vmatprep.subr.bf16.mxu1 %v8794_v42 }
 0x667   : > { %v3988_v56 = vpop.f32.mrf.mxu1  ;;  %8482 = vmatpush3.bf16.msra.mxu1 %v8794_v42 }
 0x668   : > { %4297 = vmatprep.mubr.bf16.mxu0 %v4090_v60 }
 0x669   : > { %v3990_v31 = vpop.f32.mrf.mxu1  ;;  %4298 = vmatmul.mubr.bf16.gmra.mxu0 %v4089_v29 }
 0x66b   : > { %v3992_v28 = vpop.f32.mrf.mxu1 }
 0x66c   : > { %v4091_v6 = vpack.c.bf16 %v3992_v28, %v3988_v56 }
 0x66d   : > { %v3994_v33 = vpop.f32.mrf.mxu1 }
 0x66e   : > { %v4092_v62 = vpack.c.bf16 %v3994_v33, %v3990_v31  ;;  %v8795_v31 = vld [vmem:[%s13577_s7 + $0x50] sm:$0xff]  }
 0x66f   : > { %v3998_v49 = vpop.f32.mrf.mxu1  ;;  %8435 = vmatprep.subr.bf16.mxu0 %v8795_v31  ;;  %v8796_v33 = vld [vmem:[%s13577_s7 + $0xd0] sm:$0xff]  }
 0x670   : > { %4307 = vmatprep.mubr.bf16.mxu0 %v4092_v62  ;;  %v8797_v62 = vld [vmem:[%s13577_s7 + $0x48] sm:$0xff]   ;;  %8436 = vmatpush3.bf16.msra.mxu0 %v8795_v31 }
 0x671   : > { %v4000_v4 = vpop.f32.mrf.mxu1  ;;  %4308 = vmatmul.mubr.bf16.gmra.mxu0 %v4091_v6  ;;  %8483 = vmatprep.subr.bf16.mxu1 %v8796_v33 }
 0x672   : > { %8437 = vmatprep.subr.bf16.mxu0 %v8797_v62  ;;  %8484 = vmatpush3.bf16.msra.mxu1 %v8796_v33 }
 0x673   : > { %v4002_v39 = vpop.f32.mrf.mxu1 }
 0x674   : > { %v4093_v61 = vpack.c.bf16 %v4002_v39, %v3998_v49  ;;  %v8798_v49 = vld [vmem:[%s13577_s7 + $0xc8] sm:$0xff]   ;;  %8438 = vmatpush3.bf16.msra.mxu0 %v8797_v62 }
 0x675   : > { %v4004_v22 = vpop.f32.mrf.mxu1  ;;  %8485 = vmatprep.subr.bf16.mxu1 %v8798_v49 }
 0x676   : > { %v4094_v0 = vpack.c.bf16 %v4004_v22, %v4000_v4  ;;  %8486 = vmatpush3.bf16.msra.mxu1 %v8798_v49 }
 0x677   : > { %v4008_v32 = vpop.f32.mrf.mxu1 }
 0x678   : > { %4317 = vmatprep.mubr.bf16.mxu0 %v4094_v0 }
 0x679   : > { %v4010_v19 = vpop.f32.mrf.mxu1  ;;  %4318 = vmatmul.mubr.bf16.gmra.mxu0 %v4093_v61  ;;  %v8799_v61 = vld [vmem:[%s13577_s7 + $0x40] sm:$0xff]  }
 0x67a   : > { %8439 = vmatprep.subr.bf16.mxu0 %v8799_v61 }
 0x67b   : > { %v4012_v53 = vpop.f32.mrf.mxu1  ;;  %8440 = vmatpush3.bf16.msra.mxu0 %v8799_v61 }
 0x67c   : > { %v4095_v29 = vpack.c.bf16 %v4012_v53, %v4008_v32  ;;  %v11814_v53 = vld [vmem:[%s13573_s3 + $0x38] sm:$0xff]  }
 0x67d   : > { %v4014_v44 = vpop.f32.mrf.mxu1  ;;  %8521 = vmatprep.subr.bf16.mxu0 %v11814_v53 }
 0x67e   : > { %v4096_v60 = vpack.c.bf16 %v4014_v44, %v4010_v19  ;;  %v8800_v19 = vld [vmem:[%s13577_s7 + $0xc0] sm:$0xff]  }
 0x67f   : > { %v4018_v56 = vpop.f32.mrf.mxu1  ;;  %8487 = vmatprep.subr.bf16.mxu1 %v8800_v19 }
 0x680   : > { %4327 = vmatprep.mubr.bf16.mxu0 %v4096_v60  ;;  %8488 = vmatpush3.bf16.msra.mxu1 %v8800_v19  ;;  %v11820_v60 = vld [vmem:[%s13574_s4 + $0x38] sm:$0xff]  }
 0x681   : > { %v4020_v28 = vpop.f32.mrf.mxu1  ;;  %4328 = vmatmul.mubr.bf16.gmra.mxu0 %v4095_v29  ;;  %8569 = vmatprep.subr.bf16.mxu1 %v11820_v60 }
 0x683   : > { %v4022_v6 = vpop.f32.mrf.mxu1 }
 0x684   : > { %v4097_v22 = vpack.c.bf16 %v4022_v6, %v4018_v56 }
 0x685   : > { %v4024_v4 = vpop.f32.mrf.mxu1 }
 0x686   : > { %v4098_v39 = vpack.c.bf16 %v4024_v4, %v4020_v28 }
 0x687   : > { %v4028_v0 = vpop.f32.mrf.mxu1 }
 0x688   : > { %4337 = vmatprep.mubr.bf16.mxu0 %v4098_v39 }
 0x689   : > { %v4030_v32 = vpop.f32.mrf.mxu1  ;;  %4338 = vmatmul.mubr.bf16.gmra.mxu0 %v4097_v22 }
 0x68b   : > { %v4032_v57 = vpop.f32.mrf.mxu1 }
 0x68c   : > { %v4099_v29 = vpack.c.bf16 %v4032_v57, %v4028_v0 }
 0x68d   : > { %v4034_v42 = vpop.f32.mrf.mxu1 }
 0x68e   : > { %v4100_v44 = vpack.c.bf16 %v4034_v42, %v4030_v32 }
 0x68f   : > { %v4038_v56 = vpop.f32.mrf.mxu1 }
 0x690   : > { %4347 = vmatprep.mubr.bf16.mxu0 %v4100_v44 }
 0x691   : > { %v4040_v31 = vpop.f32.mrf.mxu1  ;;  %4348 = vmatmul.mubr.bf16.gmra.mxu0 %v4099_v29 }
 0x693   : > { %v4042_v28 = vpop.f32.mrf.mxu1 }
 0x694   : > { %v4101_v6 = vpack.c.bf16 %v4042_v28, %v4038_v56 }
 0x695   : > { %v4044_v33 = vpop.f32.mrf.mxu1 }
 0x696   : > { %v4102_v62 = vpack.c.bf16 %v4044_v33, %v4040_v31 }
 0x697   : > { %v4048_v49 = vpop.f32.mrf.mxu1 }
 0x698   : > { %4357 = vmatprep.mubr.bf16.mxu0 %v4102_v62 }
 0x699   : > { %v4050_v4 = vpop.f32.mrf.mxu1  ;;  %4358 = vmatmul.mubr.bf16.gmra.mxu0 %v4101_v6 }
 0x69b   : > { %v4052_v39 = vpop.f32.mrf.mxu1 }
 0x69c   : > { %v4103_v32 = vpack.c.bf16 %v4052_v39, %v4048_v49 }
 0x69d   : > { %v4054_v22 = vpop.f32.mrf.mxu1 }
 0x69e   : > { %v4104_v61 = vpack.c.bf16 %v4054_v22, %v4050_v4 }
 0x69f   : > { %v4058_v19 = vpop.f32.mrf.mxu1 }
 0x6a0   : > { %4367 = vmatprep.mubr.bf16.mxu0 %v4104_v61 }
 0x6a1   : > { %v4060_v42 = vpop.f32.mrf.mxu1  ;;  %4368 = vmatmul.mubr.bf16.gmra.mxu0 %v4103_v32 }
 0x6a3   : > { %v4062_v0 = vpop.f32.mrf.mxu1 }
 0x6a4   : > { %v4105_v29 = vpack.c.bf16 %v4062_v0, %v4058_v19 }
 0x6a5   : > { %v4064_v57 = vpop.f32.mrf.mxu1 }
 0x6a6   : > { %v4106_v44 = vpack.c.bf16 %v4064_v57, %v4060_v42 }
 0x6a7   : > { %v4068_v59 = vpop.f32.mrf.mxu1 }
 0x6a8   : > { %4377 = vmatprep.mubr.bf16.mxu0 %v4106_v44 }
 0x6a9   : > { %v4070_v31 = vpop.f32.mrf.mxu1  ;;  %4378 = vmatmul.mubr.bf16.gmra.mxu0 %v4105_v29 }
 0x6ab   : > { %v4072_v56 = vpop.f32.mrf.mxu1 }
 0x6ac   : > { %v4107_v62 = vpack.c.bf16 %v4072_v56, %v4068_v59 }
 0x6ad   : > { %v4074_v28 = vpop.f32.mrf.mxu1 }
 0x6ae   : > { %v4108_v33 = vpack.c.bf16 %v4074_v28, %v4070_v31 }
 0x6b0   : > { %4387 = vmatprep.mubr.bf16.mxu0 %v4108_v33 }
 0x6b1   : > { %4388 = vmatmul.mubr.bf16.gmra.mxu0 %v4107_v62 }
 0x6f9   : > { %v4239_v6 = vpop.f32.mrf.mxu0 }
 0x6fa   : > { %v4398_v39 = vmul.f32 %v4239_v6, %v11572_v51 }
 0x6fb   : > { %v4241_v49 = vpop.f32.mrf.mxu0 }
 0x6fc   : > { %v4399_v32 = vmul.f32 %v4241_v49, %v11572_v51  ;;  %v9027_v49 = vld [vmem:[%s13573_s3 + $0x30] sm:$0xff]  }
 0x6fd   : > { %v4243_v4 = vpop.f32.mrf.mxu0 }
 0x6fe   : > { %v4400_v22 = vmul.f32 %v4243_v4, %v11566_v46 }
 0x6ff   : > { %v4245_v61 = vpop.f32.mrf.mxu0 }
 0x700   : > { %v4479_v19 = vpack.c.bf16 %v4400_v22, %v4398_v39  ;;  %v4401_v42 = vmul.f32 %v4245_v61, %v11566_v46 }
 0x701   : > { %v4249_v0 = vpop.f32.mrf.mxu0 }
 0x702   : > { %v4725_v57 = vpack.c.bf16 %v4401_v42, %v4399_v32  ;;  %8441 = vmatprep.mubr.bf16.mxu0 %v4479_v19  ;;  %v4402_v29 = vmul.f32 %v4249_v0, %v11540_v17  ;;  %v9030_v0 = vld [vmem:[%s13574_s4 + $0x28] sm:$0xff]  }
 0x703   : > { %v4251_v44 = vpop.f32.mrf.mxu0 }
 0x704   : > { %8489 = vmatprep.mubr.bf16.mxu1 %v4725_v57  ;;  %v4403_v28 = vmul.f32 %v4251_v44, %v11540_v17 }
 0x705   : > { %v4253_v59 = vpop.f32.mrf.mxu0 }
 0x706   : > { %v4404_v31 = vmul.f32 %v4253_v59, %v11532_v2 }
 0x707   : > { %v4255_v56 = vpop.f32.mrf.mxu0 }
 0x708   : > { %v4480_v33 = vpack.c.bf16 %v4404_v31, %v4402_v29  ;;  %v4405_v62 = vmul.f32 %v4255_v56, %v11532_v2  ;;  %v9028_v2 = vld [vmem:[%s13574_s4 + $0x30] sm:$0xff]   ;;  %v9032_v29 = vld [vmem:[%s13574_s4 + $0x20] sm:$0xff]  }
 0x709   : > { %v4259_v51 = vpop.f32.mrf.mxu0 }
 0x70a   : > { %v4726_v6 = vpack.c.bf16 %v4405_v62, %v4403_v28  ;;  %8442 = vmatmul.mubr.bf16.vlgmr.msra.gmra.mxu0 %v4480_v33  ;;  %v4406_v17 = vmul.f32 %v4259_v51, %v11504_v36  ;;  %v9033_v62 = vld [vmem:[%s13573_s3 + $0x18] sm:$0xff]  }
 0x70b   : > { %v4261_v46 = vpop.f32.mrf.mxu0  ;;  %8522 = vmatpush3.bf16.msra.mxu0 %v11814_v53 }
 0x70c   : > { %8490 = vmatmul.mubr.bf16.vlgmr.msra.gmra.mxu1 %v4726_v6  ;;  %8523 = vmatprep.subr.bf16.mxu0 %v9027_v49  ;;  %v4407_v53 = vmul.f32 %v4261_v46, %v11504_v36  ;;  %v9034_v46 = vld [vmem:[%s13574_s4 + $0x18] sm:$0xff]  }
 0x70d   : > { %v4263_v4 = vpop.f32.mrf.mxu0  ;;  %8570 = vmatpush3.bf16.msra.mxu1 %v11820_v60  ;;  %v9029_v60 = vld [vmem:[%s13573_s3 + $0x28] sm:$0xff]  }
 0x70e   : > { %v4408_v39 = vmul.f32 %v4263_v4, %v11496_v11  ;;  %8571 = vmatprep.subr.bf16.mxu1 %v9028_v2 }
 0x70f   : > { %v4265_v22 = vpop.f32.mrf.mxu0  ;;  %8524 = vmatpush3.bf16.msra.mxu0 %v9027_v49 }
 0x710   : > { %v4481_v61 = vpack.c.bf16 %v4408_v39, %v4406_v17  ;;  %v4409_v32 = vmul.f32 %v4265_v22, %v11496_v11  ;;  %8525 = vmatprep.subr.bf16.mxu0 %v9029_v60  ;;  %v9031_v11 = vld [vmem:[%s13573_s3 + $0x20] sm:$0xff]   ;;  %v9036_v39 = vld [vmem:[%s13574_s4 + $0x10] sm:$0xff]  }
 0x711   : > { %v4269_v19 = vpop.f32.mrf.mxu0  ;;  %8572 = vmatpush3.bf16.msra.mxu1 %v9028_v2 }
 0x712   : > { %v4727_v42 = vpack.c.bf16 %v4409_v32, %v4407_v53  ;;  %8445 = vmatprep.mubr.bf16.mxu0 %v4481_v61  ;;  %8573 = vmatprep.subr.bf16.mxu1 %v9030_v0  ;;  %v4410_v44 = vmul.f32 %v4269_v19, %v11474_v3  ;;  %v9037_v32 = vld [vmem:[%s13573_s3 + $0x8] sm:$0xff]  }
 0x713   : > { %v4271_v57 = vpop.f32.mrf.mxu0  ;;  %8526 = vmatpush3.bf16.msra.mxu0 %v9029_v60 }
 0x714   : > { %8493 = vmatprep.mubr.bf16.mxu1 %v4727_v42  ;;  %8527 = vmatprep.subr.bf16.mxu0 %v9031_v11  ;;  %v4411_v56 = vmul.f32 %v4271_v57, %v11474_v3  ;;  %v9038_v42 = vld [vmem:[%s13574_s4 + $0x8] sm:$0xff]  }
 0x715   : > { %v4273_v36 = vpop.f32.mrf.mxu0  ;;  %8574 = vmatpush3.bf16.msra.mxu1 %v9030_v0 }
 0x716   : > { %v4412_v59 = vmul.f32 %v4273_v36, %v11465_v12  ;;  %8575 = vmatprep.subr.bf16.mxu1 %v9032_v29  ;;  %v9040_v36 = vld [vmem:[%s13574_s4] sm:$0xff]  }
 0x717   : > { %v4275_v31 = vpop.f32.mrf.mxu0  ;;  %8528 = vmatpush3.bf16.msra.mxu0 %v9031_v11 }
 0x718   : > { %v4482_v28 = vpack.c.bf16 %v4412_v59, %v4410_v44  ;;  %v4413_v33 = vmul.f32 %v4275_v31, %v11465_v12  ;;  %8529 = vmatprep.subr.bf16.mxu0 %v9033_v62  ;;  %v9035_v12 = vld [vmem:[%s13573_s3 + $0x10] sm:$0xff]  }
 0x719   : > { %v4279_v51 = vpop.f32.mrf.mxu0  ;;  %8576 = vmatpush3.bf16.msra.mxu1 %v9032_v29 }
 0x71a   : > { %v4728_v6 = vpack.c.bf16 %v4413_v33, %v4411_v56  ;;  %8446 = vmatmul.mubr.bf16.gmra.mxu0 %v4482_v28  ;;  %8577 = vmatprep.subr.bf16.mxu1 %v9034_v46  ;;  %v4414_v4 = vmul.f32 %v4279_v51, %v11442_v14 }
 0x71b   : > { %v4281_v49 = vpop.f32.mrf.mxu0  ;;  %8530 = vmatpush3.bf16.msra.mxu0 %v9033_v62 }
 0x71c   : > { %8494 = vmatmul.mubr.bf16.gmra.mxu1 %v4728_v6  ;;  %8531 = vmatprep.subr.bf16.mxu0 %v9035_v12  ;;  %v4415_v22 = vmul.f32 %v4281_v49, %v11442_v14 }
 0x71d   : > { %v4283_v3 = vpop.f32.mrf.mxu0  ;;  %8578 = vmatpush3.bf16.msra.mxu1 %v9034_v46 }
 0x71e   : > { %v4416_v17 = vmul.f32 %v4283_v3, %v11435_v15  ;;  %8579 = vmatprep.subr.bf16.mxu1 %v9036_v39 }
 0x71f   : > { %v4285_v2 = vpop.f32.mrf.mxu0  ;;  %8532 = vmatpush3.bf16.msra.mxu0 %v9035_v12 }
 0x720   : > { %v4483_v53 = vpack.c.bf16 %v4416_v17, %v4414_v4  ;;  %v4417_v61 = vmul.f32 %v4285_v2, %v11435_v15  ;;  %8533 = vmatprep.subr.bf16.mxu0 %v9037_v32  ;;  %v9039_v15 = vld [vmem:[%s13573_s3] sm:$0xff]  }
 0x721   : > { %v4289_v60 = vpop.f32.mrf.mxu0  ;;  %8580 = vmatpush3.bf16.msra.mxu1 %v9036_v39 }
 0x722   : > { %v4729_v19 = vpack.c.bf16 %v4417_v61, %v4415_v22  ;;  %8449 = vmatprep.mubr.bf16.mxu0 %v4483_v53  ;;  %8581 = vmatprep.subr.bf16.mxu1 %v9038_v42  ;;  %v4418_v57 = vmul.f32 %v4289_v60, %v11413_v35 }
 0x723   : > { %v4291_v0 = vpop.f32.mrf.mxu0  ;;  %8534 = vmatpush3.bf16.msra.mxu0 %v9037_v32 }
 0x724   : > { %8497 = vmatprep.mubr.bf16.mxu1 %v4729_v19  ;;  %8535 = vmatprep.subr.bf16.mxu0 %v9039_v15  ;;  %v4419_v59 = vmul.f32 %v4291_v0, %v11413_v35 }
 0x725   : > { %v4293_v14 = vpop.f32.mrf.mxu0  ;;  %8582 = vmatpush3.bf16.msra.mxu1 %v9038_v42 }
 0x726   : > { %v4420_v11 = vmul.f32 %v4293_v14, %v11404_v43  ;;  %8583 = vmatprep.subr.bf16.mxu1 %v9040_v36 }
 0x727   : > { %v4295_v44 = vpop.f32.mrf.mxu0  ;;  %8536 = vmatpush3.bf16.msra.mxu0 %v9039_v15 }
 0x728   : > { %v4484_v29 = vpack.c.bf16 %v4420_v11, %v4418_v57  ;;  %v4421_v31 = vmul.f32 %v4295_v44, %v11404_v43 }
 0x729   : > { %v4299_v56 = vpop.f32.mrf.mxu0  ;;  %8584 = vmatpush3.bf16.msra.mxu1 %v9040_v36 }
 0x72a   : > { %v4730_v28 = vpack.c.bf16 %v4421_v31, %v4419_v59  ;;  %8450 = vmatmul.mubr.bf16.gmra.mxu0 %v4484_v29  ;;  %v4422_v51 = vmul.f32 %v4299_v56, %v11380_v10 }
 0x72b   : > { %v4301_v33 = vpop.f32.mrf.mxu0 }
 0x72c   : > { %8498 = vmatmul.mubr.bf16.gmra.mxu1 %v4730_v28  ;;  %v4423_v49 = vmul.f32 %v4301_v33, %v11380_v10 }
 0x72d   : > { %v4303_v62 = vpop.f32.mrf.mxu0 }
 0x72e   : > { %v4424_v6 = vmul.f32 %v4303_v62, %v11375_v20 }
 0x72f   : > { %v4305_v46 = vpop.f32.mrf.mxu0 }
 0x730   : > { %v4485_v12 = vpack.c.bf16 %v4424_v6, %v4422_v51  ;;  %v4425_v35 = vmul.f32 %v4305_v46, %v11375_v20 }
 0x731   : > { %v4309_v3 = vpop.f32.mrf.mxu0 }
 0x732   : > { %v4731_v4 = vpack.c.bf16 %v4425_v35, %v4423_v49  ;;  %8453 = vmatprep.mubr.bf16.mxu0 %v4485_v12  ;;  %v4426_v39 = vmul.f32 %v4309_v3, %v11349_v25 }
 0x733   : > { %v4311_v43 = vpop.f32.mrf.mxu0 }
 0x734   : > { %8501 = vmatprep.mubr.bf16.mxu1 %v4731_v4  ;;  %v4427_v53 = vmul.f32 %v4311_v43, %v11349_v25 }
 0x735   : > { %v4313_v17 = vpop.f32.mrf.mxu0 }
 0x736   : > { %v4428_v2 = vmul.f32 %v4313_v17, %v11342_v16 }
 0x737   : > { %v4315_v22 = vpop.f32.mrf.mxu0 }
 0x738   : > { %v4486_v61 = vpack.c.bf16 %v4428_v2, %v4426_v39  ;;  %v4429_v32 = vmul.f32 %v4315_v22, %v11342_v16 }
 0x739   : > { %v4319_v10 = vpop.f32.mrf.mxu0 }
 0x73a   : > { %v4732_v60 = vpack.c.bf16 %v4429_v32, %v4427_v53  ;;  %8454 = vmatmul.mubr.bf16.gmra.mxu0 %v4486_v61  ;;  %v4430_v42 = vmul.f32 %v4319_v10, %v11755_v24 }
 0x73b   : > { %v4321_v20 = vpop.f32.mrf.mxu0 }
 0x73c   : > { %8502 = vmatmul.mubr.bf16.gmra.mxu1 %v4732_v60  ;;  %v4431_v14 = vmul.f32 %v4321_v20, %v11755_v24 }
 0x73d   : > { %v4323_v19 = vpop.f32.mrf.mxu0 }
 0x73e   : > { %v4432_v0 = vmul.f32 %v4323_v19, %v11751_v63 }
 0x73f   : > { %v4325_v15 = vpop.f32.mrf.mxu0 }
 0x740   : > { %v4487_v57 = vpack.c.bf16 %v4432_v0, %v4430_v42  ;;  %v4433_v11 = vmul.f32 %v4325_v15, %v11751_v63 }
 0x741   : > { %v4329_v25 = vpop.f32.mrf.mxu0 }
 0x742   : > { %v4733_v36 = vpack.c.bf16 %v4433_v11, %v4431_v14  ;;  %8457 = vmatprep.mubr.bf16.mxu0 %v4487_v57  ;;  %v4434_v59 = vmul.f32 %v4329_v25, %v11740_v8 }
 0x743   : > { %v4331_v16 = vpop.f32.mrf.mxu0 }
 0x744   : > { %8505 = vmatprep.mubr.bf16.mxu1 %v4733_v36  ;;  %v4435_v56 = vmul.f32 %v4331_v16, %v11740_v8 }
 0x745   : > { %v4333_v44 = vpop.f32.mrf.mxu0 }
 0x746   : > { %v4436_v29 = vmul.f32 %v4333_v44, %v11734_v9 }
 0x747   : > { %v4335_v31 = vpop.f32.mrf.mxu0 }
 0x748   : > { %v4488_v28 = vpack.c.bf16 %v4436_v29, %v4434_v59  ;;  %v4437_v33 = vmul.f32 %v4335_v31, %v11734_v9 }
 0x749   : > { %v4339_v24 = vpop.f32.mrf.mxu0 }
 0x74a   : > { %v4734_v62 = vpack.c.bf16 %v4437_v33, %v4435_v56  ;;  %8458 = vmatmul.mubr.bf16.gmra.mxu0 %v4488_v28  ;;  %v4438_v6 = vmul.f32 %v4339_v24, %v11724_v55 }
 0x74b   : > { %v4341_v63 = vpop.f32.mrf.mxu0 }
 0x74c   : > { %8506 = vmatmul.mubr.bf16.gmra.mxu1 %v4734_v62  ;;  %v4439_v12 = vmul.f32 %v4341_v63, %v11724_v55 }
 0x74d   : > { %v4343_v51 = vpop.f32.mrf.mxu0 }
 0x74e   : > { %v4440_v46 = vmul.f32 %v4343_v51, %v11719_v54 }
 0x74f   : > { %v4345_v49 = vpop.f32.mrf.mxu0 }
 0x750   : > { %v4489_v35 = vpack.c.bf16 %v4440_v46, %v4438_v6  ;;  %v4441_v3 = vmul.f32 %v4345_v49, %v11719_v54 }
 0x751   : > { %v4349_v8 = vpop.f32.mrf.mxu0 }
 0x752   : > { %v4735_v4 = vpack.c.bf16 %v4441_v3, %v4439_v12  ;;  %8461 = vmatprep.mubr.bf16.mxu0 %v4489_v35  ;;  %v4442_v17 = vmul.f32 %v4349_v8, %v11707_v18 }
 0x753   : > { %v4351_v9 = vpop.f32.mrf.mxu0 }
 0x754   : > { %8509 = vmatprep.mubr.bf16.mxu1 %v4735_v4  ;;  %v4443_v22 = vmul.f32 %v4351_v9, %v11707_v18  ;;  %v14159_v4 = vld [vmem:[#allocation3_spill] sm:$0xff] }
 0x755   : > { %v4353_v43 = vpop.f32.mrf.mxu0  ;;  %v14161_v9 = vld [vmem:[#allocation7_spill] sm:$0xff] }
 0x756   : > { %v4444_v39 = vmul.f32 %v4353_v43, %v11700_v50  ;;  %v14162_v43 = vld [vmem:[#allocation9_spill] sm:$0xff] }
 0x757   : > { %v4355_v2 = vpop.f32.mrf.mxu0 }
 0x758   : > { %v4490_v53 = vpack.c.bf16 %v4444_v39, %v4442_v17  ;;  %v4445_v61 = vmul.f32 %v4355_v2, %v11700_v50  ;;  %v14165_v17 = vld [vmem:[#allocation15_spill] sm:$0xff]  ;;  %v14166_v39 = vld [vmem:[#allocation17_spill] sm:$0xff] }
 0x759   : > { %v4359_v55 = vpop.f32.mrf.mxu0  ;;  %v14167_v2 = vld [vmem:[#allocation19_spill] sm:$0xff] }
 0x75a   : > { %v4736_v32 = vpack.c.bf16 %v4445_v61, %v4443_v22  ;;  %8462 = vmatmul.mubr.bf16.gmra.mxu0 %v4490_v53  ;;  %v4446_v60 = vmul.f32 %v4359_v55, %v11689_v30  ;;  %v14168_v22 = vld [vmem:[#allocation21_spill] sm:$0xff]  ;;  %v14169_v53 = vld [vmem:[#allocation23_spill] sm:$0xff] }
 0x75b   : > { %v4361_v54 = vpop.f32.mrf.mxu0  ;;  %v14170_v61 = vld [vmem:[#allocation25_spill] sm:$0xff]  ;;  %v14171_v55 = vld [vmem:[#allocation27_spill] sm:$0xff] }
 0x75c   : > { %8510 = vmatmul.mubr.bf16.gmra.mxu1 %v4736_v32  ;;  %v4447_v42 = vmul.f32 %v4361_v54, %v11689_v30  ;;  %v14172_v32 = vld [vmem:[#allocation29_spill] sm:$0xff]  ;;  %v14173_v54 = vld [vmem:[#allocation31_spill] sm:$0xff] }
 0x75d   : > { %v4363_v10 = vpop.f32.mrf.mxu0 }
 0x75e   : > { %v4448_v20 = vmul.f32 %v4363_v10, %v11683_v23  ;;  %v14174_v10 = vld [vmem:[#allocation33_spill] sm:$0xff] }
 0x75f   : > { %v4365_v19 = vpop.f32.mrf.mxu0 }
 0x760   : > { %v4491_v0 = vpack.c.bf16 %v4448_v20, %v4446_v60  ;;  %v4449_v15 = vmul.f32 %v4365_v19, %v11683_v23 }
 0x761   : > { %v4369_v18 = vpop.f32.mrf.mxu0 }
 0x762   : > { %v4737_v14 = vpack.c.bf16 %v4449_v15, %v4447_v42  ;;  %8465 = vmatprep.mubr.bf16.mxu0 %v4491_v0  ;;  %v4450_v11 = vmul.f32 %v4369_v18, %v11666_v48 }
 0x763   : > { %v4371_v50 = vpop.f32.mrf.mxu0 }
 0x764   : > { %8513 = vmatprep.mubr.bf16.mxu1 %v4737_v14  ;;  %v4451_v16 = vmul.f32 %v4371_v50, %v11666_v48 }
 0x765   : > { %v4373_v57 = vpop.f32.mrf.mxu0 }
 0x766   : > { %v4452_v25 = vmul.f32 %v4373_v57, %v11655_v37 }
 0x767   : > { %v4375_v36 = vpop.f32.mrf.mxu0 }
 0x768   : > { %v4492_v44 = vpack.c.bf16 %v4452_v25, %v4450_v11  ;;  %v4453_v59 = vmul.f32 %v4375_v36, %v11655_v37 }
 0x769   : > { %v4379_v30 = vpop.f32.mrf.mxu0 }
 0x76a   : > { %v4738_v29 = vpack.c.bf16 %v4453_v59, %v4451_v16  ;;  %8466 = vmatmul.mubr.bf16.gmra.mxu0 %v4492_v44  ;;  %v4454_v56 = vmul.f32 %v4379_v30, %v11635_v1 }
 0x76b   : > { %v4381_v23 = vpop.f32.mrf.mxu0 }
 0x76c   : > { %8514 = vmatmul.mubr.bf16.gmra.mxu1 %v4738_v29  ;;  %v4455_v24 = vmul.f32 %v4381_v23, %v11635_v1 }
 0x76d   : > { %v4383_v31 = vpop.f32.mrf.mxu0 }
 0x76e   : > { %v4456_v28 = vmul.f32 %v4383_v31, %v11627_v47 }
 0x76f   : > { %v4385_v33 = vpop.f32.mrf.mxu0 }
 0x770   : > { %v4493_v62 = vpack.c.bf16 %v4456_v28, %v4454_v56  ;;  %v4457_v63 = vmul.f32 %v4385_v33, %v11627_v47  ;;  %v14160_v47 = vld [vmem:[#allocation5_spill] sm:$0xff] }
 0x771   : > { %v4389_v48 = vpop.f32.mrf.mxu0 }
 0x772   : > { %v4739_v51 = vpack.c.bf16 %v4457_v63, %v4455_v24  ;;  %8469 = vmatprep.mubr.bf16.mxu0 %v4493_v62  ;;  %v4458_v46 = vmul.f32 %v4389_v48, %v11605_v27 }
 0x773   : > { %v4391_v37 = vpop.f32.mrf.mxu0 }
 0x774   : > { %8517 = vmatprep.mubr.bf16.mxu1 %v4739_v51  ;;  %v4459_v35 = vmul.f32 %v4391_v37, %v11605_v27  ;;  %v14163_v27 = vld [vmem:[#allocation11_spill] sm:$0xff] }
 0x775   : > { %v4393_v6 = vpop.f32.mrf.mxu0 }
 0x776   : > { %v4460_v49 = vmul.f32 %v4393_v6, %v11597_v34 }
 0x777   : > { %v4395_v12 = vpop.f32.mrf.mxu0 }
 0x778   : > { %v4494_v3 = vpack.c.bf16 %v4460_v49, %v4458_v46  ;;  %v4461_v8 = vmul.f32 %v4395_v12, %v11597_v34  ;;  %v14164_v34 = vld [vmem:[#allocation13_spill] sm:$0xff] }
 0x77a   : > { %v4740_v1 = vpack.c.bf16 %v4461_v8, %v4459_v35  ;;  %8470 = vmatmul.mubr.bf16.gmra.mxu0 %v4494_v3 }
 0x77b   : > { %8537 = vmatprep.mubr.bf16.mxu0 %v14159_v4 }
 0x77c   : > { %8518 = vmatmul.mubr.bf16.gmra.mxu1 %v4740_v1 }
 0x77d   : > { %8585 = vmatprep.mubr.bf16.mxu1 %v14159_v4 }
 0x782   : > { %8538 = vmatmul.mubr.bf16.vlgmr.msra.gmra.mxu0 %v14160_v47 }
 0x783   : > { %8541 = vmatprep.mubr.bf16.mxu0 %v14161_v9 }
 0x784   : > { %8586 = vmatmul.mubr.bf16.vlgmr.msra.gmra.mxu1 %v14160_v47 }
 0x785   : > { %8589 = vmatprep.mubr.bf16.mxu1 %v14161_v9 }
 0x78a   : > { %8542 = vmatmul.mubr.bf16.gmra.mxu0 %v14162_v43 }
 0x78b   : > { %8545 = vmatprep.mubr.bf16.mxu0 %v14163_v27 }
 0x78c   : > { %8590 = vmatmul.mubr.bf16.gmra.mxu1 %v14162_v43 }
 0x78d   : > { %8593 = vmatprep.mubr.bf16.mxu1 %v14163_v27 }
 0x792   : > { %8546 = vmatmul.mubr.bf16.gmra.mxu0 %v14164_v34 }
 0x793   : > { %8549 = vmatprep.mubr.bf16.mxu0 %v14165_v17 }
 0x794   : > { %8594 = vmatmul.mubr.bf16.gmra.mxu1 %v14164_v34 }
 0x795   : > { %8597 = vmatprep.mubr.bf16.mxu1 %v14165_v17 }
 0x79a   : > { %8550 = vmatmul.mubr.bf16.gmra.mxu0 %v14166_v39 }
 0x79b   : > { %8553 = vmatprep.mubr.bf16.mxu0 %v14167_v2 }
 0x79c   : > { %8598 = vmatmul.mubr.bf16.gmra.mxu1 %v14166_v39 }
 0x79d   : > { %8601 = vmatprep.mubr.bf16.mxu1 %v14167_v2 }
 0x7a2   : > { %8554 = vmatmul.mubr.bf16.gmra.mxu0 %v14168_v22 }
 0x7a3   : > { %8557 = vmatprep.mubr.bf16.mxu0 %v14169_v53 }
 0x7a4   : > { %8602 = vmatmul.mubr.bf16.gmra.mxu1 %v14168_v22 }
 0x7a5   : > { %8605 = vmatprep.mubr.bf16.mxu1 %v14169_v53 }
 0x7aa   : > { %8558 = vmatmul.mubr.bf16.gmra.mxu0 %v14170_v61 }
 0x7ab   : > { %8561 = vmatprep.mubr.bf16.mxu0 %v14171_v55 }
 0x7ac   : > { %8606 = vmatmul.mubr.bf16.gmra.mxu1 %v14170_v61 }
 0x7ad   : > { %8609 = vmatprep.mubr.bf16.mxu1 %v14171_v55 }
 0x7b2   : > { %8562 = vmatmul.mubr.bf16.gmra.mxu0 %v14172_v32 }
 0x7b3   : > { %8565 = vmatprep.mubr.bf16.mxu0 %v14173_v54 }
 0x7b4   : > { %8610 = vmatmul.mubr.bf16.gmra.mxu1 %v14172_v32 }
 0x7b5   : > { %8613 = vmatprep.mubr.bf16.mxu1 %v14173_v54 }
 0x7ba   : > { %8566 = vmatmul.mubr.bf16.gmra.mxu0 %v14174_v10 }
 0x7bc   : > { %8614 = vmatmul.mubr.bf16.gmra.mxu1 %v14174_v10 }
 0x7ca   : > { %v11963_v60 = vpop.f32.mrf.mxu0 }
 0x7cb   : > { %14175 = vst [vmem:[#allocation155_spill] sm:$0xff] %v11963_v60 }
 0x7cc   : > { %v11965_v20 = vpop.f32.mrf.mxu1  ;;  %v11967_v19 = vpop.f32.mrf.mxu0 }
 0x7cd   : > { %14176 = vst [vmem:[#allocation153_spill] sm:$0xff] %v11965_v20  ;;  %14177 = vst [vmem:[#allocation135_spill] sm:$0xff] %v11967_v19 }
 0x7ce   : > { %v11969_v42 = vpop.f32.mrf.mxu1  ;;  %v11971_v0 = vpop.f32.mrf.mxu0 }
 0x7cf   : > { %14178 = vst [vmem:[#allocation134_spill] sm:$0xff] %v11969_v42  ;;  %14179 = vst [vmem:[#allocation150_spill] sm:$0xff] %v11971_v0 }
 0x7d0   : > { %v11973_v15 = vpop.f32.mrf.mxu1  ;;  %v11975_v18 = vpop.f32.mrf.mxu0 }
 0x7d1   : > { %14180 = vst [vmem:[#allocation148_spill] sm:$0xff] %v11973_v15  ;;  %14181 = vst [vmem:[#allocation149_spill] sm:$0xff] %v11975_v18 }
 0x7d2   : > { %v11977_v14 = vpop.f32.mrf.mxu1 }
 0x7d3   : > { %14182 = vst [vmem:[#allocation35_spill] sm:$0xff] %v11977_v14 }
 0x7da   : > { %v11979_v50 = vpop.f32.mrf.mxu0 }
 0x7db   : > { %14183 = vst [vmem:[#allocation61_spill] sm:$0xff] %v11979_v50 }
 0x7dc   : > { %v11981_v57 = vpop.f32.mrf.mxu1  ;;  %v11983_v11 = vpop.f32.mrf.mxu0 }
 0x7dd   : > { %14184 = vst [vmem:[#allocation65_spill] sm:$0xff] %v11981_v57  ;;  %14185 = vst [vmem:[#allocation64_spill] sm:$0xff] %v11983_v11 }
 0x7de   : > { %v11985_v25 = vpop.f32.mrf.mxu1  ;;  %v11987_v36 = vpop.f32.mrf.mxu0 }
 0x7df   : > { %14186 = vst [vmem:[#allocation60_spill] sm:$0xff] %v11985_v25  ;;  %14187 = vst [vmem:[#allocation69_spill] sm:$0xff] %v11987_v36 }
 0x7e0   : > { %v11989_v16 = vpop.f32.mrf.mxu1  ;;  %v11991_v44 = vpop.f32.mrf.mxu0 }
 0x7e1   : > { %14188 = vst [vmem:[#allocation63_spill] sm:$0xff] %v11989_v16  ;;  %14189 = vst [vmem:[#allocation68_spill] sm:$0xff] %v11991_v44 }
 0x7e2   : > { %v11993_v59 = vpop.f32.mrf.mxu1 }
 0x7e3   : > { %14190 = vst [vmem:[#allocation62_spill] sm:$0xff] %v11993_v59 }
 0x7ea   : > { %v11995_v30 = vpop.f32.mrf.mxu0 }
 0x7eb   : > { %14191 = vst [vmem:[#allocation57_spill] sm:$0xff] %v11995_v30 }
 0x7ec   : > { %v11997_v29 = vpop.f32.mrf.mxu1  ;;  %v11999_v23 = vpop.f32.mrf.mxu0 }
 0x7ed   : > { %14192 = vst [vmem:[#allocation53_spill] sm:$0xff] %v11997_v29  ;;  %14193 = vst [vmem:[#allocation2_spill] sm:$0xff] %v11999_v23 }
 0x7ee   : > { %v12001_v31 = vpop.f32.mrf.mxu1  ;;  %v12003_v56 = vpop.f32.mrf.mxu0 }
 0x7ef   : > { %14194 = vst [vmem:[#allocation56_spill] sm:$0xff] %v12001_v31  ;;  %14195 = vst [vmem:[#allocation52_spill] sm:$0xff] %v12003_v56 }
 0x7f0   : > { %v12005_v28 = vpop.f32.mrf.mxu1  ;;  %v12007_v33 = vpop.f32.mrf.mxu0 }
 0x7f1   : > { %14196 = vst [vmem:[#allocation4_spill] sm:$0xff] %v12005_v28  ;;  %14197 = vst [vmem:[#allocation6_spill] sm:$0xff] %v12007_v33 }
 0x7f2   : > { %v12009_v24 = vpop.f32.mrf.mxu1 }
 0x7f3   : > { %14198 = vst [vmem:[#allocation59_spill] sm:$0xff] %v12009_v24 }
 0x7fa   : > { %v12011_v62 = vpop.f32.mrf.mxu0 }
 0x7fb   : > { %14199 = vst [vmem:[#allocation55_spill] sm:$0xff] %v12011_v62 }
 0x7fc   : > { %v12013_v63 = vpop.f32.mrf.mxu1  ;;  %v12015_v48 = vpop.f32.mrf.mxu0 }
 0x7fd   : > { %14200 = vst [vmem:[#allocation8_spill] sm:$0xff] %v12013_v63  ;;  %14201 = vst [vmem:[#allocation10_spill] sm:$0xff] %v12015_v48 }
 0x7fe   : > { %v12017_v51 = vpop.f32.mrf.mxu1  ;;  %v12019_v37 = vpop.f32.mrf.mxu0 }
 0x7ff   : > { %14202 = vst [vmem:[#allocation58_spill] sm:$0xff] %v12017_v51  ;;  %14203 = vst [vmem:[#allocation54_spill] sm:$0xff] %v12019_v37 }
 0x800   : > { %v12021_v6 = vpop.f32.mrf.mxu1  ;;  %v12023_v46 = vpop.f32.mrf.mxu0 }
 0x801   : > { %14204 = vst [vmem:[#allocation12_spill] sm:$0xff] %v12021_v6  ;;  %14205 = vst [vmem:[#allocation14_spill] sm:$0xff] %v12023_v46 }
 0x802   : > { %v12025_v49 = vpop.f32.mrf.mxu1 }
 0x803   : > { %14206 = vst [vmem:[#allocation16_spill] sm:$0xff] %v12025_v49 }
 0x80a   : > { %v12027_v12 = vpop.f32.mrf.mxu0 }
 0x80b   : > { %14207 = vst [vmem:[#allocation18_spill] sm:$0xff] %v12027_v12 }
 0x80c   : > { %v12029_v35 = vpop.f32.mrf.mxu1  ;;  %v12031_v3 = vpop.f32.mrf.mxu0 }
 0x80d   : > { %14208 = vst [vmem:[#allocation51_spill] sm:$0xff] %v12029_v35  ;;  %14209 = vst [vmem:[#allocation50_spill] sm:$0xff] %v12031_v3 }
 0x80e   : > { %v12033_v8 = vpop.f32.mrf.mxu1  ;;  %v12035_v1 = vpop.f32.mrf.mxu0 }
 0x80f   : > { %14210 = vst [vmem:[#allocation43_spill] sm:$0xff] %v12033_v8  ;;  %14211 = vst [vmem:[#allocation42_spill] sm:$0xff] %v12035_v1 }
 0x810   : > { %v12037_v4 = vpop.f32.mrf.mxu1  ;;  %v12039_v47 = vpop.f32.mrf.mxu0 }
 0x811   : > { %14212 = vst [vmem:[#allocation20_spill] sm:$0xff] %v12037_v4  ;;  %14213 = vst [vmem:[#allocation22_spill] sm:$0xff] %v12039_v47 }
 0x812   : > { %v12041_v9 = vpop.f32.mrf.mxu1 }
 0x813   : > { %14214 = vst [vmem:[#allocation24_spill] sm:$0xff] %v12041_v9 }
 0x81a   : > { %v12043_v43 = vpop.f32.mrf.mxu0 }
 0x81b   : > { %14215 = vst [vmem:[#allocation26_spill] sm:$0xff] %v12043_v43 }
 0x81c   : > { %v12045_v27 = vpop.f32.mrf.mxu1  ;;  %v12047_v34 = vpop.f32.mrf.mxu0 }
 0x81d   : > { %14216 = vst [vmem:[#allocation28_spill] sm:$0xff] %v12045_v27  ;;  %14217 = vst [vmem:[#allocation30_spill] sm:$0xff] %v12047_v34 }
 0x81e   : > { %v12049_v17 = vpop.f32.mrf.mxu1  ;;  %v12051_v39 = vpop.f32.mrf.mxu0 }
 0x81f   : > { %14218 = vst [vmem:[#allocation32_spill] sm:$0xff] %v12049_v17  ;;  %14219 = vst [vmem:[#allocation169_spill] sm:$0xff] %v12051_v39 }
 0x820   : > { %v12053_v2 = vpop.f32.mrf.mxu1  ;;  %v12055_v22 = vpop.f32.mrf.mxu0 }
 0x821   : > { %14220 = vst [vmem:[#allocation159_spill] sm:$0xff] %v12053_v2  ;;  %14221 = vst [vmem:[#allocation161_spill] sm:$0xff] %v12055_v22 }
 0x822   : > { %v12057_v53 = vpop.f32.mrf.mxu1 }
 0x823   : > { %14222 = vst [vmem:[#allocation165_spill] sm:$0xff] %v12057_v53 }
 0x82a   : > { %v12059_v61 = vpop.f32.mrf.mxu0 }
 0x82b   : > { %14223 = vst [vmem:[#allocation167_spill] sm:$0xff] %v12059_v61 }
 0x82c   : > { %v12061_v55 = vpop.f32.mrf.mxu1  ;;  %v12063_v32 = vpop.f32.mrf.mxu0 }
 0x82d   : > { %14224 = vst [vmem:[#allocation168_spill] sm:$0xff] %v12061_v55  ;;  %14225 = vst [vmem:[#allocation137_spill] sm:$0xff] %v12063_v32 }
 0x82e   : > { %v12065_v54 = vpop.f32.mrf.mxu1  ;;  %v12067_v10 = vpop.f32.mrf.mxu0 }
 0x82f   : > { %14226 = vst [vmem:[#allocation139_spill] sm:$0xff] %v12065_v54  ;;  %14227 = vst [vmem:[#allocation136_spill] sm:$0xff] %v12067_v10 }
 0x830   : > { %v12069_v34 = vpop.f32.mrf.mxu1  ;;  %v12071_v17 = vpop.f32.mrf.mxu0 }
 0x831   : > { %14228 = vst [vmem:[#allocation66_spill] sm:$0xff] %v12069_v34  ;;  %14229 = vst [vmem:[#allocation100_spill] sm:$0xff] %v12071_v17 }
 0x832   : > { %v12073_v39 = vpop.f32.mrf.mxu1 }
 0x833   : > { %14230 = vst [vmem:[#allocation98_spill] sm:$0xff] %v12073_v39 }
 0x83a   : > { %v12075_v2 = vpop.f32.mrf.mxu0 }
 0x83b   : > { %14231 = vst [vmem:[#allocation94_spill] sm:$0xff] %v12075_v2 }
 0x83c   : > { %v12077_v22 = vpop.f32.mrf.mxu0  ;;  %v12079_v53 = vpop.f32.mrf.mxu1 }
 0x83d   : > { %14232 = vst [vmem:[#allocation84_spill] sm:$0xff] %v12077_v22  ;;  %14233 = vst [vmem:[#allocation96_spill] sm:$0xff] %v12079_v53 }
 0x83e   : > { %v12081_v61 = vpop.f32.mrf.mxu0  ;;  %v12083_v55 = vpop.f32.mrf.mxu1 }
 0x83f   : > { %14234 = vst [vmem:[#allocation92_spill] sm:$0xff] %v12081_v61  ;;  %14235 = vst [vmem:[#allocation90_spill] sm:$0xff] %v12083_v55 }
 0x840   : > { %v12085_v32 = vpop.f32.mrf.mxu0  ;;  %v12087_v54 = vpop.f32.mrf.mxu1 }
 0x841   : > { %14236 = vst [vmem:[#allocation86_spill] sm:$0xff] %v12085_v32  ;;  %14237 = vst [vmem:[#allocation88_spill] sm:$0xff] %v12087_v54 }
 0x842   : > { %v12089_v10 = vpop.f32.mrf.mxu1  ;;  %v8539_v34 = vpop.f32.mrf.mxu0 }
 0x843   : > { %14238 = vst [vmem:[#allocation82_spill] sm:$0xff] %v12089_v10  ;;  %v12101_v10 = vmax.f32 %v8539_v34, 0.0 }
 0x844   : > { %v4988_v17 = vpop.f32.mrf.mxu0  ;;  %v8587_v43 = vpop.f32.mrf.mxu1 }
 0x845   : > { %v12091_v2 = vmax.f32 %v4988_v17, 0.0  ;;  %v12093_v53 = vmax.f32 %v8587_v43, 0.0  ;;  %14239 = vst [vmem:[#allocation78_spill] sm:$0xff] %v12101_v10 }
 0x846   : > { %v8540_v39 = vpop.f32.mrf.mxu0  ;;  %v5181_v27 = vpop.f32.mrf.mxu1 }
 0x847   : > { %v12095_v61 = vmax.f32 %v5181_v27, 0.0  ;;  %v12111_v4 = vmax.f32 %v8540_v39, 0.0 }
 0x848   : > { %v4991_v22 = vpop.f32.mrf.mxu0  ;;  %v8588_v47 = vpop.f32.mrf.mxu1 }
 0x849   : > { %v12097_v55 = vmax.f32 %v4991_v22, 0.0  ;;  %v12099_v32 = vmax.f32 %v8588_v47, 0.0 }
 0x84a   : > { %v8543_v54 = vpop.f32.mrf.mxu0  ;;  %v5184_v9 = vpop.f32.mrf.mxu1 }
 0x84b   : > { %v5340_v1 = vadd.f32 %v12097_v55, %v12091_v2  ;;  %v12107_v17 = vpack.c.bf16 %v12099_v32, %v12093_v53  ;;  %v12109_v3 = vmax.f32 %v5184_v9, 0.0  ;;  %v12131_v63 = vmax.f32 %v8543_v54, 0.0 }
 0x84c   : > { %v5004_v43 = vpop.f32.mrf.mxu0  ;;  %v8591_v27 = vpop.f32.mrf.mxu1 }
 0x84d   : > { %v5341_v47 = vadd.f32 %v5340_v1, %v12101_v10  ;;  %v5377_v22 = vadd.f32 %v12109_v3, %v12095_v61  ;;  %v12118_v12 = vpack.c.bf16 %v12109_v3, %v12095_v61  ;;  %v12121_v46 = vmax.f32 %v5004_v43, 0.0  ;;  %14242 = vst [vmem:[#allocation74_spill] sm:$0xff] %v12131_v63 }
 0x84e   : > { %v8544_v34 = vpop.f32.mrf.mxu0  ;;  %v5197_v8 = vpop.f32.mrf.mxu1 }
 0x84f   : > { %v5378_v35 = vadd.f32 %v5377_v22, %v12093_v53  ;;  %14240 = vst [vmem:[#allocation80_spill] sm:$0xff] %v12121_v46  ;;  %v5342_v9 = vadd.f32 %v5341_v47, %v12111_v4  ;;  %v12124_v49 = vmax.f32 %v5197_v8, 0.0  ;;  %5830 = vmatprep.mubr.bf16.mxu0 %v12118_v12  ;;  %v12135_v8 = vmax.f32 %v8591_v27, 0.0 }
 0x850   : > { %v5007_v39 = vpop.f32.mrf.mxu0  ;;  %v8592_v37 = vpop.f32.mrf.mxu1  ;;  %v12139_v56 = vmax.f32 %v8544_v34, 0.0 }
 0x851   : > { %v5343_v1 = vadd.f32 %v5342_v9, %v12121_v46  ;;  %v5379_v48 = vadd.f32 %v5378_v35, %v12099_v32  ;;  %v12129_v6 = vmax.f32 %v5007_v39, 0.0  ;;  %v12142_v9 = vmax.f32 %v8592_v37, 0.0 }
 0x852   : > { %v8547_v51 = vpop.f32.mrf.mxu0  ;;  %v5200_v62 = vpop.f32.mrf.mxu1  ;;  %14243 = vst [vmem:[#allocation70_spill] sm:$0xff] %v12139_v56 }
 0x853   : > { %14241 = vst [vmem:[#allocation76_spill] sm:$0xff] %v12129_v6  ;;  %v5380_v43 = vadd.f32 %v5379_v48, %v12124_v49  ;;  %v5344_v47 = vadd.f32 %v5343_v1, %v12129_v6  ;;  %v12137_v22 = vmax.f32 %v5200_v62, 0.0  ;;  %v12155_v29 = vmax.f32 %v8547_v51, 0.0 }
 0x854   : > { %v5020_v33 = vpop.f32.mrf.mxu0  ;;  %v8595_v24 = vpop.f32.mrf.mxu1 }
 0x855   : > { %v5345_v35 = vadd.f32 %v5344_v47, %v12131_v63  ;;  %v5381_v39 = vadd.f32 %v5380_v43, %v12137_v22  ;;  %v12145_v28 = vmax.f32 %v5020_v33, 0.0  ;;  %14246 = vst [vmem:[#allocation132_spill] sm:$0xff] %v12155_v29 }
 0x856   : > { %v8548_v54 = vpop.f32.mrf.mxu0  ;;  %v5213_v23 = vpop.f32.mrf.mxu1 }
 0x857   : > { %14244 = vst [vmem:[#allocation124_spill] sm:$0xff] %v12145_v28  ;;  %v5346_v48 = vadd.f32 %v5345_v35, %v12139_v56  ;;  %v5382_v27 = vadd.f32 %v5381_v39, %v12135_v8  ;;  %v12149_v62 = vmax.f32 %v5213_v23, 0.0  ;;  %v12160_v35 = vmax.f32 %v8595_v24, 0.0 }
 0x858   : > { %v5023_v1 = vpop.f32.mrf.mxu0  ;;  %v8596_v31 = vpop.f32.mrf.mxu1  ;;  %v12163_v36 = vmax.f32 %v8548_v54, 0.0 }
 0x859   : > { %v5347_v34 = vadd.f32 %v5346_v48, %v12145_v28  ;;  %v12152_v30 = vmax.f32 %v5023_v1, 0.0  ;;  %v5383_v37 = vadd.f32 %v5382_v27, %v12142_v9  ;;  %v12166_v1 = vmax.f32 %v8596_v31, 0.0 }
 0x85a   : > { %v8551_v47 = vpop.f32.mrf.mxu0  ;;  %v5216_v43 = vpop.f32.mrf.mxu1  ;;  %14247 = vst [vmem:[#allocation130_spill] sm:$0xff] %v12163_v36  ;;  %v12238_v41 = vpack.c.bf16 %v12163_v36, %v12155_v29 }
 0x85b   : > { %14245 = vst [vmem:[#allocation72_spill] sm:$0xff] %v12152_v30  ;;  %v5348_v33 = vadd.f32 %v5347_v34, %v12152_v30  ;;  %v12158_v44 = vmax.f32 %v5216_v43, 0.0  ;;  %v5384_v23 = vadd.f32 %v5383_v37, %v12149_v62  ;;  %v12168_v27 = vmax.f32 %v8551_v47, 0.0 }
 0x85c   : > { %v5036_v39 = vpop.f32.mrf.mxu0  ;;  %v8599_v59 = vpop.f32.mrf.mxu1  ;;  %14254 = vst [vmem:[#allocation116_spill] sm:$0xff] %v12238_v41 }
 0x85d   : > { %v5349_v48 = vadd.f32 %v5348_v33, %v12155_v29  ;;  %v5385_v51 = vadd.f32 %v5384_v23, %v12158_v44  ;;  %v12171_v43 = vmax.f32 %v5036_v39, 0.0  ;;  %v12174_v16 = vmax.f32 %v8599_v59, 0.0 }
 0x85e   : > { %v8552_v11 = vpop.f32.mrf.mxu0  ;;  %v5229_v34 = vpop.f32.mrf.mxu1  ;;  %v12280_v29 = vpack.c.bf16 %v12152_v30, %v12145_v28 }
 0x85f   : > { %v5350_v24 = vadd.f32 %v5349_v48, %v12163_v36  ;;  %v12176_v37 = vmax.f32 %v8552_v11, 0.0  ;;  %v5386_v54 = vadd.f32 %v5385_v51, %v12160_v35  ;;  %v12179_v25 = vmax.f32 %v5229_v34, 0.0 }
 0x860   : > { %v5039_v31 = vpop.f32.mrf.mxu0  ;;  %v8600_v33 = vpop.f32.mrf.mxu1  ;;  %14262 = vst [vmem:[#allocation5_spill] sm:$0xff] %v12280_v29 }
 0x861   : > { %v5351_v47 = vadd.f32 %v5350_v24, %v12171_v43  ;;  %v12182_v50 = vmax.f32 %v5039_v31, 0.0  ;;  %v12184_v23 = vmax.f32 %v8600_v33, 0.0  ;;  %v12188_v39 = vpack.c.bf16 %v12176_v37, %v12168_v27 }
 0x862   : > { %v5387_v59 = vadd.f32 %v5386_v54, %v12166_v1  ;;  %v8555_v11 = vpop.f32.mrf.mxu0  ;;  %v5232_v48 = vpop.f32.mrf.mxu1 }
 0x863   : > { %14248 = vst [vmem:[#allocation126_spill] sm:$0xff] %v12188_v39  ;;  %v5352_v51 = vadd.f32 %v5351_v47, %v12182_v50  ;;  %v12194_v34 = vpack.c.bf16 %v12184_v23, %v12174_v16  ;;  %v12196_v57 = vmax.f32 %v5232_v48, 0.0  ;;  %5798 = vmatprep.subr.bf16.mxu0 %v12188_v39  ;;  %v12202_v18 = vpack.c.bf16 %v12182_v50, %v12171_v43 }
 0x864   : > { %v5388_v24 = vadd.f32 %v5387_v59, %v12179_v25  ;;  %v5052_v31 = vpop.f32.mrf.mxu0  ;;  %v8603_v33 = vpop.f32.mrf.mxu1  ;;  %v12208_v48 = vmax.f32 %v8555_v11, 0.0 }
 0x865   : > { %14249 = vst [vmem:[#allocation128_spill] sm:$0xff] %v12194_v34  ;;  %14250 = vst [vmem:[#allocation122_spill] sm:$0xff] %v12202_v18  ;;  %v5353_v54 = vadd.f32 %v5352_v51, %v12168_v27  ;;  %5799 = vmatpush1.bf16.xpose.msra.mxu0 %v12194_v34  ;;  %v12210_v19 = vmax.f32 %v5052_v31, 0.0  ;;  %v12233_v7 = vmax.f32 %v8603_v33, 0.0 }
 0x866   : > { %v5389_v47 = vadd.f32 %v5388_v24, %v12196_v57  ;;  %v8556_v0 = vpop.f32.mrf.mxu0  ;;  %v5245_v14 = vpop.f32.mrf.mxu1  ;;  %5800 = vmatprep.subr.bf16.mxu0 %v12202_v18 }
 0x867   : > { %v5354_v59 = vadd.f32 %v5353_v54, %v12176_v37  ;;  %v12213_v15 = vmax.f32 %v8556_v0, 0.0  ;;  %v12216_v60 = vmax.f32 %v5245_v14, 0.0  ;;  %v12228_v0 = vpack.c.bf16 %v12196_v57, %v12179_v25  ;;  %14253 = vst [vmem:[#allocation114_spill] sm:$0xff] %v12233_v7 }
 0x868   : > { %v5390_v42 = vadd.f32 %v5389_v47, %v12174_v16  ;;  %v5055_v51 = vpop.f32.mrf.mxu0  ;;  %v8604_v20 = vpop.f32.mrf.mxu1 }
 0x869   : > { %v5355_v24 = vadd.f32 %v5354_v59, %v12210_v19  ;;  %v12219_v52 = vmax.f32 %v5055_v51, 0.0  ;;  %v12223_v11 = vpack.c.bf16 %v12213_v15, %v12208_v48  ;;  %14252 = vst [vmem:[#allocation120_spill] sm:$0xff] %v12228_v0 }
 0x86a   : > { %v5391_v31 = vadd.f32 %v5390_v42, %v12184_v23  ;;  %v8559_v21 = vpop.f32.mrf.mxu0  ;;  %v5248_v54 = vpop.f32.mrf.mxu1 }
 0x86b   : > { %14251 = vst [vmem:[#allocation118_spill] sm:$0xff] %v12223_v11  ;;  %v5356_v14 = vadd.f32 %v5355_v24, %v12219_v52  ;;  %v12231_v47 = vmax.f32 %v5248_v54, 0.0  ;;  %v12242_v42 = vpack.c.bf16 %v12219_v52, %v12210_v19  ;;  %v12246_v24 = vmax.f32 %v8604_v20, 0.0 }
 0x86c   : > { %v5392_v59 = vadd.f32 %v5391_v31, %v12216_v60  ;;  %v5068_v51 = vpop.f32.mrf.mxu0  ;;  %v8607_v45 = vpop.f32.mrf.mxu1  ;;  %v12250_v26 = vmax.f32 %v8559_v21, 0.0 }
 0x86d   : > { %14255 = vst [vmem:[#allocation110_spill] sm:$0xff] %v12242_v42  ;;  %v5357_v40 = vadd.f32 %v5356_v14, %v12208_v48  ;;  %5801 = vmatpush1.bf16.xpose.msra.mxu0 %v12228_v0  ;;  %14256 = vst [vmem:[#allocation112_spill] sm:$0xff] %v12246_v24  ;;  %v12252_v5 = vmax.f32 %v5068_v51, 0.0  ;;  %v12275_v0 = vmax.f32 %v8607_v45, 0.0 }
 0x86e   : > { %v5393_v33 = vadd.f32 %v5392_v59, %v12231_v47  ;;  %v8560_v54 = vpop.f32.mrf.mxu0  ;;  %v5261_v31 = vpop.f32.mrf.mxu1  ;;  %5802 = vmatprep.subr.bf16.mxu0 %v12238_v41 }
 0x86f   : > { %v5358_v13 = vadd.f32 %v5357_v40, %v12213_v15  ;;  %v12255_v58 = vmax.f32 %v8560_v54, 0.0  ;;  %v12258_v38 = vmax.f32 %v5261_v31, 0.0  ;;  %v12270_v54 = vpack.c.bf16 %v12166_v1, %v12160_v35  ;;  %14261 = vst [vmem:[#allocation3_spill] sm:$0xff] %v12275_v0 }
 0x870   : > { %v5394_v14 = vadd.f32 %v5393_v33, %v12233_v7  ;;  %v5071_v20 = vpop.f32.mrf.mxu0  ;;  %v8608_v39 = vpop.f32.mrf.mxu1 }
 0x871   : > { %14257 = vst [vmem:[#allocation106_spill] sm:$0xff] %v12258_v38  ;;  %v5359_v59 = vadd.f32 %v5358_v13, %v12252_v5  ;;  %v12261_v34 = vmax.f32 %v5071_v20, 0.0  ;;  %v12265_v21 = vpack.c.bf16 %v12255_v58, %v12250_v26  ;;  %14259 = vst [vmem:[#allocation108_spill] sm:$0xff] %v12270_v54 }
 0x872   : > { %v5395_v51 = vadd.f32 %v5394_v14, %v12246_v24  ;;  %v8563_v18 = vpop.f32.mrf.mxu0  ;;  %v5264_v40 = vpop.f32.mrf.mxu1 }
 0x873   : > { %14258 = vst [vmem:[#allocation102_spill] sm:$0xff] %v12265_v21  ;;  %v5360_v33 = vadd.f32 %v5359_v59, %v12261_v34  ;;  %v12273_v31 = vmax.f32 %v5264_v40, 0.0  ;;  %v12284_v14 = vpack.c.bf16 %v12261_v34, %v12252_v5  ;;  %v12288_v59 = vmax.f32 %v8608_v39, 0.0 }
 0x874   : > { %v5396_v13 = vadd.f32 %v5395_v51, %v12258_v38  ;;  %v5084_v20 = vpop.f32.mrf.mxu0  ;;  %v8611_v41 = vpop.f32.mrf.mxu1 }
 0x875   : > { %14260 = vst [vmem:[#allocation104_spill] sm:$0xff] %v12273_v31  ;;  %14263 = vst [vmem:[#allocation7_spill] sm:$0xff] %v12284_v14  ;;  %v5361_v36 = vadd.f32 %v5360_v33, %v12250_v26  ;;  %5803 = vmatpush1.bf16.xpose.msra.mxu0 %v12270_v54  ;;  %v12292_v42 = vmax.f32 %v5084_v20, 0.0  ;;  %v12304_v20 = vpack.c.bf16 %v12158_v44, %v12149_v62 }
 0x876   : > { %14264 = vst [vmem:[#allocation9_spill] sm:$0xff] %v12288_v59  ;;  %v5397_v45 = vadd.f32 %v5396_v13, %v12273_v31  ;;  %v8564_v40 = vpop.f32.mrf.mxu0  ;;  %v5277_v51 = vpop.f32.mrf.mxu1  ;;  %5804 = vmatprep.subr.bf16.mxu0 %v12280_v29  ;;  %v12306_v29 = vmax.f32 %v8563_v18, 0.0 }
 0x877   : > { %v5362_v28 = vadd.f32 %v5361_v36, %v12255_v58  ;;  %v12296_v11 = vmax.f32 %v5277_v51, 0.0  ;;  %14266 = vst [vmem:[#allocation13_spill] sm:$0xff] %v12304_v20  ;;  %v12311_v51 = vmax.f32 %v8611_v41, 0.0  ;;  %v12318_v14 = vmax.f32 %v8564_v40, 0.0 }
 0x878   : > { %v5398_v30 = vadd.f32 %v5397_v45, %v12275_v0  ;;  %v5087_v24 = vpop.f32.mrf.mxu0  ;;  %v8612_v33 = vpop.f32.mrf.mxu1 }
 0x879   : > { %14265 = vst [vmem:[#allocation11_spill] sm:$0xff] %v12296_v11  ;;  %v5363_v54 = vadd.f32 %v5362_v28, %v12292_v42  ;;  %v12299_v39 = vmax.f32 %v5087_v24, 0.0  ;;  %v12322_v18 = vmax.f32 %v8612_v33, 0.0 }
 0x87a   : > { %v5399_v13 = vadd.f32 %v5398_v30, %v12288_v59  ;;  %v8567_v7 = vpop.f32.mrf.mxu0  ;;  %v5280_v31 = vpop.f32.mrf.mxu1  ;;  %v12316_v30 = vpack.c.bf16 %v12139_v56, %v12131_v63 }
 0x87b   : > { %v5364_v36 = vadd.f32 %v5363_v54, %v12299_v39  ;;  %v12309_v45 = vmax.f32 %v5280_v31, 0.0 }
 0x87c   : > { %v5400_v28 = vadd.f32 %v5399_v13, %v12296_v11  ;;  %v5100_v24 = vpop.f32.mrf.mxu0  ;;  %v8615_v38 = vpop.f32.mrf.mxu1  ;;  %14268 = vst [vmem:[#allocation17_spill] sm:$0xff] %v12316_v30 }
 0x87d   : > { %14267 = vst [vmem:[#allocation15_spill] sm:$0xff] %v12309_v45  ;;  %v5365_v59 = vadd.f32 %v5364_v36, %v12306_v29  ;;  %5805 = vmatpush1.bf16.xpose.msra.mxu0 %v12304_v20  ;;  %v12326_v13 = vmax.f32 %v5100_v24, 0.0  ;;  %v5145_v24 = vmax.f32 %v8567_v7, 0.0 }
 0x87e   : > { %v5401_v54 = vadd.f32 %v5400_v28, %v12309_v45  ;;  %v8568_v41 = vpop.f32.mrf.mxu0  ;;  %v5293_v31 = vpop.f32.mrf.mxu1  ;;  %5806 = vmatprep.subr.bf16.mxu0 %v12316_v30  ;;  %v12338_v30 = vpack.c.bf16 %v12142_v9, %v12135_v8 }
 0x87f   : > { %v5366_v0 = vadd.f32 %v5365_v59, %v12318_v14  ;;  %v12330_v40 = vmax.f32 %v5293_v31, 0.0 }
 0x880   : > { %v5402_v63 = vadd.f32 %v5401_v54, %v12311_v51  ;;  %v5103_v56 = vpop.f32.mrf.mxu0  ;;  %v8616_v36 = vpop.f32.mrf.mxu1  ;;  %14269 = vst [vmem:[#allocation19_spill] sm:$0xff] %v12338_v30  ;;  %v12343_v54 = vmax.f32 %v8615_v38, 0.0 }
 0x881   : > { %v5367_v20 = vadd.f32 %v5366_v0, %v12326_v13  ;;  %v12333_v33 = vmax.f32 %v5103_v56, 0.0  ;;  %v12348_v56 = vpack.c.bf16 %v12129_v6, %v12121_v46  ;;  %v5146_v0 = vmax.f32 %v8568_v41, 0.0 }
 0x882   : > { %v5403_v28 = vadd.f32 %v5402_v63, %v12322_v18  ;;  %v5296_v21 = vpop.f32.mrf.mxu1  ;;  %v12351_v11 = vmax.f32 %v8616_v36, 0.0  ;;  %v12359_v46 = vpack.c.bf16 %v12137_v22, %v12124_v49  ;;  %v12363_v36 = vpack.c.bf16 %v12111_v4, %v12101_v10 }
 0x883   : > { %v5368_v59 = vadd.f32 %v5367_v20, %v12333_v33  ;;  %v12341_v45 = vmax.f32 %v5296_v21, 0.0  ;;  %14270 = vst [vmem:[#allocation21_spill] sm:$0xff] %v12348_v56 }
 0x884   : > { %v5404_v31 = vadd.f32 %v5403_v28, %v12330_v40 }
 0x885   : > { %v5369_v63 = vadd.f32 %v5368_v59, %v5145_v24  ;;  %5807 = vmatpush1.bf16.xpose.msra.mxu0 %v12338_v30 }
 0x886   : > { %v5405_v7 = vadd.f32 %v5404_v31, %v12341_v45  ;;  %5808 = vmatprep.subr.bf16.mxu0 %v12348_v56 }
 0x887   : > { %v5370_v21 = vadd.f32 %v5369_v63, %v5146_v0 }
 0x888   : > { %v5406_v38 = vadd.f32 %v5405_v7, %v12343_v54 }
 0x889   : > { %v5371_v20 = vrot.slane %v5370_v21, 4 }
 0x88a   : > { %v5407_v28 = vadd.f32 %v5406_v38, %v12351_v11 }
 0x88b   : > { %v5372_v41 = vadd.f32 %v5371_v20, %v5370_v21  ;;  %v12371_v21 = vpack.c.bf16 %v12097_v55, %v12091_v2 }
 0x88c   : > { %v5408_v59 = vrot.slane %v5407_v28, 4 }
 0x88d   : > { %v5373_v30 = vrot.slane %v5372_v41, 2  ;;  %5809 = vmatpush1.bf16.xpose.msra.mxu0 %v12359_v46 }
 0x88e   : > { %v5409_v31 = vadd.f32 %v5408_v59, %v5407_v28  ;;  %5810 = vmatprep.subr.bf16.mxu0 %v12363_v36  ;;  %v12385_v59 = vpack.c.bf16 %v5146_v0, %v5145_v24 }
 0x88f   : > { %v5374_v63 = vadd.f32 %v5373_v30, %v5372_v41 }
 0x890   : > { %v5410_v7 = vrot.slane %v5409_v31, 2 }
 0x891   : > { %v5375_v56 = vrot.slane %v5374_v63, 1 }
 0x892   : > { %v5411_v38 = vadd.f32 %v5410_v7, %v5409_v31 }
 0x893   : > { %v12367_v6 = vadd.f32 %v5375_v56, %v5374_v63 }
 0x894   : > { %v5412_v20 = vrot.slane %v5411_v38, 1 }
 0x895   : > { %5811 = vmatpush1.bf16.xpose.msra.mxu0 %v12107_v17  ;;  %v5524_v10 = vmul.f32 %v12367_v6, %v12174_v16  ;;  %v5525_v28 = vmul.f32 %v12367_v6, %v12184_v23  ;;  %v5522_v56 = vmul.f32 %v12367_v6, %v12179_v25  ;;  %v5523_v41 = vmul.f32 %v12367_v6, %v12196_v57 }
 0x896   : > { %5812 = vmatprep.subr.bf16.mxu0 %v12371_v21  ;;  %v12379_v30 = vadd.f32 %v5412_v20, %v5411_v38  ;;  %v5520_v16 = vmul.f32 %v12367_v6, %v12160_v35  ;;  %v12411_v35 = vpack.c.bf16 %v12351_v11, %v12343_v54 }
 0x897   : > { %5570 = vadd.xlane.f32.xlu0 %v5524_v10  ;;  %5572 = vadd.xlane.f32.xlu1 %v5525_v28  ;;  %v5521_v10 = vmul.f32 %v12367_v6, %v12166_v1  ;;  %v5518_v1 = vmul.f32 %v12367_v6, %v12149_v62  ;;  %v12507_v28 = vpack.c.bf16 %v12318_v14, %v12306_v29 }
 0x898   : > { %v12394_v23 = vmul.f32 %v12379_v30, %v12176_v37  ;;  %v12398_v25 = vmul.f32 %v12379_v30, %v12168_v27  ;;  %v12402_v57 = vmul.f32 %v12379_v30, %v12182_v50  ;;  %v5519_v27 = vmul.f32 %v12367_v6, %v12158_v44 }
 0x899   : > { %v12419_v50 = vpack.c.bf16 %v12333_v33, %v12326_v13  ;;  %v5517_v37 = vmul.f32 %v12367_v6, %v12142_v9  ;;  %v12426_v31 = vmul.f32 %v12379_v30, %v5146_v0  ;;  %v12429_v63 = vmul.f32 %v12379_v30, %v5145_v24 }
 0x89a   : > { %v12433_v62 = vmul.f32 %v12379_v30, %v12333_v33  ;;  %v12437_v44 = vmul.f32 %v12379_v30, %v12326_v13  ;;  %v12445_v9 = vmul.f32 %v12379_v30, %v12306_v29  ;;  %v12449_v24 = vmul.f32 %v12379_v30, %v12299_v39 }
 0x89b   : > { %5566 = vadd.xlane.f32.xlu0 %v5522_v56  ;;  %5568 = vadd.xlane.f32.xlu1 %v5523_v41  ;;  %v12453_v33 = vmul.f32 %v12379_v30, %v12292_v42  ;;  %v12457_v13 = vmul.f32 %v12379_v30, %v12255_v58  ;;  %v12461_v0 = vmul.f32 %v12379_v30, %v12250_v26 }
 0x89c   : > { %v12465_v7 = vmul.f32 %v12379_v30, %v12261_v34  ;;  %v12469_v38 = vmul.f32 %v12379_v30, %v12252_v5  ;;  %v12473_v20 = vmul.f32 %v12379_v30, %v12213_v15  ;;  %v12478_v58 = vmul.f32 %v12379_v30, %v12208_v48 }
 0x89d   : > { %5813 = vmatpush1.bf16.xpose.msra.mxu0 %v12118_v12  ;;  %v12407_v12 = vmul.f32 %v12379_v30, %v12171_v43  ;;  %v5516_v43 = vmul.f32 %v12367_v6, %v12135_v8  ;;  %v12441_v8 = vmul.f32 %v12379_v30, %v12318_v14  ;;  %v12482_v26 = vmul.f32 %v12379_v30, %v12219_v52 }
 0x89e   : > { %5814 = vmatprep.subr.bf16.mxu0 %v12385_v59  ;;  %v12486_v34 = vmul.f32 %v12379_v30, %v12210_v19  ;;  %v12490_v5 = vmul.f32 %v12367_v6, %v12231_v47  ;;  %v12495_v15 = vmul.f32 %v12367_v6, %v12216_v60  ;;  %v5514_v52 = vmul.f32 %v12367_v6, %v12124_v49 }
 0x89f   : > { %5562 = vadd.xlane.f32.xlu0 %v5520_v16  ;;  %5564 = vadd.xlane.f32.xlu1 %v5521_v10  ;;  %v5515_v48 = vmul.f32 %v12367_v6, %v12137_v22  ;;  %v12503_v19 = vpack.c.bf16 %v12341_v45, %v12330_v40  ;;  %v5512_v56 = vmul.f32 %v12367_v6, %v12093_v53  ;;  %v14273_v10 = vld [vmem:[#allocation102_spill] sm:$0xff] }
 0x8a0   : > { %v5513_v49 = vmul.f32 %v12367_v6, %v12099_v32  ;;  %v5510_v22 = vmul.f32 %v12367_v6, %v12095_v61  ;;  %v5511_v41 = vmul.f32 %v12367_v6, %v12109_v3  ;;  %v12521_v29 = vpack.c.bf16 %v12322_v18, %v12311_v51 }
 0x8a1   : > { %v12525_v53 = vpack.c.bf16 %v12299_v39, %v12292_v42  ;;  %v5540_v32 = vmul.f32 %v12367_v6, %v12343_v54  ;;  %v5541_v61 = vmul.f32 %v12367_v6, %v12351_v11  ;;  %v5538_v3 = vmul.f32 %v12367_v6, %v12330_v40  ;;  %v14271_v42 = vld [vmem:[#allocation11_spill] sm:$0xff] }
 0x8a2   : > { %v5539_v14 = vmul.f32 %v12367_v6, %v12341_v45  ;;  %v14272_v39 = vld [vmem:[#allocation15_spill] sm:$0xff]  ;;  %v5536_v11 = vmul.f32 %v12367_v6, %v12311_v51  ;;  %v5537_v54 = vmul.f32 %v12367_v6, %v12322_v18  ;;  %v5534_v45 = vmul.f32 %v12367_v6, %v14271_v42 }
 0x8a3   : > { %5558 = vadd.xlane.f32.xlu0 %v5518_v1  ;;  %5560 = vadd.xlane.f32.xlu1 %v5519_v27  ;;  %v12539_v16 = vpack.c.bf16 %v14272_v39, %v14271_v42  ;;  %v5535_v40 = vmul.f32 %v12367_v6, %v14272_v39  ;;  %v14274_v1 = vld [vmem:[#allocation3_spill] sm:$0xff]  ;;  %v14275_v27 = vld [vmem:[#allocation9_spill] sm:$0xff]  ;;  %v14282_v39 = vld [vmem:[#allocation110_spill] sm:$0xff] }
 0x8a4   : > { %v5532_v51 = vmul.f32 %v12367_v6, %v14274_v1  ;;  %v5533_v18 = vmul.f32 %v12367_v6, %v14275_v27 }
 0x8a5   : > { %5815 = vmatpush2.bf16.xpose.msra.mxu0 %v12411_v35 }
 0x8a6   : > { %5816 = vmatprep.subr.bf16.mxu0 %v12419_v50 }
 0x8a7   : > { %5554 = vadd.xlane.f32.xlu0 %v5516_v43  ;;  %5556 = vadd.xlane.f32.xlu1 %v5517_v37  ;;  %v12553_v43 = vpack.c.bf16 %v14275_v27, %v14274_v1  ;;  %v14276_v37 = vld [vmem:[#allocation7_spill] sm:$0xff]  ;;  %v14286_v1 = vld [vmem:[#allocation124_spill] sm:$0xff] }
 0x8ab   : > { %5550 = vadd.xlane.f32.xlu0 %v5514_v52  ;;  %5552 = vadd.xlane.f32.xlu1 %v5515_v48  ;;  %v14277_v52 = vld [vmem:[#allocation106_spill] sm:$0xff] }
 0x8ac   : > { %v5530_v48 = vmul.f32 %v12367_v6, %v14277_v52 }
 0x8ad   : > { %5817 = vmatpush2.bf16.xpose.msra.mxu0 %v12503_v19 }
 0x8ae   : > { %5818 = vmatprep.subr.bf16.mxu0 %v12507_v28 }
 0x8af   : > { %5546 = vadd.xlane.f32.xlu0 %v5512_v56  ;;  %5548 = vadd.xlane.f32.xlu1 %v5513_v49  ;;  %v14278_v56 = vld [vmem:[#allocation104_spill] sm:$0xff] }
 0x8b0   : > { %v5531_v49 = vmul.f32 %v12367_v6, %v14278_v56 }
 0x8b3   : > { %5542 = vadd.xlane.f32.xlu0 %v5510_v22  ;;  %5544 = vadd.xlane.f32.xlu1 %v5511_v41  ;;  %v12567_v22 = vpack.c.bf16 %v14278_v56, %v14277_v52  ;;  %v14279_v41 = vld [vmem:[#allocation114_spill] sm:$0xff]  ;;  %v14290_v52 = vld [vmem:[#allocation80_spill] sm:$0xff]  ;;  %v5417_v56 = vmul.f32 %v12379_v30, %v12111_v4  ;;  %v14292_v4 = vld [vmem:[#allocation21_spill] sm:$0xff] }
 0x8b5   : > { %5819 = vmatpush2.bf16.xpose.msra.mxu0 %v12521_v29 }
 0x8b6   : > { %5820 = vmatprep.subr.bf16.mxu0 %v12525_v53 }
 0x8b7   : > { %5602 = vadd.xlane.f32.xlu0 %v5540_v32  ;;  %5604 = vadd.xlane.f32.xlu1 %v5541_v61  ;;  %v5528_v32 = vmul.f32 %v12367_v6, %v14279_v41  ;;  %v14280_v61 = vld [vmem:[#allocation112_spill] sm:$0xff] }
 0x8b8   : > { %v12577_v42 = vpack.c.bf16 %v14280_v61, %v14279_v41 }
 0x8bb   : > { %5598 = vadd.xlane.f32.xlu0 %v5538_v3  ;;  %5600 = vadd.xlane.f32.xlu1 %v5539_v14  ;;  %v5529_v3 = vmul.f32 %v12367_v6, %v14280_v61  ;;  %v14281_v14 = vld [vmem:[#allocation118_spill] sm:$0xff] }
 0x8bc   : > { %v14283_v6 = vld [vmem:[#allocation130_spill] sm:$0xff] }
 0x8bd   : > { %5821 = vmatpush2.bf16.xpose.msra.mxu0 %v12539_v16 }
 0x8be   : > { %5822 = vmatprep.subr.bf16.mxu0 %v14273_v10 }
 0x8bf   : > { %5594 = vadd.xlane.f32.xlu0 %v5536_v11  ;;  %5596 = vadd.xlane.f32.xlu1 %v5537_v54  ;;  %v5425_v11 = vmul.f32 %v12379_v30, %v14283_v6  ;;  %v14284_v54 = vld [vmem:[#allocation132_spill] sm:$0xff] }
 0x8c3   : > { %5590 = vadd.xlane.f32.xlu0 %v5534_v45  ;;  %5592 = vadd.xlane.f32.xlu1 %v5535_v40  ;;  %v5424_v45 = vmul.f32 %v12379_v30, %v14284_v54  ;;  %v5790_v40 = vpack.c.bf16 %v12231_v47, %v12216_v60  ;;  %v14289_v60 = vld [vmem:[#allocation76_spill] sm:$0xff] }
 0x8c4   : > { %v5419_v47 = vmul.f32 %v12379_v30, %v14289_v60 }
 0x8c5   : > { %5823 = vmatpush2.bf16.xpose.msra.mxu0 %v12553_v43 }
 0x8c6   : > { %5824 = vmatprep.subr.bf16.mxu0 %v14276_v37 }
 0x8c7   : > { %5586 = vadd.xlane.f32.xlu0 %v5532_v51  ;;  %5588 = vadd.xlane.f32.xlu1 %v5533_v18  ;;  %v14288_v51 = vld [vmem:[#allocation74_spill] sm:$0xff] }
 0x8c8   : > { %v5420_v18 = vmul.f32 %v12379_v30, %v14288_v51 }
 0x8cb   : > { %5582 = vadd.xlane.f32.xlu0 %v5530_v48  ;;  %5584 = vadd.xlane.f32.xlu1 %v5531_v49  ;;  %v5418_v48 = vmul.f32 %v12379_v30, %v14290_v52  ;;  %v14291_v49 = vld [vmem:[#allocation78_spill] sm:$0xff] }
 0x8cc   : > { %v5416_v41 = vmul.f32 %v12379_v30, %v14291_v49 }
 0x8cd   : > { %5825 = vmatpush2.bf16.xpose.msra.mxu0 %v12567_v22 }
 0x8ce   : > { %5826 = vmatprep.subr.bf16.mxu0 %v14281_v14 }
 0x8cf   : > { %5578 = vadd.xlane.f32.xlu0 %v5528_v32  ;;  %5580 = vadd.xlane.f32.xlu1 %v5529_v3  ;;  %v14293_v32 = vld [vmem:[#allocation19_spill] sm:$0xff] }
 0x8d3   : > { %5476 = vadd.xlane.f32.xlu1 %v12394_v23  ;;  %5474 = vadd.xlane.f32.xlu0 %v12398_v25  ;;  %v14285_v23 = vld [vmem:[#allocation72_spill] sm:$0xff] }
 0x8d4   : > { %v5423_v25 = vmul.f32 %v12379_v30, %v14285_v23 }
 0x8d5   : > { %5827 = vmatpush2.bf16.xpose.msra.mxu0 %v12577_v42 }
 0x8d6   : > { %5828 = vmatprep.subr.bf16.mxu0 %v14282_v39 }
 0x8d7   : > { %5472 = vadd.xlane.f32.xlu1 %v12402_v57  ;;  %5470 = vadd.xlane.f32.xlu0 %v12407_v12  ;;  %v5422_v57 = vmul.f32 %v12379_v30, %v14286_v1  ;;  %v14287_v12 = vld [vmem:[#allocation70_spill] sm:$0xff] }
 0x8d8   : > { %v5421_v27 = vmul.f32 %v12379_v30, %v14287_v12 }
 0x8db   : > { %5468 = vadd.xlane.f32.xlu1 %v5425_v11  ;;  %5466 = vadd.xlane.f32.xlu0 %v5424_v45 }
 0x8dd   : > { %5829 = vmatpush2.bf16.xpose.msra.mxu0 %v5790_v40 }
 0x8df   : > { %5464 = vadd.xlane.f32.xlu1 %v5423_v25  ;;  %5462 = vadd.xlane.f32.xlu0 %v5422_v57 }
 0x8e3   : > { %5460 = vadd.xlane.f32.xlu1 %v5421_v27  ;;  %5458 = vadd.xlane.f32.xlu0 %v5420_v18 }
 0x8e4   : > { %5831 = vmatmul.mubr.bf16.vlgmr.msra.gmra.mxu0 %v12371_v21  ;;  %v5414_v21 = vmul.f32 %v12379_v30, %v12091_v2  ;;  %v14295_v2 = vld [vmem:[#allocation13_spill] sm:$0xff] }
 0x8e5   : > { %5840 = vmatprep.mubr.bf16.mxu0 %v12107_v17  ;;  %v5415_v17 = vmul.f32 %v12379_v30, %v12097_v55  ;;  %v14296_v55 = vld [vmem:[#allocation5_spill] sm:$0xff]  ;;  %v14298_v30 = vld [vmem:[#allocation116_spill] sm:$0xff] }
 0x8e7   : > { %5456 = vadd.xlane.f32.xlu1 %v5419_v47  ;;  %5454 = vadd.xlane.f32.xlu0 %v5418_v48 }
 0x8eb   : > { %5452 = vadd.xlane.f32.xlu1 %v5417_v56  ;;  %5450 = vadd.xlane.f32.xlu0 %v5416_v41 }
 0x8ec   : > { %5841 = vmatmul.mubr.bf16.gmra.mxu0 %v12363_v36  ;;  %v14297_v36 = vld [vmem:[#allocation108_spill] sm:$0xff] }
 0x8ed   : > { %5850 = vmatprep.mubr.bf16.mxu0 %v12359_v46  ;;  %v14294_v46 = vld [vmem:[#allocation17_spill] sm:$0xff] }
 0x8ef   : > { %5448 = vadd.xlane.f32.xlu1 %v5415_v17  ;;  %5446 = vadd.xlane.f32.xlu0 %v5414_v21 }
 0x8f3   : > { %5508 = vadd.xlane.f32.xlu1 %v12426_v31  ;;  %5506 = vadd.xlane.f32.xlu0 %v12429_v63  ;;  %v14299_v31 = vld [vmem:[#allocation120_spill] sm:$0xff]  ;;  %v14300_v63 = vld [vmem:[#allocation122_spill] sm:$0xff] }
 0x8f4   : > { %5851 = vmatmul.mubr.bf16.gmra.mxu0 %v14292_v4 }
 0x8f5   : > { %5860 = vmatprep.mubr.bf16.mxu0 %v14293_v32 }
 0x8f7   : > { %5504 = vadd.xlane.f32.xlu1 %v12433_v62  ;;  %5502 = vadd.xlane.f32.xlu0 %v12437_v44  ;;  %v14301_v62 = vld [vmem:[#allocation128_spill] sm:$0xff]  ;;  %v14302_v44 = vld [vmem:[#allocation126_spill] sm:$0xff] }
 0x8fb   : > { %5500 = vadd.xlane.f32.xlu1 %v12441_v8  ;;  %5498 = vadd.xlane.f32.xlu0 %v12445_v9 }
 0x8fc   : > { %5861 = vmatmul.mubr.bf16.gmra.mxu0 %v14294_v46 }
 0x8fd   : > { %5870 = vmatprep.mubr.bf16.mxu0 %v14295_v2 }
 0x8ff   : > { %5496 = vadd.xlane.f32.xlu1 %v12449_v24  ;;  %5494 = vadd.xlane.f32.xlu0 %v12453_v33 }
 0x903   : > { %5492 = vadd.xlane.f32.xlu1 %v12457_v13  ;;  %5490 = vadd.xlane.f32.xlu0 %v12461_v0 }
 0x904   : > { %5871 = vmatmul.mubr.bf16.gmra.mxu0 %v14296_v55 }
 0x905   : > { %5880 = vmatprep.mubr.bf16.mxu0 %v14297_v36 }
 0x907   : > { %5488 = vadd.xlane.f32.xlu1 %v12465_v7  ;;  %5486 = vadd.xlane.f32.xlu0 %v12469_v38 }
 0x90b   : > { %5484 = vadd.xlane.f32.xlu1 %v12473_v20  ;;  %5482 = vadd.xlane.f32.xlu0 %v12478_v58 }
 0x90c   : > { %5881 = vmatmul.mubr.bf16.gmra.mxu0 %v14298_v30 }
 0x90d   : > { %5890 = vmatprep.mubr.bf16.mxu0 %v14299_v31 }
 0x90f   : > { %5480 = vadd.xlane.f32.xlu1 %v12482_v26  ;;  %5478 = vadd.xlane.f32.xlu0 %v12486_v34 }
 0x913   : > { %5576 = vadd.xlane.f32.xlu1 %v12490_v5  ;;  %5574 = vadd.xlane.f32.xlu0 %v12495_v15 }
 0x914   : > { %5891 = vmatmul.mubr.bf16.gmra.mxu0 %v14300_v63  ;;  %v14303_v63 = vld [vmem:[#allocation99_spill] sm:$0xff] }
 0x915   : > { %5900 = vmatprep.mubr.bf16.mxu0 %v14301_v62 }
 0x91c   : > { %5901 = vmatmul.mubr.bf16.gmra.mxu0 %v14302_v44 }
 0x91d   : > { %5910 = vmatprep.mubr.bf16.mxu0 %v5790_v40 }
 0x920   : > { %v5571_v8 = vpop.xlane.xlu0 %5570  ;;  %v5573_v9 = vpop.xlane.xlu1 %5572 }
 0x924   : > { %v5567_v24 = vpop.xlane.xlu0 %5566  ;;  %v5569_v33 = vpop.xlane.xlu1 %5568  ;;  %5911 = vmatmul.mubr.bf16.gmra.mxu0 %v14282_v39 }
 0x925   : > { %5920 = vmatprep.mubr.bf16.mxu0 %v12577_v42 }
 0x928   : > { %v5563_v13 = vpop.xlane.xlu0 %5562  ;;  %v5565_v0 = vpop.xlane.xlu1 %5564 }
 0x92c   : > { %v12646_v7 = vpop.xlane.xlu0 %5558  ;;  %v12648_v38 = vpop.xlane.xlu1 %5560  ;;  %5921 = vmatmul.mubr.bf16.gmra.mxu0 %v14281_v14 }
 0x92d   : > { %5930 = vmatprep.mubr.bf16.mxu0 %v12567_v22 }
 0x930   : > { %v12652_v20 = vpop.xlane.xlu0 %5554  ;;  %v12654_v58 = vpop.xlane.xlu1 %5556 }
 0x934   : > { %v12656_v26 = vpop.xlane.xlu0 %5550  ;;  %v12658_v34 = vpop.xlane.xlu1 %5552  ;;  %5931 = vmatmul.mubr.bf16.gmra.mxu0 %v14276_v37 }
 0x935   : > { %5940 = vmatprep.mubr.bf16.mxu0 %v12553_v43 }
 0x938   : > { %v12662_v5 = vpop.xlane.xlu0 %5546  ;;  %v12664_v15 = vpop.xlane.xlu1 %5548 }
 0x93c   : > { %v12666_v61 = vpop.xlane.xlu0 %5542  ;;  %v12668_v3 = vpop.xlane.xlu1 %5544  ;;  %5941 = vmatmul.mubr.bf16.gmra.mxu0 %v14273_v10 }
 0x93d   : > { %5950 = vmatprep.mubr.bf16.mxu0 %v12539_v16 }
 0x940   : > { %v12672_v22 = vpop.xlane.xlu0 %5602  ;;  %v12674_v14 = vpop.xlane.xlu1 %5604 }
 0x944   : > { %v12676_v42 = vpop.xlane.xlu0 %5598  ;;  %5951 = vmatmul.mubr.bf16.gmra.mxu0 %v12525_v53  ;;  %v12679_v43 = vpop.xlane.xlu1 %5600 }
 0x945   : > { %5960 = vmatprep.mubr.bf16.mxu0 %v12521_v29 }
 0x948   : > { %v12682_v37 = vpop.xlane.xlu0 %5594  ;;  %v12684_v39 = vpop.xlane.xlu1 %5596 }
 0x94c   : > { %v12686_v6 = vpop.xlane.xlu0 %5590  ;;  %5961 = vmatmul.mubr.bf16.gmra.mxu0 %v12507_v28  ;;  %v12689_v16 = vpop.xlane.xlu1 %5592 }
 0x94d   : > { %5970 = vmatprep.mubr.bf16.mxu0 %v12503_v19 }
 0x950   : > { %v12692_v10 = vpop.xlane.xlu0 %5586  ;;  %v12694_v11 = vpop.xlane.xlu1 %5588 }
 0x954   : > { %v12696_v53 = vpop.xlane.xlu0 %5582  ;;  %5971 = vmatmul.mubr.bf16.gmra.mxu0 %v12419_v50  ;;  %v12699_v29 = vpop.xlane.xlu1 %5584 }
 0x955   : > { %5980 = vmatprep.mubr.bf16.mxu0 %v12411_v35 }
 0x958   : > { %v12702_v54 = vpop.xlane.xlu0 %5578  ;;  %v12704_v45 = vpop.xlane.xlu1 %5580 }
 0x95c   : > { %5981 = vmatmul.mubr.bf16.gmra.mxu0 %v12385_v59  ;;  %v5477_v28 = vpop.xlane.xlu1 %5476  ;;  %v5475_v19 = vpop.xlane.xlu0 %5474 }
 0x95d   : > { %v5621_v40 = vadd.f32 %v5573_v9, %v5477_v28  ;;  %v5620_v23 = vadd.f32 %v5571_v8, %v5475_v19  ;;  %v14306_v28 = vld [vmem:[#allocation101_spill] sm:$0xff] }
 0x95f   : > { %vm5653_vm0 = vcmp.gt.f32.partialorder %v5621_v40, 0.0  ;;  %vm5652_vm1 = vcmp.gt.f32.partialorder %v5620_v23, 0.0 }
 0x960   : > { %v5685_v25 = vsel %vm5653_vm0, %v5621_v40, 1.0  ;;  %v5684_v50 = vsel %vm5652_vm1, %v5620_v23, 1.0  ;;  %v5473_v1 = vpop.xlane.xlu1 %5472  ;;  %v5471_v57 = vpop.xlane.xlu0 %5470  ;;  %v14307_v40 = vld [vmem:[#allocation144_spill] sm:$0xff] }
 0x961   : > { %8945 = vrsqrt.f32 %v5685_v25  ;;  %v5619_v35 = vadd.f32 %v5569_v33, %v5473_v1  ;;  %v5618_v12 = vadd.f32 %v5567_v24, %v5471_v57  ;;  %v14308_v25 = vld [vmem:[#allocation158_spill] sm:$0xff] }
 0x962   : > { %8947 = vrsqrt.f32 %v5684_v50 }
 0x963   : > { %vm5651_vm2 = vcmp.gt.f32.partialorder %v5619_v35, 0.0  ;;  %vm5650_vm3 = vcmp.gt.f32.partialorder %v5618_v12, 0.0 }
 0x964   : > { %v5683_v59 = vsel %vm5651_vm2, %v5619_v35, 1.0  ;;  %v5682_v27 = vsel %vm5650_vm3, %v5618_v12, 1.0  ;;  %v5469_v51 = vpop.xlane.xlu1 %5468  ;;  %v5467_v18 = vpop.xlane.xlu0 %5466 }
 0x965   : > { %8949 = vrsqrt.f32 %v5683_v59  ;;  %v12711_v60 = vadd.f32 %v5565_v0, %v5469_v51  ;;  %v12713_v47 = vadd.f32 %v5563_v13, %v5467_v18  ;;  %v14304_v13 = vld [vmem:[#allocation95_spill] sm:$0xff] }
 0x966   : > { %8951 = vrsqrt.f32 %v5682_v27 }
 0x967   : > { %vm5649_vm4 = vcmp.gt.f32.partialorder %v12711_v60, 0.0  ;;  %vm5648_vm5 = vcmp.gt.f32.partialorder %v12713_v47, 0.0 }
 0x968   : > { %v5681_v52 = vsel %vm5649_vm4, %v12711_v60, 1.0  ;;  %v5680_v48 = vsel %vm5648_vm5, %v12713_v47, 1.0  ;;  %v5465_v56 = vpop.xlane.xlu1 %5464  ;;  %v5463_v49 = vpop.xlane.xlu0 %5462 }
 0x969   : > { %8953 = vrsqrt.f32 %v5681_v52  ;;  %v12724_v41 = vadd.f32 %v12648_v38, %v5465_v56  ;;  %v12727_v17 = vadd.f32 %v12646_v7, %v5463_v49  ;;  %v14309_v52 = vld [vmem:[#allocation97_spill] sm:$0xff] }
 0x96a   : > { %8955 = vrsqrt.f32 %v5680_v48 }
 0x96b   : > { %vm5647_vm6 = vcmp.gt.f32.partialorder %v12724_v41, 0.0  ;;  %vm5646_vm7 = vcmp.gt.f32.partialorder %v12727_v17, 0.0 }
 0x96c   : > { %v5679_v21 = vsel %vm5647_vm6, %v12724_v41, 1.0  ;;  %v5678_v4 = vsel %vm5646_vm7, %v12727_v17, 1.0  ;;  %v5461_v32 = vpop.xlane.xlu1 %5460  ;;  %v5459_v46 = vpop.xlane.xlu0 %5458 }
 0x96d   : > { %8957 = vrsqrt.f32 %v5679_v21  ;;  %v12738_v2 = vadd.f32 %v12654_v58, %v5461_v32  ;;  %v12741_v55 = vadd.f32 %v12652_v20, %v5459_v46  ;;  %v14305_v58 = vld [vmem:[#allocation67_spill] sm:$0xff]  ;;  %v14311_v46 = vld [vmem:[#allocation157_spill] sm:$0xff] }
 0x96e   : > { %v8946_v36 = vpop.eup %8945  ;;  %8959 = vrsqrt.f32 %v5678_v4  ;;  %v1282_v19 = vadd.f32 %v14306_v28, %v14305_v58  ;;  %v14310_v4 = vld [vmem:[#allocation162_spill] sm:$0xff] }
 0x96f   : > { %v8948_v30 = vpop.eup %8947  ;;  %v12744_v31 = vsel %vm5653_vm0, %v8946_v36, 0.0  ;;  %vm5645_vm8 = vcmp.gt.f32.partialorder %v12738_v2, 0.0  ;;  %vm5644_vm9 = vcmp.gt.f32.partialorder %v12741_v55, 0.0 }
 0x970   : > { %v6053_v62 = vmul.f32 %v12744_v31, %v14303_v63  ;;  %v12751_v44 = vsel %vm5652_vm1, %v8948_v30, 0.0  ;;  %v5677_v8 = vsel %vm5645_vm8, %v12738_v2, 1.0  ;;  %v5676_v9 = vsel %vm5644_vm9, %v12741_v55, 1.0  ;;  %v5457_v24 = vpop.xlane.xlu1 %5456  ;;  %v5455_v33 = vpop.xlane.xlu0 %5454  ;;  %v14312_v63 = vld [vmem:[#allocation93_spill] sm:$0xff] }
 0x971   : > { %v6051_v0 = vmul.f32 %v12751_v44, %v14304_v13  ;;  %8961 = vrsqrt.f32 %v5677_v8  ;;  %v12762_v7 = vadd.f32 %v12658_v34, %v5457_v24  ;;  %v12765_v38 = vadd.f32 %v12656_v26, %v5455_v33 }
 0x972   : > { %v8950_v20 = vpop.eup %8949  ;;  %8963 = vrsqrt.f32 %v5676_v9  ;;  %v6052_v23 = vmul.f32 %v12751_v44, %v14307_v40  ;;  %v6054_v50 = vmul.f32 %v12744_v31, %v14308_v25  ;;  %v14315_v25 = vld [vmem:[#allocation142_spill] sm:$0xff] }
 0x973   : > { %v8952_v1 = vpop.eup %8951  ;;  %v12774_v57 = vsel %vm5651_vm2, %v8950_v20, 0.0  ;;  %vm5643_vm10 = vcmp.gt.f32.partialorder %v12762_v7, 0.0  ;;  %vm5642_vm11 = vcmp.gt.f32.partialorder %v12765_v38, 0.0  ;;  %v6101_v26 = vpack.c.bf16 %v6053_v62, %v6051_v0  ;;  %v14314_v0 = vld [vmem:[#allocation87_spill] sm:$0xff] }
 0x974   : > { %v6049_v34 = vmul.f32 %v12774_v57, %v1282_v19  ;;  %v12780_v59 = vsel %vm5650_vm3, %v8952_v1, 0.0  ;;  %v5675_v27 = vsel %vm5643_vm10, %v12762_v7, 1.0  ;;  %v5674_v35 = vsel %vm5642_vm11, %v12765_v38, 1.0  ;;  %v5453_v51 = vpop.xlane.xlu1 %5452  ;;  %v5451_v18 = vpop.xlane.xlu0 %5450 }
 0x975   : > { %v6047_v48 = vmul.f32 %v12780_v59, %v14309_v52  ;;  %8965 = vrsqrt.f32 %v5675_v27  ;;  %v6102_v56 = vpack.c.bf16 %v6054_v50, %v6052_v23  ;;  %v12791_v49 = vadd.f32 %v12664_v15, %v5453_v51 }
 0x976   : > { %v8954_v12 = vpop.eup %8953  ;;  %8967 = vrsqrt.f32 %v5674_v35  ;;  %v12794_v21 = vadd.f32 %v12662_v5, %v5451_v18  ;;  %v6048_v32 = vmul.f32 %v12780_v59, %v14310_v4  ;;  %v6050_v36 = vmul.f32 %v12774_v57, %v14311_v46  ;;  %v14313_v5 = vld [vmem:[#allocation91_spill] sm:$0xff]  ;;  %v14317_v35 = vld [vmem:[#allocation160_spill] sm:$0xff] }
 0x977   : > { %v8956_v30 = vpop.eup %8955  ;;  %v1266_v62 = vadd.f32 %v14312_v63, %v14305_v58  ;;  %v12804_v8 = vsel %vm5649_vm4, %v8954_v12, 0.0  ;;  %6119 = vmatprep.subr.bf16.mxu1 %v6102_v56  ;;  %vm5641_vm12 = vcmp.gt.f32.partialorder %v12791_v49, 0.0  ;;  %v6099_v15 = vpack.c.bf16 %v6049_v34, %v6047_v48  ;;  %v14318_v48 = vld [vmem:[#allocation89_spill] sm:$0xff] }
 0x978   : > { %v6045_v9 = vmul.f32 %v12804_v8, %v14313_v5  ;;  %v12811_v24 = vsel %vm5648_vm5, %v8956_v30, 0.0  ;;  %v5673_v33 = vsel %vm5641_vm12, %v12791_v49, 1.0  ;;  %vm5640_vm13 = vcmp.gt.f32.partialorder %v12794_v21, 0.0  ;;  %6120 = vmatpush1.bf16.msra.mxu1 %v6101_v26  ;;  %v5449_v60 = vpop.xlane.xlu1 %5448  ;;  %v5447_v13 = vpop.xlane.xlu0 %5446  ;;  %v14316_v26 = vld [vmem:[#allocation85_spill] sm:$0xff]  ;;  %v14320_v5 = vld [vmem:[#allocation143_spill] sm:$0xff] }
 0x979   : > { %v6043_v20 = vmul.f32 %v12811_v24, %v14314_v0  ;;  %8969 = vrsqrt.f32 %v5673_v33  ;;  %v5672_v28 = vsel %vm5640_vm13, %v12794_v21, 1.0  ;;  %v6100_v47 = vpack.c.bf16 %v6050_v36, %v6048_v32  ;;  %v14319_v30 = vld [vmem:[#allocation141_spill] sm:$0xff]  ;;  %v14322_v0 = vld [vmem:[#allocation79_spill] sm:$0xff] }
 0x97a   : > { %v8958_v19 = vpop.eup %8957  ;;  %8971 = vrsqrt.f32 %v5672_v28  ;;  %v12823_v40 = vadd.f32 %v12668_v3, %v5449_v60  ;;  %v12826_v23 = vadd.f32 %v12666_v61, %v5447_v13  ;;  %v6044_v50 = vmul.f32 %v12811_v24, %v14315_v25  ;;  %v14321_v60 = vld [vmem:[#allocation83_spill] sm:$0xff] }
 0x97b   : > { %v8960_v1 = vpop.eup %8959  ;;  %v1250_v34 = vadd.f32 %v14316_v26, %v14305_v58  ;;  %v12834_v27 = vsel %vm5647_vm6, %v8958_v19, 0.0  ;;  %6121 = vmatprep.subr.bf16.mxu1 %v6100_v47  ;;  %v6046_v51 = vmul.f32 %v12804_v8, %v14317_v35  ;;  %v6097_v3 = vpack.c.bf16 %v6045_v9, %v6043_v20 }
 0x97c   : > { %v6041_v18 = vmul.f32 %v12834_v27, %v1266_v62  ;;  %v12841_v61 = vsel %vm5646_vm7, %v8960_v1, 0.0  ;;  %vm5639_vm14 = vcmp.gt.f32.partialorder %v12823_v40, 0.0  ;;  %vm5638_vm15 = vcmp.gt.f32.partialorder %v12826_v23, 0.0  ;;  %6122 = vmatpush1.bf16.msra.mxu1 %v6099_v15  ;;  %v5509_v52 = vpop.xlane.xlu1 %5508  ;;  %v5507_v41 = vpop.xlane.xlu0 %5506  ;;  %v14323_v1 = vld [vmem:[#allocation44_spill] sm:$0xff] }
 0x97d   : > { %v6039_v56 = vmul.f32 %v12841_v61, %v14318_v48  ;;  %v5671_v12 = vsel %vm5639_vm14, %v12823_v40, 1.0  ;;  %v5670_v17 = vsel %vm5638_vm15, %v12826_v23, 1.0  ;;  %v6098_v4 = vpack.c.bf16 %v6046_v51, %v6044_v50  ;;  %v14325_v48 = vld [vmem:[#allocation81_spill] sm:$0xff] }
 0x97e   : > { %v8962_v32 = vpop.eup %8961  ;;  %8973 = vrsqrt.f32 %v5671_v12  ;;  %v12854_v46 = vadd.f32 %v12674_v14, %v5509_v52  ;;  %v12857_v36 = vadd.f32 %v12672_v22, %v5507_v41  ;;  %v6040_v63 = vmul.f32 %v12841_v61, %v14319_v30  ;;  %v14326_v30 = vld [vmem:[#allocation46_spill] sm:$0xff] }
 0x97f   : > { %v8964_v62 = vpop.eup %8963  ;;  %v12863_v15 = vsel %vm5645_vm8, %v8962_v32, 0.0  ;;  %8975 = vrsqrt.f32 %v5670_v17  ;;  %6123 = vmatprep.subr.bf16.mxu1 %v6098_v4  ;;  %v6042_v9 = vmul.f32 %v12834_v27, %v14320_v5  ;;  %v6095_v33 = vpack.c.bf16 %v6041_v18, %v6039_v56 }
 0x980   : > { %v6037_v14 = vmul.f32 %v12863_v15, %v14321_v60  ;;  %v12871_v22 = vsel %vm5644_vm9, %v8964_v62, 0.0  ;;  %vm5669_vm0 = vcmp.gt.f32.partialorder %v12854_v46, 0.0  ;;  %vm5668_vm1 = vcmp.gt.f32.partialorder %v12857_v36, 0.0  ;;  %6124 = vmatpush1.bf16.msra.mxu1 %v6097_v3  ;;  %v5505_v2 = vpop.xlane.xlu1 %5504  ;;  %v5503_v13 = vpop.xlane.xlu0 %5502  ;;  %v14324_v3 = vld [vmem:[#allocation48_spill] sm:$0xff] }
 0x981   : > { %v6035_v20 = vmul.f32 %v12871_v22, %v14322_v0  ;;  %v5701_v28 = vsel %vm5669_vm0, %v12854_v46, 1.0  ;;  %v5700_v55 = vsel %vm5668_vm1, %v12857_v36, 1.0  ;;  %v6096_v47 = vpack.c.bf16 %v6042_v9, %v6040_v63  ;;  %v14327_v9 = vld [vmem:[#allocation156_spill] sm:$0xff]  ;;  %v14338_v46 = vld [vmem:[#allocation127_spill] sm:$0xff] }
 0x982   : > { %v8966_v19 = vpop.eup %8965  ;;  %8977 = vrsqrt.f32 %v5701_v28  ;;  %v12884_v25 = vadd.f32 %v12679_v43, %v5505_v2  ;;  %v12887_v50 = vadd.f32 %v12676_v42, %v5503_v13  ;;  %v6036_v26 = vmul.f32 %v12871_v22, %v14323_v1  ;;  %v14329_v13 = vld [vmem:[#allocation71_spill] sm:$0xff] }
 0x983   : > { %v8968_v35 = vpop.eup %8967  ;;  %v12893_v51 = vsel %vm5643_vm10, %v8966_v19, 0.0  ;;  %8979 = vrsqrt.f32 %v5700_v55  ;;  %6125 = vmatprep.subr.bf16.mxu1 %v6096_v47  ;;  %v6038_v18 = vmul.f32 %v12863_v15, %v14324_v3  ;;  %v6093_v52 = vpack.c.bf16 %v6037_v14, %v6035_v20  ;;  %v14328_v14 = vld [vmem:[#allocation75_spill] sm:$0xff]  ;;  %v14330_v19 = vld [vmem:[#allocation36_spill] sm:$0xff] }
 0x984   : > { %v6033_v43 = vmul.f32 %v12893_v51, %v1250_v34  ;;  %v12900_v42 = vsel %vm5642_vm11, %v8968_v35, 0.0  ;;  %vm5667_vm2 = vcmp.gt.f32.partialorder %v12884_v25, 0.0  ;;  %vm5666_vm3 = vcmp.gt.f32.partialorder %v12887_v50, 0.0  ;;  %6126 = vmatpush1.bf16.msra.mxu1 %v6095_v33  ;;  %v5501_v7 = vpop.xlane.xlu1 %5500  ;;  %v5499_v41 = vpop.xlane.xlu0 %5498  ;;  %v14331_v35 = vld [vmem:[#allocation77_spill] sm:$0xff] }
 0x985   : > { %v6031_v56 = vmul.f32 %v12900_v42, %v14325_v48  ;;  %v5699_v12 = vsel %vm5667_vm2, %v12884_v25, 1.0  ;;  %v5698_v38 = vsel %vm5666_vm3, %v12887_v50, 1.0  ;;  %v6094_v34 = vpack.c.bf16 %v6038_v18, %v6036_v26  ;;  %v14332_v18 = vld [vmem:[#allocation40_spill] sm:$0xff] }
 0x986   : > { %v8970_v17 = vpop.eup %8969  ;;  %8981 = vrsqrt.f32 %v5699_v12  ;;  %v12913_v4 = vadd.f32 %v12684_v39, %v5501_v7  ;;  %v12916_v32 = vadd.f32 %v12682_v37, %v5499_v41  ;;  %v6032_v63 = vmul.f32 %v12900_v42, %v14326_v30 }
 0x987   : > { %v8972_v62 = vpop.eup %8971  ;;  %v12922_v5 = vsel %vm5641_vm12, %v8970_v17, 0.0  ;;  %8983 = vrsqrt.f32 %v5698_v38  ;;  %6127 = vmatprep.subr.bf16.mxu1 %v6094_v34  ;;  %v6034_v33 = vmul.f32 %v12893_v51, %v14327_v9  ;;  %v6091_v60 = vpack.c.bf16 %v6033_v43, %v6031_v56  ;;  %v14333_v38 = vld [vmem:[#allocation73_spill] sm:$0xff] }
 0x988   : > { %v6029_v39 = vmul.f32 %v12922_v5, %v14328_v14  ;;  %v12930_v37 = vsel %vm5640_vm13, %v8972_v62, 0.0  ;;  %vm5665_vm4 = vcmp.gt.f32.partialorder %v12913_v4, 0.0  ;;  %vm5664_vm5 = vcmp.gt.f32.partialorder %v12916_v32, 0.0  ;;  %6128 = vmatpush1.bf16.msra.mxu1 %v6093_v52  ;;  %v5497_v49 = vpop.xlane.xlu1 %5496  ;;  %v5495_v2 = vpop.xlane.xlu0 %5494  ;;  %v14334_v62 = vld [vmem:[#allocation38_spill] sm:$0xff] }
 0x989   : > { %v6027_v0 = vmul.f32 %v12930_v37, %v14329_v13  ;;  %v5697_v20 = vsel %vm5665_vm4, %v12913_v4, 1.0  ;;  %v5696_v21 = vsel %vm5664_vm5, %v12916_v32, 1.0  ;;  %v6092_v28 = vpack.c.bf16 %v6034_v33, %v6032_v63  ;;  %v14335_v33 = vld [vmem:[#allocation138_spill] sm:$0xff] }
 0x98a   : > { %8985 = vrsqrt.f32 %v5697_v20  ;;  %v12943_v55 = vadd.f32 %v12689_v16, %v5497_v49  ;;  %v12946_v47 = vadd.f32 %v12686_v6, %v5495_v2  ;;  %v6028_v1 = vmul.f32 %v12930_v37, %v14330_v19 }
 0x98b   : > { %v8974_v26 = vpop.eup %8973  ;;  %v1234_v3 = vadd.f32 %v14331_v35, %v14305_v58  ;;  %8987 = vrsqrt.f32 %v5696_v21  ;;  %6129 = vmatprep.subr.bf16.mxu1 %v6092_v28  ;;  %v6030_v52 = vmul.f32 %v12922_v5, %v14332_v18  ;;  %v6089_v43 = vpack.c.bf16 %v6029_v39, %v6027_v0  ;;  %v14336_v39 = vld [vmem:[#allocation133_spill] sm:$0xff]  ;;  %v14337_v0 = vld [vmem:[#allocation131_spill] sm:$0xff]  ;;  %v14339_v18 = vld [vmem:[#allocation166_spill] sm:$0xff] }
 0x98c   : > { %v8976_v7 = vpop.eup %8975  ;;  %v12956_v16 = vsel %vm5639_vm14, %v8974_v26, 0.0  ;;  %vm5663_vm6 = vcmp.gt.f32.partialorder %v12943_v55, 0.0  ;;  %vm5662_vm7 = vcmp.gt.f32.partialorder %v12946_v47, 0.0  ;;  %6130 = vmatpush1.bf16.msra.mxu1 %v6091_v60  ;;  %v5493_v6 = vpop.xlane.xlu1 %5492  ;;  %v1346_v49 = vadd.f32 %v14336_v39, %v14305_v58 }
 0x98d   : > { %v5491_v41 = vpop.xlane.xlu0 %5490  ;;  %v6025_v48 = vmul.f32 %v12956_v16, %v1234_v3  ;;  %v12963_v56 = vsel %vm5638_vm15, %v8976_v7, 0.0  ;;  %v5695_v12 = vsel %vm5663_vm6, %v12943_v55, 1.0  ;;  %v5694_v40 = vsel %vm5662_vm7, %v12946_v47, 1.0 }
 0x98e   : > { %v6023_v34 = vmul.f32 %v12963_v56, %v14333_v38  ;;  %8989 = vrsqrt.f32 %v5695_v12  ;;  %v6090_v17 = vpack.c.bf16 %v6030_v52, %v6028_v1  ;;  %v12974_v30 = vadd.f32 %v12694_v11, %v5493_v6  ;;  %v14341_v38 = vld [vmem:[#allocation129_spill] sm:$0xff] }
 0x98f   : > { %v8978_v63 = vpop.eup %8977  ;;  %8991 = vrsqrt.f32 %v5694_v40  ;;  %v12977_v23 = vadd.f32 %v12692_v10, %v5491_v41  ;;  %v6024_v9 = vmul.f32 %v12963_v56, %v14334_v62  ;;  %v6026_v60 = vmul.f32 %v12956_v16, %v14335_v33  ;;  %v14340_v41 = vld [vmem:[#allocation146_spill] sm:$0xff]  ;;  %v14342_v33 = vld [vmem:[#allocation145_spill] sm:$0xff] }
 0x990   : > { %v8980_v14 = vpop.eup %8979  ;;  %v12987_v2 = vsel %vm5669_vm0, %v8978_v63, 0.0  ;;  %6131 = vmatprep.subr.bf16.mxu1 %v6090_v17  ;;  %vm5661_vm8 = vcmp.gt.f32.partialorder %v12974_v30, 0.0  ;;  %v5489_v11 = vpop.xlane.xlu1 %5488  ;;  %v6087_v13 = vpack.c.bf16 %v6025_v48, %v6023_v34  ;;  %vm7208_vm0 = vcmask 1040384  }
 0x991   : > { %v5487_v10 = vpop.xlane.xlu0 %5486  ;;  %v6085_v20 = vmul.f32 %v12987_v2, %v14337_v0  ;;  %v12994_v21 = vsel %vm5668_vm1, %v8980_v14, 0.0  ;;  %v5693_v28 = vsel %vm5661_vm8, %v12974_v30, 1.0  ;;  %vm5660_vm9 = vcmp.gt.f32.partialorder %v12977_v23, 0.0  ;;  %6132 = vmatpush1.bf16.msra.mxu1 %v6089_v43  ;;  %v14344_v0 = vld [vmem:[#allocation123_spill] sm:$0xff] }
 0x992   : > { %v6083_v19 = vmul.f32 %v12994_v21, %v14338_v46  ;;  %8993 = vrsqrt.f32 %v5693_v28  ;;  %v5692_v1 = vsel %vm5660_vm9, %v12977_v23, 1.0  ;;  %v13006_v26 = vadd.f32 %v12699_v29, %v5489_v11  ;;  %v14343_v11 = vld [vmem:[#allocation147_spill] sm:$0xff] }
 0x993   : > { %v8982_v36 = vpop.eup %8981  ;;  %8995 = vrsqrt.f32 %v5692_v1  ;;  %v6088_v35 = vpack.c.bf16 %v6026_v60, %v6024_v9  ;;  %v13009_v3 = vadd.f32 %v12696_v53, %v5487_v10  ;;  %v6084_v52 = vmul.f32 %v12994_v21, %v14339_v18  ;;  %v14345_v28 = vld [vmem:[#allocation119_spill] sm:$0xff] }
 0x994   : > { %v8984_v43 = vpop.eup %8983  ;;  %v13015_v7 = vsel %vm5667_vm2, %v8982_v36, 0.0  ;;  %vm5659_vm10 = vcmp.gt.f32.partialorder %v13006_v26, 0.0  ;;  %v5485_v6 = vpop.xlane.xlu1 %5484  ;;  %v6086_v29 = vmul.f32 %v12987_v2, %v14340_v41  ;;  %v6117_v12 = vpack.c.bf16 %v6085_v20, %v6083_v19  ;;  %v14346_v36 = vld [vmem:[#allocation125_spill] sm:$0xff]  ;;  %v14347_v18 = vld [vmem:[#allocation163_spill] sm:$0xff] }
 0x995   : > { %v5483_v48 = vpop.xlane.xlu0 %5482  ;;  %v6081_v40 = vmul.f32 %v13015_v7, %v1346_v49  ;;  %v13023_v53 = vsel %vm5666_vm3, %v8984_v43, 0.0  ;;  %v5691_v25 = vsel %vm5659_vm10, %v13006_v26, 1.0  ;;  %6133 = vmatprep.subr.bf16.mxu1 %v6088_v35  ;;  %vm5658_vm11 = vcmp.gt.f32.partialorder %v13009_v3, 0.0  ;;  %v14348_v43 = vld [vmem:[#allocation164_spill] sm:$0xff] }
 0x996   : > { %v6079_v34 = vmul.f32 %v13023_v53, %v14341_v38  ;;  %8997 = vrsqrt.f32 %v5691_v25  ;;  %v5690_v17 = vsel %vm5658_vm11, %v13009_v3, 1.0  ;;  %6134 = vmatpush1.bf16.msra.mxu1 %v6087_v13  ;;  %v13035_v50 = vadd.f32 %v12704_v45, %v5485_v6 }
 0x997   : > { %v8986_v63 = vpop.eup %8985  ;;  %8999 = vrsqrt.f32 %v5690_v17  ;;  %v6118_v62 = vpack.c.bf16 %v6086_v29, %v6084_v52  ;;  %v13038_v9 = vadd.f32 %v12702_v54, %v5483_v48  ;;  %v6080_v60 = vmul.f32 %v13023_v53, %v14342_v33  ;;  %v14350_v33 = vld [vmem:[#allocation140_spill] sm:$0xff] }
 0x998   : > { %v8988_v14 = vpop.eup %8987  ;;  %v13044_v39 = vsel %vm5665_vm4, %v8986_v63, 0.0  ;;  %vm5657_vm12 = vcmp.gt.f32.partialorder %v13035_v50, 0.0  ;;  %v5481_v49 = vpop.xlane.xlu1 %5480  ;;  %v6082_v45 = vmul.f32 %v13015_v7, %v14343_v11  ;;  %v6115_v13 = vpack.c.bf16 %v6081_v40, %v6079_v34  ;;  %v14349_v63 = vld [vmem:[#allocation121_spill] sm:$0xff] }
 0x999   : > { %v5479_v10 = vpop.xlane.xlu0 %5478  ;;  %v6077_v54 = vmul.f32 %v13044_v39, %v14344_v0  ;;  %v13053_v20 = vsel %vm5664_vm5, %v8988_v14, 0.0  ;;  %v5689_v4 = vsel %vm5657_vm12, %v13035_v50, 1.0  ;;  %6135 = vmatprep.subr.bf16.mxu1 %v6118_v62  ;;  %vm5656_vm13 = vcmp.gt.f32.partialorder %v13038_v9, 0.0  ;;  %v14351_v14 = vld [vmem:[#allocation152_spill] sm:$0xff]  ;;  %v14352_v0 = vld [vmem:[#allocation115_spill] sm:$0xff] }
 0x99a   : > { %v6075_v46 = vmul.f32 %v13053_v20, %v14345_v28  ;;  %9001 = vrsqrt.f32 %v5689_v4  ;;  %v5688_v19 = vsel %vm5656_vm13, %v13038_v9, 1.0  ;;  %6136 = vmatpush2.bf16.msra.mxu1 %v6117_v12  ;;  %v6116_v1 = vpack.c.bf16 %v6082_v45, %v6080_v60  ;;  %v14353_v28 = vld [vmem:[#allocation111_spill] sm:$0xff] }
 0x99b   : > { %v8990_v32 = vpop.eup %8989  ;;  %v1330_v35 = vadd.f32 %v14346_v36, %v14305_v58  ;;  %9003 = vrsqrt.f32 %v5688_v19  ;;  %v6076_v52 = vmul.f32 %v13053_v20, %v14347_v18  ;;  %v6078_v6 = vmul.f32 %v13044_v39, %v14348_v43  ;;  %v14356_v18 = vld [vmem:[#allocation49_spill] sm:$0xff] }
 0x99c   : > { %v8992_v41 = vpop.eup %8991  ;;  %v13072_v29 = vsel %vm5663_vm6, %v8990_v32, 0.0  ;;  %6137 = vmatprep.subr.bf16.mxu1 %v6116_v1  ;;  %v5577_v48 = vpop.xlane.xlu1 %5576  ;;  %v6113_v40 = vpack.c.bf16 %v6077_v54, %v6075_v46  ;;  %v14354_v1 = vld [vmem:[#allocation45_spill] sm:$0xff]  ;;  %vm7210_vm1 = vcmask 1041408   ;;  %vm7212_vm2 = vcmask 1042432  }
 0x99d   : > { %v5575_v12 = vpop.xlane.xlu0 %5574  ;;  %v6073_v25 = vmul.f32 %v13072_v29, %v1330_v35  ;;  %v13077_v38 = vsel %vm5662_vm7, %v8992_v41, 0.0  ;;  %v13079_v34 = vadd.f32 %v5577_v48, %v5481_v49  ;;  %v6114_v17 = vpack.c.bf16 %v6078_v6, %v6076_v52  ;;  %v14355_v35 = vld [vmem:[#allocation117_spill] sm:$0xff] }
 0x99e   : > { %v6071_v62 = vmul.f32 %v13077_v38, %v14349_v63  ;;  %6138 = vmatpush2.bf16.msra.mxu1 %v6115_v13  ;;  %v13083_v55 = vadd.f32 %v5575_v12, %v5479_v10  ;;  %v6072_v60 = vmul.f32 %v13077_v38, %v14350_v33  ;;  %v6074_v11 = vmul.f32 %v13072_v29, %v14351_v14 }
 0x99f   : > { %v8994_v45 = vpop.eup %8993  ;;  %vm5655_vm14 = vcmp.gt.f32.partialorder %v13079_v34, 0.0  ;;  %6139 = vmatprep.subr.bf16.mxu1 %v6114_v17  ;;  %v1314_v23 = vadd.f32 %v14355_v35, %v14305_v58  ;;  %v14357_v17 = vld [vmem:[#allocation151_spill] sm:$0xff] }
 0x9a0   : > { %v8996_v47 = vpop.eup %8995  ;;  %v13092_v49 = vsel %vm5661_vm8, %v8994_v45, 0.0  ;;  %v5687_v10 = vsel %vm5655_vm14, %v13079_v34, 1.0  ;;  %vm5654_vm15 = vcmp.gt.f32.partialorder %v13083_v55, 0.0  ;;  %v6112_v13 = vpack.c.bf16 %v6074_v11, %v6072_v60  ;;  %v14359_v60 = vld [vmem:[#allocation47_spill] sm:$0xff]  ;;  %v8802_v34 = vld [vmem:[%s13577_s7 + $0x138] sm:$0xff]  }
 0x9a1   : > { %v6069_v54 = vmul.f32 %v13092_v49, %v14352_v0  ;;  %v13102_v4 = vsel %vm5660_vm9, %v8996_v47, 0.0  ;;  %9005 = vrsqrt.f32 %v5687_v10  ;;  %v5686_v30 = vsel %vm5654_vm15, %v13083_v55, 1.0  ;;  %v14360_v0 = vld [vmem:[#allocation107_spill] sm:$0xff]  ;;  %v8804_v55 = vld [vmem:[%s13577_s7 + $0x130] sm:$0xff]   ;;  %8665 = vmatprep.subr.bf16.mxu0 %v8802_v34 }
 0x9a2   : > { %v6067_v46 = vmul.f32 %v13102_v4, %v14353_v28  ;;  %9007 = vrsqrt.f32 %v5686_v30  ;;  %6140 = vmatpush2.bf16.msra.mxu1 %v6113_v40  ;;  %v6111_v19 = vpack.c.bf16 %v6073_v25, %v6071_v62  ;;  %v6068_v32 = vmul.f32 %v13102_v4, %v14354_v1  ;;  %v14358_v62 = vld [vmem:[#allocation113_spill] sm:$0xff]  ;;  %8666 = vmatpush3.bf16.msra.mxu0 %v8802_v34 }
 0x9a3   : > { %v8998_v36 = vpop.eup %8997  ;;  %6141 = vmatprep.subr.bf16.mxu1 %v6112_v13  ;;  %v6070_v52 = vmul.f32 %v13092_v49, %v14356_v18  ;;  %v14361_v28 = vld [vmem:[#allocation41_spill] sm:$0xff]  ;;  %8667 = vmatprep.subr.bf16.mxu0 %v8804_v55 }
 0x9a4   : > { %v9000_v43 = vpop.eup %8999  ;;  %v13117_v6 = vsel %vm5659_vm10, %v8998_v36, 0.0  ;;  %v13119_v41 = vpop.f32.mrf.mxu0  ;;  %v6109_v48 = vpack.c.bf16 %v6069_v54, %v6067_v46 }
 0x9a5   : > { %v6065_v12 = vmul.f32 %v13117_v6, %v1314_v23  ;;  %v13124_v40 = vsel %vm5658_vm11, %v9000_v43, 0.0  ;;  %v6110_v25 = vpack.c.bf16 %v6070_v52, %v6068_v32  ;;  %v6066_v63 = vmul.f32 %v13117_v6, %v14357_v17  ;;  %v14363_v32 = vld [vmem:[#allocation37_spill] sm:$0xff] }
 0x9a6   : > { %v6063_v33 = vmul.f32 %v13124_v40, %v14358_v62  ;;  %6142 = vmatpush2.bf16.msra.mxu1 %v6111_v19  ;;  %v5834_v26 = vpop.f32.mrf.mxu0  ;;  %v6064_v14 = vmul.f32 %v13124_v40, %v14359_v60  ;;  %v14362_v19 = vld [vmem:[#allocation103_spill] sm:$0xff]  ;;  %v14364_v43 = vld [vmem:[#allocation109_spill] sm:$0xff]  ;;  %8668 = vmatpush3.bf16.msra.mxu0 %v8804_v55 }
 0x9a7   : > { %v9002_v11 = vpop.eup %9001  ;;  %6143 = vmatprep.subr.bf16.mxu1 %v6110_v25 }
 0x9a8   : > { %v9004_v45 = vpop.eup %9003  ;;  %v13134_v3 = vsel %vm5657_vm12, %v9002_v11, 0.0  ;;  %v5836_v47 = vpop.f32.mrf.mxu0  ;;  %v6108_v10 = vpack.c.bf16 %v6066_v63, %v6064_v14  ;;  %v6107_v13 = vpack.c.bf16 %v6065_v12, %v6063_v33  ;;  %v1298_v12 = vadd.f32 %v14364_v43, %v14305_v58  ;;  %v14366_v14 = vld [vmem:[#allocation105_spill] sm:$0xff]  ;;  %v14367_v11 = vld [vmem:[#allocation39_spill] sm:$0xff]  ;;  %v8807_v43 = vld [vmem:[%s13577_s7 + $0xa0] sm:$0xff]  }
 0x9a9   : > { %v6061_v54 = vmul.f32 %v13134_v3, %v14360_v0  ;;  %v13140_v30 = vsel %vm5656_vm13, %v9004_v45, 0.0  ;;  %v6062_v46 = vmul.f32 %v13134_v3, %v14361_v28 }
 0x9aa   : > { %v6059_v1 = vmul.f32 %v13140_v30, %v14362_v19  ;;  %6144 = vmatpush2.bf16.msra.mxu1 %v6109_v48  ;;  %v5838_v50 = vpop.f32.mrf.mxu0  ;;  %v6060_v36 = vmul.f32 %v13140_v30, %v14363_v32 }
 0x9ab   : > { %6145 = vmatprep.subr.bf16.mxu1 %v6108_v10  ;;  %v5992_v35 = vpack.c.bf16 %v5838_v50, %v5834_v26  ;;  %v14365_v26 = vld [vmem:[#allocation154_spill] sm:$0xff]  ;;  %v8803_v50 = vld [vmem:[%s13577_s7 + $0xb0] sm:$0xff]  }
 0x9ac   : > { %v5842_v23 = vpop.f32.mrf.mxu0  ;;  %v6106_v18 = vpack.c.bf16 %v6062_v46, %v6060_v36  ;;  %v6105_v52 = vpack.c.bf16 %v6061_v54, %v6059_v1  ;;  %v8801_v54 = vld [vmem:[%s13577_s7 + $0xb8] sm:$0xff]   ;;  %v8806_v46 = vld [vmem:[%s13577_s7 + $0x128] sm:$0xff]   ;;  %v5991_v1 = vpack.c.bf16 %v5836_v47, %v13119_v41 }
 0x9ad   : > { %6151 = vmatprep.mubr.bf16.mxu1 %v5992_v35  ;;  %8669 = vmatprep.subr.bf16.mxu0 %v8806_v46  ;;  %v8808_v35 = vld [vmem:[%s13577_s7 + $0x120] sm:$0xff]   ;;  %v8805_v41 = vld [vmem:[%s13577_s7 + $0xa8] sm:$0xff]  }
 0x9ae   : > { %v9006_v9 = vpop.eup %9005  ;;  %6146 = vmatpush2.bf16.msra.mxu1 %v6107_v13  ;;  %v5844_v25 = vpop.f32.mrf.mxu0  ;;  %8670 = vmatpush3.bf16.msra.mxu0 %v8806_v46 }
 0x9af   : > { %v9008_v17 = vpop.eup %9007  ;;  %v13152_v48 = vsel %vm5655_vm14, %v9006_v9, 0.0  ;;  %6147 = vmatprep.subr.bf16.mxu1 %v6106_v18  ;;  %8671 = vmatprep.subr.bf16.mxu0 %v8808_v35 }
 0x9b0   : > { %v6057_v63 = vmul.f32 %v13152_v48, %v1298_v12  ;;  %v13157_v62 = vsel %vm5654_vm15, %v9008_v17, 0.0  ;;  %v5846_v33 = vpop.f32.mrf.mxu0  ;;  %v6058_v60 = vmul.f32 %v13152_v48, %v14365_v26 }
 0x9b1   : > { %v6055_v58 = vmul.f32 %v13157_v62, %v14366_v14  ;;  %v6056_v45 = vmul.f32 %v13157_v62, %v14367_v11  ;;  %v5993_v9 = vpack.c.bf16 %v5846_v33, %v5842_v23 }
 0x9b2   : > { %6148 = vmatpush2.bf16.msra.mxu1 %v6105_v52  ;;  %v5848_v10 = vpop.f32.mrf.mxu0  ;;  %8672 = vmatpush3.bf16.msra.mxu0 %v8808_v35 }
 0x9b3   : > { %v6104_v13 = vpack.c.bf16 %v6058_v60, %v6056_v45  ;;  %v6103_v0 = vpack.c.bf16 %v6057_v63, %v6055_v58  ;;  %v5994_v32 = vpack.c.bf16 %v5848_v10, %v5844_v25 }
 0x9b4   : > { %v5852_v28 = vpop.f32.mrf.mxu0 }
 0x9b5   : > { %6149 = vmatprep.subr.bf16.mxu1 %v6104_v13 }
 0x9b6   : > { %6150 = vmatpush2.bf16.msra.mxu1 %v6103_v0  ;;  %v5854_v19 = vpop.f32.mrf.mxu0 }
 0x9b7   : > { %8617 = vmatprep.subr.bf16.mxu1 %v8801_v54 }
 0x9b8   : > { %v5856_v36 = vpop.f32.mrf.mxu0 }
 0x9b9   : > { %6152 = vmatmul.mubr.bf16.vlgmr.msra.gmra.mxu1 %v5991_v1  ;;  %v5995_v60 = vpack.c.bf16 %v5856_v36, %v5852_v28 }
 0x9ba   : > { %6161 = vmatprep.mubr.bf16.mxu1 %v5994_v32  ;;  %v5858_v18 = vpop.f32.mrf.mxu0  ;;  %8618 = vmatpush3.bf16.msra.mxu1 %v8801_v54 }
 0x9bb   : > { %8619 = vmatprep.subr.bf16.mxu1 %v8803_v50  ;;  %v5996_v12 = vpack.c.bf16 %v5858_v18, %v5854_v19 }
 0x9bc   : > { %v5862_v47 = vpop.f32.mrf.mxu0 }
 0x9be   : > { %v5864_v52 = vpop.f32.mrf.mxu0  ;;  %8620 = vmatpush3.bf16.msra.mxu1 %v8803_v50 }
 0x9bf   : > { %8621 = vmatprep.subr.bf16.mxu1 %v8805_v41 }
 0x9c0   : > { %v5866_v25 = vpop.f32.mrf.mxu0 }
 0x9c1   : > { %6162 = vmatmul.mubr.bf16.gmra.mxu1 %v5993_v9  ;;  %v5997_v45 = vpack.c.bf16 %v5866_v25, %v5862_v47 }
 0x9c2   : > { %6171 = vmatprep.mubr.bf16.mxu1 %v5996_v12  ;;  %v5868_v17 = vpop.f32.mrf.mxu0  ;;  %8622 = vmatpush3.bf16.msra.mxu1 %v8805_v41 }
 0x9c3   : > { %8623 = vmatprep.subr.bf16.mxu1 %v8807_v43  ;;  %v5998_v14 = vpack.c.bf16 %v5868_v17, %v5864_v52 }
 0x9c4   : > { %v5872_v63 = vpop.f32.mrf.mxu0 }
 0x9c6   : > { %v5874_v26 = vpop.f32.mrf.mxu0  ;;  %8624 = vmatpush3.bf16.msra.mxu1 %v8807_v43 }
 0x9c8   : > { %v5876_v58 = vpop.f32.mrf.mxu0 }
 0x9c9   : > { %6172 = vmatmul.mubr.bf16.gmra.mxu1 %v5995_v60  ;;  %v5999_v54 = vpack.c.bf16 %v5876_v58, %v5872_v63 }
 0x9ca   : > { %6181 = vmatprep.mubr.bf16.mxu1 %v5998_v14  ;;  %v5878_v23 = vpop.f32.mrf.mxu0 }
 0x9cb   : > { %v6000_v34 = vpack.c.bf16 %v5878_v23, %v5874_v26 }
 0x9cc   : > { %v5882_v33 = vpop.f32.mrf.mxu0 }
 0x9ce   : > { %v5884_v11 = vpop.f32.mrf.mxu0 }
 0x9d0   : > { %v5886_v10 = vpop.f32.mrf.mxu0 }
 0x9d1   : > { %6182 = vmatmul.mubr.bf16.gmra.mxu1 %v5997_v45  ;;  %v6001_v32 = vpack.c.bf16 %v5886_v10, %v5882_v33  ;;  %v8809_v10 = vld [vmem:[%s13577_s7 + $0x98] sm:$0xff]  }
 0x9d2   : > { %6191 = vmatprep.mubr.bf16.mxu1 %v6000_v34  ;;  %v5888_v55 = vpop.f32.mrf.mxu0  ;;  %8625 = vmatprep.subr.bf16.mxu1 %v8809_v10 }
 0x9d3   : > { %v6002_v46 = vpack.c.bf16 %v5888_v55, %v5884_v11  ;;  %8626 = vmatpush3.bf16.msra.mxu1 %v8809_v10 }
 0x9d4   : > { %v5892_v13 = vpop.f32.mrf.mxu0 }
 0x9d6   : > { %v5894_v0 = vpop.f32.mrf.mxu0 }
 0x9d8   : > { %v5896_v19 = vpop.f32.mrf.mxu0 }
 0x9d9   : > { %6192 = vmatmul.mubr.bf16.gmra.mxu1 %v5999_v54  ;;  %v6003_v52 = vpack.c.bf16 %v5896_v19, %v5892_v13  ;;  %v8810_v13 = vld [vmem:[%s13577_s7 + $0x118] sm:$0xff]  }
 0x9da   : > { %6201 = vmatprep.mubr.bf16.mxu1 %v6002_v46  ;;  %v5898_v28 = vpop.f32.mrf.mxu0  ;;  %8673 = vmatprep.subr.bf16.mxu0 %v8810_v13 }
 0x9db   : > { %v6004_v36 = vpack.c.bf16 %v5898_v28, %v5894_v0  ;;  %8674 = vmatpush3.bf16.msra.mxu0 %v8810_v13  ;;  %v8811_v28 = vld [vmem:[%s13577_s7 + $0x90] sm:$0xff]  }
 0x9dc   : > { %v5902_v1 = vpop.f32.mrf.mxu0  ;;  %8627 = vmatprep.subr.bf16.mxu1 %v8811_v28 }
 0x9dd   : > { %8628 = vmatpush3.bf16.msra.mxu1 %v8811_v28 }
 0x9de   : > { %v5904_v50 = vpop.f32.mrf.mxu0 }
 0x9e0   : > { %v5906_v35 = vpop.f32.mrf.mxu0 }
 0x9e1   : > { %6202 = vmatmul.mubr.bf16.gmra.mxu1 %v6001_v32  ;;  %v6005_v63 = vpack.c.bf16 %v5906_v35, %v5902_v1  ;;  %v8813_v32 = vld [vmem:[%s13577_s7 + $0x88] sm:$0xff]  }
 0x9e2   : > { %6211 = vmatprep.mubr.bf16.mxu1 %v6004_v36  ;;  %v5908_v18 = vpop.f32.mrf.mxu0  ;;  %8629 = vmatprep.subr.bf16.mxu1 %v8813_v32  ;;  %v8814_v35 = vld [vmem:[%s13577_s7 + $0x108] sm:$0xff]  }
 0x9e3   : > { %v6006_v9 = vpack.c.bf16 %v5908_v18, %v5904_v50  ;;  %v8812_v50 = vld [vmem:[%s13577_s7 + $0x110] sm:$0xff]   ;;  %8630 = vmatpush3.bf16.msra.mxu1 %v8813_v32 }
 0x9e4   : > { %v5912_v41 = vpop.f32.mrf.mxu0  ;;  %8675 = vmatprep.subr.bf16.mxu0 %v8812_v50 }
 0x9e5   : > { %8676 = vmatpush3.bf16.msra.mxu0 %v8812_v50 }
 0x9e6   : > { %v5914_v47 = vpop.f32.mrf.mxu0  ;;  %8677 = vmatprep.subr.bf16.mxu0 %v8814_v35 }
 0x9e8   : > { %v5916_v43 = vpop.f32.mrf.mxu0 }
 0x9e9   : > { %6212 = vmatmul.mubr.bf16.gmra.mxu1 %v6003_v52  ;;  %v6007_v33 = vpack.c.bf16 %v5916_v43, %v5912_v41  ;;  %8678 = vmatpush3.bf16.msra.mxu0 %v8814_v35 }
 0x9ea   : > { %6221 = vmatprep.mubr.bf16.mxu1 %v6006_v9  ;;  %v5918_v12 = vpop.f32.mrf.mxu0  ;;  %v8815_v9 = vld [vmem:[%s13577_s7 + $0x80] sm:$0xff]  }
 0x9eb   : > { %v6008_v26 = vpack.c.bf16 %v5918_v12, %v5914_v47  ;;  %8631 = vmatprep.subr.bf16.mxu1 %v8815_v9  ;;  %v8816_v12 = vld [vmem:[%s13577_s7 + $0x100] sm:$0xff]  }
 0x9ec   : > { %v5922_v25 = vpop.f32.mrf.mxu0  ;;  %8632 = vmatpush3.bf16.msra.mxu1 %v8815_v9  ;;  %8679 = vmatprep.subr.bf16.mxu0 %v8816_v12 }
 0x9ed   : > { %8680 = vmatpush3.bf16.msra.mxu0 %v8816_v12 }
 0x9ee   : > { %v5924_v17 = vpop.f32.mrf.mxu0 }
 0x9f0   : > { %v5926_v60 = vpop.f32.mrf.mxu0 }
 0x9f1   : > { %6222 = vmatmul.mubr.bf16.gmra.mxu1 %v6005_v63  ;;  %v6009_v54 = vpack.c.bf16 %v5926_v60, %v5922_v25 }
 0x9f2   : > { %6231 = vmatprep.mubr.bf16.mxu1 %v6008_v26  ;;  %v5928_v14 = vpop.f32.mrf.mxu0 }
 0x9f3   : > { %v6010_v11 = vpack.c.bf16 %v5928_v14, %v5924_v17 }
 0x9f4   : > { %v5932_v58 = vpop.f32.mrf.mxu0 }
 0x9f6   : > { %v5934_v23 = vpop.f32.mrf.mxu0 }
 0x9f8   : > { %v5936_v45 = vpop.f32.mrf.mxu0 }
 0x9f9   : > { %6232 = vmatmul.mubr.bf16.gmra.mxu1 %v6007_v33  ;;  %v6011_v41 = vpack.c.bf16 %v5936_v45, %v5932_v58 }
 0x9fa   : > { %6241 = vmatprep.mubr.bf16.mxu1 %v6010_v11  ;;  %v5938_v34 = vpop.f32.mrf.mxu0 }
 0x9fb   : > { %v6012_v46 = vpack.c.bf16 %v5938_v34, %v5934_v23 }
 0x9fc   : > { %v5942_v55 = vpop.f32.mrf.mxu0 }
 0x9fe   : > { %v5944_v0 = vpop.f32.mrf.mxu0 }
 0xa00   : > { %v5946_v19 = vpop.f32.mrf.mxu0 }
 0xa01   : > { %6242 = vmatmul.mubr.bf16.gmra.mxu1 %v6009_v54  ;;  %v6013_v63 = vpack.c.bf16 %v5946_v19, %v5942_v55 }
 0xa02   : > { %6251 = vmatprep.mubr.bf16.mxu1 %v6012_v46  ;;  %v5948_v1 = vpop.f32.mrf.mxu0 }
 0xa03   : > { %v6014_v47 = vpack.c.bf16 %v5948_v1, %v5944_v0 }
 0xa04   : > { %v5952_v36 = vpop.f32.mrf.mxu0 }
 0xa06   : > { %v5954_v18 = vpop.f32.mrf.mxu0 }
 0xa08   : > { %v5956_v52 = vpop.f32.mrf.mxu0 }
 0xa09   : > { %6252 = vmatmul.mubr.bf16.gmra.mxu1 %v6011_v41  ;;  %v6015_v33 = vpack.c.bf16 %v5956_v52, %v5952_v36 }
 0xa0a   : > { %6261 = vmatprep.mubr.bf16.mxu1 %v6014_v47  ;;  %v5958_v43 = vpop.f32.mrf.mxu0 }
 0xa0b   : > { %v6016_v26 = vpack.c.bf16 %v5958_v43, %v5954_v18 }
 0xa0c   : > { %v5962_v25 = vpop.f32.mrf.mxu0 }
 0xa0e   : > { %v5964_v17 = vpop.f32.mrf.mxu0 }
 0xa10   : > { %v5966_v60 = vpop.f32.mrf.mxu0 }
 0xa11   : > { %6262 = vmatmul.mubr.bf16.gmra.mxu1 %v6013_v63  ;;  %v6017_v0 = vpack.c.bf16 %v5966_v60, %v5962_v25 }
 0xa12   : > { %6271 = vmatprep.mubr.bf16.mxu1 %v6016_v26  ;;  %v5968_v14 = vpop.f32.mrf.mxu0 }
 0xa13   : > { %v6018_v11 = vpack.c.bf16 %v5968_v14, %v5964_v17 }
 0xa14   : > { %v5972_v58 = vpop.f32.mrf.mxu0 }
 0xa16   : > { %v5974_v23 = vpop.f32.mrf.mxu0 }
 0xa18   : > { %v5976_v45 = vpop.f32.mrf.mxu0 }
 0xa19   : > { %6272 = vmatmul.mubr.bf16.gmra.mxu1 %v6015_v33  ;;  %v6019_v19 = vpack.c.bf16 %v5976_v45, %v5972_v58 }
 0xa1a   : > { %6281 = vmatprep.mubr.bf16.mxu1 %v6018_v11  ;;  %v5978_v34 = vpop.f32.mrf.mxu0 }
 0xa1b   : > { %v6020_v54 = vpack.c.bf16 %v5978_v34, %v5974_v23 }
 0xa1c   : > { %v5982_v10 = vpop.f32.mrf.mxu0 }
 0xa1e   : > { %v5984_v13 = vpop.f32.mrf.mxu0 }
 0xa20   : > { %v5986_v46 = vpop.f32.mrf.mxu0 }
 0xa21   : > { %6282 = vmatmul.mubr.bf16.gmra.mxu1 %v6017_v0  ;;  %v6021_v1 = vpack.c.bf16 %v5986_v46, %v5982_v10 }
 0xa22   : > { %6291 = vmatprep.mubr.bf16.mxu1 %v6020_v54  ;;  %v5988_v55 = vpop.f32.mrf.mxu0 }
 0xa23   : > { %v6022_v28 = vpack.c.bf16 %v5988_v55, %v5984_v13 }
 0xa29   : > { %6292 = vmatmul.mubr.bf16.gmra.mxu1 %v6019_v19 }
 0xa2a   : > { %6301 = vmatprep.mubr.bf16.mxu1 %v6022_v28 }
 0xa31   : > { %6302 = vmatmul.mubr.bf16.gmra.mxu1 %v6021_v1 }
 0xa79   : > { %v6153_v50 = vpop.f32.mrf.mxu1 }
 0xa7a   : > { %v6312_v35 = vmul.f32 %v6153_v50, %v12963_v56 }
 0xa7b   : > { %v6155_v32 = vpop.f32.mrf.mxu1 }
 0xa7c   : > { %v6313_v47 = vmul.f32 %v6155_v32, %v12963_v56 }
 0xa7d   : > { %v6157_v36 = vpop.f32.mrf.mxu1 }
 0xa7e   : > { %v6314_v18 = vmul.f32 %v6157_v36, %v12956_v16 }
 0xa7f   : > { %v6159_v41 = vpop.f32.mrf.mxu1 }
 0xa80   : > { %v6393_v52 = vpack.c.bf16 %v6314_v18, %v6312_v35  ;;  %v6315_v9 = vmul.f32 %v6159_v41, %v12956_v16 }
 0xa81   : > { %v6163_v43 = vpop.f32.mrf.mxu1 }
 0xa82   : > { %v6639_v12 = vpack.c.bf16 %v6315_v9, %v6313_v47  ;;  %8633 = vmatprep.mubr.bf16.mxu1 %v6393_v52  ;;  %v6316_v63 = vmul.f32 %v6163_v43, %v12930_v37 }
 0xa83   : > { %v6165_v25 = vpop.f32.mrf.mxu1 }
 0xa84   : > { %8681 = vmatprep.mubr.bf16.mxu0 %v6639_v12  ;;  %v6317_v14 = vmul.f32 %v6165_v25, %v12930_v37 }
 0xa85   : > { %v6167_v17 = vpop.f32.mrf.mxu1 }
 0xa86   : > { %v6318_v26 = vmul.f32 %v6167_v17, %v12922_v5 }
 0xa87   : > { %v6169_v60 = vpop.f32.mrf.mxu1 }
 0xa88   : > { %v6394_v58 = vpack.c.bf16 %v6318_v26, %v6316_v63  ;;  %v6319_v23 = vmul.f32 %v6169_v60, %v12922_v5 }
 0xa89   : > { %v6173_v56 = vpop.f32.mrf.mxu1 }
 0xa8a   : > { %v6640_v33 = vpack.c.bf16 %v6319_v23, %v6317_v14  ;;  %8634 = vmatmul.mubr.bf16.vlgmr.msra.gmra.mxu1 %v6394_v58  ;;  %v6320_v45 = vmul.f32 %v6173_v56, %v12900_v42 }
 0xa8b   : > { %v6175_v16 = vpop.f32.mrf.mxu1 }
 0xa8c   : > { %8682 = vmatmul.mubr.bf16.vlgmr.msra.gmra.mxu0 %v6640_v33  ;;  %v6321_v13 = vmul.f32 %v6175_v16, %v12900_v42 }
 0xa8d   : > { %v6177_v11 = vpop.f32.mrf.mxu1 }
 0xa8e   : > { %v6322_v34 = vmul.f32 %v6177_v11, %v12893_v51 }
 0xa8f   : > { %v6179_v10 = vpop.f32.mrf.mxu1 }
 0xa90   : > { %v6395_v0 = vpack.c.bf16 %v6322_v34, %v6320_v45  ;;  %v6323_v54 = vmul.f32 %v6179_v10, %v12893_v51 }
 0xa91   : > { %v6183_v37 = vpop.f32.mrf.mxu1 }
 0xa92   : > { %v6641_v46 = vpack.c.bf16 %v6323_v54, %v6321_v13  ;;  %8637 = vmatprep.mubr.bf16.mxu1 %v6395_v0  ;;  %v6324_v19 = vmul.f32 %v6183_v37, %v12871_v22 }
 0xa93   : > { %v6185_v5 = vpop.f32.mrf.mxu1 }
 0xa94   : > { %8685 = vmatprep.mubr.bf16.mxu0 %v6641_v46  ;;  %v6325_v50 = vmul.f32 %v6185_v5, %v12871_v22 }
 0xa95   : > { %v6187_v55 = vpop.f32.mrf.mxu1 }
 0xa96   : > { %v6326_v28 = vmul.f32 %v6187_v55, %v12863_v15 }
 0xa97   : > { %v6189_v1 = vpop.f32.mrf.mxu1 }
 0xa98   : > { %v6396_v32 = vpack.c.bf16 %v6326_v28, %v6324_v19  ;;  %v6327_v36 = vmul.f32 %v6189_v1, %v12863_v15 }
 0xa99   : > { %v6193_v42 = vpop.f32.mrf.mxu1 }
 0xa9a   : > { %v6642_v35 = vpack.c.bf16 %v6327_v36, %v6325_v50  ;;  %8638 = vmatmul.mubr.bf16.gmra.mxu1 %v6396_v32  ;;  %v6328_v41 = vmul.f32 %v6193_v42, %v12841_v61 }
 0xa9b   : > { %v6195_v51 = vpop.f32.mrf.mxu1 }
 0xa9c   : > { %8686 = vmatmul.mubr.bf16.gmra.mxu0 %v6642_v35  ;;  %v6329_v9 = vmul.f32 %v6195_v51, %v12841_v61 }
 0xa9d   : > { %v6197_v18 = vpop.f32.mrf.mxu1 }
 0xa9e   : > { %v6330_v47 = vmul.f32 %v6197_v18, %v12834_v27 }
 0xa9f   : > { %v6199_v52 = vpop.f32.mrf.mxu1 }
 0xaa0   : > { %v6397_v43 = vpack.c.bf16 %v6330_v47, %v6328_v41  ;;  %v6331_v12 = vmul.f32 %v6199_v52, %v12834_v27 }
 0xaa1   : > { %v6203_v22 = vpop.f32.mrf.mxu1 }
 0xaa2   : > { %v6643_v25 = vpack.c.bf16 %v6331_v12, %v6329_v9  ;;  %8641 = vmatprep.mubr.bf16.mxu1 %v6397_v43  ;;  %v6332_v63 = vmul.f32 %v6203_v22, %v12811_v24 }
 0xaa3   : > { %v6205_v15 = vpop.f32.mrf.mxu1 }
 0xaa4   : > { %8689 = vmatprep.mubr.bf16.mxu0 %v6643_v25  ;;  %v6333_v14 = vmul.f32 %v6205_v15, %v12811_v24 }
 0xaa5   : > { %v6207_v17 = vpop.f32.mrf.mxu1 }
 0xaa6   : > { %v6334_v26 = vmul.f32 %v6207_v17, %v12804_v8 }
 0xaa7   : > { %v6209_v60 = vpop.f32.mrf.mxu1 }
 0xaa8   : > { %v6398_v58 = vpack.c.bf16 %v6334_v26, %v6332_v63  ;;  %v6335_v23 = vmul.f32 %v6209_v60, %v12804_v8 }
 0xaa9   : > { %v6213_v61 = vpop.f32.mrf.mxu1 }
 0xaaa   : > { %v6644_v56 = vpack.c.bf16 %v6335_v23, %v6333_v14  ;;  %8642 = vmatmul.mubr.bf16.gmra.mxu1 %v6398_v58  ;;  %v6336_v16 = vmul.f32 %v6213_v61, %v12780_v59 }
 0xaab   : > { %v6215_v27 = vpop.f32.mrf.mxu1 }
 0xaac   : > { %8690 = vmatmul.mubr.bf16.gmra.mxu0 %v6644_v56  ;;  %v6337_v34 = vmul.f32 %v6215_v27, %v12780_v59 }
 0xaad   : > { %v6217_v33 = vpop.f32.mrf.mxu1 }
 0xaae   : > { %v6338_v11 = vmul.f32 %v6217_v33, %v12774_v57 }
 0xaaf   : > { %v6219_v45 = vpop.f32.mrf.mxu1 }
 0xab0   : > { %v6399_v10 = vpack.c.bf16 %v6338_v11, %v6336_v16  ;;  %v6339_v13 = vmul.f32 %v6219_v45, %v12774_v57 }
 0xab1   : > { %v6223_v24 = vpop.f32.mrf.mxu1 }
 0xab2   : > { %v6645_v0 = vpack.c.bf16 %v6339_v13, %v6337_v34  ;;  %8645 = vmatprep.mubr.bf16.mxu1 %v6399_v10  ;;  %v6340_v37 = vmul.f32 %v6223_v24, %v12751_v44 }
 0xab3   : > { %v6225_v8 = vpop.f32.mrf.mxu1 }
 0xab4   : > { %8693 = vmatprep.mubr.bf16.mxu0 %v6645_v0  ;;  %v6341_v55 = vmul.f32 %v6225_v8, %v12751_v44 }
 0xab5   : > { %v6227_v54 = vpop.f32.mrf.mxu1 }
 0xab6   : > { %v6342_v46 = vmul.f32 %v6227_v54, %v12744_v31 }
 0xab7   : > { %v6229_v5 = vpop.f32.mrf.mxu1 }
 0xab8   : > { %v6400_v19 = vpack.c.bf16 %v6342_v46, %v6340_v37  ;;  %v6343_v28 = vmul.f32 %v6229_v5, %v12744_v31 }
 0xab9   : > { %v6233_v59 = vpop.f32.mrf.mxu1 }
 0xaba   : > { %v6646_v1 = vpack.c.bf16 %v6343_v28, %v6341_v55  ;;  %8646 = vmatmul.mubr.bf16.gmra.mxu1 %v6400_v19  ;;  %v6344_v32 = vmul.f32 %v6233_v59, %v13157_v62 }
 0xabb   : > { %v6235_v57 = vpop.f32.mrf.mxu1 }
 0xabc   : > { %8694 = vmatmul.mubr.bf16.gmra.mxu0 %v6646_v1  ;;  %v6345_v35 = vmul.f32 %v6235_v57, %v13157_v62 }
 0xabd   : > { %v6237_v50 = vpop.f32.mrf.mxu1 }
 0xabe   : > { %v6346_v36 = vmul.f32 %v6237_v50, %v13152_v48 }
 0xabf   : > { %v6239_v42 = vpop.f32.mrf.mxu1 }
 0xac0   : > { %v6401_v51 = vpack.c.bf16 %v6346_v36, %v6344_v32  ;;  %v6347_v18 = vmul.f32 %v6239_v42, %v13152_v48 }
 0xac1   : > { %v6243_v44 = vpop.f32.mrf.mxu1 }
 0xac2   : > { %v6647_v41 = vpack.c.bf16 %v6347_v18, %v6345_v35  ;;  %8649 = vmatprep.mubr.bf16.mxu1 %v6401_v51  ;;  %v6348_v52 = vmul.f32 %v6243_v44, %v13140_v30 }
 0xac3   : > { %v6245_v31 = vpop.f32.mrf.mxu1 }
 0xac4   : > { %8697 = vmatprep.mubr.bf16.mxu0 %v6647_v41  ;;  %v6349_v12 = vmul.f32 %v6245_v31, %v13140_v30 }
 0xac5   : > { %v6247_v47 = vpop.f32.mrf.mxu1 }
 0xac6   : > { %v6350_v9 = vmul.f32 %v6247_v47, %v13134_v3 }
 0xac7   : > { %v6249_v43 = vpop.f32.mrf.mxu1 }
 0xac8   : > { %v6402_v22 = vpack.c.bf16 %v6350_v9, %v6348_v52  ;;  %v6351_v25 = vmul.f32 %v6249_v43, %v13134_v3 }
 0xac9   : > { %v6253_v62 = vpop.f32.mrf.mxu1 }
 0xaca   : > { %v6648_v15 = vpack.c.bf16 %v6351_v25, %v6349_v12  ;;  %8650 = vmatmul.mubr.bf16.gmra.mxu1 %v6402_v22  ;;  %v6352_v63 = vmul.f32 %v6253_v62, %v13124_v40 }
 0xacb   : > { %v6255_v48 = vpop.f32.mrf.mxu1 }
 0xacc   : > { %8698 = vmatmul.mubr.bf16.gmra.mxu0 %v6648_v15  ;;  %v6353_v14 = vmul.f32 %v6255_v48, %v13124_v40  ;;  %v9041_v48 = vld [vmem:[%s13578_s8] sm:$0x1f] }
 0xacd   : > { %v6257_v17 = vpop.f32.mrf.mxu1 }
 0xace   : > { %v6354_v26 = vmul.f32 %v6257_v17, %v13117_v6 }
 0xacf   : > { %v6259_v60 = vpop.f32.mrf.mxu1 }
 0xad0   : > { %v6403_v58 = vpack.c.bf16 %v6354_v26, %v6352_v63  ;;  %v6355_v23 = vmul.f32 %v6259_v60, %v13117_v6 }
 0xad1   : > { %v6263_v30 = vpop.f32.mrf.mxu1 }
 0xad2   : > { %v6649_v61 = vpack.c.bf16 %v6355_v23, %v6353_v14  ;;  %8653 = vmatprep.mubr.bf16.mxu1 %v6403_v58  ;;  %v6356_v27 = vmul.f32 %v6263_v30, %v13102_v4  ;;  %v14371_v58 = vld [vmem:[#allocation153_spill] sm:$0xff] }
 0xad3   : > { %v6265_v3 = vpop.f32.mrf.mxu1 }
 0xad4   : > { %8701 = vmatprep.mubr.bf16.mxu0 %v6649_v61  ;;  %v6357_v11 = vmul.f32 %v6265_v3, %v13102_v4  ;;  %v14372_v61 = vld [vmem:[#allocation155_spill] sm:$0xff] }
 0xad5   : > { %v6267_v56 = vpop.f32.mrf.mxu1 }
 0xad6   : > { %v6358_v33 = vmul.f32 %v6267_v56, %v13092_v49 }
 0xad7   : > { %v6269_v16 = vpop.f32.mrf.mxu1 }
 0xad8   : > { %v6404_v45 = vpack.c.bf16 %v6358_v33, %v6356_v27  ;;  %v6359_v34 = vmul.f32 %v6269_v16, %v13092_v49  ;;  %v14373_v33 = vld [vmem:[#allocation134_spill] sm:$0xff] }
 0xad9   : > { %v6273_v40 = vpop.f32.mrf.mxu1 }
 0xada   : > { %v6650_v10 = vpack.c.bf16 %v6359_v34, %v6357_v11  ;;  %8654 = vmatmul.mubr.bf16.gmra.mxu1 %v6404_v45  ;;  %v6360_v24 = vmul.f32 %v6273_v40, %v13077_v38 }
 0xadb   : > { %v6275_v6 = vpop.f32.mrf.mxu1 }
 0xadc   : > { %8702 = vmatmul.mubr.bf16.gmra.mxu0 %v6650_v10  ;;  %v6361_v54 = vmul.f32 %v6275_v6, %v13077_v38  ;;  %v14374_v6 = vld [vmem:[#allocation148_spill] sm:$0xff] }
 0xadd   : > { %v6277_v13 = vpop.f32.mrf.mxu1 }
 0xade   : > { %v6362_v0 = vmul.f32 %v6277_v13, %v13072_v29 }
 0xadf   : > { %v6279_v8 = vpop.f32.mrf.mxu1 }
 0xae0   : > { %v6405_v37 = vpack.c.bf16 %v6362_v0, %v6360_v24  ;;  %v6363_v46 = vmul.f32 %v6279_v8, %v13072_v29 }
 0xae1   : > { %v6283_v4 = vpop.f32.mrf.mxu1 }
 0xae2   : > { %v6651_v5 = vpack.c.bf16 %v6363_v46, %v6361_v54  ;;  %8657 = vmatprep.mubr.bf16.mxu1 %v6405_v37  ;;  %v6364_v19 = vmul.f32 %v6283_v4, %v13053_v20  ;;  %v14375_v54 = vld [vmem:[#allocation135_spill] sm:$0xff] }
 0xae3   : > { %v6285_v49 = vpop.f32.mrf.mxu1 }
 0xae4   : > { %8705 = vmatprep.mubr.bf16.mxu0 %v6651_v5  ;;  %v6365_v1 = vmul.f32 %v6285_v49, %v13053_v20  ;;  %v14376_v49 = vld [vmem:[#allocation35_spill] sm:$0xff] }
 0xae5   : > { %v6287_v55 = vpop.f32.mrf.mxu1 }
 0xae6   : > { %v6366_v28 = vmul.f32 %v6287_v55, %v13044_v39 }
 0xae7   : > { %v6289_v59 = vpop.f32.mrf.mxu1 }
 0xae8   : > { %v6406_v57 = vpack.c.bf16 %v6366_v28, %v6364_v19  ;;  %v6367_v50 = vmul.f32 %v6289_v59, %v13044_v39  ;;  %v14377_v59 = vld [vmem:[#allocation150_spill] sm:$0xff] }
 0xae9   : > { %v6293_v38 = vpop.f32.mrf.mxu1 }
 0xaea   : > { %v6652_v32 = vpack.c.bf16 %v6367_v50, %v6365_v1  ;;  %8658 = vmatmul.mubr.bf16.gmra.mxu1 %v6406_v57  ;;  %v6368_v42 = vmul.f32 %v6293_v38, %v13023_v53 }
 0xaeb   : > { %v6295_v29 = vpop.f32.mrf.mxu1 }
 0xaec   : > { %8706 = vmatmul.mubr.bf16.gmra.mxu0 %v6652_v32  ;;  %v6369_v18 = vmul.f32 %v6295_v29, %v13023_v53  ;;  %v14378_v32 = vld [vmem:[#allocation149_spill] sm:$0xff] }
 0xaed   : > { %v6297_v36 = vpop.f32.mrf.mxu1 }
 0xaee   : > { %v6370_v35 = vmul.f32 %v6297_v36, %v13015_v7 }
 0xaef   : > { %v6299_v51 = vpop.f32.mrf.mxu1 }
 0xaf0   : > { %v6407_v44 = vpack.c.bf16 %v6370_v35, %v6368_v42  ;;  %v6371_v41 = vmul.f32 %v6299_v51, %v13015_v7  ;;  %v14368_v7 = vld [vmem:[#allocation34_spill] sm:$0xff] }
 0xaf1   : > { %v6303_v20 = vpop.f32.mrf.mxu1  ;;  %v4743_v62 = vsub.s32 3, %v14368_v7  ;;  %v6657_v15 = vsub.s32 4, %v14368_v7 }
 0xaf2   : > { %v6653_v31 = vpack.c.bf16 %v6371_v41, %v6369_v18  ;;  %8661 = vmatprep.mubr.bf16.mxu1 %v6407_v44  ;;  %v6372_v52 = vmul.f32 %v6303_v20, %v12994_v21 }
 0xaf3   : > { %v6305_v39 = vpop.f32.mrf.mxu1  ;;  %v13283_v17 = vrot.slane %v9041_v48, %v4743_v62  ;;  %v13293_v60 = vrot.slane %v9041_v48, %v6657_v15  ;;  %v14379_v62 = vld [vmem:[#allocation65_spill] sm:$0xff] }
 0xaf4   : > { %8709 = vmatprep.mubr.bf16.mxu0 %v6653_v31  ;;  %v6373_v12 = vmul.f32 %v6305_v39, %v12994_v21  ;;  %v14369_v21 = vsub.s32 2, %v14368_v7 }
 0xaf5   : > { %v6307_v47 = vpop.f32.mrf.mxu1  ;;  %v4836_v23 = vadd.f32 %v14371_v58, %v13283_v17  ;;  %v4828_v16 = vadd.f32 %v14373_v33, %v13283_v17  ;;  %v4839_v13 = vadd.f32 %v14374_v6, %v13283_v17  ;;  %v4831_v55 = vadd.f32 %v14376_v49, %v13283_v17  ;;  %v14382_v6 = vld [vmem:[#allocation63_spill] sm:$0xff]  ;;  %v14384_v49 = vld [vmem:[#allocation69_spill] sm:$0xff] }
 0xaf6   : > { %v6374_v9 = vmul.f32 %v6307_v47, %v12987_v2  ;;  %v13287_v63 = vrot.slane %v9041_v48, %v14369_v21  ;;  %v4852_v15 = vadd.f32 %v14379_v62, %v13283_v17 }
 0xaf7   : > { %v6309_v43 = vpop.f32.mrf.mxu1 }
 0xaf8   : > { %v6408_v22 = vpack.c.bf16 %v6374_v9, %v6372_v52  ;;  %v6375_v53 = vmul.f32 %v6309_v43, %v12987_v2  ;;  %v14370_v2 = vsub.s32 1, %v14368_v7 }
 0xafa   : > { %v6654_v25 = vpack.c.bf16 %v6375_v53, %v6373_v12  ;;  %8662 = vmatmul.mubr.bf16.gmra.mxu1 %v6408_v22  ;;  %v13291_v26 = vrot.slane %v9041_v48, %v14370_v2 }
 0xafc   : > { %8710 = vmatmul.mubr.bf16.gmra.mxu0 %v6654_v25  ;;  %v4590_v3 = vadd.f32 %v14372_v61, %v13291_v26  ;;  %v4582_v37 = vadd.f32 %v14375_v54, %v13291_v26  ;;  %v4593_v1 = vadd.f32 %v14377_v59, %v13291_v26  ;;  %v4585_v29 = vadd.f32 %v14378_v32, %v13291_v26  ;;  %v14383_v54 = vld [vmem:[#allocation64_spill] sm:$0xff] }
 0xb4a   : > { %v8635_v14 = vpop.f32.mrf.mxu1 }
 0xb4b   : > { %v6504_v30 = vadd.f32 %v8635_v14, %v13287_v63 }
 0xb4c   : > { %v6495_v56 = vpop.f32.mrf.mxu1  ;;  %v8683_v27 = vpop.f32.mrf.mxu0 }
 0xb4d   : > { %v6870_v11 = vadd.f32 %v6504_v30, %v4836_v23  ;;  %v6496_v45 = vadd.f32 %v6495_v56, %v13287_v63  ;;  %v6750_v34 = vadd.f32 %v8683_v27, %v13293_v60  ;;  %v14380_v30 = vld [vmem:[#allocation61_spill] sm:$0xff] }
 0xb4e   : > { %v8636_v40 = vpop.f32.mrf.mxu1  ;;  %v6741_v10 = vpop.f32.mrf.mxu0  ;;  %v4606_v61 = vadd.f32 %v14380_v30, %v13291_v26 }
 0xb4f   : > { %6934 = vst [vmem:[%s13304_s16 + $0x10] sm:$0xff] %v6870_v11  ;;  %v6868_v24 = vadd.f32 %v6496_v45, %v4828_v16  ;;  %v6902_v0 = vadd.f32 %v6750_v34, %v4590_v3  ;;  %v6507_v8 = vadd.f32 %v8636_v40, %v13287_v63  ;;  %v6742_v46 = vadd.f32 %v6741_v10, %v13293_v60  ;;  %v14381_v3 = vld [vmem:[#allocation60_spill] sm:$0xff] }
 0xb50   : > { %v6498_v4 = vpop.f32.mrf.mxu1  ;;  %v8684_v5 = vpop.f32.mrf.mxu0  ;;  %v7035_v20 = vmul.f32 %v6870_v11, %v6870_v11  ;;  %v4844_v56 = vadd.f32 %v14381_v3, %v13283_v17 }
 0xb51   : > { %6932 = vst [vmem:[%s13304_s16] sm:$0xff] %v6868_v24  ;;  %6966 = vst [vmem:[%s13314_s19 + $0x10] sm:$0xff] %v6902_v0  ;;  %v6871_v19 = vadd.f32 %v6507_v8, %v4839_v13  ;;  %v6499_v28 = vadd.f32 %v6498_v4, %v13287_v63  ;;  %v6900_v57 = vadd.f32 %v6742_v46, %v4582_v37 }
 0xb52   : > { %v6753_v50 = vadd.f32 %v8684_v5, %v13293_v60  ;;  %v6744_v38 = vpop.f32.mrf.mxu0  ;;  %v7033_v51 = vmul.f32 %v6868_v24, %v6868_v24  ;;  %v7141_v43 = vmul.f32 %v6902_v0, %v6902_v0  ;;  %v4855_v13 = vadd.f32 %v14382_v6, %v13283_v17 }
 0xb53   : > { %6935 = vst [vmem:[%s13304_s16 + $0x18] sm:$0xff] %v6871_v19  ;;  %v6869_v36 = vadd.f32 %v6499_v28, %v4831_v55  ;;  %v6745_v42 = vadd.f32 %v6744_v38, %v13293_v60  ;;  %6964 = vst [vmem:[%s13314_s19] sm:$0xff] %v6900_v57  ;;  %v7139_v31 = vmul.f32 %v6900_v57, %v6900_v57 }
 0xb54   : > { %v6903_v35 = vadd.f32 %v6753_v50, %v4593_v1  ;;  %v7036_v12 = vmul.f32 %v6871_v19, %v6871_v19  ;;  %v4598_v37 = vadd.f32 %v14383_v54, %v13291_v26  ;;  %v4609_v55 = vadd.f32 %v14384_v49, %v13291_v26  ;;  %v14385_v1 = vld [vmem:[#allocation62_spill] sm:$0xff] }
 0xb55   : > { %6933 = vst [vmem:[%s13304_s16 + $0x8] sm:$0xff] %v6869_v36  ;;  %v6996_v18 = vadd.f32 %v6869_v36, %v6868_v24  ;;  %v7034_v44 = vmul.f32 %v6869_v36, %v6869_v36  ;;  %v6901_v41 = vadd.f32 %v6745_v42, %v4585_v29  ;;  %v14386_v36 = vld [vmem:[#allocation68_spill] sm:$0xff] }
 0xb56   : > { %6967 = vst [vmem:[%s13314_s19 + $0x18] sm:$0xff] %v6903_v35  ;;  %v7142_v48 = vmul.f32 %v6903_v35, %v6903_v35  ;;  %v4601_v42 = vadd.f32 %v14386_v36, %v13291_v26 }
 0xb57   : > { %v6997_v39 = vadd.f32 %v6996_v18, %v6870_v11  ;;  %v7065_v47 = vadd.f32 %v7034_v44, %v7033_v51  ;;  %6965 = vst [vmem:[%s13314_s19 + $0x8] sm:$0xff] %v6901_v41  ;;  %v7102_v52 = vadd.f32 %v6901_v41, %v6900_v57  ;;  %v7140_v9 = vmul.f32 %v6901_v41, %v6901_v41 }
 0xb58   : > { %v4847_v57 = vadd.f32 %v14385_v1, %v13283_v17 }
 0xb59   : > { %v7066_v22 = vadd.f32 %v7065_v47, %v7035_v20  ;;  %v7103_v53 = vadd.f32 %v7102_v52, %v6902_v0  ;;  %v7171_v25 = vadd.f32 %v7140_v9, %v7139_v31  ;;  %v6998_v7 = vadd.f32 %v6997_v39, %v6871_v19 }
 0xb5a   : > { %v8639_v21 = vpop.f32.mrf.mxu1 }
 0xb5b   : > { %v7172_v2 = vadd.f32 %v7171_v25, %v7141_v43  ;;  %v6520_v14 = vadd.f32 %v8639_v21, %v13287_v63  ;;  %v7067_v58 = vadd.f32 %v7066_v22, %v7036_v12  ;;  %v7104_v23 = vadd.f32 %v7103_v53, %v6903_v35 }
 0xb5c   : > { %v6511_v27 = vpop.f32.mrf.mxu1  ;;  %v8687_v33 = vpop.f32.mrf.mxu0 }
 0xb5d   : > { %v6874_v16 = vadd.f32 %v6520_v14, %v4852_v15  ;;  %v6512_v11 = vadd.f32 %v6511_v27, %v13287_v63  ;;  %v6766_v45 = vadd.f32 %v8687_v33, %v13293_v60  ;;  %v7173_v34 = vadd.f32 %v7172_v2, %v7142_v48  ;;  %v14387_v15 = vld [vmem:[#allocation53_spill] sm:$0xff]  ;;  %v14389_v33 = vld [vmem:[#allocation56_spill] sm:$0xff] }
 0xb5e   : > { %v8640_v40 = vpop.f32.mrf.mxu1  ;;  %v6757_v10 = vpop.f32.mrf.mxu0  ;;  %v4868_v48 = vadd.f32 %v14387_v15, %v13283_v17 }
 0xb5f   : > { %6938 = vst [vmem:[%s13304_s16 + $0x30] sm:$0xff] %v6874_v16  ;;  %v6872_v24 = vadd.f32 %v6512_v11, %v4844_v56  ;;  %v6906_v0 = vadd.f32 %v6766_v45, %v4606_v61  ;;  %v6523_v8 = vadd.f32 %v8640_v40, %v13287_v63  ;;  %v6758_v46 = vadd.f32 %v6757_v10, %v13293_v60  ;;  %v14388_v56 = vld [vmem:[#allocation57_spill] sm:$0xff] }
 0xb60   : > { %v6514_v4 = vpop.f32.mrf.mxu1  ;;  %v8688_v5 = vpop.f32.mrf.mxu0  ;;  %v7039_v12 = vmul.f32 %v6874_v16, %v6874_v16  ;;  %v4622_v27 = vadd.f32 %v14388_v56, %v13291_v26 }
 0xb61   : > { %6936 = vst [vmem:[%s13304_s16 + $0x20] sm:$0xff] %v6872_v24  ;;  %v6999_v19 = vadd.f32 %v6998_v7, %v6872_v24  ;;  %v7037_v28 = vmul.f32 %v6872_v24, %v6872_v24  ;;  %6970 = vst [vmem:[%s13314_s19 + $0x30] sm:$0xff] %v6906_v0  ;;  %v6875_v59 = vadd.f32 %v6523_v8, %v4855_v13  ;;  %v14390_v8 = vld [vmem:[#allocation4_spill] sm:$0xff] }
 0xb62   : > { %v6904_v50 = vadd.f32 %v6758_v46, %v4598_v37  ;;  %v6515_v38 = vadd.f32 %v6514_v4, %v13287_v63  ;;  %v6769_v32 = vadd.f32 %v8688_v5, %v13293_v60  ;;  %v6760_v29 = vpop.f32.mrf.mxu0  ;;  %v7145_v25 = vmul.f32 %v6906_v0, %v6906_v0  ;;  %v14391_v5 = vld [vmem:[#allocation2_spill] sm:$0xff] }
 0xb63   : > { %v7068_v35 = vadd.f32 %v7067_v58, %v7037_v28  ;;  %6939 = vst [vmem:[%s13304_s16 + $0x38] sm:$0xff] %v6875_v59  ;;  %v6761_v51 = vadd.f32 %v6760_v29, %v13293_v60  ;;  %v7040_v21 = vmul.f32 %v6875_v59, %v6875_v59  ;;  %v4871_v54 = vadd.f32 %v14390_v8, %v13283_v17 }
 0xb64   : > { %6968 = vst [vmem:[%s13314_s19 + $0x20] sm:$0xff] %v6904_v50  ;;  %v7105_v18 = vadd.f32 %v7104_v23, %v6904_v50  ;;  %v7143_v44 = vmul.f32 %v6904_v50, %v6904_v50  ;;  %v6873_v41 = vadd.f32 %v6515_v38, %v4847_v57  ;;  %v6907_v20 = vadd.f32 %v6769_v32, %v4609_v55  ;;  %v14393_v32 = vld [vmem:[#allocation59_spill] sm:$0xff] }
 0xb65   : > { %v6905_v31 = vadd.f32 %v6761_v51, %v4601_v42  ;;  %v4614_v49 = vadd.f32 %v14391_v5, %v13291_v26  ;;  %v4863_v29 = vadd.f32 %v14393_v32, %v13283_v17 }
 0xb66   : > { %v7174_v39 = vadd.f32 %v7173_v34, %v7143_v44  ;;  %6937 = vst [vmem:[%s13304_s16 + $0x28] sm:$0xff] %v6873_v41  ;;  %v7000_v47 = vadd.f32 %v6999_v19, %v6873_v41  ;;  %v7038_v52 = vmul.f32 %v6873_v41, %v6873_v41  ;;  %6971 = vst [vmem:[%s13314_s19 + $0x38] sm:$0xff] %v6907_v20 }
 0xb67   : > { %6969 = vst [vmem:[%s13314_s19 + $0x28] sm:$0xff] %v6905_v31  ;;  %v7106_v9 = vadd.f32 %v7105_v18, %v6905_v31  ;;  %v7144_v43 = vmul.f32 %v6905_v31, %v6905_v31  ;;  %v7146_v23 = vmul.f32 %v6907_v20, %v6907_v20  ;;  %v14394_v18 = vld [vmem:[#allocation6_spill] sm:$0xff] }
 0xb68   : > { %v7001_v22 = vadd.f32 %v7000_v47, %v6874_v16  ;;  %v7069_v53 = vadd.f32 %v7068_v35, %v7038_v52  ;;  %v4860_v16 = vadd.f32 %v14389_v33, %v13283_v17  ;;  %v4617_v44 = vadd.f32 %v14394_v18, %v13291_v26 }
 0xb69   : > { %v7107_v7 = vadd.f32 %v7106_v9, %v6906_v0  ;;  %v7175_v62 = vadd.f32 %v7174_v39, %v7144_v43 }
 0xb6a   : > { %v7070_v2 = vadd.f32 %v7069_v53, %v7039_v12  ;;  %v8643_v14 = vpop.f32.mrf.mxu1  ;;  %v7002_v58 = vadd.f32 %v7001_v22, %v6875_v59  ;;  %v14392_v59 = vld [vmem:[#allocation52_spill] sm:$0xff] }
 0xb6b   : > { %v7176_v30 = vadd.f32 %v7175_v62, %v7145_v25  ;;  %v6536_v61 = vadd.f32 %v8643_v14, %v13287_v63  ;;  %v7108_v3 = vadd.f32 %v7107_v7, %v6907_v20  ;;  %v4625_v1 = vadd.f32 %v14392_v59, %v13291_v26  ;;  %v14395_v14 = vld [vmem:[#allocation8_spill] sm:$0xff] }
 0xb6c   : > { %v6527_v11 = vpop.f32.mrf.mxu1  ;;  %v7071_v45 = vadd.f32 %v7070_v2, %v7040_v21  ;;  %v8691_v34 = vpop.f32.mrf.mxu0 }
 0xb6d   : > { %v6878_v40 = vadd.f32 %v6536_v61, %v4868_v48  ;;  %v6528_v10 = vadd.f32 %v6527_v11, %v13287_v63  ;;  %v6782_v6 = vadd.f32 %v8691_v34, %v13293_v60  ;;  %v7177_v13 = vadd.f32 %v7176_v30, %v7146_v23  ;;  %v14396_v11 = vld [vmem:[#allocation55_spill] sm:$0xff]  ;;  %v14397_v34 = vld [vmem:[#allocation58_spill] sm:$0xff] }
 0xb6e   : > { %v8644_v24 = vpop.f32.mrf.mxu1  ;;  %v6773_v0 = vpop.f32.mrf.mxu0 }
 0xb6f   : > { %6942 = vst [vmem:[%s13304_s16 + $0x50] sm:$0xff] %v6878_v40  ;;  %v6876_v37 = vadd.f32 %v6528_v10, %v4860_v16  ;;  %v6910_v46 = vadd.f32 %v6782_v6, %v4622_v27  ;;  %v6539_v4 = vadd.f32 %v8644_v24, %v13287_v63  ;;  %v6774_v55 = vadd.f32 %v6773_v0, %v13293_v60 }
 0xb70   : > { %v6530_v19 = vpop.f32.mrf.mxu1  ;;  %v8692_v28 = vpop.f32.mrf.mxu0  ;;  %v7043_v7 = vmul.f32 %v6878_v40, %v6878_v40 }
 0xb71   : > { %6940 = vst [vmem:[%s13304_s16 + $0x40] sm:$0xff] %v6876_v37  ;;  %v7003_v57 = vadd.f32 %v7002_v58, %v6876_v37  ;;  %v7041_v50 = vmul.f32 %v6876_v37, %v6876_v37  ;;  %6974 = vst [vmem:[%s13314_s19 + $0x50] sm:$0xff] %v6910_v46  ;;  %v6879_v38 = vadd.f32 %v6539_v4, %v4871_v54  ;;  %v14398_v4 = vld [vmem:[#allocation12_spill] sm:$0xff] }
 0xb72   : > { %v6908_v36 = vadd.f32 %v6774_v55, %v4614_v49  ;;  %v6531_v42 = vadd.f32 %v6530_v19, %v13287_v63  ;;  %v6785_v35 = vadd.f32 %v8692_v28, %v13293_v60  ;;  %v6776_v51 = vpop.f32.mrf.mxu0  ;;  %v7149_v48 = vmul.f32 %v6910_v46, %v6910_v46  ;;  %v14399_v28 = vld [vmem:[#allocation10_spill] sm:$0xff] }
 0xb73   : > { %v7072_v41 = vadd.f32 %v7071_v45, %v7041_v50  ;;  %6943 = vst [vmem:[%s13304_s16 + $0x58] sm:$0xff] %v6879_v38  ;;  %v6777_v20 = vadd.f32 %v6776_v51, %v13293_v60  ;;  %v4884_v58 = vadd.f32 %v14395_v14, %v13283_v17  ;;  %v7044_v23 = vmul.f32 %v6879_v38, %v6879_v38 }
 0xb74   : > { %6972 = vst [vmem:[%s13314_s19 + $0x40] sm:$0xff] %v6908_v36  ;;  %v7109_v31 = vadd.f32 %v7108_v3, %v6908_v36  ;;  %v7147_v39 = vmul.f32 %v6908_v36, %v6908_v36  ;;  %v6877_v47 = vadd.f32 %v6531_v42, %v4863_v29  ;;  %v6911_v52 = vadd.f32 %v6785_v35, %v4625_v1  ;;  %v14401_v35 = vld [vmem:[#allocation16_spill] sm:$0xff] }
 0xb75   : > { %v6909_v9 = vadd.f32 %v6777_v20, %v4617_v44  ;;  %v4638_v45 = vadd.f32 %v14396_v11, %v13291_v26  ;;  %v4887_v5 = vadd.f32 %v14398_v4, %v13283_v17  ;;  %v4630_v59 = vadd.f32 %v14399_v28, %v13291_v26 }
 0xb76   : > { %v7178_v43 = vadd.f32 %v7177_v13, %v7147_v39  ;;  %6941 = vst [vmem:[%s13304_s16 + $0x48] sm:$0xff] %v6877_v47  ;;  %v7004_v12 = vadd.f32 %v7003_v57, %v6877_v47  ;;  %v7042_v22 = vmul.f32 %v6877_v47, %v6877_v47  ;;  %6975 = vst [vmem:[%s13314_s19 + $0x58] sm:$0xff] %v6911_v52 }
 0xb77   : > { %6973 = vst [vmem:[%s13314_s19 + $0x48] sm:$0xff] %v6909_v9  ;;  %v7110_v53 = vadd.f32 %v7109_v31, %v6909_v9  ;;  %v7148_v25 = vmul.f32 %v6909_v9, %v6909_v9  ;;  %v7150_v56 = vmul.f32 %v6911_v52, %v6911_v52  ;;  %v4879_v51 = vadd.f32 %v14401_v35, %v13283_v17  ;;  %v14402_v31 = vld [vmem:[#allocation14_spill] sm:$0xff] }
 0xb78   : > { %v7005_v62 = vadd.f32 %v7004_v12, %v6878_v40  ;;  %v7073_v15 = vadd.f32 %v7072_v41, %v7042_v22  ;;  %v4876_v40 = vadd.f32 %v14397_v34, %v13283_v17  ;;  %v4633_v39 = vadd.f32 %v14402_v31, %v13291_v26 }
 0xb79   : > { %v7111_v21 = vadd.f32 %v7110_v53, %v6910_v46  ;;  %v7179_v2 = vadd.f32 %v7178_v43, %v7148_v25 }
 0xb7a   : > { %v7074_v30 = vadd.f32 %v7073_v15, %v7043_v7  ;;  %v8647_v61 = vpop.f32.mrf.mxu1  ;;  %v7006_v3 = vadd.f32 %v7005_v62, %v6879_v38  ;;  %v14400_v38 = vld [vmem:[#allocation54_spill] sm:$0xff] }
 0xb7b   : > { %v7180_v27 = vadd.f32 %v7179_v2, %v7149_v48  ;;  %v6552_v33 = vadd.f32 %v8647_v61, %v13287_v63  ;;  %v7112_v16 = vadd.f32 %v7111_v21, %v6911_v52  ;;  %v4641_v32 = vadd.f32 %v14400_v38, %v13291_v26  ;;  %v14403_v61 = vld [vmem:[#allocation51_spill] sm:$0xff] }
 0xb7c   : > { %v6543_v10 = vpop.f32.mrf.mxu1  ;;  %v7075_v6 = vadd.f32 %v7074_v30, %v7044_v23  ;;  %v8695_v13 = vpop.f32.mrf.mxu0 }
 0xb7d   : > { %v6882_v24 = vadd.f32 %v6552_v33, %v4884_v58  ;;  %v6544_v0 = vadd.f32 %v6543_v10, %v13287_v63  ;;  %v6798_v8 = vadd.f32 %v8695_v13, %v13293_v60  ;;  %v7181_v54 = vadd.f32 %v7180_v27, %v7150_v56  ;;  %v14404_v10 = vld [vmem:[#allocation18_spill] sm:$0xff]  ;;  %v14405_v13 = vld [vmem:[#allocation43_spill] sm:$0xff] }
 0xb7e   : > { %v8648_v37 = vpop.f32.mrf.mxu1  ;;  %v6789_v46 = vpop.f32.mrf.mxu0 }
 0xb7f   : > { %6946 = vst [vmem:[%s13304_s16 + $0x70] sm:$0xff] %v6882_v24  ;;  %v6880_v49 = vadd.f32 %v6544_v0, %v4876_v40  ;;  %v6914_v55 = vadd.f32 %v6798_v8, %v4638_v45  ;;  %v6555_v19 = vadd.f32 %v8648_v37, %v13287_v63  ;;  %v6790_v1 = vadd.f32 %v6789_v46, %v13293_v60 }
 0xb80   : > { %v6546_v57 = vpop.f32.mrf.mxu1  ;;  %v8696_v50 = vpop.f32.mrf.mxu0  ;;  %v7047_v21 = vmul.f32 %v6882_v24, %v6882_v24 }
 0xb81   : > { %6944 = vst [vmem:[%s13304_s16 + $0x60] sm:$0xff] %v6880_v49  ;;  %v7007_v29 = vadd.f32 %v7006_v3, %v6880_v49  ;;  %v7045_v36 = vmul.f32 %v6880_v49, %v6880_v49  ;;  %6978 = vst [vmem:[%s13314_s19 + $0x70] sm:$0xff] %v6914_v55  ;;  %v6883_v42 = vadd.f32 %v6555_v19, %v4887_v5  ;;  %v14406_v19 = vld [vmem:[#allocation20_spill] sm:$0xff] }
 0xb82   : > { %v6912_v18 = vadd.f32 %v6790_v1, %v4630_v59  ;;  %v6547_v44 = vadd.f32 %v6546_v57, %v13287_v63  ;;  %v6801_v41 = vadd.f32 %v8696_v50, %v13293_v60  ;;  %v6792_v20 = vpop.f32.mrf.mxu0  ;;  %v7153_v58 = vmul.f32 %v6914_v55, %v6914_v55  ;;  %v14407_v50 = vld [vmem:[#allocation50_spill] sm:$0xff] }
 0xb83   : > { %v7076_v47 = vadd.f32 %v7075_v6, %v7045_v36  ;;  %6947 = vst [vmem:[%s13304_s16 + $0x78] sm:$0xff] %v6883_v42  ;;  %v6793_v52 = vadd.f32 %v6792_v20, %v13293_v60  ;;  %v4900_v3 = vadd.f32 %v14403_v61, %v13283_v17  ;;  %v7048_v56 = vmul.f32 %v6883_v42, %v6883_v42 }
 0xb84   : > { %6976 = vst [vmem:[%s13314_s19 + $0x60] sm:$0xff] %v6912_v18  ;;  %v7113_v9 = vadd.f32 %v7112_v16, %v6912_v18  ;;  %v7151_v43 = vmul.f32 %v6912_v18, %v6912_v18  ;;  %v6881_v12 = vadd.f32 %v6547_v44, %v4879_v51  ;;  %v6915_v22 = vadd.f32 %v6801_v41, %v4641_v32  ;;  %v14409_v41 = vld [vmem:[#allocation24_spill] sm:$0xff] }
 0xb85   : > { %v6913_v53 = vadd.f32 %v6793_v52, %v4633_v39  ;;  %v4654_v6 = vadd.f32 %v14404_v10, %v13291_v26  ;;  %v4903_v28 = vadd.f32 %v14406_v19, %v13283_v17  ;;  %v4646_v38 = vadd.f32 %v14407_v50, %v13291_v26 }
 0xb86   : > { %v7182_v25 = vadd.f32 %v7181_v54, %v7151_v43  ;;  %6945 = vst [vmem:[%s13304_s16 + $0x68] sm:$0xff] %v6881_v12  ;;  %v7008_v7 = vadd.f32 %v7007_v29, %v6881_v12  ;;  %v7046_v62 = vmul.f32 %v6881_v12, %v6881_v12  ;;  %6979 = vst [vmem:[%s13314_s19 + $0x78] sm:$0xff] %v6915_v22 }
 0xb87   : > { %6977 = vst [vmem:[%s13314_s19 + $0x68] sm:$0xff] %v6913_v53  ;;  %v7114_v15 = vadd.f32 %v7113_v9, %v6913_v53  ;;  %v7152_v48 = vmul.f32 %v6913_v53, %v6913_v53  ;;  %v7154_v11 = vmul.f32 %v6915_v22, %v6915_v22  ;;  %v4895_v20 = vadd.f32 %v14409_v41, %v13283_v17  ;;  %v14410_v9 = vld [vmem:[#allocation22_spill] sm:$0xff] }
 0xb88   : > { %v7009_v2 = vadd.f32 %v7008_v7, %v6882_v24  ;;  %v7077_v14 = vadd.f32 %v7076_v47, %v7046_v62  ;;  %v4892_v24 = vadd.f32 %v14405_v13, %v13283_v17  ;;  %v4649_v43 = vadd.f32 %v14410_v9, %v13291_v26 }
 0xb89   : > { %v7115_v23 = vadd.f32 %v7114_v15, %v6914_v55  ;;  %v7183_v30 = vadd.f32 %v7182_v25, %v7152_v48 }
 0xb8a   : > { %v7078_v27 = vadd.f32 %v7077_v14, %v7047_v21  ;;  %v8651_v33 = vpop.f32.mrf.mxu1  ;;  %v7010_v16 = vadd.f32 %v7009_v2, %v6883_v42  ;;  %v14408_v42 = vld [vmem:[#allocation42_spill] sm:$0xff] }
 0xb8b   : > { %v7184_v45 = vadd.f32 %v7183_v30, %v7153_v58  ;;  %v6568_v34 = vadd.f32 %v8651_v33, %v13287_v63  ;;  %v7116_v40 = vadd.f32 %v7115_v23, %v6915_v22  ;;  %v4657_v35 = vadd.f32 %v14408_v42, %v13291_v26  ;;  %v14411_v33 = vld [vmem:[#allocation28_spill] sm:$0xff] }
 0xb8c   : > { %v6559_v0 = vpop.f32.mrf.mxu1  ;;  %v7079_v8 = vadd.f32 %v7078_v27, %v7048_v56  ;;  %v8699_v54 = vpop.f32.mrf.mxu0 }
 0xb8d   : > { %v6886_v37 = vadd.f32 %v6568_v34, %v4900_v3  ;;  %v6560_v46 = vadd.f32 %v6559_v0, %v13287_v63  ;;  %v6814_v4 = vadd.f32 %v8699_v54, %v13293_v60  ;;  %v7185_v5 = vadd.f32 %v7184_v45, %v7154_v11  ;;  %v14412_v0 = vld [vmem:[#allocation26_spill] sm:$0xff]  ;;  %v14413_v54 = vld [vmem:[#allocation32_spill] sm:$0xff] }
 0xb8e   : > { %v8652_v49 = vpop.f32.mrf.mxu1  ;;  %v6805_v55 = vpop.f32.mrf.mxu0 }
 0xb8f   : > { %6950 = vst [vmem:[%s13304_s16 + $0x90] sm:$0xff] %v6886_v37  ;;  %v6884_v59 = vadd.f32 %v6560_v46, %v4892_v24  ;;  %v6918_v1 = vadd.f32 %v6814_v4, %v4654_v6  ;;  %v6571_v57 = vadd.f32 %v8652_v49, %v13287_v63  ;;  %v6806_v32 = vadd.f32 %v6805_v55, %v13293_v60 }
 0xb90   : > { %v6562_v29 = vpop.f32.mrf.mxu1  ;;  %v8700_v36 = vpop.f32.mrf.mxu0  ;;  %v7051_v23 = vmul.f32 %v6886_v37, %v6886_v37 }
 0xb91   : > { %6948 = vst [vmem:[%s13304_s16 + $0x80] sm:$0xff] %v6884_v59  ;;  %v7011_v51 = vadd.f32 %v7010_v16, %v6884_v59  ;;  %v7049_v18 = vmul.f32 %v6884_v59, %v6884_v59  ;;  %6982 = vst [vmem:[%s13314_s19 + $0x90] sm:$0xff] %v6918_v1  ;;  %v6887_v44 = vadd.f32 %v6571_v57, %v4903_v28  ;;  %v14414_v57 = vld [vmem:[#allocation159_spill] sm:$0xff] }
 0xb92   : > { %v6916_v31 = vadd.f32 %v6806_v32, %v4646_v38  ;;  %v6563_v39 = vadd.f32 %v6562_v29, %v13287_v63  ;;  %v6817_v47 = vadd.f32 %v8700_v36, %v13293_v60  ;;  %v6808_v52 = vpop.f32.mrf.mxu0  ;;  %v7157_v3 = vmul.f32 %v6918_v1, %v6918_v1  ;;  %v14415_v36 = vld [vmem:[#allocation30_spill] sm:$0xff] }
 0xb93   : > { %v7080_v12 = vadd.f32 %v7079_v8, %v7049_v18  ;;  %6951 = vst [vmem:[%s13304_s16 + $0x98] sm:$0xff] %v6887_v44  ;;  %v6809_v22 = vadd.f32 %v6808_v52, %v13293_v60  ;;  %v4916_v16 = vadd.f32 %v14411_v33, %v13283_v17  ;;  %v7052_v11 = vmul.f32 %v6887_v44, %v6887_v44 }
 0xb94   : > { %6980 = vst [vmem:[%s13314_s19 + $0x80] sm:$0xff] %v6916_v31  ;;  %v7117_v53 = vadd.f32 %v7116_v40, %v6916_v31  ;;  %v7155_v25 = vmul.f32 %v6916_v31, %v6916_v31  ;;  %v6885_v7 = vadd.f32 %v6563_v39, %v4895_v20  ;;  %v6919_v62 = vadd.f32 %v6817_v47, %v4657_v35  ;;  %v14417_v47 = vld [vmem:[#allocation165_spill] sm:$0xff] }
 0xb95   : > { %v6917_v15 = vadd.f32 %v6809_v22, %v4649_v43  ;;  %v4670_v8 = vadd.f32 %v14412_v0, %v13291_v26  ;;  %v4919_v50 = vadd.f32 %v14414_v57, %v13283_v17  ;;  %v4662_v42 = vadd.f32 %v14415_v36, %v13291_v26 }
 0xb96   : > { %v7186_v48 = vadd.f32 %v7185_v5, %v7155_v25  ;;  %6949 = vst [vmem:[%s13304_s16 + $0x88] sm:$0xff] %v6885_v7  ;;  %v7012_v21 = vadd.f32 %v7011_v51, %v6885_v7  ;;  %v7050_v2 = vmul.f32 %v6885_v7, %v6885_v7  ;;  %6983 = vst [vmem:[%s13314_s19 + $0x98] sm:$0xff] %v6919_v62 }
 0xb97   : > { %6981 = vst [vmem:[%s13314_s19 + $0x88] sm:$0xff] %v6917_v15  ;;  %v7118_v14 = vadd.f32 %v7117_v53, %v6917_v15  ;;  %v7156_v58 = vmul.f32 %v6917_v15, %v6917_v15  ;;  %v7158_v10 = vmul.f32 %v6919_v62, %v6919_v62  ;;  %v4911_v52 = vadd.f32 %v14417_v47, %v13283_v17  ;;  %v14418_v53 = vld [vmem:[#allocation161_spill] sm:$0xff] }
 0xb98   : > { %v7013_v30 = vadd.f32 %v7012_v21, %v6886_v37  ;;  %v7081_v61 = vadd.f32 %v7080_v12, %v7050_v2  ;;  %v4908_v37 = vadd.f32 %v14413_v54, %v13283_v17  ;;  %v4665_v25 = vadd.f32 %v14418_v53, %v13291_v26 }
 0xb99   : > { %v7119_v56 = vadd.f32 %v7118_v14, %v6918_v1  ;;  %v7187_v27 = vadd.f32 %v7186_v48, %v7156_v58 }
 0xb9a   : > { %v7082_v45 = vadd.f32 %v7081_v61, %v7051_v23  ;;  %v8655_v34 = vpop.f32.mrf.mxu1  ;;  %v7014_v40 = vadd.f32 %v7013_v30, %v6887_v44  ;;  %v14416_v44 = vld [vmem:[#allocation169_spill] sm:$0xff] }
 0xb9b   : > { %v7188_v6 = vadd.f32 %v7187_v27, %v7157_v3  ;;  %v6584_v13 = vadd.f32 %v8655_v34, %v13287_v63  ;;  %v7120_v24 = vadd.f32 %v7119_v56, %v6919_v62  ;;  %v4673_v41 = vadd.f32 %v14416_v44, %v13291_v26  ;;  %v14419_v34 = vld [vmem:[#allocation168_spill] sm:$0xff] }
 0xb9c   : > { %v6575_v46 = vpop.f32.mrf.mxu1  ;;  %v7083_v4 = vadd.f32 %v7082_v45, %v7052_v11  ;;  %v8703_v5 = vpop.f32.mrf.mxu0 }
 0xb9d   : > { %v6890_v49 = vadd.f32 %v6584_v13, %v4916_v16  ;;  %v6576_v55 = vadd.f32 %v6575_v46, %v13287_v63  ;;  %v6830_v19 = vadd.f32 %v8703_v5, %v13293_v60  ;;  %v7189_v28 = vadd.f32 %v7188_v6, %v7158_v10  ;;  %v14420_v46 = vld [vmem:[#allocation167_spill] sm:$0xff] }
 0xb9e   : > { %v8656_v59 = vpop.f32.mrf.mxu1  ;;  %v6821_v1 = vpop.f32.mrf.mxu0  ;;  %v14421_v5 = vld [vmem:[#allocation139_spill] sm:$0xff] }
 0xb9f   : > { %6954 = vst [vmem:[%s13304_s16 + $0xb0] sm:$0xff] %v6890_v49  ;;  %v6888_v38 = vadd.f32 %v6576_v55, %v4908_v37  ;;  %v6922_v32 = vadd.f32 %v6830_v19, %v4670_v8  ;;  %v6587_v29 = vadd.f32 %v8656_v59, %v13287_v63  ;;  %v6822_v35 = vadd.f32 %v6821_v1, %v13293_v60 }
 0xba0   : > { %v6578_v51 = vpop.f32.mrf.mxu1  ;;  %v8704_v18 = vpop.f32.mrf.mxu0  ;;  %v7055_v56 = vmul.f32 %v6890_v49, %v6890_v49 }
 0xba1   : > { %6952 = vst [vmem:[%s13304_s16 + $0xa0] sm:$0xff] %v6888_v38  ;;  %v7015_v20 = vadd.f32 %v7014_v40, %v6888_v38  ;;  %v7053_v31 = vmul.f32 %v6888_v38, %v6888_v38  ;;  %6986 = vst [vmem:[%s13314_s19 + $0xb0] sm:$0xff] %v6922_v32  ;;  %v6891_v39 = vadd.f32 %v6587_v29, %v4919_v50  ;;  %v14422_v29 = vld [vmem:[#allocation66_spill] sm:$0xff] }
 0xba2   : > { %v6920_v9 = vadd.f32 %v6822_v35, %v4662_v42  ;;  %v6579_v43 = vadd.f32 %v6578_v51, %v13287_v63  ;;  %v6833_v12 = vadd.f32 %v8704_v18, %v13293_v60  ;;  %v6824_v22 = vpop.f32.mrf.mxu0  ;;  %v7161_v16 = vmul.f32 %v6922_v32, %v6922_v32  ;;  %v14423_v18 = vld [vmem:[#allocation137_spill] sm:$0xff] }
 0xba3   : > { %v7084_v7 = vadd.f32 %v7083_v4, %v7053_v31  ;;  %6955 = vst [vmem:[%s13304_s16 + $0xb8] sm:$0xff] %v6891_v39  ;;  %v6825_v62 = vadd.f32 %v6824_v22, %v13293_v60  ;;  %v4932_v40 = vadd.f32 %v14419_v34, %v13283_v17  ;;  %v7056_v10 = vmul.f32 %v6891_v39, %v6891_v39 }
 0xba4   : > { %6984 = vst [vmem:[%s13314_s19 + $0xa0] sm:$0xff] %v6920_v9  ;;  %v7121_v15 = vadd.f32 %v7120_v24, %v6920_v9  ;;  %v7159_v48 = vmul.f32 %v6920_v9, %v6920_v9  ;;  %v6889_v21 = vadd.f32 %v6579_v43, %v4911_v52  ;;  %v6923_v2 = vadd.f32 %v6833_v12, %v4673_v41  ;;  %v14425_v12 = vld [vmem:[#allocation98_spill] sm:$0xff] }
 0xba5   : > { %v6921_v14 = vadd.f32 %v6825_v62, %v4665_v25  ;;  %v4686_v4 = vadd.f32 %v14420_v46, %v13291_v26  ;;  %v4935_v36 = vadd.f32 %v14422_v29, %v13283_v17  ;;  %v4678_v44 = vadd.f32 %v14423_v18, %v13291_v26 }
 0xba6   : > { %v7190_v58 = vadd.f32 %v7189_v28, %v7159_v48  ;;  %6953 = vst [vmem:[%s13304_s16 + $0xa8] sm:$0xff] %v6889_v21  ;;  %v7016_v23 = vadd.f32 %v7015_v20, %v6889_v21  ;;  %v7054_v30 = vmul.f32 %v6889_v21, %v6889_v21  ;;  %6987 = vst [vmem:[%s13314_s19 + $0xb8] sm:$0xff] %v6923_v2 }
 0xba7   : > { %6985 = vst [vmem:[%s13314_s19 + $0xa8] sm:$0xff] %v6921_v14  ;;  %v7122_v61 = vadd.f32 %v7121_v15, %v6921_v14  ;;  %v7160_v3 = vmul.f32 %v6921_v14, %v6921_v14  ;;  %v7162_v0 = vmul.f32 %v6923_v2, %v6923_v2  ;;  %v4927_v22 = vadd.f32 %v14425_v12, %v13283_v17  ;;  %v14426_v15 = vld [vmem:[#allocation100_spill] sm:$0xff] }
 0xba8   : > { %v7017_v27 = vadd.f32 %v7016_v23, %v6890_v49  ;;  %v7085_v33 = vadd.f32 %v7084_v7, %v7054_v30  ;;  %v4924_v49 = vadd.f32 %v14421_v5, %v13283_v17  ;;  %v4681_v48 = vadd.f32 %v14426_v15, %v13291_v26 }
 0xba9   : > { %v7123_v11 = vadd.f32 %v7122_v61, %v6922_v32  ;;  %v7191_v45 = vadd.f32 %v7190_v58, %v7160_v3 }
 0xbaa   : > { %v7086_v6 = vadd.f32 %v7085_v33, %v7055_v56  ;;  %v8659_v13 = vpop.f32.mrf.mxu1  ;;  %v7018_v24 = vadd.f32 %v7017_v27, %v6891_v39  ;;  %v14424_v39 = vld [vmem:[#allocation136_spill] sm:$0xff] }
 0xbab   : > { %v7192_v8 = vadd.f32 %v7191_v45, %v7161_v16  ;;  %v6600_v54 = vadd.f32 %v8659_v13, %v13287_v63  ;;  %v7124_v37 = vadd.f32 %v7123_v11, %v6923_v2  ;;  %v4689_v47 = vadd.f32 %v14424_v39, %v13291_v26  ;;  %v14427_v13 = vld [vmem:[#allocation96_spill] sm:$0xff] }
 0xbac   : > { %v6591_v55 = vpop.f32.mrf.mxu1  ;;  %v7087_v19 = vadd.f32 %v7086_v6, %v7056_v10  ;;  %v8707_v28 = vpop.f32.mrf.mxu0 }
 0xbad   : > { %v6894_v59 = vadd.f32 %v6600_v54, %v4932_v40  ;;  %v6592_v1 = vadd.f32 %v6591_v55, %v13287_v63  ;;  %v6846_v57 = vadd.f32 %v8707_v28, %v13293_v60  ;;  %v7193_v50 = vadd.f32 %v7192_v8, %v7162_v0  ;;  %v14428_v55 = vld [vmem:[#allocation94_spill] sm:$0xff] }
 0xbae   : > { %v8660_v38 = vpop.f32.mrf.mxu1  ;;  %v6837_v32 = vpop.f32.mrf.mxu0  ;;  %v14429_v28 = vld [vmem:[#allocation90_spill] sm:$0xff] }
 0xbaf   : > { %6958 = vst [vmem:[%s13304_s16 + $0xd0] sm:$0xff] %v6894_v59  ;;  %v6892_v42 = vadd.f32 %v6592_v1, %v4924_v49  ;;  %v6926_v35 = vadd.f32 %v6846_v57, %v4686_v4  ;;  %v6603_v51 = vadd.f32 %v8660_v38, %v13287_v63  ;;  %v6838_v41 = vadd.f32 %v6837_v32, %v13293_v60 }
 0xbb0   : > { %v6594_v20 = vpop.f32.mrf.mxu1  ;;  %v8708_v31 = vpop.f32.mrf.mxu0  ;;  %v7059_v11 = vmul.f32 %v6894_v59, %v6894_v59 }
 0xbb1   : > { %6956 = vst [vmem:[%s13304_s16 + $0xc0] sm:$0xff] %v6892_v42  ;;  %v7019_v52 = vadd.f32 %v7018_v24, %v6892_v42  ;;  %v7057_v9 = vmul.f32 %v6892_v42, %v6892_v42  ;;  %6990 = vst [vmem:[%s13314_s19 + $0xd0] sm:$0xff] %v6926_v35  ;;  %v6895_v43 = vadd.f32 %v6603_v51, %v4935_v36  ;;  %v14430_v51 = vld [vmem:[#allocation88_spill] sm:$0xff] }
 0xbb2   : > { %v6924_v53 = vadd.f32 %v6838_v41, %v4678_v44  ;;  %v6595_v25 = vadd.f32 %v6594_v20, %v13287_v63  ;;  %v6849_v7 = vadd.f32 %v8708_v31, %v13293_v60  ;;  %v6840_v62 = vpop.f32.mrf.mxu0  ;;  %v7165_v40 = vmul.f32 %v6926_v35, %v6926_v35  ;;  %v14431_v31 = vld [vmem:[#allocation84_spill] sm:$0xff] }
 0xbb3   : > { %v7088_v21 = vadd.f32 %v7087_v19, %v7057_v9  ;;  %6959 = vst [vmem:[%s13304_s16 + $0xd8] sm:$0xff] %v6895_v43  ;;  %v6841_v2 = vadd.f32 %v6840_v62, %v13293_v60  ;;  %v4948_v24 = vadd.f32 %v14427_v13, %v13283_v17  ;;  %v7060_v0 = vmul.f32 %v6895_v43, %v6895_v43 }
 0xbb4   : > { %6988 = vst [vmem:[%s13314_s19 + $0xc0] sm:$0xff] %v6924_v53  ;;  %v7125_v14 = vadd.f32 %v7124_v37, %v6924_v53  ;;  %v7163_v58 = vmul.f32 %v6924_v53, %v6924_v53  ;;  %v6893_v23 = vadd.f32 %v6595_v25, %v4927_v22  ;;  %v6927_v30 = vadd.f32 %v6849_v7, %v4689_v47  ;;  %v14433_v7 = vld [vmem:[#allocation82_spill] sm:$0xff] }
 0xbb5   : > { %v6925_v61 = vadd.f32 %v6841_v2, %v4681_v48  ;;  %v4702_v19 = vadd.f32 %v14428_v55, %v13291_v26  ;;  %v4951_v18 = vadd.f32 %v14430_v51, %v13283_v17  ;;  %v4694_v39 = vadd.f32 %v14431_v31, %v13291_v26 }
 0xbb6   : > { %v7194_v3 = vadd.f32 %v7193_v50, %v7163_v58  ;;  %6957 = vst [vmem:[%s13304_s16 + $0xc8] sm:$0xff] %v6893_v23  ;;  %v7020_v56 = vadd.f32 %v7019_v52, %v6893_v23  ;;  %v7058_v27 = vmul.f32 %v6893_v23, %v6893_v23  ;;  %6991 = vst [vmem:[%s13314_s19 + $0xd8] sm:$0xff] %v6927_v30 }
 0xbb7   : > { %6989 = vst [vmem:[%s13314_s19 + $0xc8] sm:$0xff] %v6925_v61  ;;  %v7126_v33 = vadd.f32 %v7125_v14, %v6925_v61  ;;  %v7164_v16 = vmul.f32 %v6925_v61, %v6925_v61  ;;  %v7166_v46 = vmul.f32 %v6927_v30, %v6927_v30  ;;  %v4943_v62 = vadd.f32 %v14433_v7, %v13283_v17  ;;  %v14434_v14 = vld [vmem:[#allocation86_spill] sm:$0xff] }
 0xbb8   : > { %v7021_v45 = vadd.f32 %v7020_v56, %v6894_v59  ;;  %v7089_v34 = vadd.f32 %v7088_v21, %v7058_v27  ;;  %v4940_v59 = vadd.f32 %v14429_v28, %v13283_v17  ;;  %v4697_v58 = vadd.f32 %v14434_v14, %v13291_v26 }
 0xbb9   : > { %v7127_v10 = vadd.f32 %v7126_v33, %v6926_v35  ;;  %v7195_v6 = vadd.f32 %v7194_v3, %v7164_v16 }
 0xbba   : > { %v7090_v8 = vadd.f32 %v7089_v34, %v7059_v11  ;;  %v8663_v54 = vpop.f32.mrf.mxu1  ;;  %v7022_v37 = vadd.f32 %v7021_v45, %v6895_v43  ;;  %v14432_v43 = vld [vmem:[#allocation92_spill] sm:$0xff] }
 0xbbb   : > { %v7196_v4 = vadd.f32 %v7195_v6, %v7165_v40  ;;  %v6616_v5 = vadd.f32 %v8663_v54, %v13287_v63  ;;  %v7128_v49 = vadd.f32 %v7127_v10, %v6927_v30  ;;  %v4705_v12 = vadd.f32 %v14432_v43, %v13291_v26 }
 0xbbc   : > { %v6607_v1 = vpop.f32.mrf.mxu1  ;;  %v7091_v57 = vadd.f32 %v7090_v8, %v7060_v0  ;;  %v8711_v50 = vpop.f32.mrf.mxu0 }
 0xbbd   : > { %v6898_v38 = vadd.f32 %v6616_v5, %v4948_v24  ;;  %v6608_v32 = vadd.f32 %v6607_v1, %v13287_v63  ;;  %v6862_v29 = vadd.f32 %v8711_v50, %v13293_v60  ;;  %v7197_v36 = vadd.f32 %v7196_v4, %v7166_v46 }
 0xbbe   : > { %v8664_v42 = vpop.f32.mrf.mxu1  ;;  %v6853_v35 = vpop.f32.mrf.mxu0 }
 0xbbf   : > { %6962 = vst [vmem:[%s13304_s16 + $0xf0] sm:$0xff] %v6898_v38  ;;  %v6896_v44 = vadd.f32 %v6608_v32, %v4940_v59  ;;  %v6930_v41 = vadd.f32 %v6862_v29, %v4702_v19  ;;  %v6619_v20 = vadd.f32 %v8664_v42, %v13287_v63  ;;  %v6854_v47 = vadd.f32 %v6853_v35, %v13293_v60 }
 0xbc0   : > { %v6610_v52 = vpop.f32.mrf.mxu1  ;;  %v8712_v9 = vpop.f32.mrf.mxu0  ;;  %v7063_v34 = vmul.f32 %v6898_v38, %v6898_v38 }
 0xbc1   : > { %6960 = vst [vmem:[%s13304_s16 + $0xe0] sm:$0xff] %v6896_v44  ;;  %v7023_v22 = vadd.f32 %v7022_v37, %v6896_v44  ;;  %v7061_v53 = vmul.f32 %v6896_v44, %v6896_v44  ;;  %6994 = vst [vmem:[%s13314_s19 + $0xf0] sm:$0xff] %v6930_v41  ;;  %v6899_v25 = vadd.f32 %v6619_v20, %v4951_v18 }
 0xbc2   : > { %v6928_v15 = vadd.f32 %v6854_v47, %v4694_v39  ;;  %v6611_v48 = vadd.f32 %v6610_v52, %v13287_v63  ;;  %v6865_v21 = vadd.f32 %v8712_v9, %v13293_v60  ;;  %v6856_v2 = vpop.f32.mrf.mxu0  ;;  %v7169_v10 = vmul.f32 %v6930_v41, %v6930_v41 }
 0xbc3   : > { %v7092_v23 = vadd.f32 %v7091_v57, %v7061_v53  ;;  %6963 = vst [vmem:[%s13304_s16 + $0xf8] sm:$0xff] %v6899_v25  ;;  %v6857_v30 = vadd.f32 %v6856_v2, %v13293_v60  ;;  %v7064_v13 = vmul.f32 %v6899_v25, %v6899_v25 }
 0xbc4   : > { %6992 = vst [vmem:[%s13314_s19 + $0xe0] sm:$0xff] %v6928_v15  ;;  %v7129_v61 = vadd.f32 %v7128_v49, %v6928_v15  ;;  %v7167_v3 = vmul.f32 %v6928_v15, %v6928_v15  ;;  %v6897_v17 = vadd.f32 %v6611_v48, %v4943_v62  ;;  %v6931_v56 = vadd.f32 %v6865_v21, %v4705_v12 }
 0xbc5   : > { %v6929_v27 = vadd.f32 %v6857_v30, %v4697_v58 }
 0xbc6   : > { %v7198_v33 = vadd.f32 %v7197_v36, %v7167_v3  ;;  %6961 = vst [vmem:[%s13304_s16 + $0xe8] sm:$0xff] %v6897_v17  ;;  %v7024_v63 = vadd.f32 %v7023_v22, %v6897_v17  ;;  %v7062_v16 = vmul.f32 %v6897_v17, %v6897_v17  ;;  %6995 = vst [vmem:[%s13314_s19 + $0xf8] sm:$0xff] %v6931_v56 }
 0xbc7   : > { %6993 = vst [vmem:[%s13314_s19 + $0xe8] sm:$0xff] %v6929_v27  ;;  %v7130_v11 = vadd.f32 %v7129_v61, %v6929_v27  ;;  %v7168_v45 = vmul.f32 %v6929_v27, %v6929_v27  ;;  %v7170_v8 = vmul.f32 %v6931_v56, %v6931_v56 }
 0xbc8   : > { %v7025_v26 = vadd.f32 %v7024_v63, %v6898_v38  ;;  %v7093_v40 = vadd.f32 %v7092_v23, %v7062_v16 }
 0xbc9   : > { %v7131_v6 = vadd.f32 %v7130_v11, %v6930_v41  ;;  %v7199_v60 = vadd.f32 %v7198_v33, %v7168_v45 }
 0xbca   : > { %v7026_v24 = vadd.f32 %v7025_v26, %v6899_v25  ;;  %v7094_v0 = vadd.f32 %v7093_v40, %v7063_v34 }
 0xbcb   : > { %v7132_v54 = vadd.f32 %v7131_v6, %v6931_v56  ;;  %v7200_v37 = vadd.f32 %v7199_v60, %v7169_v10 }
 0xbcc   : > { %v7027_v46 = vrot.slane %v7026_v24, 4  ;;  %v7095_v4 = vadd.f32 %v7094_v0, %v7064_v13 }
 0xbcd   : > { %v7133_v5 = vrot.slane %v7132_v54, 4  ;;  %v7201_v49 = vadd.f32 %v7200_v37, %v7170_v8 }
 0xbce   : > { %v7028_v55 = vadd.f32 %v7027_v46, %v7026_v24  ;;  %v7096_v19 = vrot.slane %v7095_v4, 4 }
 0xbcf   : > { %v7134_v28 = vadd.f32 %v7133_v5, %v7132_v54  ;;  %v7202_v59 = vrot.slane %v7201_v49, 4 }
 0xbd0   : > { %v7029_v1 = vrot.slane %v7028_v55, 2  ;;  %v7097_v57 = vadd.f32 %v7096_v19, %v7095_v4 }
 0xbd1   : > { %v7135_v50 = vrot.slane %v7134_v28, 2  ;;  %v7203_v38 = vadd.f32 %v7202_v59, %v7201_v49 }
 0xbd2   : > { %v7030_v32 = vadd.f32 %v7029_v1, %v7028_v55  ;;  %v7098_v29 = vrot.slane %v7097_v57, 2 }
 0xbd3   : > { %v7136_v36 = vadd.f32 %v7135_v50, %v7134_v28  ;;  %v7204_v42 = vrot.slane %v7203_v38, 2 }
 0xbd4   : > { %v7031_v35 = vrot.slane %v7030_v32, 1  ;;  %v7099_v51 = vadd.f32 %v7098_v29, %v7097_v57 }
 0xbd5   : > { %v7137_v18 = vrot.slane %v7136_v36, 1  ;;  %v7205_v44 = vadd.f32 %v7204_v42, %v7203_v38 }
 0xbd6   : > { %v7100_v41 = vrot.slane %v7099_v51, 1  ;;  %v7032_v39 = vadd.f32 %v7031_v35, %v7030_v32 }
 0xbd7   : > { %v7138_v20 = vadd.f32 %v7137_v18, %v7136_v36  ;;  %v7206_v31 = vrot.slane %v7205_v44, 1 }
 0xbd8   : > { %v7101_v47 = vadd.f32 %v7100_v41, %v7099_v51 }
 0xbd9   : > { %v7207_v52 = vadd.f32 %v7206_v31, %v7205_v44 }
 0xbda   : > { %v7209_v9 = vsel %vm7208_vm0, %v7032_v39, %v7101_v47 }
 0xbdb   : > { %v7211_v43 = vsel %vm7210_vm1, %v7209_v9, %v7138_v20 }
 0xbdc   : > { %v7213_v12 = vsel %vm7212_vm2, %v7211_v43, %v7207_v52 }
 0xbdd   : > { %7214 = vst [vmem:[%s488_s24] sm:$0xf] %v7213_v12 }
 0xbde PF: > { %s23_s21 = sadd.s32 1, %s9048_s21  }
 0xbdf   : > { %p20_p4 = scmp.ge.s32.totalorder %s23_s21, 4  }
 0xbe1   :  { %22 = sbr.rel (!%p20_p4) target bundleno = 1 (0x1), region = 134 }

</bundles_post_ra>
